<compile_context>
chip_gen: v7x
topology: tpu7x:2x2x1
jax: 0.10.0
libtpu: 0.0.40
codegen_flags: <defaults>
</compile_context>

<pallas_src>
import functools

import jax
import jax.numpy as jnp
from jax.experimental import pallas as pl
from jax.experimental.pallas import tpu as pltpu

GAMMA_RELU = 1.7139588594436646   # _nonlin_gamma['relu']
ALPHA = 0.2                       # BasicBlock default alpha
BETA = 1.0                        # BasicBlock default beta
WS_EPS = 1e-5                     # ScaledStdConv2d eps (use_layernorm=False)


# ----------------------------------------------------------------------------
# In-kernel helpers
# ----------------------------------------------------------------------------
def _im2col_conv3x3(src, slab_ref, w_ref, ho, wo, m, c):
    """Stride-1 3x3 conv of a zero-padded bf16 value src=(B, ho+2, wo+2, c).

    Writes the nine shifted taps into a lane-concatenated im2col slab scratch
    (m, 9*c) and does a single (m, 9*c) @ (9*c, cout) MXU matmul (f32 accum)."""
    for k in range(9):
        dh, dw = divmod(k, 3)
        slab_ref[:, k * c:(k + 1) * c] = (
            src[:, dh:dh + ho, dw:dw + wo, :].reshape(m, c))
    return jnp.dot(slab_ref[...], w_ref[...], preferred_element_type=jnp.float32)


def _im2col_conv3x3_s2(phases, slab_ref, w_ref, ho, wo, m, c):
    """Stride-2 3x3 conv from the four even/odd phase tensors of padded input."""
    ee, eo, oe, oo = phases
    taps = [
        ee[:, 0:ho,     0:wo,     :], eo[:, 0:ho,     0:wo,     :], ee[:, 0:ho,     1:wo + 1, :],
        oe[:, 0:ho,     0:wo,     :], oo[:, 0:ho,     0:wo,     :], oe[:, 0:ho,     1:wo + 1, :],
        ee[:, 1:ho + 1, 0:wo,     :], eo[:, 1:ho + 1, 0:wo,     :], ee[:, 1:ho + 1, 1:wo + 1, :],
    ]
    for k in range(9):
        slab_ref[:, k * c:(k + 1) * c] = taps[k].reshape(m, c)
    return jnp.dot(slab_ref[...], w_ref[...], preferred_element_type=jnp.float32)


def _store_zero_padded(h, pad_ref, b, ho, wo, c):
    """Store h=(m,c) into the interior of pad_ref=(b,ho+2,wo+2,c); zero only the
    1-pixel border (single kernel invocation, interior fully overwritten)."""
    zrow = jnp.zeros((b, 1, wo + 2, c), pad_ref.dtype)
    zcol = jnp.zeros((b, ho + 2, 1, c), pad_ref.dtype)
    pad_ref[:, 0:1, :, :] = zrow
    pad_ref[:, ho + 1:ho + 2, :, :] = zrow
    pad_ref[:, :, 0:1, :] = zcol
    pad_ref[:, :, wo + 1:wo + 2, :] = zcol
    pad_ref[:, 1:ho + 1, 1:wo + 1, :] = h.reshape(b, ho, wo, c).astype(pad_ref.dtype)


# ----------------------------------------------------------------------------
# Fused BasicBlock kernels (stride 1 / stride 2)
# ----------------------------------------------------------------------------
def _block_s1_kernel(*refs, has_downsample):
    if has_downsample:
        (xp_ref, w1_ref, w2_ref, wd_ref, o_ref,
         slab1_ref, h1pad_ref, slab2_ref) = refs
    else:
        (xp_ref, w1_ref, w2_ref, o_ref,
         slab1_ref, h1pad_ref, slab2_ref) = refs
        wd_ref = None

    b, hp, wp, cin = xp_ref.shape
    ho, wo = hp - 2, wp - 2
    cout = o_ref.shape[3]
    m = b * ho * wo

    xp = xp_ref[...]                                              # raw zero-padded x (f32)
    # out = act(x) * beta  == relu(x) * gamma_relu * beta ; single bf16 cast.
    pre = (jnp.maximum(xp, 0.0) * (GAMMA_RELU * BETA)).astype(jnp.bfloat16)

    acc1 = _im2col_conv3x3(pre, slab1_ref, w1_ref, ho, wo, m, cin)            # conv1
    h1 = jnp.maximum(acc1, 0.0) * GAMMA_RELU                                  # self.act
    _store_zero_padded(h1, h1pad_ref, b, ho, wo, cout)
    acc2 = _im2col_conv3x3(h1pad_ref[...], slab2_ref, w2_ref, ho, wo, m, cout)  # conv2

    # Shortcut reads RAW x (identity = self.downsample(x)  /  identity = x).
    x_int = xp[:, 1:ho + 1, 1:wo + 1, :].reshape(m, cin)
    if has_downsample:
        ident = jnp.dot(x_int.astype(jnp.bfloat16), wd_ref[...],
                        preferred_element_type=jnp.float32)
    else:
        ident = x_int                                             # cin == cout

    out = acc2 * ALPHA + ident
    o_ref[...] = out.reshape(b, ho, wo, cout).astype(o_ref.dtype)


def _block_s2_kernel(*refs):
    (ee_ref, eo_ref, oe_ref, oo_ref, w1_ref, w2_ref, wd_ref, o_ref,
     slab1_ref, h1pad_ref, slab2_ref) = refs

    b, _, _, cin = ee_ref.shape
    _, ho, wo, cout = o_ref.shape
    m = b * ho * wo

    ee, eo, oe, oo = ee_ref[...], eo_ref[...], oe_ref[...], oo_ref[...]
    s = GAMMA_RELU * BETA
    pre = tuple((jnp.maximum(p, 0.0) * s).astype(jnp.bfloat16)
                for p in (ee, eo, oe, oo))

    acc1 = _im2col_conv3x3_s2(pre, slab1_ref, w1_ref, ho, wo, m, cin)         # conv1 s2
    h1 = jnp.maximum(acc1, 0.0) * GAMMA_RELU                                  # self.act
    _store_zero_padded(h1, h1pad_ref, b, ho, wo, cout)
    acc2 = _im2col_conv3x3(h1pad_ref[...], slab2_ref, w2_ref, ho, wo, m, cout)  # conv2

    # 1x1 stride-2 downsample on RAW x == odd/odd phase interior of padded x.
    xin = oo[:, 0:ho, 0:wo, :].reshape(m, cin).astype(jnp.bfloat16)
    ident = jnp.dot(xin, wd_ref[...], preferred_element_type=jnp.float32)

    out = acc2 * ALPHA + ident
    o_ref[...] = out.reshape(b, ho, wo, cout).astype(o_ref.dtype)


# ----------------------------------------------------------------------------
# Wrapper (plain-JAX glue: layout / pad / phase split only; all compute in Pallas)
# ----------------------------------------------------------------------------
def nf_basic_block(x_nchw, w1, w2, wd, *, stride):
    """BasicBlock.forward as one fused pallas_call.

    x_nchw : (B, Cin, H, W) float input (PyTorch layout).
    w1     : (9*Cin, Cout)  bf16 prepared conv1 weight (tap-major).
    w2     : (9*Cout, Cout) bf16 prepared conv2 weight.
    wd     : (Cin, Cout)    bf16 prepared 1x1 downsample weight, or None (identity).
    """
    x = jnp.transpose(x_nchw, (0, 2, 3, 1)).astype(jnp.float32)       # NCHW -> NHWC
    B, H, W, Cin = x.shape
    Cout = w1.shape[-1]
    xp = jnp.pad(x, ((0, 0), (1, 1), (1, 1), (0, 0)))

    if stride == 1:
        Ho, Wo = H, W
        if wd is None:
            assert Cin == Cout, "identity shortcut requires Cin == Cout"
        inputs = (xp,)
        kernel = functools.partial(_block_s1_kernel, has_downsample=wd is not None)
    else:
        assert stride == 2 and H % 2 == 0 and W % 2 == 0
        assert wd is not None, "stride-2 BasicBlock requires a downsample module"
        Ho, Wo = H // 2, W // 2
        inputs = (xp[:, 0::2, 0::2, :], xp[:, 0::2, 1::2, :],
                  xp[:, 1::2, 0::2, :], xp[:, 1::2, 1::2, :])
        kernel = _block_s2_kernel
    weights = (w1, w2) + ((wd,) if wd is not None else ())

    m = B * Ho * Wo
    out = pl.pallas_call(
        kernel,
        out_shape=jax.ShapeDtypeStruct((B, Ho, Wo, Cout), jnp.float32),
        scratch_shapes=[
            pltpu.VMEM((m, 9 * Cin), jnp.bfloat16),                  # conv1 im2col slab
            pltpu.VMEM((B, Ho + 2, Wo + 2, Cout), jnp.bfloat16),     # zero-padded h1
            pltpu.VMEM((m, 9 * Cout), jnp.bfloat16),                 # conv2 im2col slab
        ],
    )(*inputs, *weights)
    return jnp.transpose(out, (0, 3, 1, 2))                          # NHWC -> NCHW


@functools.partial(jax.jit, static_argnames=("stride",))
def basic_block_forward(x_nchw, prepped, *, stride):
    return nf_basic_block(x_nchw, prepped["w1"], prepped["w2"], prepped["wd"],
                          stride=stride)


# ----------------------------------------------------------------------------
# Parameter preparation (ScaledStdConv2d weight standardization), runs once
# ----------------------------------------------------------------------------
def _std_weight(w_oihw, gain):
    """ScaledStdConv2d.get_weight(): scale*(w-mean)/(std+eps)*gain (population std,
    eps added to std -- exactly as in the reference)."""
    O, I, kh, kw = w_oihw.shape
    scale = (I * kh * kw) ** (-0.5)                       # gamma = 1.0
    mean = jnp.mean(w_oihw, axis=(1, 2, 3), keepdims=True)
    std = jnp.sqrt(jnp.mean((w_oihw - mean) ** 2, axis=(1, 2, 3), keepdims=True))
    w = scale * (w_oihw - mean) / (std + WS_EPS)
    return w * gain.reshape(-1, 1, 1, 1)


def prep_conv3x3(w_oihw, gain):
    O, I, kh, kw = w_oihw.shape
    w = _std_weight(w_oihw, gain)
    return jnp.transpose(w, (2, 3, 1, 0)).reshape(kh * kw * I, O).astype(jnp.bfloat16)


def prep_conv1x1(w_oihw, gain):
    w = _std_weight(w_oihw, gain)[:, :, 0, 0]             # (O, I)
    return jnp.transpose(w, (1, 0)).astype(jnp.bfloat16)  # (Cin, Cout)


def prepare_block_params(raw):
    return {
        "w1": prep_conv3x3(raw["w1"], raw["g1"]),
        "w2": prep_conv3x3(raw["w2"], raw["g2"]),
        "wd": (prep_conv1x1(raw["wd"], raw["gd"]) if "wd" in raw else None),
    }


def init_block_params(key, cin, cout, with_downsample):
    ks = jax.random.split(key, 3)

    def conv_w(k, o, i, kh, kw):
        fan_in = i * kh * kw
        return jax.random.normal(k, (o, i, kh, kw), jnp.float32) * fan_in ** -0.5

    p = {"w1": conv_w(ks[0], cout, cin, 3, 3), "g1": jnp.ones((cout,), jnp.float32),
         "w2": conv_w(ks[1], cout, cout, 3, 3), "g2": jnp.ones((cout,), jnp.float32)}
    if with_downsample:
        p["wd"] = conv_w(ks[2], cout, cin, 1, 1)
        p["gd"] = jnp.ones((cout,), jnp.float32)
    return p


# ----------------------------------------------------------------------------
# Pure-JAX reference of BasicBlock.forward (f32) for validation
# ----------------------------------------------------------------------------
def basic_block_reference(x_nchw, raw, *, stride):
    def conv(t, w, s, pad):
        return jax.lax.conv_general_dilated(
            t, w, window_strides=(s, s), padding=((pad, pad), (pad, pad)),
            dimension_numbers=("NCHW", "OIHW", "NCHW"))

    act = lambda t: jnp.maximum(t, 0.0) * GAMMA_RELU       # activation_fn['relu']
    out = act(x_nchw) * BETA
    out = conv(out, _std_weight(raw["w1"], raw["g1"]), stride, 1)
    out = act(out)
    out = conv(out, _std_weight(raw["w2"], raw["g2"]), 1, 1)
    if "wd" in raw:
        identity = conv(x_nchw, _std_weight(raw["wd"], raw["gd"]), stride, 0)
    else:
        identity = x_nchw
    return out * ALPHA + identity


if __name__ == "__main__":
    key = jax.random.PRNGKey(0)
    kx, kp = jax.random.split(key)

    configs = [
        # (name,              B, Cin, H,  W,  Cout, stride, downsample)
        ("stride1_downsample", 2, 64, 16, 16, 128, 1, True),    # first block of a stage
        ("stride2_downsample", 2, 64, 16, 16, 128, 2, True),    # spatial-downsampling block
        ("stride1_identity",   2, 128, 16, 16, 128, 1, False),  # identity shortcut
    ]

    for i, (name, B, Cin, H, W, Cout, stride, has_ds) in enumerate(configs):
        x = jax.random.normal(jax.random.fold_in(kx, i), (B, Cin, H, W), jnp.float32)
        raw = init_block_params(jax.random.fold_in(kp, i), Cin, Cout, has_ds)
        prepped = prepare_block_params(raw)                       # hoisted, runs once

        out = jax.block_until_ready(basic_block_forward(x, prepped, stride=stride))

        assert out.shape == (B, Cout, H // stride, W // stride), (name, out.shape)
        assert bool(jnp.all(jnp.isfinite(out))), name
        ref = basic_block_reference(x, raw, stride=stride)
        err = float(jnp.max(jnp.abs(out - ref)))
        assert err < 0.1, (name, err)   # bf16 MXU operands vs f32 reference

    print("KERNEL_OK")
</pallas_src>

<mosaic_0001>
module attributes {stable_mosaic.version = 11 : i64} {
  func.func @_block_s1_kernel(%arg0: memref<2x18x18x64xf32, #tpu.memory_space<vmem>>, %arg1: memref<576x128xbf16, #tpu.memory_space<vmem>>, %arg2: memref<1152x128xbf16, #tpu.memory_space<vmem>>, %arg3: memref<64x128xbf16, #tpu.memory_space<vmem>>, %arg4: memref<2x16x16x128xf32, #tpu.memory_space<vmem>>, %arg5: memref<512x576xbf16, #tpu.memory_space<vmem>>, %arg6: memref<2x18x18x128xbf16, #tpu.memory_space<vmem>>, %arg7: memref<512x1152xbf16, #tpu.memory_space<vmem>>) attributes {dimension_semantics = [], scalar_prefetch = 0 : i64, scratch_operands = 3 : i64, tpu.core_type = #tpu.core_type<tc>} {
    %c0 = arith.constant 0 : index
    %c0_0 = arith.constant 0 : index
    %c0_1 = arith.constant 0 : index
    %c0_2 = arith.constant 0 : index
    %0 = vector.load %arg0[%c0, %c0_0, %c0_1, %c0_2] : memref<2x18x18x64xf32, #tpu.memory_space<vmem>>, vector<2x18x18x64xf32>
    %cst = arith.constant 0.000000e+00 : f32
    %1 = vector.broadcast %cst : f32 to vector<2x18x18x64xf32>
    %2 = arith.maximumf %0, %1 : vector<2x18x18x64xf32>
    %cst_3 = arith.constant 1.71395886 : f32
    %3 = vector.broadcast %cst_3 : f32 to vector<2x18x18x64xf32>
    %4 = arith.mulf %2, %3 : vector<2x18x18x64xf32>
    %5 = arith.truncf %4 : vector<2x18x18x64xf32> to vector<2x18x18x64xbf16>
    %6 = vector.extract_strided_slice %5 {offsets = [0, 0, 0, 0], sizes = [2, 16, 16, 64], strides = [1, 1, 1, 1]} : vector<2x18x18x64xbf16> to vector<2x16x16x64xbf16>
    %7 = vector.shape_cast %6 : vector<2x16x16x64xbf16> to vector<512x64xbf16>
    %c0_4 = arith.constant 0 : index
    %c0_5 = arith.constant 0 : index
    %8 = vector.load %arg5[%c0_4, %c0_5] : memref<512x576xbf16, #tpu.memory_space<vmem>>, vector<512x64xbf16>
    tpu.vector_store %arg5[%c0_4, %c0_5], %7 {strides = array<i32>} : memref<512x576xbf16, #tpu.memory_space<vmem>>, vector<512x64xbf16>,
    %9 = vector.extract_strided_slice %5 {offsets = [0, 0, 1, 0], sizes = [2, 16, 16, 64], strides = [1, 1, 1, 1]} : vector<2x18x18x64xbf16> to vector<2x16x16x64xbf16>
    %10 = vector.shape_cast %9 : vector<2x16x16x64xbf16> to vector<512x64xbf16>
    %c0_6 = arith.constant 0 : index
    %c64 = arith.constant 64 : index
    %11 = vector.load %arg5[%c0_6, %c64] : memref<512x576xbf16, #tpu.memory_space<vmem>>, vector<512x64xbf16>
    tpu.vector_store %arg5[%c0_6, %c64], %10 {strides = array<i32>} : memref<512x576xbf16, #tpu.memory_space<vmem>>, vector<512x64xbf16>,
    %12 = vector.extract_strided_slice %5 {offsets = [0, 0, 2, 0], sizes = [2, 16, 16, 64], strides = [1, 1, 1, 1]} : vector<2x18x18x64xbf16> to vector<2x16x16x64xbf16>
    %13 = vector.shape_cast %12 : vector<2x16x16x64xbf16> to vector<512x64xbf16>
    %c0_7 = arith.constant 0 : index
    %c128 = arith.constant 128 : index
    %14 = vector.load %arg5[%c0_7, %c128] : memref<512x576xbf16, #tpu.memory_space<vmem>>, vector<512x64xbf16>
    tpu.vector_store %arg5[%c0_7, %c128], %13 {strides = array<i32>} : memref<512x576xbf16, #tpu.memory_space<vmem>>, vector<512x64xbf16>,
    %15 = vector.extract_strided_slice %5 {offsets = [0, 1, 0, 0], sizes = [2, 16, 16, 64], strides = [1, 1, 1, 1]} : vector<2x18x18x64xbf16> to vector<2x16x16x64xbf16>
    %16 = vector.shape_cast %15 : vector<2x16x16x64xbf16> to vector<512x64xbf16>
    %c0_8 = arith.constant 0 : index
    %c192 = arith.constant 192 : index
    %17 = vector.load %arg5[%c0_8, %c192] : memref<512x576xbf16, #tpu.memory_space<vmem>>, vector<512x64xbf16>
    tpu.vector_store %arg5[%c0_8, %c192], %16 {strides = array<i32>} : memref<512x576xbf16, #tpu.memory_space<vmem>>, vector<512x64xbf16>,
    %18 = vector.extract_strided_slice %5 {offsets = [0, 1, 1, 0], sizes = [2, 16, 16, 64], strides = [1, 1, 1, 1]} : vector<2x18x18x64xbf16> to vector<2x16x16x64xbf16>
    %19 = vector.shape_cast %18 : vector<2x16x16x64xbf16> to vector<512x64xbf16>
    %c0_9 = arith.constant 0 : index
    %c256 = arith.constant 256 : index
    %20 = vector.load %arg5[%c0_9, %c256] : memref<512x576xbf16, #tpu.memory_space<vmem>>, vector<512x64xbf16>
    tpu.vector_store %arg5[%c0_9, %c256], %19 {strides = array<i32>} : memref<512x576xbf16, #tpu.memory_space<vmem>>, vector<512x64xbf16>,
    %21 = vector.extract_strided_slice %5 {offsets = [0, 1, 2, 0], sizes = [2, 16, 16, 64], strides = [1, 1, 1, 1]} : vector<2x18x18x64xbf16> to vector<2x16x16x64xbf16>
    %22 = vector.shape_cast %21 : vector<2x16x16x64xbf16> to vector<512x64xbf16>
    %c0_10 = arith.constant 0 : index
    %c320 = arith.constant 320 : index
    %23 = vector.load %arg5[%c0_10, %c320] : memref<512x576xbf16, #tpu.memory_space<vmem>>, vector<512x64xbf16>
    tpu.vector_store %arg5[%c0_10, %c320], %22 {strides = array<i32>} : memref<512x576xbf16, #tpu.memory_space<vmem>>, vector<512x64xbf16>,
    %24 = vector.extract_strided_slice %5 {offsets = [0, 2, 0, 0], sizes = [2, 16, 16, 64], strides = [1, 1, 1, 1]} : vector<2x18x18x64xbf16> to vector<2x16x16x64xbf16>
    %25 = vector.shape_cast %24 : vector<2x16x16x64xbf16> to vector<512x64xbf16>
    %c0_11 = arith.constant 0 : index
    %c384 = arith.constant 384 : index
    %26 = vector.load %arg5[%c0_11, %c384] : memref<512x576xbf16, #tpu.memory_space<vmem>>, vector<512x64xbf16>
    tpu.vector_store %arg5[%c0_11, %c384], %25 {strides = array<i32>} : memref<512x576xbf16, #tpu.memory_space<vmem>>, vector<512x64xbf16>,
    %27 = vector.extract_strided_slice %5 {offsets = [0, 2, 1, 0], sizes = [2, 16, 16, 64], strides = [1, 1, 1, 1]} : vector<2x18x18x64xbf16> to vector<2x16x16x64xbf16>
    %28 = vector.shape_cast %27 : vector<2x16x16x64xbf16> to vector<512x64xbf16>
    %c0_12 = arith.constant 0 : index
    %c448 = arith.constant 448 : index
    %29 = vector.load %arg5[%c0_12, %c448] : memref<512x576xbf16, #tpu.memory_space<vmem>>, vector<512x64xbf16>
    tpu.vector_store %arg5[%c0_12, %c448], %28 {strides = array<i32>} : memref<512x576xbf16, #tpu.memory_space<vmem>>, vector<512x64xbf16>,
    %30 = vector.extract_strided_slice %5 {offsets = [0, 2, 2, 0], sizes = [2, 16, 16, 64], strides = [1, 1, 1, 1]} : vector<2x18x18x64xbf16> to vector<2x16x16x64xbf16>
    %31 = vector.shape_cast %30 : vector<2x16x16x64xbf16> to vector<512x64xbf16>
    %c0_13 = arith.constant 0 : index
    %c512 = arith.constant 512 : index
    %32 = vector.load %arg5[%c0_13, %c512] : memref<512x576xbf16, #tpu.memory_space<vmem>>, vector<512x64xbf16>
    tpu.vector_store %arg5[%c0_13, %c512], %31 {strides = array<i32>} : memref<512x576xbf16, #tpu.memory_space<vmem>>, vector<512x64xbf16>,
    %c0_14 = arith.constant 0 : index
    %c0_15 = arith.constant 0 : index
    %33 = vector.load %arg5[%c0_14, %c0_15] : memref<512x576xbf16, #tpu.memory_space<vmem>>, vector<512x576xbf16>
    %c0_16 = arith.constant 0 : index
    %c0_17 = arith.constant 0 : index
    %34 = vector.load %arg1[%c0_16, %c0_17] : memref<576x128xbf16, #tpu.memory_space<vmem>>, vector<576x128xbf16>
    %cst_18 = arith.constant dense<0.000000e+00> : vector<512x128xf32>
    %35 = tpu.matmul %33, %34, %cst_18 {dimension_numbers = #tpu.dot_dimension_numbers<[1], [0], [0], [1], [0, 0, 1, 1], [], []>} : vector<512x576xbf16>, vector<576x128xbf16>, vector<512x128xf32> -> vector<512x128xf32>
    %cst_19 = arith.constant 0.000000e+00 : f32
    %36 = vector.broadcast %cst_19 : f32 to vector<512x128xf32>
    %37 = arith.maximumf %35, %36 : vector<512x128xf32>
    %cst_20 = arith.constant 1.71395886 : f32
    %38 = vector.broadcast %cst_20 : f32 to vector<512x128xf32>
    %39 = arith.mulf %37, %38 : vector<512x128xf32>
    %cst_21 = arith.constant 0.000000e+00 : bf16
    %40 = vector.broadcast %cst_21 : bf16 to vector<2x1x18x128xbf16>
    %cst_22 = arith.constant 0.000000e+00 : bf16
    %41 = vector.broadcast %cst_22 : bf16 to vector<2x18x1x128xbf16>
    %c0_23 = arith.constant 0 : index
    %c0_24 = arith.constant 0 : index
    %c0_25 = arith.constant 0 : index
    %c0_26 = arith.constant 0 : index
    %42 = vector.load %arg6[%c0_23, %c0_24, %c0_25, %c0_26] : memref<2x18x18x128xbf16, #tpu.memory_space<vmem>>, vector<2x1x18x128xbf16>
    tpu.vector_store %arg6[%c0_23, %c0_24, %c0_25, %c0_26], %40 {strides = array<i32>} : memref<2x18x18x128xbf16, #tpu.memory_space<vmem>>, vector<2x1x18x128xbf16>,
    %c0_27 = arith.constant 0 : index
    %c17 = arith.constant 17 : index
    %c0_28 = arith.constant 0 : index
    %c0_29 = arith.constant 0 : index
    %43 = vector.load %arg6[%c0_27, %c17, %c0_28, %c0_29] : memref<2x18x18x128xbf16, #tpu.memory_space<vmem>>, vector<2x1x18x128xbf16>
    tpu.vector_store %arg6[%c0_27, %c17, %c0_28, %c0_29], %40 {strides = array<i32>} : memref<2x18x18x128xbf16, #tpu.memory_space<vmem>>, vector<2x1x18x128xbf16>,
    %c0_30 = arith.constant 0 : index
    %c0_31 = arith.constant 0 : index
    %c0_32 = arith.constant 0 : index
    %c0_33 = arith.constant 0 : index
    %44 = vector.load %arg6[%c0_30, %c0_31, %c0_32, %c0_33] : memref<2x18x18x128xbf16, #tpu.memory_space<vmem>>, vector<2x18x1x128xbf16>
    tpu.vector_store %arg6[%c0_30, %c0_31, %c0_32, %c0_33], %41 {strides = array<i32>} : memref<2x18x18x128xbf16, #tpu.memory_space<vmem>>, vector<2x18x1x128xbf16>,
    %c0_34 = arith.constant 0 : index
    %c0_35 = arith.constant 0 : index
    %c17_36 = arith.constant 17 : index
    %c0_37 = arith.constant 0 : index
    %45 = vector.load %arg6[%c0_34, %c0_35, %c17_36, %c0_37] : memref<2x18x18x128xbf16, #tpu.memory_space<vmem>>, vector<2x18x1x128xbf16>
    tpu.vector_store %arg6[%c0_34, %c0_35, %c17_36, %c0_37], %41 {strides = array<i32>} : memref<2x18x18x128xbf16, #tpu.memory_space<vmem>>, vector<2x18x1x128xbf16>,
    %46 = vector.shape_cast %39 : vector<512x128xf32> to vector<2x16x16x128xf32>
    %47 = arith.truncf %46 : vector<2x16x16x128xf32> to vector<2x16x16x128xbf16>
    %c0_38 = arith.constant 0 : index
    %c1 = arith.constant 1 : index
    %c1_39 = arith.constant 1 : index
    %c0_40 = arith.constant 0 : index
    %48 = vector.load %arg6[%c0_38, %c1, %c1_39, %c0_40] : memref<2x18x18x128xbf16, #tpu.memory_space<vmem>>, vector<2x16x16x128xbf16>
    tpu.vector_store %arg6[%c0_38, %c1, %c1_39, %c0_40], %47 {strides = array<i32>} : memref<2x18x18x128xbf16, #tpu.memory_space<vmem>>, vector<2x16x16x128xbf16>,
    %c0_41 = arith.constant 0 : index
    %c0_42 = arith.constant 0 : index
    %c0_43 = arith.constant 0 : index
    %c0_44 = arith.constant 0 : index
    %49 = vector.load %arg6[%c0_41, %c0_42, %c0_43, %c0_44] : memref<2x18x18x128xbf16, #tpu.memory_space<vmem>>, vector<2x18x18x128xbf16>
    %50 = vector.extract_strided_slice %49 {offsets = [0, 0, 0, 0], sizes = [2, 16, 16, 128], strides = [1, 1, 1, 1]} : vector<2x18x18x128xbf16> to vector<2x16x16x128xbf16>
    %51 = vector.shape_cast %50 : vector<2x16x16x128xbf16> to vector<512x128xbf16>
    %c0_45 = arith.constant 0 : index
    %c0_46 = arith.constant 0 : index
    %52 = vector.load %arg7[%c0_45, %c0_46] : memref<512x1152xbf16, #tpu.memory_space<vmem>>, vector<512x128xbf16>
    tpu.vector_store %arg7[%c0_45, %c0_46], %51 {strides = array<i32>} : memref<512x1152xbf16, #tpu.memory_space<vmem>>, vector<512x128xbf16>,
    %53 = vector.extract_strided_slice %49 {offsets = [0, 0, 1, 0], sizes = [2, 16, 16, 128], strides = [1, 1, 1, 1]} : vector<2x18x18x128xbf16> to vector<2x16x16x128xbf16>
    %54 = vector.shape_cast %53 : vector<2x16x16x128xbf16> to vector<512x128xbf16>
    %c0_47 = arith.constant 0 : index
    %c128_48 = arith.constant 128 : index
    %55 = vector.load %arg7[%c0_47, %c128_48] : memref<512x1152xbf16, #tpu.memory_space<vmem>>, vector<512x128xbf16>
    tpu.vector_store %arg7[%c0_47, %c128_48], %54 {strides = array<i32>} : memref<512x1152xbf16, #tpu.memory_space<vmem>>, vector<512x128xbf16>,
    %56 = vector.extract_strided_slice %49 {offsets = [0, 0, 2, 0], sizes = [2, 16, 16, 128], strides = [1, 1, 1, 1]} : vector<2x18x18x128xbf16> to vector<2x16x16x128xbf16>
    %57 = vector.shape_cast %56 : vector<2x16x16x128xbf16> to vector<512x128xbf16>
    %c0_49 = arith.constant 0 : index
    %c256_50 = arith.constant 256 : index
    %58 = vector.load %arg7[%c0_49, %c256_50] : memref<512x1152xbf16, #tpu.memory_space<vmem>>, vector<512x128xbf16>
    tpu.vector_store %arg7[%c0_49, %c256_50], %57 {strides = array<i32>} : memref<512x1152xbf16, #tpu.memory_space<vmem>>, vector<512x128xbf16>,
    %59 = vector.extract_strided_slice %49 {offsets = [0, 1, 0, 0], sizes = [2, 16, 16, 128], strides = [1, 1, 1, 1]} : vector<2x18x18x128xbf16> to vector<2x16x16x128xbf16>
    %60 = vector.shape_cast %59 : vector<2x16x16x128xbf16> to vector<512x128xbf16>
    %c0_51 = arith.constant 0 : index
    %c384_52 = arith.constant 384 : index
    %61 = vector.load %arg7[%c0_51, %c384_52] : memref<512x1152xbf16, #tpu.memory_space<vmem>>, vector<512x128xbf16>
    tpu.vector_store %arg7[%c0_51, %c384_52], %60 {strides = array<i32>} : memref<512x1152xbf16, #tpu.memory_space<vmem>>, vector<512x128xbf16>,
    %62 = vector.extract_strided_slice %49 {offsets = [0, 1, 1, 0], sizes = [2, 16, 16, 128], strides = [1, 1, 1, 1]} : vector<2x18x18x128xbf16> to vector<2x16x16x128xbf16>
    %63 = vector.shape_cast %62 : vector<2x16x16x128xbf16> to vector<512x128xbf16>
    %c0_53 = arith.constant 0 : index
    %c512_54 = arith.constant 512 : index
    %64 = vector.load %arg7[%c0_53, %c512_54] : memref<512x1152xbf16, #tpu.memory_space<vmem>>, vector<512x128xbf16>
    tpu.vector_store %arg7[%c0_53, %c512_54], %63 {strides = array<i32>} : memref<512x1152xbf16, #tpu.memory_space<vmem>>, vector<512x128xbf16>,
    %65 = vector.extract_strided_slice %49 {offsets = [0, 1, 2, 0], sizes = [2, 16, 16, 128], strides = [1, 1, 1, 1]} : vector<2x18x18x128xbf16> to vector<2x16x16x128xbf16>
    %66 = vector.shape_cast %65 : vector<2x16x16x128xbf16> to vector<512x128xbf16>
    %c0_55 = arith.constant 0 : index
    %c640 = arith.constant 640 : index
    %67 = vector.load %arg7[%c0_55, %c640] : memref<512x1152xbf16, #tpu.memory_space<vmem>>, vector<512x128xbf16>
    tpu.vector_store %arg7[%c0_55, %c640], %66 {strides = array<i32>} : memref<512x1152xbf16, #tpu.memory_space<vmem>>, vector<512x128xbf16>,
    %68 = vector.extract_strided_slice %49 {offsets = [0, 2, 0, 0], sizes = [2, 16, 16, 128], strides = [1, 1, 1, 1]} : vector<2x18x18x128xbf16> to vector<2x16x16x128xbf16>
    %69 = vector.shape_cast %68 : vector<2x16x16x128xbf16> to vector<512x128xbf16>
    %c0_56 = arith.constant 0 : index
    %c768 = arith.constant 768 : index
    %70 = vector.load %arg7[%c0_56, %c768] : memref<512x1152xbf16, #tpu.memory_space<vmem>>, vector<512x128xbf16>
    tpu.vector_store %arg7[%c0_56, %c768], %69 {strides = array<i32>} : memref<512x1152xbf16, #tpu.memory_space<vmem>>, vector<512x128xbf16>,
    %71 = vector.extract_strided_slice %49 {offsets = [0, 2, 1, 0], sizes = [2, 16, 16, 128], strides = [1, 1, 1, 1]} : vector<2x18x18x128xbf16> to vector<2x16x16x128xbf16>
    %72 = vector.shape_cast %71 : vector<2x16x16x128xbf16> to vector<512x128xbf16>
    %c0_57 = arith.constant 0 : index
    %c896 = arith.constant 896 : index
    %73 = vector.load %arg7[%c0_57, %c896] : memref<512x1152xbf16, #tpu.memory_space<vmem>>, vector<512x128xbf16>
    tpu.vector_store %arg7[%c0_57, %c896], %72 {strides = array<i32>} : memref<512x1152xbf16, #tpu.memory_space<vmem>>, vector<512x128xbf16>,
    %74 = vector.extract_strided_slice %49 {offsets = [0, 2, 2, 0], sizes = [2, 16, 16, 128], strides = [1, 1, 1, 1]} : vector<2x18x18x128xbf16> to vector<2x16x16x128xbf16>
    %75 = vector.shape_cast %74 : vector<2x16x16x128xbf16> to vector<512x128xbf16>
    %c0_58 = arith.constant 0 : index
    %c1024 = arith.constant 1024 : index
    %76 = vector.load %arg7[%c0_58, %c1024] : memref<512x1152xbf16, #tpu.memory_space<vmem>>, vector<512x128xbf16>
    tpu.vector_store %arg7[%c0_58, %c1024], %75 {strides = array<i32>} : memref<512x1152xbf16, #tpu.memory_space<vmem>>, vector<512x128xbf16>,
    %c0_59 = arith.constant 0 : index
    %c0_60 = arith.constant 0 : index
    %77 = vector.load %arg7[%c0_59, %c0_60] : memref<512x1152xbf16, #tpu.memory_space<vmem>>, vector<512x1152xbf16>
    %c0_61 = arith.constant 0 : index
    %c0_62 = arith.constant 0 : index
    %78 = vector.load %arg2[%c0_61, %c0_62] : memref<1152x128xbf16, #tpu.memory_space<vmem>>, vector<1152x128xbf16>
    %cst_63 = arith.constant dense<0.000000e+00> : vector<512x128xf32>
    %79 = tpu.matmul %77, %78, %cst_63 {dimension_numbers = #tpu.dot_dimension_numbers<[1], [0], [0], [1], [0, 0, 1, 1], [], []>} : vector<512x1152xbf16>, vector<1152x128xbf16>, vector<512x128xf32> -> vector<512x128xf32>
    %80 = vector.extract_strided_slice %0 {offsets = [0, 1, 1, 0], sizes = [2, 16, 16, 64], strides = [1, 1, 1, 1]} : vector<2x18x18x64xf32> to vector<2x16x16x64xf32>
    %81 = vector.shape_cast %80 : vector<2x16x16x64xf32> to vector<512x64xf32>
    %82 = arith.truncf %81 : vector<512x64xf32> to vector<512x64xbf16>
    %c0_64 = arith.constant 0 : index
    %c0_65 = arith.constant 0 : index
    %83 = vector.load %arg3[%c0_64, %c0_65] : memref<64x128xbf16, #tpu.memory_space<vmem>>, vector<64x128xbf16>
    %cst_66 = arith.constant dense<0.000000e+00> : vector<512x128xf32>
    %84 = tpu.matmul %82, %83, %cst_66 {dimension_numbers = #tpu.dot_dimension_numbers<[1], [0], [0], [1], [0, 0, 1, 1], [], []>} : vector<512x64xbf16>, vector<64x128xbf16>, vector<512x128xf32> -> vector<512x128xf32>
    %cst_67 = arith.constant 2.000000e-01 : f32
    %85 = vector.broadcast %cst_67 : f32 to vector<512x128xf32>
    %86 = arith.mulf %79, %85 : vector<512x128xf32>
    %87 = arith.addf %86, %84 : vector<512x128xf32>
    %88 = vector.shape_cast %87 : vector<512x128xf32> to vector<2x16x16x128xf32>
    %c0_68 = arith.constant 0 : index
    %c0_69 = arith.constant 0 : index
    %c0_70 = arith.constant 0 : index
    %c0_71 = arith.constant 0 : index
    %89 = vector.load %arg4[%c0_68, %c0_69, %c0_70, %c0_71] : memref<2x16x16x128xf32, #tpu.memory_space<vmem>>, vector<2x16x16x128xf32>
    tpu.vector_store %arg4[%c0_68, %c0_69, %c0_70, %c0_71], %88 {strides = array<i32>} : memref<2x16x16x128xf32, #tpu.memory_space<vmem>>, vector<2x16x16x128xf32>,
    return
  }
}

</mosaic_0001>

<bundles_post_ra>
// kernel: basic_block_forward.1
= control target key start
LH: loop header
LB: loop body
LE: loop exit
PB: predicated region body
PF: predicated region fallthrough
CT: control target
= control target key end

     0   :  { %vm448_vm0 = vsmask.f32 7424  ;;  %vm415_vm1 = vcmask 523264   ;;  %s11458_s9 = smov 64   ;;  %vm1026_vm2 = vcmask 1046528   ;;  %vm929_vm3 = vcmask 1048064   ;;  %s16092_s0 = inlined_call_operand.vmem [shape: f32[2,18,18,64], index: 0, kind: input, shape index: {}]   ;;  %s16093_s1 = inlined_call_operand.vmem [shape: bf16[576,128], index: 1, kind: input, shape index: {}]   ;;  %s16094_s2 = inlined_call_operand.vmem [shape: bf16[1152,128], index: 2, kind: input, shape index: {}]   ;;  %s16095_s3 = inlined_call_operand.vmem [shape: bf16[64,128], index: 3, kind: input, shape index: {}]   ;;  %s16096_s4 = inlined_call_operand.hbm [shape: f32[2,16,16,128], index: 4, kind: output, shape index: {}]  }
   0x1   :  { %v22_v0 = vld [vmem:[%s16092_s0 + $0x18] sm:$0xff]  ;;  %v23_v1 = vld [vmem:[%s16092_s0 + $0x20] sm:$0xff]  ;;  %v20_v5 = vld [vmem:[%s16092_s0 + $0x8] sm:$0xff] }
   0x2   :  { %v19_v2 = vld [vmem:[%s16092_s0] sm:$0xff]  ;;  %v130_v3 = vmax.f32 %v22_v0, 0.0  ;;  %v131_v4 = vmax.f32 %v23_v1, 0.0  ;;  %v21_v6 = vld [vmem:[%s16092_s0 + $0x10] sm:$0x3]  ;;  %v128_v8 = vmax.f32 %v20_v5, 0.0 }
   0x3   :  { %v127_v7 = vmax.f32 %v19_v2, 0.0  ;;  %v129_v9 = vmax.f32 %v21_v6, 0.0  ;;  %v11506_v10 = vld [vmem:[%s16092_s0 + $0x30] sm:$0xff]  ;;  %v11511_v11 = vld [vmem:[%s16092_s0 + $0x38] sm:$0xff]  ;;  %v24_v12 = vld [vmem:[%s16092_s0 + $0x28] sm:$0x3] }
   0x4   :  { %v238_v13 = vmul.f32 1.7139589, %v130_v3  ;;  %v239_v14 = vmul.f32 1.7139589, %v131_v4  ;;  %v236_v16 = vmul.f32 1.7139589, %v128_v8 }
   0x5   :  { %v235_v15 = vmul.f32 1.7139589, %v127_v7  ;;  %v237_v17 = vmul.f32 1.7139589, %v129_v9  ;;  %v133_v18 = vmax.f32 %v11506_v10, 0.0  ;;  %v134_v19 = vmax.f32 %v11511_v11, 0.0 }
   0x6   :  { %v11518_v20 = vpack.c.bf16 %v239_v14, %v238_v13  ;;  %v8990_v21 = vrot.slane %v11506_v10, 1  ;;  %v132_v22 = vmax.f32 %v24_v12, 0.0  ;;  %v28_v27 = vld [vmem:[%s16092_s0 + $0x48] sm:$0xff]  ;;  %v29_v28 = vld [vmem:[%s16092_s0 + $0x50] sm:$0xff]  ;;  %v27_v32 = vld [vmem:[%s16092_s0 + $0x40] sm:$0x3] }
   0x7   :  { %v11521_v23 = vpack.c.bf16 %v236_v16, %v235_v15  ;;  %v11523_v24 = vpack.c.bf16 %v237_v17, %v237_v17  ;;  %v241_v25 = vmul.f32 1.7139589, %v133_v18  ;;  %v242_v26 = vmul.f32 1.7139589, %v134_v19  ;;  %v31_v49 = vld [vmem:[%s16092_s0 + $0x60] sm:$0xff]  ;;  %v11564_v53 = vld [vmem:[%s16092_s0 + $0x68] sm:$0xff] }
   0x8   :  { %1189 = vrot.lane.b32.xlu0 %v11518_v20, %s11458_s9  ;;  %v240_v29 = vmul.f32 1.7139589, %v132_v22  ;;  %v462_v30 = vshrl.u32 %v11518_v20, 16  ;;  %v464_v31 = vshll.u32 %v11518_v20, 16  ;;  %417 = vst.msk [vmem:[#allocation2 + $0x28] sm:$0xff] %vm415_vm1, %v11518_v20  ;;  %v136_v39 = vmax.f32 %v28_v27, 0.0 }
   0x9   :  { %v450_v33 = vshrl.u32 %v11521_v23, 16  ;;  %v452_v34 = vshll.u32 %v11521_v23, 16  ;;  %v457_v35 = vshll.u32 %v11523_v24, 16  ;;  %v11543_v36 = vpack.c.bf16 %v242_v26, %v241_v25  ;;  %416 = vst.msk [vmem:[#allocation2] sm:$0xff] %vm415_vm1, %v11521_v23  ;;  %v30_v62 = vld [vmem:[%s16092_s0 + $0x58] sm:$0x3] }
   0xa   :  { %v11547_v37 = vpack.c.bf16 %v240_v29, %v240_v29  ;;  %v466_v38 = vrot.slane %v464_v31, 1  ;;  %v137_v40 = vmax.f32 %v29_v28, 0.0  ;;  %v135_v43 = vmax.f32 %v27_v32, 0.0  ;;  %v33_v63 = vld [vmem:[%s16092_s0 + $0x70] sm:$0x3]  ;;  %v34_v4 = vld [vmem:[%s16092_s0 + $0x78] sm:$0xff] }
   0xb   :  { %v454_v41 = vrot.slane %v452_v34, 1  ;;  %v459_v42 = vrot.slane %v457_v35, 1  ;;  %1191 = vrot.lane.b32.xlu1 %v11543_v36, %s11458_s9  ;;  %418 = vst.msk [vmem:[#allocation2 + $0x50] sm:$0xff] %vm415_vm1, %v11543_v36  ;;  %1541 = vst.msk [vmem:[#allocation2 + $0x18] sm:$0xff] %vm415_vm1, %v11543_v36  ;;  %v474_v44 = vshrl.u32 %v11543_v36, 16  ;;  %v476_v52 = vshll.u32 %v11543_v36, 16 }
   0xc   :  { %v467_v45 = vor.u32 %v466_v38, %v462_v30  ;;  %v469_v46 = vshll.u32 %v11547_v37, 16  ;;  %v244_v47 = vmul.f32 1.7139589, %v136_v39  ;;  %v245_v48 = vmul.f32 1.7139589, %v137_v40  ;;  %v35_v9 = vld [vmem:[%s16092_s0 + $0x80] sm:$0xff] }
   0xd   :  { %v455_v50 = vor.u32 %v454_v41, %v450_v33  ;;  %v243_v51 = vmul.f32 1.7139589, %v135_v43  ;;  %v8991_v56 = vrot.slane %v11511_v11, 1  ;;  %v8993_v57 = vrot.slane %v27_v32, 1  ;;  %v11613_v28 = vld [vmem:[%s16092_s0 + $0x90] sm:$0xff]  ;;  %v11627_v33 = vld [vmem:[%s16092_s0 + $0x98] sm:$0xff] }
   0xe   :  { %v471_v54 = vrot.slane %v469_v46, 1  ;;  %v11566_v55 = vpack.c.bf16 %v245_v48, %v244_v47  ;;  %v478_v60 = vrot.slane %v476_v52, 1  ;;  %v139_v61 = vmax.f32 %v31_v49, 0.0  ;;  %v36_v34 = vld [vmem:[%s16092_s0 + $0x88] sm:$0x3] }
   0xf   :  { %v460_v58 = vsel %vm448_vm0, %v455_v50, %v459_v42  ;;  %v11570_v59 = vpack.c.bf16 %v243_v51, %v243_v51  ;;  %v11585_v1 = vsel %vm1026_vm2, %v8990_v21, %v8991_v56  ;;  %v11588_v2 = vsel %vm1026_vm2, %v8991_v56, %v8993_v57  ;;  %v40_v48 = vld [vmem:[%s16092_s0 + $0xa8] sm:$0xff] }
  0x10   :  { %833 = vrot.lane.b32.xlu0 %v460_v58, %s11458_s9  ;;  %v472_v0 = vsel %vm448_vm0, %v467_v45, %v471_v54  ;;  %419 = vst.msk [vmem:[#allocation2 + $0x78] sm:$0xff] %vm415_vm1, %v11566_v55  ;;  %1542 = vst.msk [vmem:[#allocation2 + $0x40] sm:$0xff] %vm415_vm1, %v11566_v55  ;;  %v140_v3 = vmax.f32 %v11564_v53, 0.0  ;;  %v479_v5 = vor.u32 %v478_v60, %v474_v44  ;;  %v247_v8 = vmul.f32 1.7139589, %v139_v61 }
  0x11   :  { %16255 = vst [vmem:[#allocation8_spill] sm:$0xff] %v11585_v1  ;;  %16256 = vst [vmem:[#allocation9_spill] sm:$0xff] %v11588_v2  ;;  %835 = vrot.lane.b32.xlu1 %v472_v0, %s11458_s9  ;;  %v481_v6 = vshll.u32 %v11570_v59, 16  ;;  %v9000_v11 = vrot.slane %v31_v49, 1  ;;  %v138_v12 = vmax.f32 %v30_v62, 0.0  ;;  %v486_v14 = vshrl.u32 %v11566_v55, 16 }
  0x12   :  { %1373 = vst.msk [vmem:[#allocation2 + $0x10] sm:$0xff] %vm415_vm1, %v472_v0  ;;  %v248_v10 = vmul.f32 1.7139589, %v140_v3  ;;  %v488_v15 = vshll.u32 %v11566_v55, 16  ;;  %v142_v16 = vmax.f32 %v34_v4, 0.0  ;;  %v143_v19 = vmax.f32 %v35_v9, 0.0 }
  0x13   :  { %v483_v13 = vrot.slane %v481_v6, 1  ;;  %v246_v18 = vmul.f32 1.7139589, %v138_v12  ;;  %v141_v21 = vmax.f32 %v33_v63, 0.0  ;;  %v9001_v27 = vrot.slane %v11564_v53, 1  ;;  %v41_v49 = vld [vmem:[%s16092_s0 + $0xb0] sm:$0xff] }
  0x14   :  { %1193 = vrot.lane.b32.xlu0 %v11566_v55, %s11458_s9  ;;  %v11606_v17 = vpack.c.bf16 %v248_v10, %v247_v8  ;;  %v490_v25 = vrot.slane %v488_v15, 1  ;;  %v250_v26 = vmul.f32 1.7139589, %v142_v16  ;;  %v251_v30 = vmul.f32 1.7139589, %v143_v19  ;;  %v11679_v12 = vld [vmem:[%s16092_s0 + $0xc0] sm:$0xff] }
  0x15   :  { %v484_v22 = vsel %vm448_vm0, %v479_v5, %v483_v13  ;;  %v11621_v29 = vpack.c.bf16 %v246_v18, %v246_v18  ;;  %v249_v31 = vmul.f32 1.7139589, %v141_v21  ;;  %v11634_v39 = vsel %vm1026_vm2, %v9000_v11, %v9001_v27  ;;  %v39_v54 = vld [vmem:[%s16092_s0 + $0xa0] sm:$0x3]  ;;  %v11692_v18 = vld [vmem:[%s16092_s0 + $0xc8] sm:$0xff] }
  0x16   :  { %1374 = vst.msk [vmem:[#allocation2 + $0x38] sm:$0xff] %vm415_vm1, %v484_v22  ;;  %837 = vrot.lane.b32.xlu1 %v484_v22, %s11458_s9  ;;  %420 = vst.msk [vmem:[#allocation2 + $0xa0] sm:$0xff] %vm415_vm1, %v11606_v17  ;;  %v498_v32 = vshrl.u32 %v11606_v17, 16  ;;  %v491_v35 = vor.u32 %v490_v25, %v486_v14  ;;  %v500_v38 = vshll.u32 %v11606_v17, 16  ;;  %v9003_v40 = vrot.slane %v33_v63, 1 }
  0x17   :  { %1543 = vst.msk [vmem:[#allocation2 + $0x68] sm:$0xff] %vm415_vm1, %v11606_v17  ;;  %16257 = vst [vmem:[#allocation10_spill] sm:$0xff] %v11634_v39  ;;  %v493_v41 = vshll.u32 %v11621_v29, 16  ;;  %v11639_v42 = vpack.c.bf16 %v251_v30, %v250_v26  ;;  %v11641_v43 = vpack.c.bf16 %v249_v31, %v249_v31  ;;  %v145_v44 = vmax.f32 %v11613_v28, 0.0  ;;  %v42_v26 = vld [vmem:[%s16092_s0 + $0xb8] sm:$0x3] }
  0x18   :  { %1195 = vrot.lane.b32.xlu0 %v11606_v17, %s11458_s9  ;;  %v502_v45 = vrot.slane %v500_v38, 1  ;;  %v11645_v46 = vsel %vm1026_vm2, %v9001_v27, %v9003_v40  ;;  %v146_v47 = vmax.f32 %v11627_v33, 0.0  ;;  %v9010_v58 = vrot.slane %v11613_v28, 1  ;;  %v46_v38 = vld [vmem:[%s16092_s0 + $0xd8] sm:$0xff] }
  0x19   :  { %16258 = vst [vmem:[#allocation11_spill] sm:$0xff] %v11645_v46  ;;  %v495_v50 = vrot.slane %v493_v41, 1  ;;  %421 = vst.msk [vmem:[#allocation2 + $0xc8] sm:$0xff] %vm415_vm1, %v11639_v42  ;;  %v505_v51 = vshll.u32 %v11641_v43, 16  ;;  %v253_v53 = vmul.f32 1.7139589, %v145_v44 }
  0x1a   :  { %1544 = vst.msk [vmem:[#allocation2 + $0x90] sm:$0xff] %vm415_vm1, %v11639_v42  ;;  %v503_v56 = vor.u32 %v502_v45, %v498_v32  ;;  %v254_v57 = vmul.f32 1.7139589, %v146_v47  ;;  %v144_v60 = vmax.f32 %v36_v34, 0.0  ;;  %v510_v63 = vshrl.u32 %v11639_v42, 16 }
  0x1b   :  { %v496_v61 = vsel %vm448_vm0, %v491_v35, %v495_v50  ;;  %v507_v62 = vrot.slane %v505_v51, 1  ;;  %v512_v0 = vshll.u32 %v11639_v42, 16  ;;  %v148_v5 = vmax.f32 %v40_v48, 0.0  ;;  %v11157_v35 = vld [vmem:[%s16093_s1] sm:$0xff]  }
  0x1c   :  { %1197 = vrot.lane.b32.xlu0 %v11639_v42, %s11458_s9  ;;  %1375 = vst.msk [vmem:[#allocation2 + $0x60] sm:$0xff] %vm415_vm1, %v496_v61  ;;  %839 = vrot.lane.b32.xlu1 %v496_v61, %s11458_s9  ;;  %v11672_v3 = vpack.c.bf16 %v254_v57, %v253_v53  ;;  %v252_v4 = vmul.f32 1.7139589, %v144_v60  ;;  %v149_v6 = vmax.f32 %v41_v49, 0.0  ;;  %v147_v10 = vmax.f32 %v39_v54, 0.0  ;;  %v47_v51 = vld [vmem:[%s16092_s0 + $0xe0] sm:$0xff] }
  0x1d   :  { %v508_v8 = vsel %vm448_vm0, %v503_v56, %v507_v62  ;;  %v514_v9 = vrot.slane %v512_v0, 1  ;;  %v9011_v11 = vrot.slane %v11627_v33, 1  ;;  %v256_v14 = vmul.f32 1.7139589, %v148_v5  ;;  %v11165_v49 = vld [vmem:[%s16093_s1 + $0x40] sm:$0xff]  }
  0x1e   :  { %1376 = vst.msk [vmem:[#allocation2 + $0x88] sm:$0xff] %vm415_vm1, %v508_v8  ;;  %422 = vst.msk [vmem:[#allocation2 + $0xf0] sm:$0xff] %vm415_vm1, %v11672_v3  ;;  %v11686_v13 = vpack.c.bf16 %v252_v4, %v252_v4  ;;  %v257_v15 = vmul.f32 1.7139589, %v149_v6  ;;  %v522_v16 = vshrl.u32 %v11672_v3, 16  ;;  %v524_v22 = vshll.u32 %v11672_v3, 16 }
  0x1f   :  { %1545 = vst.msk [vmem:[#allocation2 + $0xb8] sm:$0xff] %vm415_vm1, %v11672_v3  ;;  %v515_v19 = vor.u32 %v514_v9, %v510_v63  ;;  %v255_v21 = vmul.f32 1.7139589, %v147_v10  ;;  %v11698_v25 = vsel %vm1026_vm2, %v9010_v58, %v9011_v11  ;;  %v9013_v30 = vrot.slane %v39_v54, 1  ;;  %v45_v58 = vld [vmem:[%s16092_s0 + $0xd0] sm:$0x3] }
  0x20   :  { %1199 = vrot.lane.b32.xlu0 %v11672_v3, %s11458_s9  ;;  %16259 = vst [vmem:[#allocation12_spill] sm:$0xff] %v11698_v25  ;;  %841 = vrot.lane.b32.xlu1 %v508_v8, %s11458_s9  ;;  %v517_v27 = vshll.u32 %v11686_v13, 16  ;;  %v11705_v28 = vpack.c.bf16 %v257_v15, %v256_v14  ;;  %v151_v31 = vmax.f32 %v11679_v12, 0.0  ;;  %v526_v33 = vrot.slane %v524_v22, 1  ;;  %v11158_v63 = vld [vmem:[%s16093_s1 + $0x8] sm:$0xff]   ;;  %v11764_v9 = vld [vmem:[%s16092_s0 + $0xf0] sm:$0xff] }
  0x21   :  { %v11708_v32 = vpack.c.bf16 %v255_v21, %v255_v21  ;;  %v152_v34 = vmax.f32 %v11692_v18, 0.0  ;;  %v11722_v41 = vsel %vm1026_vm2, %v9011_v11, %v9013_v30  ;;  %v150_v45 = vmax.f32 %v42_v26, 0.0  ;;  %v11778_v15 = vld [vmem:[%s16092_s0 + $0xf8] sm:$0xff]  ;;  %v48_v26 = vld [vmem:[%s16092_s0 + $0xe8] sm:$0x3] }
  0x22   :  { %v519_v40 = vrot.slane %v517_v27, 1  ;;  %423 = vst.msk [vmem:[#allocation2 + $0x118] sm:$0xff] %vm415_vm1, %v11705_v28  ;;  %1546 = vst.msk [vmem:[#allocation2 + $0xe0] sm:$0xff] %vm415_vm1, %v11705_v28  ;;  %v259_v44 = vmul.f32 1.7139589, %v151_v31  ;;  %v527_v47 = vor.u32 %v526_v33, %v522_v16  ;;  %v534_v56 = vshrl.u32 %v11705_v28, 16 }
  0x23   :  { %16260 = vst [vmem:[#allocation13_spill] sm:$0xff] %v11722_v41  ;;  %v529_v48 = vshll.u32 %v11708_v32, 16  ;;  %v260_v50 = vmul.f32 1.7139589, %v152_v34  ;;  %v258_v54 = vmul.f32 1.7139589, %v150_v45 }
  0x24   :  { %1201 = vrot.lane.b32.xlu0 %v11705_v28, %s11458_s9  ;;  %v520_v53 = vsel %vm448_vm0, %v515_v19, %v519_v40  ;;  %v536_v57 = vshll.u32 %v11705_v28, 16  ;;  %v9020_v62 = vrot.slane %v11679_v12, 1  ;;  %v16098_v5 = vmov 0   ;;  %v11159_v34 = vld [vmem:[%s16093_s1 + $0x10] sm:$0xff]  }
  0x25   :  { %1377 = vst.msk [vmem:[#allocation2 + $0xb0] sm:$0xff] %vm415_vm1, %v520_v53  ;;  %843 = vrot.lane.b32.xlu1 %v520_v53, %s11458_s9  ;;  %v531_v60 = vrot.slane %v529_v48, 1  ;;  %v11740_v61 = vpack.c.bf16 %v260_v50, %v259_v44  ;;  %v11746_v0 = vpack.c.bf16 %v258_v54, %v258_v54  ;;  %2231 = vmatprep.subr.bf16.mxu0 %v16098_v5  ;;  %3226 = vst [vmem:[#allocation3] sm:$0xf] %v16098_v5 }
  0x26   :  { %v538_v4 = vrot.slane %v536_v57, 1  ;;  %3227 = vst [vmem:[#allocation3 + $0x4] sm:$0xf] %v16098_v5  ;;  %3228 = vst [vmem:[#allocation3 + $0x8] sm:$0x1] %v16098_v5  ;;  %v154_v6 = vmax.f32 %v46_v38, 0.0  ;;  %2232 = vmatpush1.bf16.msra.mxu0 %v11157_v35 }
  0x27   :  { %3229 = vst [vmem:[#allocation3 + $0xd8] sm:$0xf] %v16098_v5  ;;  %3230 = vst [vmem:[#allocation3 + $0xdc] sm:$0xf] %v16098_v5  ;;  %v155_v8 = vmax.f32 %v47_v51, 0.0  ;;  %v532_v10 = vsel %vm448_vm0, %v527_v47, %v531_v60  ;;  %v153_v11 = vmax.f32 %v45_v58, 0.0  ;;  %2233 = vmatprep.subr.bf16.mxu0 %v16098_v5 }
  0x28   :  { %3231 = vst [vmem:[#allocation3 + $0xe0] sm:$0x1] %v16098_v5  ;;  %3233 = vst [vmem:[#allocation3 + $0xcc] sm:$0xf] %v16098_v5  ;;  %1203 = vrot.lane.b32.xlu0 %v11740_v61, %s11458_s9  ;;  %v546_v12 = vshrl.u32 %v11740_v61, 16  ;;  %v548_v14 = vshll.u32 %v11740_v61, 16  ;;  %v539_v16 = vor.u32 %v538_v4, %v534_v56 }
  0x29   :  { %3234 = vst [vmem:[#allocation3 + $0xd0] sm:$0xf] %v16098_v5  ;;  %3235 = vst [vmem:[#allocation3 + $0xd4] sm:$0x1] %v16098_v5  ;;  %v541_v19 = vshll.u32 %v11746_v0, 16  ;;  %845 = vrot.lane.b32.xlu1 %v532_v10, %s11458_s9  ;;  %v9021_v31 = vrot.slane %v11692_v18, 1 }
  0x2a   :  { %3236 = vst [vmem:[#allocation3 + $0x1a4] sm:$0xf] %v16098_v5  ;;  %3237 = vst [vmem:[#allocation3 + $0x1a8] sm:$0xf] %v16098_v5  ;;  %v262_v21 = vmul.f32 1.7139589, %v154_v6  ;;  %2234 = vmatpush1.bf16.msra.mxu0 %v11158_v63 }
  0x2b   :  { %3238 = vst [vmem:[#allocation3 + $0x1ac] sm:$0x1] %v16098_v5  ;;  %424 = vst.msk [vmem:[#allocation2 + $0x140] sm:$0xff] %vm415_vm1, %v11740_v61  ;;  %v263_v22 = vmul.f32 1.7139589, %v155_v8  ;;  %v550_v30 = vrot.slane %v548_v14, 1  ;;  %v11804_v48 = vsel %vm1026_vm2, %v9020_v62, %v9021_v31  ;;  %2235 = vmatprep.subr.bf16.mxu0 %v16098_v5 }
  0x2c   :  { %1547 = vst.msk [vmem:[#allocation2 + $0x108] sm:$0xff] %vm415_vm1, %v11740_v61  ;;  %1378 = vst.msk [vmem:[#allocation2 + $0xd8] sm:$0xff] %vm415_vm1, %v532_v10  ;;  %v261_v27 = vmul.f32 1.7139589, %v153_v11  ;;  %v9023_v33 = vrot.slane %v45_v58, 1  ;;  %v52_v35 = vld [vmem:[%s16092_s0 + $0x108] sm:$0xff] }
  0x2d   :  { %v543_v38 = vrot.slane %v541_v19, 1  ;;  %v11794_v40 = vpack.c.bf16 %v263_v22, %v262_v21  ;;  %v157_v44 = vmax.f32 %v11764_v9, 0.0  ;;  %v158_v45 = vmax.f32 %v11778_v15, 0.0  ;;  %v53_v18 = vld [vmem:[%s16092_s0 + $0x110] sm:$0xff]  ;;  %16261 = vst [vmem:[#allocation14_spill] sm:$0xff] %v11804_v48  ;;  %v11160_v4 = vld [vmem:[%s16093_s1 + $0x18] sm:$0xff]  }
  0x2e   :  { %v11801_v47 = vpack.c.bf16 %v261_v27, %v261_v27  ;;  %v11807_v50 = vsel %vm1026_vm2, %v9021_v31, %v9023_v33  ;;  %v51_v51 = vld [vmem:[%s16092_s0 + $0x100] sm:$0x3]  ;;  %v551_v58 = vor.u32 %v550_v30, %v546_v12  ;;  %v9030_v62 = vrot.slane %v11764_v9, 1  ;;  %2236 = vmatpush1.bf16.msra.mxu0 %v11159_v34  ;;  %v11850_v30 = vld [vmem:[%s16092_s0 + $0x128] sm:$0xff] }
  0x2f   :  { %16262 = vst [vmem:[#allocation15_spill] sm:$0xff] %v11807_v50  ;;  %v544_v53 = vsel %vm448_vm0, %v539_v16, %v543_v38  ;;  %1205 = vrot.lane.b32.xlu0 %v11794_v40, %s11458_s9  ;;  %425 = vst.msk [vmem:[#allocation2 + $0x168] sm:$0xff] %vm415_vm1, %v11794_v40  ;;  %v265_v56 = vmul.f32 1.7139589, %v157_v44  ;;  %v266_v57 = vmul.f32 1.7139589, %v158_v45  ;;  %2237 = vmatprep.subr.bf16.mxu0 %v16098_v5 }
  0x30   :  { %1548 = vst.msk [vmem:[#allocation2 + $0x130] sm:$0xff] %vm415_vm1, %v11794_v40  ;;  %1379 = vst.msk [vmem:[#allocation2 + $0x100] sm:$0xff] %vm415_vm1, %v544_v53  ;;  %847 = vrot.lane.b32.xlu1 %v544_v53, %s11458_s9  ;;  %v553_v60 = vshll.u32 %v11801_v47, 16  ;;  %v156_v63 = vmax.f32 %v48_v26, 0.0  ;;  %v558_v8 = vshrl.u32 %v11794_v40, 16  ;;  %v560_v10 = vshll.u32 %v11794_v40, 16 }
  0x31   :  { %v11829_v6 = vpack.c.bf16 %v266_v57, %v265_v56  ;;  %v160_v11 = vmax.f32 %v52_v35, 0.0  ;;  %v161_v12 = vmax.f32 %v53_v18, 0.0  ;;  %v159_v19 = vmax.f32 %v51_v51, 0.0  ;;  %v11836_v9 = vld [vmem:[%s16092_s0 + $0x120] sm:$0xff]  ;;  %v54_v38 = vld [vmem:[%s16092_s0 + $0x118] sm:$0x3] }
  0x32   :  { %v555_v14 = vrot.slane %v553_v60, 1  ;;  %v264_v16 = vmul.f32 1.7139589, %v156_v63  ;;  %v562_v21 = vrot.slane %v560_v10, 1  ;;  %v11161_v45 = vld [vmem:[%s16093_s1 + $0x20] sm:$0xff]   ;;  %v9031_v53 = vrot.slane %v11778_v15, 1  ;;  %2238 = vmatpush1.bf16.msra.mxu0 %v11160_v4 }
  0x33   :  { %1207 = vrot.lane.b32.xlu0 %v11829_v6, %s11458_s9  ;;  %426 = vst.msk [vmem:[#allocation2 + $0x190] sm:$0xff] %vm415_vm1, %v11829_v6  ;;  %1549 = vst.msk [vmem:[#allocation2 + $0x158] sm:$0xff] %vm415_vm1, %v11829_v6  ;;  %v268_v22 = vmul.f32 1.7139589, %v160_v11  ;;  %v570_v26 = vshrl.u32 %v11829_v6, 16  ;;  %v572_v27 = vshll.u32 %v11829_v6, 16  ;;  %2239 = vmatprep.subr.bf16.mxu0 %v16098_v5 }
  0x34   :  { %v556_v31 = vsel %vm448_vm0, %v551_v58, %v555_v14  ;;  %v11853_v33 = vpack.c.bf16 %v264_v16, %v264_v16  ;;  %v269_v34 = vmul.f32 1.7139589, %v161_v12  ;;  %v267_v35 = vmul.f32 1.7139589, %v159_v19  ;;  %v59_v4 = vld [vmem:[%s16092_s0 + $0x140] sm:$0xff]  ;;  %v64_v16 = vld [vmem:[%s16092_s0 + $0x168] sm:$0xff] }
  0x35   :  { %1380 = vst.msk [vmem:[#allocation2 + $0x128] sm:$0xff] %vm415_vm1, %v556_v31  ;;  %849 = vrot.lane.b32.xlu1 %v556_v31, %s11458_s9  ;;  %v563_v44 = vor.u32 %v562_v21, %v558_v8  ;;  %v574_v18 = vrot.slane %v572_v27, 1  ;;  %v9033_v56 = vrot.slane %v51_v51, 1  ;;  %v163_v63 = vmax.f32 %v11836_v9, 0.0  ;;  %v58_v51 = vld [vmem:[%s16092_s0 + $0x138] sm:$0xff]  ;;  %v11162_v31 = vld [vmem:[%s16093_s1 + $0x28] sm:$0xff]  }
  0x36   :  { %v565_v57 = vshll.u32 %v11853_v33, 16  ;;  %v11865_v58 = vpack.c.bf16 %v269_v34, %v268_v22  ;;  %v11867_v60 = vpack.c.bf16 %v267_v35, %v267_v35  ;;  %v11872_v10 = vsel %vm1026_vm2, %v9030_v62, %v9031_v53  ;;  %2240 = vmatpush1.bf16.msra.mxu0 %v11161_v45 }
  0x37   :  { %v575_v8 = vor.u32 %v574_v18, %v570_v26  ;;  %16263 = vst [vmem:[#allocation16_spill] sm:$0xff] %v11872_v10  ;;  %v11875_v11 = vsel %vm1026_vm2, %v9031_v53, %v9033_v56  ;;  %v164_v15 = vmax.f32 %v11850_v30, 0.0  ;;  %v271_v12 = vmul.f32 1.7139589, %v163_v63  ;;  %v57_v26 = vld [vmem:[%s16092_s0 + $0x130] sm:$0x3]  ;;  %2241 = vmatprep.subr.bf16.mxu0 %v16098_v5 }
  0x38   :  { %16264 = vst [vmem:[#allocation17_spill] sm:$0xff] %v11875_v11  ;;  %v567_v14 = vrot.slane %v565_v57, 1  ;;  %1209 = vrot.lane.b32.xlu0 %v11865_v58, %s11458_s9  ;;  %427 = vst.msk [vmem:[#allocation2 + $0x1b8] sm:$0xff] %vm415_vm1, %v11865_v58  ;;  %v577_v62 = vshll.u32 %v11867_v60, 16  ;;  %v9040_v21 = vrot.slane %v11836_v9, 1  ;;  %v162_v22 = vmax.f32 %v54_v38, 0.0 }
  0x39   :  { %1550 = vst.msk [vmem:[#allocation2 + $0x180] sm:$0xff] %vm415_vm1, %v11865_v58  ;;  %v272_v19 = vmul.f32 1.7139589, %v164_v15  ;;  %v582_v35 = vshrl.u32 %v11865_v58, 16  ;;  %v584_v18 = vshll.u32 %v11865_v58, 16  ;;  %v167_v45 = vmax.f32 %v59_v4, 0.0 }
  0x3a   :  { %v568_v27 = vsel %vm448_vm0, %v563_v44, %v567_v14  ;;  %v579_v34 = vrot.slane %v577_v62, 1  ;;  %v270_v38 = vmul.f32 1.7139589, %v162_v22  ;;  %v166_v44 = vmax.f32 %v58_v51, 0.0  ;;  %v11913_v15 = vld [vmem:[%s16092_s0 + $0x150] sm:$0xff]  ;;  %v11928_v14 = vld [vmem:[%s16092_s0 + $0x158] sm:$0xff]  ;;  %2242 = vmatpush1.bf16.msra.mxu0 %v11162_v31 }
  0x3b   :  { %1381 = vst.msk [vmem:[#allocation2 + $0x150] sm:$0xff] %vm415_vm1, %v568_v27  ;;  %851 = vrot.lane.b32.xlu1 %v568_v27, %s11458_s9  ;;  %v11906_v9 = vpack.c.bf16 %v272_v19, %v271_v12  ;;  %v586_v56 = vrot.slane %v584_v18, 1  ;;  %v165_v57 = vmax.f32 %v57_v26, 0.0  ;;  %v9041_v63 = vrot.slane %v11850_v30, 1  ;;  %v11163_v62 = vld [vmem:[%s16093_s1 + $0x30] sm:$0xff]   ;;  %2243 = vmatprep.subr.bf16.mxu0 %v16098_v5 }
  0x3c   :  { %v580_v53 = vsel %vm448_vm0, %v575_v8, %v579_v34  ;;  %v11922_v8 = vpack.c.bf16 %v270_v38, %v270_v38  ;;  %v274_v51 = vmul.f32 1.7139589, %v166_v44  ;;  %v275_v30 = vmul.f32 1.7139589, %v167_v45  ;;  %v60_v34 = vld [vmem:[%s16092_s0 + $0x148] sm:$0x3] }
  0x3d   :  { %1382 = vst.msk [vmem:[#allocation2 + $0x178] sm:$0xff] %vm415_vm1, %v580_v53  ;;  %1211 = vrot.lane.b32.xlu0 %v11906_v9, %s11458_s9  ;;  %428 = vst.msk [vmem:[#allocation2 + $0x1e0] sm:$0xff] %vm415_vm1, %v11906_v9  ;;  %v594_v4 = vshrl.u32 %v11906_v9, 16  ;;  %v587_v12 = vor.u32 %v586_v56, %v582_v35  ;;  %v273_v19 = vmul.f32 1.7139589, %v165_v57  ;;  %v596_v22 = vshll.u32 %v11906_v9, 16 }
  0x3e   :  { %1551 = vst.msk [vmem:[#allocation2 + $0x1a8] sm:$0xff] %vm415_vm1, %v11906_v9  ;;  %v11935_v27 = vsel %vm1026_vm2, %v9040_v21, %v9041_v63  ;;  %v589_v31 = vshll.u32 %v11922_v8, 16  ;;  %v11943_v18 = vpack.c.bf16 %v275_v30, %v274_v51  ;;  %v9043_v38 = vrot.slane %v57_v26, 1  ;;  %2244 = vmatpush1.bf16.msra.mxu0 %v11163_v62  ;;  %v11164_v51 = vld [vmem:[%s16093_s1 + $0x38] sm:$0xff]  }
  0x3f   :  { %16265 = vst [vmem:[#allocation18_spill] sm:$0xff] %v11935_v27  ;;  %853 = vrot.lane.b32.xlu1 %v580_v53, %s11458_s9  ;;  %v169_v35 = vmax.f32 %v11913_v15, 0.0  ;;  %v11946_v44 = vpack.c.bf16 %v273_v19, %v273_v19  ;;  %v598_v45 = vrot.slane %v596_v22, 1  ;;  %v170_v21 = vmax.f32 %v11928_v14, 0.0  ;;  %2245 = vmatprep.subr.bf16.mxu0 %v16098_v5 }
  0x40   :  { %v591_v56 = vrot.slane %v589_v31, 1  ;;  %429 = vst.msk [vmem:[#allocation2 + $0x208] sm:$0xff] %vm415_vm1, %v11943_v18  ;;  %1552 = vst.msk [vmem:[#allocation2 + $0x1d0] sm:$0xff] %vm415_vm1, %v11943_v18  ;;  %v11956_v53 = vsel %vm1026_vm2, %v9041_v63, %v9043_v38  ;;  %v168_v57 = vmax.f32 %v60_v34, 0.0  ;;  %v65_v63 = vld [vmem:[%s16092_s0 + $0x170] sm:$0xff]  ;;  %v608_v38 = vshll.u32 %v11943_v18, 16 }
  0x41   :  { %1213 = vrot.lane.b32.xlu0 %v11943_v18, %s11458_s9  ;;  %16266 = vst [vmem:[#allocation19_spill] sm:$0xff] %v11956_v53  ;;  %v277_v26 = vmul.f32 1.7139589, %v169_v35  ;;  %v599_v30 = vor.u32 %v598_v45, %v594_v4  ;;  %v601_v19 = vshll.u32 %v11946_v44, 16  ;;  %v278_v31 = vmul.f32 1.7139589, %v170_v21 }
  0x42   :  { %v592_v62 = vsel %vm448_vm0, %v587_v12, %v591_v56  ;;  %v276_v34 = vmul.f32 1.7139589, %v168_v57  ;;  %v606_v4 = vshrl.u32 %v11943_v18, 16  ;;  %v63_v35 = vld [vmem:[%s16092_s0 + $0x160] sm:$0x3]  ;;  %v9050_v22 = vrot.slane %v11913_v15, 1  ;;  %2246 = vmatpush1.bf16.msra.mxu0 %v11164_v51 }
  0x43   :  { %1383 = vst.msk [vmem:[#allocation2 + $0x1a0] sm:$0xff] %vm415_vm1, %v592_v62  ;;  %855 = vrot.lane.b32.xlu1 %v592_v62, %s11458_s9  ;;  %v603_v45 = vrot.slane %v601_v19, 1  ;;  %v11979_v21 = vpack.c.bf16 %v278_v31, %v277_v26  ;;  %v610_v12 = vrot.slane %v608_v38, 1  ;;  %v1027_v56 = vrot.slane %v11521_v23, 1  ;;  %2247 = vmatprep.subr.bf16.mxu0 %v16098_v5  ;;  %v67_v31 = vld [vmem:[%s16092_s0 + $0x180] sm:$0xff] }
  0x44   :  { %v11982_v54 = vpack.c.bf16 %v276_v34, %v276_v34  ;;  %v1028_v57 = vrot.slane %v11523_v24, 1  ;;  %v172_v15 = vmax.f32 %v64_v16, 0.0  ;;  %v173_v23 = vmax.f32 %v65_v63, 0.0 }
  0x45   :  { %v604_v52 = vsel %vm448_vm0, %v599_v30, %v603_v45  ;;  %1215 = vrot.lane.b32.xlu0 %v11979_v21, %s11458_s9  ;;  %430 = vst.msk [vmem:[#allocation2 + $0x230] sm:$0xff] %vm415_vm1, %v11979_v21  ;;  %1553 = vst.msk [vmem:[#allocation2 + $0x1f8] sm:$0xff] %vm415_vm1, %v11979_v21  ;;  %v171_v26 = vmax.f32 %v63_v35, 0.0  ;;  %v611_v24 = vor.u32 %v610_v12, %v606_v4  ;;  %v618_v19 = vshrl.u32 %v11979_v21, 16  ;;  %v11166_v12 = vld [vmem:[%s16093_s1 + $0x48] sm:$0xff]  }
  0x46   :  { %1384 = vst.msk [vmem:[#allocation2 + $0x1c8] sm:$0xff] %vm415_vm1, %v604_v52  ;;  %v613_v51 = vshll.u32 %v11982_v54, 16  ;;  %v1029_v30 = vsel %vm1026_vm2, %v1027_v56, %v1028_v57  ;;  %v280_v16 = vmul.f32 1.7139589, %v172_v15  ;;  %v281_v63 = vmul.f32 1.7139589, %v173_v23  ;;  %2248 = vmatpush1.bf16.msra.mxu0 %v11165_v49 }
  0x47   :  { %857 = vrot.lane.b32.xlu1 %v604_v52, %s11458_s9  ;;  %1155 = vst.msk [vmem:[#allocation2 + $0x8] sm:$0xff] %vm415_vm1, %v1029_v30  ;;  %v279_v62 = vmul.f32 1.7139589, %v171_v26  ;;  %v620_v4 = vshll.u32 %v11979_v21, 16  ;;  %v9051_v38 = vrot.slane %v11928_v14, 1  ;;  %v9053_v45 = vrot.slane %v63_v35, 1  ;;  %2249 = vmatprep.subr.bf16.mxu0 %v16098_v5 }
  0x48   :  { %v615_v34 = vrot.slane %v613_v51, 1  ;;  %v12011_v56 = vpack.c.bf16 %v281_v63, %v280_v16  ;;  %v1030_v52 = vrot.slane %v11518_v20, 1  ;;  %v1031_v15 = vrot.slane %v11547_v37, 1  ;;  %v68_v23 = vld [vmem:[%s16092_s0 + $0x188] sm:$0xff]  ;;  %v66_v20 = vld [vmem:[%s16092_s0 + $0x178] sm:$0x3] }
  0x49   :  { %v12013_v57 = vpack.c.bf16 %v279_v62, %v279_v62  ;;  %v622_v14 = vrot.slane %v620_v4, 1  ;;  %v12023_v35 = vsel %vm1026_vm2, %v9050_v22, %v9051_v38  ;;  %v12026_v26 = vsel %vm1026_vm2, %v9051_v38, %v9053_v45  ;;  %v11167_v37 = vld [vmem:[%s16093_s1 + $0x50] sm:$0xff]   ;;  %v76_v16 = vld [vmem:[%s16092_s0 + $0x1c8] sm:$0xff] }
  0x4a   :  { %v616_v49 = vsel %vm448_vm0, %v611_v24, %v615_v34  ;;  %16267 = vst [vmem:[#allocation20_spill] sm:$0xff] %v12023_v35  ;;  %16268 = vst [vmem:[#allocation21_spill] sm:$0xff] %v12026_v26  ;;  %1217 = vrot.lane.b32.xlu0 %v12011_v56, %s11458_s9  ;;  %v12046_v51 = vsel %vm1026_vm2, %v1030_v52, %v1031_v15  ;;  %v175_v30 = vmax.f32 %v67_v31, 0.0  ;;  %v77_v63 = vld [vmem:[%s16092_s0 + $0x1d0] sm:$0xff]  ;;  %v176_v34 = vmax.f32 %v68_v23, 0.0  ;;  %v74_v31 = vld [vmem:[%s16092_s0 + $0x1b8] sm:$0xff] }
  0x4b   :  { %1385 = vst.msk [vmem:[#allocation2 + $0x1f0] sm:$0xff] %vm415_vm1, %v616_v49  ;;  %859 = vrot.lane.b32.xlu1 %v616_v49, %s11458_s9  ;;  %431 = vst.msk [vmem:[#allocation2 + $0x258] sm:$0xff] %vm415_vm1, %v12011_v56  ;;  %v625_v22 = vshll.u32 %v12013_v57, 16  ;;  %v623_v62 = vor.u32 %v622_v14, %v618_v19  ;;  %v73_v4 = vld [vmem:[%s16092_s0 + $0x1b0] sm:$0xff]  ;;  %2250 = vmatpush1.bf16.msra.mxu0 %v11166_v12  ;;  %v174_v52 = vmax.f32 %v66_v20, 0.0  ;;  %v630_v23 = vshrl.u32 %v12011_v56, 16 }
  0x4c   :  { %1554 = vst.msk [vmem:[#allocation2 + $0x220] sm:$0xff] %vm415_vm1, %v12011_v56  ;;  %1156 = vst.msk [vmem:[#allocation2 + $0x30] sm:$0xff] %vm415_vm1, %v12046_v51  ;;  %v283_v45 = vmul.f32 1.7139589, %v175_v30  ;;  %v75_v19 = vld [vmem:[%s16092_s0 + $0x1c0] sm:$0x3]  ;;  %2251 = vmatprep.subr.bf16.mxu0 %v16098_v5 }
  0x4d   :  { %v627_v38 = vrot.slane %v625_v22, 1  ;;  %v284_v15 = vmul.f32 1.7139589, %v176_v34  ;;  %v632_v49 = vshll.u32 %v12011_v56, 16  ;;  %v184_v14 = vmax.f32 %v76_v16, 0.0  ;;  %v11168_v20 = vld [vmem:[%s16093_s1 + $0x58] sm:$0xff]  }
  0x4e   :  { %v282_v7 = vmul.f32 1.7139589, %v174_v52  ;;  %v185_v35 = vmax.f32 %v77_v63, 0.0  ;;  %v181_v12 = vmax.f32 %v73_v4, 0.0  ;;  %v182_v5 = vmax.f32 %v74_v31, 0.0  ;;  %v12079_v16 = vld [vmem:[%s16092_s0 + $0x1e0] sm:$0xff] }
  0x4f   :  { %v628_v24 = vsel %vm448_vm0, %v623_v62, %v627_v38  ;;  %v12074_v22 = vpack.c.bf16 %v284_v15, %v283_v45  ;;  %v634_v30 = vrot.slane %v632_v49, 1  ;;  %v292_v34 = vmul.f32 1.7139589, %v184_v14  ;;  %2252 = vmatpush1.bf16.msra.mxu0 %v11167_v37  ;;  %v78_v52 = vld [vmem:[%s16092_s0 + $0x1d8] sm:$0x3] }
  0x50   :  { %1386 = vst.msk [vmem:[#allocation2 + $0x218] sm:$0xff] %vm415_vm1, %v628_v24  ;;  %861 = vrot.lane.b32.xlu1 %v628_v24, %s11458_s9  ;;  %v12081_v63 = vpack.c.bf16 %v282_v7, %v282_v7  ;;  %v293_v62 = vmul.f32 1.7139589, %v185_v35  ;;  %v183_v4 = vmax.f32 %v75_v19, 0.0  ;;  %v289_v38 = vmul.f32 1.7139589, %v181_v12 }
  0x51   :  { %16269 = vst [vmem:[#allocation22_spill] sm:$0xff] %v12074_v22  ;;  %v12086_v24 = vld [vmem:[%s16092_s0 + $0x1e8] sm:$0xff]  ;;  %v16270_v45 = vmov 0   ;;  %1219 = vrot.lane.b32.xlu0 %v12074_v22, %s11458_s9  ;;  %1555 = vst.msk [vmem:[#allocation2 + $0x248] sm:$0xff] %vm415_vm1, %v12074_v22  ;;  %v635_v31 = vor.u32 %v634_v30, %v630_v23  ;;  %v290_v37 = vmul.f32 1.7139589, %v182_v5 }
  0x52   :  { %2253 = vmatprep.subr.bf16.mxu0 %v16270_v45  ;;  %v1033_v7 = vrot.slane %v11543_v36, 1  ;;  %v1034_v35 = vrot.slane %v11570_v59, 1  ;;  %v637_v19 = vshll.u32 %v12081_v63, 16  ;;  %v12099_v15 = vpack.c.bf16 %v293_v62, %v292_v34  ;;  %v11169_v59 = vld [vmem:[%s16093_s1 + $0x60] sm:$0xff]   ;;  %v81_v26 = vld [vmem:[%s16092_s0 + $0x1f0] sm:$0x3] }
  0x53   :  { %v291_v49 = vmul.f32 1.7139589, %v183_v4  ;;  %v187_v14 = vmax.f32 %v12079_v16, 0.0  ;;  %v12102_v12 = vpack.c.bf16 %v290_v37, %v289_v38  ;;  %v188_v36 = vmax.f32 %v12086_v24, 0.0  ;;  %2254 = vmatpush1.bf16.msra.mxu0 %v11168_v20  ;;  %v82_v20 = vld [vmem:[%s16092_s0 + $0x1f8] sm:$0xff] }
  0x54   :  { %v12105_v23 = vsel %vm1026_vm2, %v1033_v7, %v1034_v35  ;;  %v639_v5 = vrot.slane %v637_v19, 1  ;;  %433 = vst.msk [vmem:[#allocation2 + $0x2a8] sm:$0xff] %vm415_vm1, %v12099_v15  ;;  %v186_v62 = vmax.f32 %v78_v52, 0.0  ;;  %2255 = vmatprep.subr.bf16.mxu0 %v16270_v45  ;;  %v654_v7 = vshrl.u32 %v12099_v15, 16  ;;  %v83_v35 = vld [vmem:[%s16092_s0 + $0x200] sm:$0xff] }
  0x55   :  { %v12113_v30 = vpack.c.bf16 %v291_v49, %v291_v49  ;;  %1157 = vst.msk [vmem:[#allocation2 + $0x58] sm:$0xff] %vm415_vm1, %v12105_v23  ;;  %1655 = vst.msk [vmem:[#allocation2 + $0x20] sm:$0xff] %vm415_vm1, %v12105_v23  ;;  %v295_v34 = vmul.f32 1.7139589, %v187_v14  ;;  %1221 = vrot.lane.b32.xlu0 %v12099_v15, %s11458_s9  ;;  %v642_v4 = vshrl.u32 %v12102_v12, 16  ;;  %v644_v38 = vshll.u32 %v12102_v12, 16 }
  0x56   :  { %432 = vst.msk [vmem:[#allocation2 + $0x280] sm:$0xff] %vm415_vm1, %v12102_v12  ;;  %v296_v37 = vmul.f32 1.7139589, %v188_v36  ;;  %v640_v52 = vsel %vm448_vm0, %v635_v31, %v639_v5  ;;  %v294_v49 = vmul.f32 1.7139589, %v186_v62  ;;  %v656_v14 = vshll.u32 %v12099_v15, 16 }
  0x57   :  { %v649_v19 = vshll.u32 %v12113_v30, 16  ;;  %1387 = vst.msk [vmem:[#allocation2 + $0x240] sm:$0xff] %vm415_vm1, %v640_v52  ;;  %863 = vrot.lane.b32.xlu1 %v640_v52, %s11458_s9  ;;  %v646_v36 = vrot.slane %v644_v38, 1  ;;  %v9070_v53 = vrot.slane %v12079_v16, 1  ;;  %v1036_v31 = vrot.slane %v11566_v55, 1  ;;  %2256 = vmatpush1.bf16.msra.mxu0 %v11169_v59  ;;  %v11170_v5 = vld [vmem:[%s16093_s1 + $0x68] sm:$0xff]  }
  0x58   :  { %v12141_v27 = vpack.c.bf16 %v296_v37, %v295_v34  ;;  %v12148_v10 = vpack.c.bf16 %v294_v49, %v294_v49  ;;  %v658_v11 = vrot.slane %v656_v14, 1  ;;  %v1037_v48 = vrot.slane %v11621_v29, 1  ;;  %2257 = vmatprep.subr.bf16.mxu0 %v16270_v45  ;;  %v11171_v34 = vld [vmem:[%s16093_s1 + $0x70] sm:$0xff]  }
  0x59   :  { %v651_v62 = vrot.slane %v649_v19, 1  ;;  %v647_v38 = vor.u32 %v646_v36, %v642_v4  ;;  %v190_v55 = vmax.f32 %v82_v20, 0.0  ;;  %v191_v16 = vmax.f32 %v83_v35, 0.0  ;;  %v12177_v36 = vld [vmem:[%s16092_s0 + $0x210] sm:$0xff] }
  0x5a   :  { %1223 = vrot.lane.b32.xlu0 %v12141_v27, %s11458_s9  ;;  %434 = vst.msk [vmem:[#allocation2 + $0x2d0] sm:$0xff] %vm415_vm1, %v12141_v27  ;;  %1557 = vst.msk [vmem:[#allocation2 + $0x298] sm:$0xff] %vm415_vm1, %v12141_v27  ;;  %v189_v59 = vmax.f32 %v81_v26, 0.0  ;;  %v659_v29 = vor.u32 %v658_v11, %v654_v7  ;;  %v661_v37 = vshll.u32 %v12148_v10, 16  ;;  %v12163_v4 = vsel %vm1026_vm2, %v1036_v31, %v1037_v48  ;;  %v12182_v31 = vld [vmem:[%s16092_s0 + $0x218] sm:$0xff] }
  0x5b   :  { %v666_v52 = vshrl.u32 %v12141_v27, 16  ;;  %v652_v19 = vsel %vm448_vm0, %v647_v38, %v651_v62  ;;  %1158 = vst.msk [vmem:[#allocation2 + $0x80] sm:$0xff] %vm415_vm1, %v12163_v4  ;;  %1656 = vst.msk [vmem:[#allocation2 + $0x48] sm:$0xff] %vm415_vm1, %v12163_v4  ;;  %v298_v20 = vmul.f32 1.7139589, %v190_v55  ;;  %2258 = vmatpush1.bf16.msra.mxu0 %v11170_v5  ;;  %v668_v48 = vshll.u32 %v12141_v27, 16 }
  0x5c   :  { %v299_v35 = vmul.f32 1.7139589, %v191_v16  ;;  %v297_v49 = vmul.f32 1.7139589, %v189_v59  ;;  %865 = vrot.lane.b32.xlu1 %v652_v19, %s11458_s9  ;;  %v663_v11 = vrot.slane %v661_v37, 1  ;;  %v9071_v7 = vrot.slane %v12086_v24, 1  ;;  %2259 = vmatprep.subr.bf16.mxu0 %v16270_v45 }
  0x5d   :  { %v9073_v14 = vrot.slane %v81_v26, 1  ;;  %v1039_v38 = vrot.slane %v11606_v17, 1  ;;  %v1040_v26 = vrot.slane %v11641_v43, 1  ;;  %v84_v24 = vld [vmem:[%s16092_s0 + $0x208] sm:$0x3]  ;;  %v670_v16 = vrot.slane %v668_v48, 1 }
  0x5e   :  { %v12185_v5 = vpack.c.bf16 %v299_v35, %v298_v20  ;;  %v12187_v62 = vpack.c.bf16 %v297_v49, %v297_v49  ;;  %v664_v55 = vsel %vm448_vm0, %v659_v29, %v663_v11  ;;  %v12196_v59 = vsel %vm1026_vm2, %v9070_v53, %v9071_v7  ;;  %v11172_v19 = vld [vmem:[%s16093_s1 + $0x78] sm:$0xff]   ;;  %v87_v11 = vld [vmem:[%s16092_s0 + $0x220] sm:$0x3] }
  0x5f   :  { %16271 = vst [vmem:[#allocation23_spill] sm:$0xff] %v12196_v59  ;;  %v12199_v37 = vsel %vm1026_vm2, %v9071_v7, %v9073_v14  ;;  %1389 = vst.msk [vmem:[#allocation2 + $0x290] sm:$0xff] %vm415_vm1, %v664_v55  ;;  %v12212_v53 = vsel %vm1026_vm2, %v1039_v38, %v1040_v26  ;;  %v193_v29 = vmax.f32 %v12177_v36, 0.0  ;;  %2260 = vmatpush1.bf16.msra.mxu0 %v11171_v34  ;;  %v194_v35 = vmax.f32 %v12182_v31, 0.0  ;;  %v88_v34 = vld [vmem:[%s16092_s0 + $0x228] sm:$0xff]  ;;  %v89_v38 = vld [vmem:[%s16092_s0 + $0x230] sm:$0xff] }
  0x60   :  { %16272 = vst [vmem:[#allocation24_spill] sm:$0xff] %v12199_v37  ;;  %1225 = vrot.lane.b32.xlu0 %v12185_v5, %s11458_s9  ;;  %435 = vst.msk [vmem:[#allocation2 + $0x2f8] sm:$0xff] %vm415_vm1, %v12185_v5  ;;  %v673_v17 = vshll.u32 %v12187_v62, 16  ;;  %867 = vrot.lane.b32.xlu1 %v664_v55, %s11458_s9  ;;  %v671_v20 = vor.u32 %v670_v16, %v666_v52  ;;  %v192_v49 = vmax.f32 %v84_v24, 0.0  ;;  %v678_v7 = vshrl.u32 %v12185_v5, 16 }
  0x61   :  { %1558 = vst.msk [vmem:[#allocation2 + $0x2c0] sm:$0xff] %vm415_vm1, %v12185_v5  ;;  %1159 = vst.msk [vmem:[#allocation2 + $0xa8] sm:$0xff] %vm415_vm1, %v12212_v53  ;;  %2261 = vmatprep.subr.bf16.mxu0 %v16270_v45  ;;  %v301_v48 = vmul.f32 1.7139589, %v193_v29  ;;  %v680_v14 = vshll.u32 %v12185_v5, 16  ;;  %v9080_v24 = vrot.slane %v12177_v36, 1 }
  0x62   :  { %1657 = vst.msk [vmem:[#allocation2 + $0x70] sm:$0xff] %vm415_vm1, %v12212_v53  ;;  %v675_v52 = vrot.slane %v673_v17, 1  ;;  %v302_v26 = vmul.f32 1.7139589, %v194_v35  ;;  %v300_v55 = vmul.f32 1.7139589, %v192_v49 }
  0x63   :  { %v1042_v16 = vrot.slane %v11639_v42, 1  ;;  %v682_v59 = vrot.slane %v680_v14, 1  ;;  %v1043_v17 = vrot.slane %v11686_v13, 1  ;;  %v196_v29 = vmax.f32 %v88_v34, 0.0  ;;  %2262 = vmatpush1.bf16.msra.mxu0 %v11172_v19  ;;  %v12249_v42 = vld [vmem:[%s16092_s0 + $0x240] sm:$0xff]  ;;  %v12259_v49 = vld [vmem:[%s16092_s0 + $0x248] sm:$0xff] }
  0x64   :  { %v676_v43 = vsel %vm448_vm0, %v671_v20, %v675_v52  ;;  %v12242_v37 = vpack.c.bf16 %v302_v26, %v301_v48  ;;  %v12244_v50 = vpack.c.bf16 %v300_v55, %v300_v55  ;;  %v197_v35 = vmax.f32 %v89_v38, 0.0  ;;  %2520 = vmatprep.subr.bf16.mxu0 %v16270_v45 }
  0x65   :  { %1390 = vst.msk [vmem:[#allocation2 + $0x2b8] sm:$0xff] %vm415_vm1, %v676_v43  ;;  %869 = vrot.lane.b32.xlu1 %v676_v43, %s11458_s9  ;;  %v195_v36 = vmax.f32 %v87_v11, 0.0  ;;  %v683_v13 = vor.u32 %v682_v59, %v678_v7  ;;  %v12253_v19 = vsel %vm1026_vm2, %v1042_v16, %v1043_v17  ;;  %v304_v20 = vmul.f32 1.7139589, %v196_v29  ;;  %v90_v29 = vld [vmem:[%s16092_s0 + $0x238] sm:$0x3] }
  0x66   :  { %v9081_v43 = vrot.slane %v12182_v31, 1  ;;  %1227 = vrot.lane.b32.xlu0 %v12242_v37, %s11458_s9  ;;  %436 = vst.msk [vmem:[#allocation2 + $0x320] sm:$0xff] %vm415_vm1, %v12242_v37  ;;  %1559 = vst.msk [vmem:[#allocation2 + $0x2e8] sm:$0xff] %vm415_vm1, %v12242_v37  ;;  %v685_v59 = vshll.u32 %v12244_v50, 16  ;;  %v305_v31 = vmul.f32 1.7139589, %v197_v35 }
  0x67   :  { %1160 = vst.msk [vmem:[#allocation2 + $0xd0] sm:$0xff] %vm415_vm1, %v12253_v19  ;;  %1658 = vst.msk [vmem:[#allocation2 + $0x98] sm:$0xff] %vm415_vm1, %v12253_v19  ;;  %v303_v34 = vmul.f32 1.7139589, %v195_v36  ;;  %v690_v52 = vshrl.u32 %v12242_v37, 16  ;;  %v692_v48 = vshll.u32 %v12242_v37, 16 }
  0x68   :  { %v12275_v7 = vsel %vm1026_vm2, %v9080_v24, %v9081_v43  ;;  %v9083_v14 = vrot.slane %v87_v11, 1  ;;  %v1045_v38 = vrot.slane %v11672_v3, 1  ;;  %v687_v26 = vrot.slane %v685_v59, 1 }
  0x69   :  { %16273 = vst [vmem:[#allocation25_spill] sm:$0xff] %v12275_v7  ;;  %v12278_v55 = vpack.c.bf16 %v305_v31, %v304_v20  ;;  %v12280_v16 = vpack.c.bf16 %v303_v34, %v303_v34  ;;  %v1046_v17 = vrot.slane %v11708_v32, 1  ;;  %v694_v35 = vrot.slane %v692_v48, 1  ;;  %v94_v34 = vld [vmem:[%s16092_s0 + $0x258] sm:$0xff]  ;;  %v95_v48 = vld [vmem:[%s16092_s0 + $0x260] sm:$0xff] }
  0x6a   :  { %v12287_v36 = vsel %vm1026_vm2, %v9081_v43, %v9083_v14  ;;  %v199_v24 = vmax.f32 %v12249_v42, 0.0  ;;  %v200_v11 = vmax.f32 %v12259_v49, 0.0  ;;  %v688_v3 = vsel %vm448_vm0, %v683_v13, %v687_v26 }
  0x6b   :  { %16274 = vst [vmem:[#allocation26_spill] sm:$0xff] %v12287_v36  ;;  %1229 = vrot.lane.b32.xlu0 %v12278_v55, %s11458_s9  ;;  %437 = vst.msk [vmem:[#allocation2 + $0x348] sm:$0xff] %vm415_vm1, %v12278_v55  ;;  %v697_v32 = vshll.u32 %v12280_v16, 16  ;;  %v12302_v43 = vsel %vm1026_vm2, %v1045_v38, %v1046_v17  ;;  %871 = vrot.lane.b32.xlu1 %v688_v3, %s11458_s9  ;;  %v695_v13 = vor.u32 %v694_v35, %v690_v52  ;;  %v93_v17 = vld [vmem:[%s16092_s0 + $0x250] sm:$0x3] }
  0x6c   :  { %1560 = vst.msk [vmem:[#allocation2 + $0x310] sm:$0xff] %vm415_vm1, %v12278_v55  ;;  %1391 = vst.msk [vmem:[#allocation2 + $0x2e0] sm:$0xff] %vm415_vm1, %v688_v3  ;;  %v307_v59 = vmul.f32 1.7139589, %v199_v24  ;;  %v308_v31 = vmul.f32 1.7139589, %v200_v11 }
  0x6d   :  { %1161 = vst.msk [vmem:[#allocation2 + $0xf8] sm:$0xff] %vm415_vm1, %v12302_v43  ;;  %1659 = vst.msk [vmem:[#allocation2 + $0xc0] sm:$0xff] %vm415_vm1, %v12302_v43  ;;  %v699_v14 = vrot.slane %v697_v32, 1  ;;  %v198_v38 = vmax.f32 %v90_v29, 0.0  ;;  %v702_v52 = vshrl.u32 %v12278_v55, 16  ;;  %v704_v26 = vshll.u32 %v12278_v55, 16 }
  0x6e   :  { %v12321_v35 = vpack.c.bf16 %v308_v31, %v307_v59  ;;  %v9090_v24 = vrot.slane %v12249_v42, 1  ;;  %v1048_v11 = vrot.slane %v11705_v28, 1  ;;  %v1049_v3 = vrot.slane %v11746_v0, 1 }
  0x6f   :  { %v700_v20 = vsel %vm448_vm0, %v695_v13, %v699_v14  ;;  %v306_v32 = vmul.f32 1.7139589, %v198_v38  ;;  %v706_v29 = vrot.slane %v704_v26, 1  ;;  %v202_v7 = vmax.f32 %v94_v34, 0.0  ;;  %v12349_v14 = vld [vmem:[%s16092_s0 + $0x270] sm:$0xff] }
  0x70   :  { %1392 = vst.msk [vmem:[#allocation2 + $0x308] sm:$0xff] %vm415_vm1, %v700_v20  ;;  %873 = vrot.lane.b32.xlu1 %v700_v20, %s11458_s9  ;;  %1231 = vrot.lane.b32.xlu0 %v12321_v35, %s11458_s9  ;;  %438 = vst.msk [vmem:[#allocation2 + $0x370] sm:$0xff] %vm415_vm1, %v12321_v35  ;;  %v12336_v28 = vsel %vm1026_vm2, %v1048_v11, %v1049_v3  ;;  %v203_v0 = vmax.f32 %v95_v48, 0.0  ;;  %v201_v42 = vmax.f32 %v93_v17, 0.0  ;;  %v714_v13 = vshrl.u32 %v12321_v35, 16  ;;  %v12354_v48 = vld [vmem:[%s16092_s0 + $0x278] sm:$0xff] }
  0x71   :  { %1561 = vst.msk [vmem:[#allocation2 + $0x338] sm:$0xff] %vm415_vm1, %v12321_v35  ;;  %v12339_v59 = vpack.c.bf16 %v306_v32, %v306_v32  ;;  %v707_v31 = vor.u32 %v706_v29, %v702_v52  ;;  %1162 = vst.msk [vmem:[#allocation2 + $0x120] sm:$0xff] %vm415_vm1, %v12336_v28  ;;  %v310_v20 = vmul.f32 1.7139589, %v202_v7  ;;  %v716_v34 = vshll.u32 %v12321_v35, 16 }
  0x72   :  { %1660 = vst.msk [vmem:[#allocation2 + $0xe8] sm:$0xff] %vm415_vm1, %v12336_v28  ;;  %v311_v38 = vmul.f32 1.7139589, %v203_v0  ;;  %v309_v52 = vmul.f32 1.7139589, %v201_v42  ;;  %v9091_v26 = vrot.slane %v12259_v49, 1 }
  0x73   :  { %v9093_v11 = vrot.slane %v93_v17, 1  ;;  %v96_v7 = vld [vmem:[%s16092_s0 + $0x268] sm:$0x3]  ;;  %v709_v3 = vshll.u32 %v12339_v59, 16  ;;  %v718_v32 = vrot.slane %v716_v34, 1  ;;  %v1051_v29 = vrot.slane %v11740_v61, 1 }
  0x74   :  { %v1052_v36 = vrot.slane %v11801_v47, 1  ;;  %v12363_v25 = vpack.c.bf16 %v311_v38, %v310_v20  ;;  %v12365_v41 = vpack.c.bf16 %v309_v52, %v309_v52  ;;  %v12368_v0 = vsel %vm1026_vm2, %v9090_v24, %v9091_v26  ;;  %v100_v20 = vld [vmem:[%s16092_s0 + $0x288] sm:$0xff] }
  0x75   :  { %16275 = vst [vmem:[#allocation27_spill] sm:$0xff] %v12368_v0  ;;  %v12371_v49 = vsel %vm1026_vm2, %v9091_v26, %v9093_v11  ;;  %v711_v17 = vrot.slane %v709_v3, 1  ;;  %v719_v61 = vor.u32 %v718_v32, %v714_v13  ;;  %v206_v24 = vmax.f32 %v12354_v48, 0.0  ;;  %v99_v13 = vld [vmem:[%s16092_s0 + $0x280] sm:$0x3]  ;;  %v101_v3 = vld [vmem:[%s16092_s0 + $0x290] sm:$0xff] }
  0x76   :  { %16276 = vst [vmem:[#allocation28_spill] sm:$0xff] %v12371_v49  ;;  %v12376_v34 = vsel %vm1026_vm2, %v1051_v29, %v1052_v36  ;;  %1233 = vrot.lane.b32.xlu0 %v12363_v25, %s11458_s9  ;;  %439 = vst.msk [vmem:[#allocation2 + $0x398] sm:$0xff] %vm415_vm1, %v12363_v25  ;;  %v721_v47 = vshll.u32 %v12365_v41, 16  ;;  %v205_v36 = vmax.f32 %v12349_v14, 0.0  ;;  %v204_v52 = vmax.f32 %v96_v7, 0.0 }
  0x77   :  { %1562 = vst.msk [vmem:[#allocation2 + $0x360] sm:$0xff] %vm415_vm1, %v12363_v25  ;;  %1163 = vst.msk [vmem:[#allocation2 + $0x148] sm:$0xff] %vm415_vm1, %v12376_v34  ;;  %v712_v38 = vsel %vm448_vm0, %v707_v31, %v711_v17  ;;  %v726_v26 = vshrl.u32 %v12363_v25, 16  ;;  %v728_v11 = vshll.u32 %v12363_v25, 16  ;;  %v314_v42 = vmul.f32 1.7139589, %v206_v24 }
  0x78   :  { %1661 = vst.msk [vmem:[#allocation2 + $0x110] sm:$0xff] %vm415_vm1, %v12376_v34  ;;  %1393 = vst.msk [vmem:[#allocation2 + $0x330] sm:$0xff] %vm415_vm1, %v712_v38  ;;  %875 = vrot.lane.b32.xlu1 %v712_v38, %s11458_s9  ;;  %v723_v32 = vrot.slane %v721_v47, 1  ;;  %v313_v29 = vmul.f32 1.7139589, %v205_v36  ;;  %v9100_v0 = vrot.slane %v12349_v14, 1 }
  0x79   :  { %v312_v49 = vmul.f32 1.7139589, %v204_v52  ;;  %v730_v31 = vrot.slane %v728_v11, 1  ;;  %v1054_v7 = vrot.slane %v11794_v40, 1  ;;  %v1055_v17 = vrot.slane %v11853_v33, 1  ;;  %v12436_v38 = vld [vmem:[%s16092_s0 + $0x2a0] sm:$0xff] }
  0x7a   :  { %v724_v39 = vsel %vm448_vm0, %v719_v61, %v723_v32  ;;  %v12409_v46 = vpack.c.bf16 %v314_v42, %v313_v29  ;;  %v208_v1 = vmax.f32 %v100_v20, 0.0  ;;  %v209_v2 = vmax.f32 %v101_v3, 0.0  ;;  %v1190_v22 = vpop.permute.xlu0 %1189  ;;  %v12445_v3 = vld [vmem:[%s16092_s0 + $0x2a8] sm:$0xff] }
  0x7b   :  { %1394 = vst.msk [vmem:[#allocation2 + $0x358] sm:$0xff] %vm415_vm1, %v724_v39  ;;  %v12412_v47 = vpack.c.bf16 %v312_v49, %v312_v49  ;;  %v731_v36 = vor.u32 %v730_v31, %v726_v26  ;;  %v12415_v14 = vsel %vm1026_vm2, %v1054_v7, %v1055_v17  ;;  %v207_v24 = vmax.f32 %v99_v13, 0.0 }
  0x7c   :  { %1285 = vst.msk [vmem:[#allocation2 + $0x8] sm:$0xff] %vm929_vm3, %v1190_v22  ;;  %877 = vrot.lane.b32.xlu1 %v724_v39, %s11458_s9  ;;  %1235 = vrot.lane.b32.xlu0 %v12409_v46, %s11458_s9  ;;  %v316_v40 = vmul.f32 1.7139589, %v208_v1  ;;  %v317_v33 = vmul.f32 1.7139589, %v209_v2  ;;  %v738_v22 = vshrl.u32 %v12409_v46, 16 }
  0x7d   :  { %440 = vst.msk [vmem:[#allocation2 + $0x3c0] sm:$0xff] %vm415_vm1, %v12409_v46  ;;  %1563 = vst.msk [vmem:[#allocation2 + $0x388] sm:$0xff] %vm415_vm1, %v12409_v46  ;;  %v740_v39 = vshll.u32 %v12409_v46, 16  ;;  %v733_v49 = vshll.u32 %v12412_v47, 16  ;;  %v315_v42 = vmul.f32 1.7139589, %v207_v24  ;;  %v1192_v52 = vpop.permute.xlu1 %1191 }
  0x7e   :  { %1164 = vst.msk [vmem:[#allocation2 + $0x170] sm:$0xff] %vm415_vm1, %v12415_v14  ;;  %1662 = vst.msk [vmem:[#allocation2 + $0x138] sm:$0xff] %vm415_vm1, %v12415_v14  ;;  %v9101_v61 = vrot.slane %v12354_v48, 1  ;;  %v9103_v20 = vrot.slane %v99_v13, 1  ;;  %v12438_v26 = vpack.c.bf16 %v317_v33, %v316_v40  ;;  %v1057_v2 = vrot.slane %v11829_v6, 1  ;;  %v106_v33 = vld [vmem:[%s16092_s0 + $0x2b8] sm:$0xff] }
  0x7f   :  { %v742_v1 = vrot.slane %v740_v39, 1  ;;  %v1058_v11 = vrot.slane %v11867_v60, 1  ;;  %v102_v48 = vld [vmem:[%s16092_s0 + $0x298] sm:$0x3]  ;;  %1286 = vst.msk [vmem:[#allocation2 + $0x30] sm:$0xff] %vm929_vm3, %v1192_v52  ;;  %v735_v13 = vrot.slane %v733_v49, 1  ;;  %v12451_v32 = vpack.c.bf16 %v315_v42, %v315_v42 }
  0x80   :  { %16277 = vst [vmem:[#allocation29_spill] sm:$0xff] %v12438_v26  ;;  %v12454_v29 = vsel %vm1026_vm2, %v9100_v0, %v9101_v61  ;;  %v12457_v6 = vsel %vm1026_vm2, %v9101_v61, %v9103_v20  ;;  %1237 = vrot.lane.b32.xlu0 %v12438_v26, %s11458_s9  ;;  %441 = vst.msk [vmem:[#allocation2 + $0x3e8] sm:$0xff] %vm415_vm1, %v12438_v26  ;;  %v211_v0 = vmax.f32 %v12436_v38, 0.0  ;;  %v212_v40 = vmax.f32 %v12445_v3, 0.0  ;;  %v12484_v39 = vld [vmem:[%s16092_s0 + $0x2b0] sm:$0x3] }
  0x81   :  { %16278 = vst [vmem:[#allocation30_spill] sm:$0xff] %v12454_v29  ;;  %16279 = vst [vmem:[#allocation31_spill] sm:$0xff] %v12457_v6  ;;  %v12468_v31 = vsel %vm1026_vm2, %v1057_v2, %v1058_v11  ;;  %v736_v7 = vsel %vm448_vm0, %v731_v36, %v735_v13  ;;  %v743_v17 = vor.u32 %v742_v1, %v738_v22  ;;  %v745_v24 = vshll.u32 %v12451_v32, 16  ;;  %v107_v61 = vld [vmem:[%s16092_s0 + $0x2c0] sm:$0xff] }
  0x82   :  { %1564 = vst.msk [vmem:[#allocation2 + $0x3b0] sm:$0xff] %vm415_vm1, %v12438_v26  ;;  %1165 = vst.msk [vmem:[#allocation2 + $0x198] sm:$0xff] %vm415_vm1, %v12468_v31  ;;  %879 = vrot.lane.b32.xlu1 %v736_v7, %s11458_s9  ;;  %v319_v36 = vmul.f32 1.7139589, %v211_v0  ;;  %v210_v22 = vmax.f32 %v102_v48, 0.0  ;;  %v750_v49 = vshrl.u32 %v12438_v26, 16  ;;  %v834_v20 = vpop.permute.xlu0 %833 }
  0x83   :  { %1663 = vst.msk [vmem:[#allocation2 + $0x160] sm:$0xff] %vm415_vm1, %v12468_v31  ;;  %1395 = vst.msk [vmem:[#allocation2 + $0x380] sm:$0xff] %vm415_vm1, %v736_v7  ;;  %v752_v42 = vshll.u32 %v12438_v26, 16  ;;  %v1688_v52 = vld [vmem:[#allocation2 + $0x8] sm:$0xff]  ;;  %v747_v1 = vrot.slane %v745_v24, 1  ;;  %v9110_v11 = vrot.slane %v12436_v38, 1  ;;  %v836_v48 = vpop.permute.xlu1 %835 }
  0x84   :  { %v320_v2 = vmul.f32 1.7139589, %v212_v40  ;;  %v1060_v13 = vrot.slane %v11865_v58, 1  ;;  %930 = vst.msk [vmem:[#allocation2] sm:$0xff] %vm929_vm3, %v834_v20  ;;  %2263 = vmatprep.mubr.bf16.mxu0 %v1688_v52  ;;  %v318_v0 = vmul.f32 1.7139589, %v210_v22 }
  0x85   :  { %v754_v7 = vrot.slane %v752_v42, 1  ;;  %v1061_v60 = vrot.slane %v11922_v8, 1  ;;  %v214_v29 = vmax.f32 %v106_v33, 0.0  ;;  %931 = vst.msk [vmem:[#allocation2 + $0x28] sm:$0xff] %vm929_vm3, %v836_v48  ;;  %v748_v6 = vsel %vm448_vm0, %v743_v17, %v747_v1  ;;  %v12512_v17 = vld [vmem:[%s16092_s0 + $0x2d0] sm:$0xff]  ;;  %v11173_v33 = vld [vmem:[%s16093_s1 + $0x80] sm:$0xff]  }
  0x86   :  { %v12499_v26 = vpack.c.bf16 %v320_v2, %v319_v36  ;;  %v215_v24 = vmax.f32 %v107_v61, 0.0  ;;  %v213_v38 = vmax.f32 %v12484_v39, 0.0  ;;  %1396 = vst.msk [vmem:[#allocation2 + $0x3a8] sm:$0xff] %vm415_vm1, %v748_v6  ;;  %881 = vrot.lane.b32.xlu1 %v748_v6, %s11458_s9  ;;  %v12504_v58 = vpack.c.bf16 %v318_v0, %v318_v0  ;;  %v1194_v36 = vpop.permute.xlu0 %1193  ;;  %v12532_v42 = vld [vmem:[%s16092_s0 + $0x2d8] sm:$0xff]  ;;  %v1693_v61 = vld [vmem:[#allocation2 + $0x30] sm:$0xff] }
  0x87   :  { %v755_v40 = vor.u32 %v754_v7, %v750_v49  ;;  %v12507_v22 = vsel %vm1026_vm2, %v1060_v13, %v1061_v60  ;;  %v322_v8 = vmul.f32 1.7139589, %v214_v29  ;;  %1287 = vst.msk [vmem:[#allocation2 + $0x58] sm:$0xff] %vm929_vm3, %v1194_v36  ;;  %v9111_v52 = vrot.slane %v12445_v3, 1  ;;  %v108_v13 = vld [vmem:[%s16092_s0 + $0x2c8] sm:$0x3] }
  0x88   :  { %1239 = vrot.lane.b32.xlu0 %v12499_v26, %s11458_s9  ;;  %442 = vst.msk [vmem:[#allocation2 + $0x410] sm:$0xff] %vm415_vm1, %v12499_v26  ;;  %1565 = vst.msk [vmem:[#allocation2 + $0x3d8] sm:$0xff] %vm415_vm1, %v12499_v26  ;;  %v323_v29 = vmul.f32 1.7139589, %v215_v24  ;;  %v321_v6 = vmul.f32 1.7139589, %v213_v38  ;;  %v838_v48 = vpop.permute.xlu1 %837 }
  0x89   :  { %1166 = vst.msk [vmem:[#allocation2 + $0x1c0] sm:$0xff] %vm415_vm1, %v12507_v22  ;;  %1664 = vst.msk [vmem:[#allocation2 + $0x188] sm:$0xff] %vm415_vm1, %v12507_v22  ;;  %v762_v60 = vshrl.u32 %v12499_v26, 16  ;;  %v764_v49 = vshll.u32 %v12499_v26, 16  ;;  %v757_v20 = vshll.u32 %v12504_v58, 16  ;;  %v9113_v1 = vrot.slane %v12484_v39, 1 }
  0x8a   :  { %v1063_v2 = vrot.slane %v11906_v9, 1  ;;  %v12542_v0 = vpack.c.bf16 %v323_v29, %v322_v8  ;;  %v12544_v7 = vpack.c.bf16 %v321_v6, %v321_v6  ;;  %v1064_v38 = vrot.slane %v11946_v44, 1  ;;  %932 = vst.msk [vmem:[#allocation2 + $0x50] sm:$0xff] %vm929_vm3, %v838_v48  ;;  %1609 = vst.msk [vmem:[#allocation2 + $0x18] sm:$0xff] %vm929_vm3, %v838_v48  ;;  %v1196_v29 = vpop.permute.xlu0 %1195  ;;  %v112_v48 = vld [vmem:[%s16092_s0 + $0x2e8] sm:$0xff] }
  0x8b   :  { %v766_v24 = vrot.slane %v764_v49, 1  ;;  %v759_v3 = vrot.slane %v757_v20, 1  ;;  %v12550_v39 = vsel %vm1026_vm2, %v9110_v11, %v9111_v52  ;;  %v12553_v9 = vsel %vm1026_vm2, %v9111_v52, %v9113_v1  ;;  %v1687_v8 = vld [vmem:[#allocation2] sm:$0xff]  ;;  %1288 = vst.msk [vmem:[#allocation2 + $0x80] sm:$0xff] %vm929_vm3, %v1196_v29 }
  0x8c   :  { %16280 = vst [vmem:[#allocation32_spill] sm:$0xff] %v12542_v0  ;;  %16281 = vst [vmem:[#allocation33_spill] sm:$0xff] %v12544_v7  ;;  %v217_v36 = vmax.f32 %v12512_v17, 0.0  ;;  %1241 = vrot.lane.b32.xlu0 %v12542_v0, %s11458_s9  ;;  %v769_v11 = vshll.u32 %v12544_v7, 16  ;;  %v12566_v49 = vsel %vm1026_vm2, %v1063_v2, %v1064_v38  ;;  %v12571_v20 = vld [vmem:[%s16092_s0 + $0x2e0] sm:$0x3]  ;;  %2264 = vmatmul.mubr.bf16.vlgmr.msra.gmra.mrb[0].mxu0 %v1687_v8 }
  0x8d   :  { %16282 = vst [vmem:[#allocation34_spill] sm:$0xff] %v12550_v39  ;;  %16283 = vst [vmem:[#allocation35_spill] sm:$0xff] %v12553_v9  ;;  %v767_v44 = vor.u32 %v766_v24, %v762_v60  ;;  %v11174_v60 = vld [vmem:[%s16093_s1 + $0x88] sm:$0xff]   ;;  %v760_v52 = vsel %vm448_vm0, %v755_v40, %v759_v3  ;;  %v218_v1 = vmax.f32 %v12532_v42, 0.0  ;;  %v113_v24 = vld [vmem:[%s16092_s0 + $0x2f0] sm:$0xff]  ;;  %2521 = vmatpush1.bf16.msra.mxu0 %v11173_v33  ;;  %2271 = vmatprep.mubr.bf16.mxu0 %v1693_v61 }
  0x8e   :  { %443 = vst.msk [vmem:[#allocation2 + $0x438] sm:$0xff] %vm415_vm1, %v12542_v0  ;;  %1566 = vst.msk [vmem:[#allocation2 + $0x400] sm:$0xff] %vm415_vm1, %v12542_v0  ;;  %v325_v2 = vmul.f32 1.7139589, %v217_v36  ;;  %v771_v40 = vrot.slane %v769_v11, 1  ;;  %v216_v38 = vmax.f32 %v108_v13, 0.0  ;;  %2522 = vmatprep.subr.bf16.mxu0 %v16270_v45  ;;  %883 = vrot.lane.b32.xlu1 %v760_v52, %s11458_s9  ;;  %v1198_v61 = vpop.permute.xlu0 %1197  ;;  %v840_v7 = vpop.permute.xlu1 %839 }
  0x8f   :  { %1167 = vst.msk [vmem:[#allocation2 + $0x1e8] sm:$0xff] %vm415_vm1, %v12566_v49  ;;  %1665 = vst.msk [vmem:[#allocation2 + $0x1b0] sm:$0xff] %vm415_vm1, %v12566_v49  ;;  %v774_v3 = vshrl.u32 %v12542_v0, 16  ;;  %v776_v8 = vshll.u32 %v12542_v0, 16  ;;  %v326_v36 = vmul.f32 1.7139589, %v218_v1 }
  0x90   :  { %1397 = vst.msk [vmem:[#allocation2 + $0x3d0] sm:$0xff] %vm415_vm1, %v760_v52  ;;  %v9120_v29 = vrot.slane %v12512_v17, 1  ;;  %v1066_v6 = vrot.slane %v11943_v18, 1  ;;  %v1067_v33 = vrot.slane %v11982_v54, 1  ;;  %v11175_v13 = vld [vmem:[%s16093_s1 + $0x90] sm:$0xff]   ;;  %v772_v11 = vsel %vm448_vm0, %v767_v44, %v771_v40  ;;  %v12612_v44 = vld [vmem:[%s16092_s0 + $0x300] sm:$0xff] }
  0x91   :  { %v324_v39 = vmul.f32 1.7139589, %v216_v38  ;;  %v778_v9 = vrot.slane %v776_v8, 1  ;;  %v220_v0 = vmax.f32 %v112_v48, 0.0  ;;  %1289 = vst.msk [vmem:[#allocation2 + $0xa8] sm:$0xff] %vm929_vm3, %v1198_v61  ;;  %v12603_v17 = vpack.c.bf16 %v326_v36, %v325_v2  ;;  %v1692_v1 = vld [vmem:[#allocation2 + $0x28] sm:$0xff]  ;;  %2523 = vmatpush1.bf16.msra.mxu0 %v11174_v60 }
  0x92   :  { %1398 = vst.msk [vmem:[#allocation2 + $0x3f8] sm:$0xff] %vm415_vm1, %v772_v11  ;;  %v12606_v18 = vsel %vm1026_vm2, %v1066_v6, %v1067_v33  ;;  %v221_v54 = vmax.f32 %v113_v24, 0.0  ;;  %v219_v52 = vmax.f32 %v12571_v20, 0.0  ;;  %v1698_v48 = vld [vmem:[#allocation2 + $0x58] sm:$0xff]  ;;  %v9121_v24 = vrot.slane %v12532_v42, 1  ;;  %v12626_v38 = vld [vmem:[%s16092_s0 + $0x308] sm:$0xff]  ;;  %2524 = vmatprep.subr.bf16.mxu0 %v16270_v45  ;;  %885 = vrot.lane.b32.xlu1 %v772_v11, %s11458_s9  ;;  %v842_v61 = vpop.permute.xlu1 %841 }
  0x93   :  { %933 = vst.msk [vmem:[#allocation2 + $0x78] sm:$0xff] %vm929_vm3, %v840_v7  ;;  %1610 = vst.msk [vmem:[#allocation2 + $0x40] sm:$0xff] %vm929_vm3, %v840_v7  ;;  %v12616_v2 = vpack.c.bf16 %v324_v39, %v324_v39  ;;  %v779_v40 = vor.u32 %v778_v9, %v774_v3  ;;  %v328_v6 = vmul.f32 1.7139589, %v220_v0  ;;  %v786_v0 = vshrl.u32 %v12603_v17, 16  ;;  %v1200_v9 = vpop.permute.xlu0 %1199  ;;  %1243 = vrot.lane.b32.xlu0 %v12603_v17, %s11458_s9 }
  0x94   :  { %1168 = vst.msk [vmem:[#allocation2 + $0x210] sm:$0xff] %vm415_vm1, %v12606_v18  ;;  %1666 = vst.msk [vmem:[#allocation2 + $0x1d8] sm:$0xff] %vm415_vm1, %v12606_v18  ;;  %v329_v7 = vmul.f32 1.7139589, %v221_v54  ;;  %v327_v39 = vmul.f32 1.7139589, %v219_v52  ;;  %v12640_v3 = vsel %vm1026_vm2, %v9120_v29, %v9121_v24  ;;  %2272 = vmatmul.mubr.bf16.gmra.mrb[4].mxu0 %v1692_v1 }
  0x95   :  { %444 = vst.msk [vmem:[#allocation2 + $0x460] sm:$0xff] %vm415_vm1, %v12603_v17  ;;  %1567 = vst.msk [vmem:[#allocation2 + $0x428] sm:$0xff] %vm415_vm1, %v12603_v17  ;;  %v788_v42 = vshll.u32 %v12603_v17, 16  ;;  %v781_v60 = vshll.u32 %v12616_v2, 16  ;;  %v9123_v8 = vrot.slane %v12571_v20, 1  ;;  %v1069_v36 = vrot.slane %v11979_v21, 1  ;;  %2279 = vmatprep.mubr.bf16.mxu0 %v1698_v48  ;;  %2525 = vmatpush1.bf16.msra.mxu0 %v11175_v13 }
  0x96   :  { %16284 = vst [vmem:[#allocation36_spill] sm:$0xff] %v12640_v3  ;;  %v114_v33 = vld [vmem:[%s16092_s0 + $0x2f8] sm:$0x3]  ;;  %1290 = vst.msk [vmem:[#allocation2 + $0xd0] sm:$0xff] %vm929_vm3, %v1200_v9  ;;  %v12648_v11 = vpack.c.bf16 %v329_v7, %v328_v6  ;;  %v12650_v54 = vpack.c.bf16 %v327_v39, %v327_v39  ;;  %v1070_v29 = vrot.slane %v12013_v57, 1  ;;  %v223_v6 = vmax.f32 %v12612_v44, 0.0  ;;  %2526 = vmatprep.subr.bf16.mxu0 %v16270_v45 }
  0x97   :  { %v790_v52 = vrot.slane %v788_v42, 1  ;;  %934 = vst.msk [vmem:[#allocation2 + $0xa0] sm:$0xff] %vm929_vm3, %v842_v61  ;;  %1611 = vst.msk [vmem:[#allocation2 + $0x68] sm:$0xff] %vm929_vm3, %v842_v61  ;;  %v11176_v21 = vld [vmem:[%s16093_s1 + $0x98] sm:$0xff]   ;;  %v783_v20 = vrot.slane %v781_v60, 1  ;;  %v12659_v1 = vsel %vm1026_vm2, %v9121_v24, %v9123_v8  ;;  %v224_v7 = vmax.f32 %v12626_v38, 0.0  ;;  %v1202_v42 = vpop.permute.xlu0 %1201  ;;  %v844_v48 = vpop.permute.xlu1 %843 }
  0x98   :  { %16285 = vst [vmem:[#allocation37_spill] sm:$0xff] %v12648_v11  ;;  %16286 = vst [vmem:[#allocation38_spill] sm:$0xff] %v12650_v54  ;;  %v793_v13 = vshll.u32 %v12650_v54, 16  ;;  %v12672_v24 = vsel %vm1026_vm2, %v1069_v36, %v1070_v29  ;;  %v12677_v39 = vld [vmem:[%s16092_s0 + $0x310] sm:$0x3]  ;;  %v11177_v9 = vld [vmem:[%s16093_s1 + $0xa0] sm:$0xff]   ;;  %1245 = vrot.lane.b32.xlu0 %v12648_v11, %s11458_s9 }
  0x99   :  { %16287 = vst [vmem:[#allocation39_spill] sm:$0xff] %v12659_v1  ;;  %445 = vst.msk [vmem:[#allocation2 + $0x488] sm:$0xff] %vm415_vm1, %v12648_v11  ;;  %v791_v57 = vor.u32 %v790_v52, %v786_v0  ;;  %v784_v0 = vsel %vm448_vm0, %v779_v40, %v783_v20  ;;  %v331_v60 = vmul.f32 1.7139589, %v223_v6  ;;  %v332_v8 = vmul.f32 1.7139589, %v224_v7  ;;  %2527 = vmatpush1.bf16.msra.mxu0 %v11176_v21 }
  0x9a   :  { %1568 = vst.msk [vmem:[#allocation2 + $0x450] sm:$0xff] %vm415_vm1, %v12648_v11  ;;  %1169 = vst.msk [vmem:[#allocation2 + $0x238] sm:$0xff] %vm415_vm1, %v12672_v24  ;;  %v118_v36 = vld [vmem:[%s16092_s0 + $0x318] sm:$0xff]  ;;  %v1697_v61 = vld [vmem:[#allocation2 + $0x50] sm:$0xff]  ;;  %887 = vrot.lane.b32.xlu1 %v784_v0, %s11458_s9  ;;  %v795_v40 = vrot.slane %v793_v13, 1  ;;  %v222_v52 = vmax.f32 %v114_v33, 0.0  ;;  %2528 = vmatprep.subr.bf16.mxu0 %v16270_v45 }
  0x9b   :  { %1667 = vst.msk [vmem:[#allocation2 + $0x200] sm:$0xff] %vm415_vm1, %v12672_v24  ;;  %1399 = vst.msk [vmem:[#allocation2 + $0x420] sm:$0xff] %vm415_vm1, %v784_v0  ;;  %v798_v29 = vshrl.u32 %v12648_v11, 16  ;;  %v800_v20 = vshll.u32 %v12648_v11, 16  ;;  %v119_v6 = vld [vmem:[%s16092_s0 + $0x320] sm:$0xff]  ;;  %v12700_v3 = vpack.c.bf16 %v332_v8, %v331_v60  ;;  %v1072_v1 = vrot.slane %v12011_v56, 1  ;;  %v1204_v21 = vpop.permute.xlu0 %1203 }
  0x9c   :  { %1291 = vst.msk [vmem:[#allocation2 + $0xf8] sm:$0xff] %vm929_vm3, %v1202_v42  ;;  %v1703_v7 = vld [vmem:[#allocation2 + $0x80] sm:$0xff]  ;;  %v9130_v42 = vrot.slane %v12612_v44, 1  ;;  %v1073_v13 = vrot.slane %v12081_v63, 1  ;;  %935 = vst.msk [vmem:[#allocation2 + $0xc8] sm:$0xff] %vm929_vm3, %v844_v48  ;;  %v796_v33 = vsel %vm448_vm0, %v791_v57, %v795_v40  ;;  %v226_v54 = vmax.f32 %v118_v36, 0.0  ;;  %2280 = vmatmul.mubr.bf16.gmra.mrb[8].mxu0 %v1697_v61 }
  0x9d   :  { %1612 = vst.msk [vmem:[#allocation2 + $0x90] sm:$0xff] %vm929_vm3, %v844_v48  ;;  %v330_v0 = vmul.f32 1.7139589, %v222_v52  ;;  %v802_v11 = vrot.slane %v800_v20, 1  ;;  %1247 = vrot.lane.b32.xlu0 %v12700_v3, %s11458_s9  ;;  %v227_v63 = vmax.f32 %v119_v6, 0.0  ;;  %v225_v44 = vmax.f32 %v12677_v39, 0.0  ;;  %2287 = vmatprep.mubr.bf16.mxu0 %v1703_v7  ;;  %v846_v52 = vpop.permute.xlu1 %845 }
  0x9e   :  { %1400 = vst.msk [vmem:[#allocation2 + $0x448] sm:$0xff] %vm415_vm1, %v796_v33  ;;  %446 = vst.msk [vmem:[#allocation2 + $0x4b0] sm:$0xff] %vm415_vm1, %v12700_v3  ;;  %v12717_v56 = vsel %vm1026_vm2, %v1072_v1, %v1073_v13  ;;  %v810_v57 = vshrl.u32 %v12700_v3, 16  ;;  %v11178_v48 = vld [vmem:[%s16093_s1 + $0xa8] sm:$0xff]   ;;  %889 = vrot.lane.b32.xlu1 %v796_v33, %s11458_s9  ;;  %v334_v1 = vmul.f32 1.7139589, %v226_v54  ;;  %2529 = vmatpush1.bf16.msra.mxu0 %v11177_v9 }
  0x9f   :  { %1569 = vst.msk [vmem:[#allocation2 + $0x478] sm:$0xff] %vm415_vm1, %v12700_v3  ;;  %v12726_v60 = vpack.c.bf16 %v330_v0, %v330_v0  ;;  %v803_v8 = vor.u32 %v802_v11, %v798_v29  ;;  %1170 = vst.msk [vmem:[#allocation2 + $0x260] sm:$0xff] %vm415_vm1, %v12717_v56  ;;  %v812_v36 = vshll.u32 %v12700_v3, 16  ;;  %v121_v61 = vld [vmem:[%s16092_s0 + $0x330] sm:$0xff]  ;;  %v122_v40 = vld [vmem:[%s16092_s0 + $0x338] sm:$0xff]  ;;  %v9131_v20 = vrot.slane %v12626_v38, 1  ;;  %2530 = vmatprep.subr.bf16.mxu0 %v16270_v45 }
  0xa0   :  { %1292 = vst.msk [vmem:[#allocation2 + $0x120] sm:$0xff] %vm929_vm3, %v1204_v21  ;;  %v335_v11 = vmul.f32 1.7139589, %v227_v63  ;;  %v333_v29 = vmul.f32 1.7139589, %v225_v44  ;;  %v9133_v6 = vrot.slane %v12677_v39, 1 }
  0xa1   :  { %1668 = vst.msk [vmem:[#allocation2 + $0x228] sm:$0xff] %vm415_vm1, %v12717_v56  ;;  %v805_v54 = vshll.u32 %v12726_v60, 16  ;;  %v814_v13 = vrot.slane %v812_v36, 1  ;;  %v1075_v33 = vrot.slane %v12102_v12, 1  ;;  %v1076_v7 = vrot.slane %v12113_v30, 1  ;;  %v1206_v63 = vpop.permute.xlu0 %1205 }
  0xa2   :  { %936 = vst.msk [vmem:[#allocation2 + $0xf0] sm:$0xff] %vm929_vm3, %v846_v52  ;;  %1613 = vst.msk [vmem:[#allocation2 + $0xb8] sm:$0xff] %vm929_vm3, %v846_v52  ;;  %v12747_v9 = vpack.c.bf16 %v335_v11, %v334_v1  ;;  %v12749_v0 = vpack.c.bf16 %v333_v29, %v333_v29  ;;  %v12752_v38 = vsel %vm1026_vm2, %v9130_v42, %v9131_v20  ;;  %v120_v21 = vld [vmem:[%s16092_s0 + $0x328] sm:$0x3]  ;;  %v1702_v1 = vld [vmem:[#allocation2 + $0x78] sm:$0xff]  ;;  %v848_v36 = vpop.permute.xlu1 %847  ;;  %2531 = vmatpush1.bf16.msra.mxu0 %v11178_v48 }
  0xa3   :  { %16288 = vst [vmem:[#allocation40_spill] sm:$0xff] %v12752_v38  ;;  %v12755_v39 = vsel %vm1026_vm2, %v9131_v20, %v9133_v6  ;;  %v807_v44 = vrot.slane %v805_v54, 1  ;;  %v1077_v30 = vsel %vm1026_vm2, %v1075_v33, %v1076_v7  ;;  %1293 = vst.msk [vmem:[#allocation2 + $0x148] sm:$0xff] %vm929_vm3, %v1206_v63  ;;  %v11179_v42 = vld [vmem:[%s16093_s1 + $0xb0] sm:$0xff]   ;;  %v815_v52 = vor.u32 %v814_v13, %v810_v57  ;;  %v1708_v20 = vld [vmem:[#allocation2 + $0xa8] sm:$0xff] }
  0xa4   :  { %16289 = vst [vmem:[#allocation41_spill] sm:$0xff] %v12755_v39  ;;  %1249 = vrot.lane.b32.xlu0 %v12747_v9, %s11458_s9  ;;  %447 = vst.msk [vmem:[#allocation2 + $0x4d8] sm:$0xff] %vm415_vm1, %v12747_v9  ;;  %v817_v11 = vshll.u32 %v12749_v0, 16  ;;  %v229_v29 = vmax.f32 %v121_v61, 0.0  ;;  %v230_v48 = vmax.f32 %v122_v40, 0.0  ;;  %2532 = vmatprep.subr.bf16.mxu0 %v16270_v45  ;;  %v228_v54 = vmax.f32 %v120_v21, 0.0 }
  0xa5   :  { %1570 = vst.msk [vmem:[#allocation2 + $0x4a0] sm:$0xff] %vm415_vm1, %v12747_v9  ;;  %1171 = vst.msk [vmem:[#allocation2 + $0x288] sm:$0xff] %vm415_vm1, %v1077_v30  ;;  %v808_v6 = vsel %vm448_vm0, %v803_v8, %v807_v44  ;;  %2288 = vmatmul.mubr.bf16.gmra.mrb[12].mxu0 %v1702_v1  ;;  %v1208_v61 = vpop.permute.xlu0 %1207  ;;  %v822_v7 = vshrl.u32 %v12747_v9, 16  ;;  %v824_v63 = vshll.u32 %v12747_v9, 16  ;;  %v1078_v30 = vrot.slane %v12099_v15, 1  ;;  %v11180_v8 = vld [vmem:[%s16093_s1 + $0xb8] sm:$0xff]  }
  0xa6   :  { %937 = vst.msk [vmem:[#allocation2 + $0x118] sm:$0xff] %vm929_vm3, %v848_v36  ;;  %1614 = vst.msk [vmem:[#allocation2 + $0xe0] sm:$0xff] %vm929_vm3, %v848_v36  ;;  %891 = vrot.lane.b32.xlu1 %v808_v6, %s11458_s9  ;;  %v819_v57 = vrot.slane %v817_v11, 1  ;;  %v337_v13 = vmul.f32 1.7139589, %v229_v29  ;;  %2295 = vmatprep.mubr.bf16.mxu0 %v1708_v20  ;;  %v1079_v1 = vrot.slane %v12148_v10, 1 }
  0xa7   :  { %1401 = vst.msk [vmem:[#allocation2 + $0x470] sm:$0xff] %vm415_vm1, %v808_v6  ;;  %v338_v33 = vmul.f32 1.7139589, %v230_v48  ;;  %v336_v40 = vmul.f32 1.7139589, %v228_v54  ;;  %2533 = vmatpush1.bf16.msra.mxu0 %v11179_v42  ;;  %v1081_v36 = vrot.slane %v12141_v27, 1  ;;  %v850_v11 = vpop.permute.xlu1 %849 }
  0xa8   :  { %1294 = vst.msk [vmem:[#allocation2 + $0x170] sm:$0xff] %vm929_vm3, %v1208_v61  ;;  %v820_v21 = vsel %vm448_vm0, %v815_v52, %v819_v57  ;;  %2534 = vmatprep.subr.bf16.mxu0 %v16270_v45  ;;  %v826_v42 = vrot.slane %v824_v63, 1  ;;  %v1082_v29 = vrot.slane %v12187_v62, 1  ;;  %v1084_v48 = vrot.slane %v12185_v5, 1  ;;  %938 = vst.msk [vmem:[#allocation2 + $0x140] sm:$0xff] %vm929_vm3, %v850_v11  ;;  %v1707_v57 = vld [vmem:[#allocation2 + $0xa0] sm:$0xff] }
  0xa9   :  { %v12789_v44 = vpack.c.bf16 %v338_v33, %v337_v13  ;;  %1402 = vst.msk [vmem:[#allocation2 + $0x498] sm:$0xff] %vm415_vm1, %v820_v21  ;;  %v12795_v15 = vpack.c.bf16 %v336_v40, %v336_v40  ;;  %v12807_v10 = vsel %vm1026_vm2, %v1078_v30, %v1079_v1  ;;  %v1085_v27 = vrot.slane %v12244_v50, 1  ;;  %v11181_v50 = vld [vmem:[%s16093_s1 + $0xc0] sm:$0xff]   ;;  %v1713_v33 = vld [vmem:[#allocation2 + $0xd0] sm:$0xff] }
  0xaa   :  { %1615 = vst.msk [vmem:[#allocation2 + $0x108] sm:$0xff] %vm929_vm3, %v850_v11  ;;  %893 = vrot.lane.b32.xlu1 %v820_v21, %s11458_s9  ;;  %v1087_v62 = vrot.slane %v12242_v37, 1  ;;  %v1088_v5 = vrot.slane %v12280_v16, 1  ;;  %v827_v52 = vor.u32 %v826_v42, %v822_v7  ;;  %v12816_v6 = vsel %vm1026_vm2, %v1081_v36, %v1082_v29  ;;  %v1210_v13 = vpop.permute.xlu0 %1209  ;;  %v11183_v36 = vld [vmem:[%s16093_s1 + $0xd0] sm:$0xff]  }
  0xab   :  { %1251 = vrot.lane.b32.xlu0 %v12789_v44, %s11458_s9  ;;  %1571 = vst.msk [vmem:[#allocation2 + $0x4c8] sm:$0xff] %vm415_vm1, %v12789_v44  ;;  %v829_v20 = vshll.u32 %v12795_v15, 16  ;;  %1172 = vst.msk [vmem:[#allocation2 + $0x2b0] sm:$0xff] %vm415_vm1, %v12807_v10  ;;  %v1090_v54 = vrot.slane %v12278_v55, 1  ;;  %2535 = vmatpush1.bf16.msra.mxu0 %v11180_v8  ;;  %v12827_v37 = vsel %vm1026_vm2, %v1084_v48, %v1085_v27  ;;  %v1091_v55 = vrot.slane %v12339_v59, 1  ;;  %v11182_v8 = vld [vmem:[%s16093_s1 + $0xc8] sm:$0xff]  }
  0xac   :  { %1173 = vst.msk [vmem:[#allocation2 + $0x2d8] sm:$0xff] %vm415_vm1, %v12816_v6  ;;  %1671 = vst.msk [vmem:[#allocation2 + $0x2a0] sm:$0xff] %vm415_vm1, %v12816_v6  ;;  %v12830_v16 = vsel %vm1026_vm2, %v1087_v62, %v1088_v5  ;;  %2536 = vmatprep.subr.bf16.mxu0 %v16270_v45  ;;  %v1093_v63 = vrot.slane %v12321_v35, 1  ;;  %v1094_v30 = vrot.slane %v12365_v41, 1  ;;  %v1712_v35 = vld [vmem:[#allocation2 + $0xc8] sm:$0xff]  ;;  %v1718_v41 = vld [vmem:[#allocation2 + $0xf8] sm:$0xff] }
  0xad   :  { %1295 = vst.msk [vmem:[#allocation2 + $0x198] sm:$0xff] %vm929_vm3, %v1210_v13  ;;  %v831_v61 = vrot.slane %v829_v20, 1  ;;  %v12846_v59 = vsel %vm1026_vm2, %v1090_v54, %v1091_v55  ;;  %2296 = vmatmul.mubr.bf16.gmra.mrb[16].mxu0 %v1707_v57  ;;  %v852_v40 = vpop.permute.xlu1 %851  ;;  %v1096_v11 = vrot.slane %v12363_v25, 1  ;;  %v1097_v42 = vrot.slane %v12412_v47, 1  ;;  %v1717_v25 = vld [vmem:[#allocation2 + $0xf0] sm:$0xff]  ;;  %v11185_v13 = vld [vmem:[%s16093_s1 + $0xe0] sm:$0xff]  }
  0xae   :  { %1174 = vst.msk [vmem:[#allocation2 + $0x300] sm:$0xff] %vm415_vm1, %v12827_v37  ;;  %1672 = vst.msk [vmem:[#allocation2 + $0x2c8] sm:$0xff] %vm415_vm1, %v12827_v37  ;;  %2303 = vmatprep.mubr.bf16.mxu0 %v1713_v33  ;;  %v12863_v21 = vsel %vm1026_vm2, %v1093_v63, %v1094_v30  ;;  %v1099_v47 = vrot.slane %v12409_v46, 1  ;;  %v1100_v27 = vrot.slane %v12451_v32, 1  ;;  %v1722_v46 = vld [vmem:[#allocation2 + $0x118] sm:$0xff]  ;;  %v1103_v54 = vrot.slane %v12504_v58, 1 }
  0xaf   :  { %1175 = vst.msk [vmem:[#allocation2 + $0x328] sm:$0xff] %vm415_vm1, %v12830_v16  ;;  %1673 = vst.msk [vmem:[#allocation2 + $0x2f0] sm:$0xff] %vm415_vm1, %v12830_v16  ;;  %1413 = vrot.lane.b32.xlu0 %v12046_v51, %s11458_s9  ;;  %v832_v7 = vsel %vm448_vm0, %v827_v52, %v831_v61  ;;  %v1212_v51 = vpop.permute.xlu0 %1211  ;;  %2537 = vmatpush1.bf16.msra.mxu0 %v11181_v50  ;;  %v12891_v29 = vsel %vm1026_vm2, %v1096_v11, %v1097_v42  ;;  %v16290_v52 = vld [vmem:[#allocation29_spill] sm:$0xff]  ;;  %v1733_v58 = vld [vmem:[#allocation2 + $0x170] sm:$0xff]  ;;  %v1105_v50 = vrot.slane %v12499_v26, 1 }
  0xb0   :  { %1176 = vst.msk [vmem:[#allocation2 + $0x350] sm:$0xff] %vm415_vm1, %v12846_v59  ;;  %1674 = vst.msk [vmem:[#allocation2 + $0x318] sm:$0xff] %vm415_vm1, %v12846_v59  ;;  %895 = vrot.lane.b32.xlu1 %v832_v7, %s11458_s9  ;;  %2538 = vmatprep.subr.bf16.mxu0 %v16270_v45  ;;  %v1102_v20 = vrot.slane %v16290_v52, 1  ;;  %v16291_v55 = vld [vmem:[#allocation33_spill] sm:$0xff]  ;;  %v16293_v11 = vld [vmem:[#allocation38_spill] sm:$0xff] }
  0xb1   :  { %939 = vst.msk [vmem:[#allocation2 + $0x168] sm:$0xff] %vm929_vm3, %v852_v40  ;;  %1616 = vst.msk [vmem:[#allocation2 + $0x130] sm:$0xff] %vm929_vm3, %v852_v40  ;;  %v854_v1 = vpop.permute.xlu1 %853  ;;  %v1106_v33 = vrot.slane %v16291_v55, 1  ;;  %v1112_v42 = vrot.slane %v16293_v11, 1 }
  0xb2   :  { %1403 = vst.msk [vmem:[#allocation2 + $0x4c0] sm:$0xff] %vm415_vm1, %v832_v7  ;;  %1177 = vst.msk [vmem:[#allocation2 + $0x378] sm:$0xff] %vm415_vm1, %v12863_v21 }
  0xb3   :  { %1296 = vst.msk [vmem:[#allocation2 + $0x1c0] sm:$0xff] %vm929_vm3, %v1212_v51  ;;  %1417 = vrot.lane.b32.xlu0 %v12163_v4, %s11458_s9  ;;  %940 = vst.msk [vmem:[#allocation2 + $0x190] sm:$0xff] %vm929_vm3, %v854_v1  ;;  %v1214_v4 = vpop.permute.xlu0 %1213  ;;  %2539 = vmatpush1.bf16.msra.mxu0 %v11182_v8  ;;  %v1109_v51 = vrot.slane %v12616_v2, 1  ;;  %v11186_v2 = vld [vmem:[%s16093_s1 + $0xe8] sm:$0xff]  }
  0xb4   :  { %1675 = vst.msk [vmem:[#allocation2 + $0x340] sm:$0xff] %vm415_vm1, %v12863_v21  ;;  %1415 = vrot.lane.b32.xlu1 %v12105_v23, %s11458_s9  ;;  %2540 = vmatprep.subr.bf16.mxu0 %v16270_v45  ;;  %1178 = vst.msk [vmem:[#allocation2 + $0x3a0] sm:$0xff] %vm415_vm1, %v12891_v29  ;;  %v1738_v40 = vld [vmem:[#allocation2 + $0x198] sm:$0xff] }
  0xb5   :  { %1617 = vst.msk [vmem:[#allocation2 + $0x158] sm:$0xff] %vm929_vm3, %v854_v1  ;;  %1297 = vst.msk [vmem:[#allocation2 + $0x1e8] sm:$0xff] %vm929_vm3, %v1214_v4  ;;  %2304 = vmatmul.mubr.bf16.gmra.mrb[20].mxu0 %v1712_v35  ;;  %v856_v23 = vpop.permute.xlu1 %855  ;;  %v1111_v4 = vrot.slane %v12603_v17, 1 }
  0xb6   :  { %2311 = vmatprep.mubr.bf16.mxu0 %v1718_v41  ;;  %941 = vst.msk [vmem:[#allocation2 + $0x1b8] sm:$0xff] %vm929_vm3, %v856_v23  ;;  %1618 = vst.msk [vmem:[#allocation2 + $0x180] sm:$0xff] %vm929_vm3, %v856_v23 }
  0xb7   :  { %1421 = vrot.lane.b32.xlu0 %v12253_v19, %s11458_s9  ;;  %2541 = vmatpush1.bf16.msra.mxu0 %v11183_v36  ;;  %v1216_v48 = vpop.permute.xlu0 %1215  ;;  %1676 = vst.msk [vmem:[#allocation2 + $0x368] sm:$0xff] %vm415_vm1, %v12891_v29  ;;  %v1723_v19 = vld [vmem:[#allocation2 + $0x120] sm:$0xff] }
  0xb8   :  { %1419 = vrot.lane.b32.xlu1 %v12212_v53, %s11458_s9  ;;  %2542 = vmatprep.subr.bf16.mxu0 %v16270_v45  ;;  %1298 = vst.msk [vmem:[#allocation2 + $0x210] sm:$0xff] %vm929_vm3, %v1216_v48  ;;  %v1732_v26 = vld [vmem:[#allocation2 + $0x168] sm:$0xff] }
  0xb9   :  { %v858_v53 = vpop.permute.xlu1 %857 }
  0xba   :  { %942 = vst.msk [vmem:[#allocation2 + $0x1e0] sm:$0xff] %vm929_vm3, %v858_v53  ;;  %1619 = vst.msk [vmem:[#allocation2 + $0x1a8] sm:$0xff] %vm929_vm3, %v858_v53  ;;  %v1737_v35 = vld [vmem:[#allocation2 + $0x190] sm:$0xff]  ;;  %v1743_v36 = vld [vmem:[#allocation2 + $0x1c0] sm:$0xff] }
  0xbb   :  { %1425 = vrot.lane.b32.xlu0 %v12336_v28, %s11458_s9  ;;  %v11184_v28 = vld [vmem:[%s16093_s1 + $0xd8] sm:$0xff]  }
  0xbc   :  { %1423 = vrot.lane.b32.xlu1 %v12302_v43, %s11458_s9  ;;  %v1218_v43 = vpop.permute.xlu0 %1217  ;;  %2543 = vmatpush1.bf16.msra.mxu0 %v11184_v28 }
  0xbd   :  { %2312 = vmatmul.mubr.bf16.gmra.mrb[24].mxu0 %v1717_v25  ;;  %v860_v62 = vpop.permute.xlu1 %859  ;;  %1299 = vst.msk [vmem:[#allocation2 + $0x238] sm:$0xff] %vm929_vm3, %v1218_v43  ;;  %2544 = vmatprep.subr.bf16.mxu0 %v16270_v45 }
  0xbe   :  { %2319 = vmatprep.mubr.bf16.mxu0 %v1723_v19  ;;  %943 = vst.msk [vmem:[#allocation2 + $0x208] sm:$0xff] %vm929_vm3, %v860_v62  ;;  %1620 = vst.msk [vmem:[#allocation2 + $0x1d0] sm:$0xff] %vm929_vm3, %v860_v62 }
  0xbf   :  { %1429 = vrot.lane.b32.xlu0 %v12415_v14, %s11458_s9  ;;  %v12918_v14 = vsel %vm1026_vm2, %v1099_v47, %v1100_v27 }
  0xc0   :  { %1427 = vrot.lane.b32.xlu1 %v12376_v34, %s11458_s9  ;;  %1179 = vst.msk [vmem:[#allocation2 + $0x3c8] sm:$0xff] %vm415_vm1, %v12918_v14  ;;  %1677 = vst.msk [vmem:[#allocation2 + $0x390] sm:$0xff] %vm415_vm1, %v12918_v14  ;;  %v1728_v34 = vld [vmem:[#allocation2 + $0x148] sm:$0xff]  ;;  %2545 = vmatpush1.bf16.msra.mxu0 %v11185_v13 }
  0xc1   :  { %2546 = vmatprep.subr.bf16.mxu0 %v16270_v45 }
  0xc2   :  { %v862_v32 = vpop.permute.xlu1 %861 }
  0xc3   :  { %1433 = vrot.lane.b32.xlu0 %v12507_v22, %s11458_s9  ;;  %944 = vst.msk [vmem:[#allocation2 + $0x230] sm:$0xff] %vm929_vm3, %v862_v32  ;;  %1621 = vst.msk [vmem:[#allocation2 + $0x1f8] sm:$0xff] %vm929_vm3, %v862_v32  ;;  %v1220_v5 = vpop.permute.xlu0 %1219  ;;  %v1727_v22 = vld [vmem:[#allocation2 + $0x140] sm:$0xff] }
  0xc4   :  { %1431 = vrot.lane.b32.xlu1 %v12468_v31, %s11458_s9  ;;  %1300 = vst.msk [vmem:[#allocation2 + $0x260] sm:$0xff] %vm929_vm3, %v1220_v5  ;;  %v12939_v31 = vsel %vm1026_vm2, %v1102_v20, %v1103_v54 }
  0xc5   :  { %2320 = vmatmul.mubr.bf16.gmra.mrb[28].mxu0 %v1722_v46  ;;  %1180 = vst.msk [vmem:[#allocation2 + $0x3f0] sm:$0xff] %vm415_vm1, %v12939_v31  ;;  %1678 = vst.msk [vmem:[#allocation2 + $0x3b8] sm:$0xff] %vm415_vm1, %v12939_v31 }
  0xc6   :  { %2327 = vmatprep.mubr.bf16.mxu0 %v1728_v34 }
  0xc7   :  { %1437 = vrot.lane.b32.xlu0 %v12606_v18, %s11458_s9  ;;  %v1222_v18 = vpop.permute.xlu0 %1221 }
  0xc8   :  { %1435 = vrot.lane.b32.xlu1 %v12566_v49, %s11458_s9  ;;  %1301 = vst.msk [vmem:[#allocation2 + $0x288] sm:$0xff] %vm929_vm3, %v1222_v18 }
  0xc9   :  { %v864_v57 = vpop.permute.xlu1 %863 }
  0xca   :  { %945 = vst.msk [vmem:[#allocation2 + $0x258] sm:$0xff] %vm929_vm3, %v864_v57  ;;  %1622 = vst.msk [vmem:[#allocation2 + $0x220] sm:$0xff] %vm929_vm3, %v864_v57 }
  0xcc   :  { %1439 = vrot.lane.b32.xlu1 %v12672_v24, %s11458_s9  ;;  %v1224_v49 = vpop.permute.xlu0 %1223  ;;  %v12959_v24 = vsel %vm1026_vm2, %v1105_v50, %v1106_v33 }
  0xcd   :  { %2328 = vmatmul.mubr.bf16.gmra.mrb[32].mxu0 %v1727_v22  ;;  %1302 = vst.msk [vmem:[#allocation2 + $0x2b0] sm:$0xff] %vm929_vm3, %v1224_v49 }
  0xce   :  { %2335 = vmatprep.mubr.bf16.mxu0 %v1733_v58  ;;  %v866_v61 = vpop.permute.xlu1 %865  ;;  %1181 = vst.msk [vmem:[#allocation2 + $0x418] sm:$0xff] %vm415_vm1, %v12959_v24  ;;  %1679 = vst.msk [vmem:[#allocation2 + $0x3e0] sm:$0xff] %vm415_vm1, %v12959_v24 }
  0xcf   :  { %946 = vst.msk [vmem:[#allocation2 + $0x280] sm:$0xff] %vm929_vm3, %v866_v61 }
  0xd0   :  { %1441 = vrot.lane.b32.xlu1 %v12717_v56, %s11458_s9  ;;  %v16292_v56 = vld [vmem:[#allocation32_spill] sm:$0xff] }
  0xd1   :  { %v1108_v30 = vrot.slane %v16292_v56, 1 }
  0xd2   :  { %v1226_v7 = vpop.permute.xlu0 %1225  ;;  %v868_v63 = vpop.permute.xlu1 %867 }
  0xd3   :  { %1303 = vst.msk [vmem:[#allocation2 + $0x2d8] sm:$0xff] %vm929_vm3, %v1226_v7  ;;  %947 = vst.msk [vmem:[#allocation2 + $0x2a8] sm:$0xff] %vm929_vm3, %v868_v63  ;;  %v12972_v8 = vsel %vm1026_vm2, %v1108_v30, %v1109_v51 }
  0xd4   :  { %1182 = vst.msk [vmem:[#allocation2 + $0x440] sm:$0xff] %vm415_vm1, %v12972_v8  ;;  %1680 = vst.msk [vmem:[#allocation2 + $0x408] sm:$0xff] %vm415_vm1, %v12972_v8 }
  0xd5   :  { %2336 = vmatmul.mubr.bf16.gmra.mrb[36].mxu0 %v1732_v26 }
  0xd6   :  { %2343 = vmatprep.mubr.bf16.mxu0 %v1738_v40 }
  0xd7   :  { %v870_v41 = vpop.permute.xlu1 %869 }
  0xd8   :  { %948 = vst.msk [vmem:[#allocation2 + $0x2d0] sm:$0xff] %vm929_vm3, %v870_v41  ;;  %1625 = vst.msk [vmem:[#allocation2 + $0x298] sm:$0xff] %vm929_vm3, %v870_v41  ;;  %v1228_v1 = vpop.permute.xlu0 %1227 }
  0xd9   :  { %1304 = vst.msk [vmem:[#allocation2 + $0x300] sm:$0xff] %vm929_vm3, %v1228_v1 }
  0xdd   :  { %2344 = vmatmul.mubr.bf16.gmra.mrb[40].mxu0 %v1737_v35  ;;  %v1230_v23 = vpop.permute.xlu0 %1229 }
  0xde   :  { %2351 = vmatprep.mubr.bf16.mxu0 %v1743_v36 }
  0xdf   :  { %9 = vsyncpa [#allocation6], 0  ;;  %v872_v48 = vpop.permute.xlu1 %871  ;;  %1305 = vst.msk [vmem:[#allocation2 + $0x328] sm:$0xff] %vm929_vm3, %v1230_v23  ;;  %2547 = vmatpush1.bf16.msra.mxu0 %v11186_v2  ;;  %v12988_v25 = vsel %vm1026_vm2, %v1111_v4, %v1112_v42  ;;  %v1742_v17 = vld [vmem:[#allocation2 + $0x1b8] sm:$0xff]  ;;  %v1748_v53 = vld [vmem:[#allocation2 + $0x1e8] sm:$0xff]  ;;  %v1115_v62 = vrot.slane %v12726_v60, 1 }
  0xe0   :  { %949 = vst.msk [vmem:[#allocation2 + $0x2f8] sm:$0xff] %vm929_vm3, %v872_v48  ;;  %1626 = vst.msk [vmem:[#allocation2 + $0x2c0] sm:$0xff] %vm929_vm3, %v872_v48  ;;  %2548 = vmatprep.subr.bf16.mxu0 %v16270_v45  ;;  %v16294_v47 = vld [vmem:[#allocation37_spill] sm:$0xff]  ;;  %v1747_v34 = vld [vmem:[#allocation2 + $0x1e0] sm:$0xff]  ;;  %v1117_v52 = vrot.slane %v12700_v3, 1  ;;  %v1118_v20 = vrot.slane %v12749_v0, 1 }
  0xe1   :  { %1183 = vst.msk [vmem:[#allocation2 + $0x468] sm:$0xff] %vm415_vm1, %v12988_v25  ;;  %1681 = vst.msk [vmem:[#allocation2 + $0x430] sm:$0xff] %vm415_vm1, %v12988_v25  ;;  %v1114_v27 = vrot.slane %v16294_v47, 1  ;;  %v1753_v32 = vld [vmem:[#allocation2 + $0x210] sm:$0xff]  ;;  %v1752_v3 = vld [vmem:[#allocation2 + $0x208] sm:$0xff]  ;;  %v1120_v49 = vrot.slane %v12747_v9, 1 }
  0xe2   :  { %v1232_v28 = vpop.permute.xlu0 %1231  ;;  %v11187_v60 = vld [vmem:[%s16093_s1 + $0xf0] sm:$0xff]   ;;  %v13018_v18 = vsel %vm1026_vm2, %v1117_v52, %v1118_v20  ;;  %v1758_v0 = vld [vmem:[#allocation2 + $0x238] sm:$0xff]  ;;  %v1121_v13 = vrot.slane %v12795_v15, 1  ;;  %v11188_v50 = vld [vmem:[%s16093_s1 + $0x100] sm:$0xff]   ;;  %vm3239_vm4 = vcmask 1040384   ;;  %vm4295_vm9 = vcmask 1043456  }
  0xe3   :  { %v874_v19 = vpop.permute.xlu1 %873  ;;  %1306 = vst.msk [vmem:[#allocation2 + $0x350] sm:$0xff] %vm929_vm3, %v1232_v28  ;;  %v13003_v43 = vsel %vm1026_vm2, %v1114_v27, %v1115_v62  ;;  %2549 = vmatpush1.bf16.msra.mxu0 %v11187_v60  ;;  %v69_v55 = vld [vmem:[%s16092_s0 + $0x190] sm:$0x3]  ;;  %10426 = vmatprep.subr.bf16.mxu1 %v11188_v50  ;;  %v11305_v15 = vld [vmem:[%s16092_s0 + $0x180] sm:$0xff]  ;;  %v11306_v40 = vld [vmem:[%s16092_s0 + $0x188] sm:$0xff] }
  0xe4   :  { %950 = vst.msk [vmem:[#allocation2 + $0x320] sm:$0xff] %vm929_vm3, %v874_v19  ;;  %1627 = vst.msk [vmem:[#allocation2 + $0x2e8] sm:$0xff] %vm929_vm3, %v874_v19  ;;  %2550 = vmatprep.subr.bf16.mxu0 %v16270_v45  ;;  %v177_v33 = vmax.f32 %v69_v55, 0.0  ;;  %v13040_v61 = vsel %vm1026_vm2, %v1120_v49, %v1121_v13  ;;  %10427 = vmatpush3.bf16.msra.mxu1 %v11188_v50  ;;  %v9060_v26 = vrot.slane %v11305_v15, 1  ;;  %v9061_v7 = vrot.slane %v11306_v40, 1  ;;  %v1757_v56 = vld [vmem:[#allocation2 + $0x230] sm:$0xff] }
  0xe5   :  { %2352 = vmatmul.mubr.bf16.gmra.mrb[44].mxu0 %v1742_v17  ;;  %1184 = vst.msk [vmem:[#allocation2 + $0x490] sm:$0xff] %vm415_vm1, %v13003_v43  ;;  %1682 = vst.msk [vmem:[#allocation2 + $0x458] sm:$0xff] %vm415_vm1, %v13003_v43  ;;  %v16295_v35 = vld [vmem:[#allocation22_spill] sm:$0xff]  ;;  %v70_v36 = vld [vmem:[%s16092_s0 + $0x198] sm:$0xff]  ;;  %v9063_v19 = vrot.slane %v69_v55, 1 }
  0xe6   :  { %2359 = vmatprep.mubr.bf16.mxu0 %v1748_v53  ;;  %1185 = vst.msk [vmem:[#allocation2 + $0x4b8] sm:$0xff] %vm415_vm1, %v13018_v18  ;;  %1683 = vst.msk [vmem:[#allocation2 + $0x480] sm:$0xff] %vm415_vm1, %v13018_v18  ;;  %v285_v9 = vmul.f32 1.7139589, %v177_v33  ;;  %v1320_v41 = vshll.u32 %v16295_v35, 16  ;;  %v1763_v1 = vld [vmem:[#allocation2 + $0x260] sm:$0xff]  ;;  %v13073_v53 = vsel %vm1026_vm2, %v9060_v26, %v9061_v7 }
  0xe7   :  { %1186 = vst.msk [vmem:[#allocation2 + $0x4e0] sm:$0xff] %vm415_vm1, %v13040_v61  ;;  %1684 = vst.msk [vmem:[#allocation2 + $0x4a8] sm:$0xff] %vm415_vm1, %v13040_v61  ;;  %v71_v2 = vld [vmem:[%s16092_s0 + $0x1a0] sm:$0xff]  ;;  %v1318_v4 = vshrl.u32 %v16295_v35, 16  ;;  %v178_v23 = vmax.f32 %v70_v36, 0.0  ;;  %v11189_v48 = vld [vmem:[%s16093_s1 + $0xf8] sm:$0xff]  }
  0xe8   :  { %v1234_v46 = vpop.permute.xlu0 %1233  ;;  %v13054_v51 = vpack.c.bf16 %v285_v9, %v285_v9  ;;  %v1322_v11 = vrot.slane %v1320_v41, 1  ;;  %v11190_v17 = vld [vmem:[%s16093_s1 + $0x108] sm:$0xff]   ;;  %16296 = vst [vmem:[#allocation29_spill] sm:$0xff] %v13073_v53  ;;  %v179_v28 = vmax.f32 %v71_v2, 0.0  ;;  %2551 = vmatpush1.bf16.msra.mxu0 %v11189_v48  ;;  %v11192_v26 = vld [vmem:[%s16093_s1 + $0x118] sm:$0xff]  }
  0xe9   :  { %1307 = vst.msk [vmem:[#allocation2 + $0x378] sm:$0xff] %vm929_vm3, %v1234_v46  ;;  %v11191_v46 = vld [vmem:[%s16093_s1 + $0x110] sm:$0xff]   ;;  %10428 = vmatprep.subr.bf16.mxu1 %v11190_v17  ;;  %7443 = vmatprep.subr.bf16.mxu0 %v16270_v45  ;;  %vm3240_vm5 = vsmask.f32 256  ;;  %vm3350_vm7 = vsmask.f32 7938 }
  0xea   :  { %v876_v5 = vpop.permute.xlu1 %875  ;;  %v1325_v42 = vshll.u32 %v13054_v51, 16  ;;  %v1323_v27 = vor.u32 %v1322_v11, %v1318_v4  ;;  %v287_v52 = vmul.f32 1.7139589, %v179_v28  ;;  %10429 = vmatpush3.bf16.msra.mxu1 %v11190_v17  ;;  %vm13294_vm6 = vmand %vm3239_vm4, %vm3240_vm5  ;;  %vm3652_vm10 = vsmask.f32 4368 }
  0xeb   :  { %951 = vst.msk [vmem:[#allocation2 + $0x348] sm:$0xff] %vm929_vm3, %v876_v5  ;;  %1628 = vst.msk [vmem:[#allocation2 + $0x310] sm:$0xff] %vm929_vm3, %v876_v5  ;;  %v13083_v5 = vsel %vm1026_vm2, %v9061_v7, %v9063_v19  ;;  %10430 = vmatprep.subr.bf16.mxu1 %v11191_v46  ;;  %v1772_v19 = vld [vmem:[#allocation2 + $0x2a8] sm:$0xff]  ;;  %vm4853_vm12 = vsmask.f32 3328 }
  0xec   :  { %v1327_v62 = vrot.slane %v1325_v42, 1  ;;  %16297 = vst [vmem:[#allocation33_spill] sm:$0xff] %v13083_v5  ;;  %v1773_v42 = vld [vmem:[#allocation2 + $0x2b0] sm:$0xff]  ;;  %vm13303_vm8 = vmand %vm3239_vm4, %vm3350_vm7  ;;  %vm4854_vm14 = vsmask.f32 7440 }
  0xed   :  { %2360 = vmatmul.mubr.bf16.gmra.mrb[48].mxu0 %v1747_v34  ;;  %v72_v34 = vld [vmem:[%s16092_s0 + $0x1a8] sm:$0x3]  ;;  %vm13494_vm11 = vmand %vm4295_vm9, %vm3350_vm7 }
  0xee   :  { %2367 = vmatprep.mubr.bf16.mxu0 %v1753_v32  ;;  %v878_v54 = vpop.permute.xlu1 %877  ;;  %v1236_v22 = vpop.permute.xlu0 %1235  ;;  %v286_v32 = vmul.f32 1.7139589, %v178_v23  ;;  %v180_v60 = vmax.f32 %v72_v34, 0.0  ;;  %v1328_v20 = vsel %vm448_vm0, %v1323_v27, %v1327_v62  ;;  %10431 = vmatpush3.bf16.msra.mxu1 %v11191_v46  ;;  %v1706_v27 = vld [vmem:[#allocation2 + $0x98] sm:$0xff]  ;;  %v1783_v62 = vld [vmem:[#allocation2 + $0x300] sm:$0xff]  ;;  %vm13503_vm13 = vmor %vm3240_vm5, %vm3652_vm10 }
  0xef   :  { %952 = vst.msk [vmem:[#allocation2 + $0x370] sm:$0xff] %vm929_vm3, %v878_v54  ;;  %1629 = vst.msk [vmem:[#allocation2 + $0x338] sm:$0xff] %vm929_vm3, %v878_v54  ;;  %1597 = vrot.lane.b32.xlu0 %v1328_v20, %s11458_s9  ;;  %10432 = vmatprep.subr.bf16.mxu1 %v11192_v26 }
  0xf0   :  { %1308 = vst.msk [vmem:[#allocation2 + $0x3a0] sm:$0xff] %vm929_vm3, %v1236_v22  ;;  %vm13522_vm15 = vmor %vm4853_vm12, %vm4854_vm14 }
  0xf1   :  { %1388 = vst.msk [vmem:[#allocation2 + $0x268] sm:$0xff] %vm415_vm1, %v1328_v20 }
  0xf2   :  { %v1238_v58 = vpop.permute.xlu0 %1237  ;;  %10433 = vmatpush3.bf16.msra.mxu1 %v11192_v26  ;;  %v1792_v20 = vld [vmem:[#allocation2 + $0x348] sm:$0xff] }
  0xf3   :  { %1309 = vst.msk [vmem:[#allocation2 + $0x3c8] sm:$0xff] %vm929_vm3, %v1238_v58  ;;  %v1762_v58 = vld [vmem:[#allocation2 + $0x258] sm:$0xff]  ;;  %10650 = vmatprep.subr.bf16.mxu1 %v16270_v45 }
  0xf4   :  { %v880_v57 = vpop.permute.xlu1 %879 }
  0xf5   :  { %2368 = vmatmul.mubr.bf16.gmra.mrb[52].mxu0 %v1752_v3  ;;  %953 = vst.msk [vmem:[#allocation2 + $0x398] sm:$0xff] %vm929_vm3, %v880_v57  ;;  %1630 = vst.msk [vmem:[#allocation2 + $0x360] sm:$0xff] %vm929_vm3, %v880_v57  ;;  %v288_v3 = vmul.f32 1.7139589, %v180_v60  ;;  %v1768_v57 = vld [vmem:[#allocation2 + $0x288] sm:$0xff] }
  0xf6   :  { %2375 = vmatprep.mubr.bf16.mxu0 %v1758_v0  ;;  %v377_v0 = vpack.c.bf16 %v287_v52, %v286_v32  ;;  %v1711_v32 = vld [vmem:[#allocation2 + $0xc0] sm:$0xff]  ;;  %v1716_v60 = vld [vmem:[#allocation2 + $0xe8] sm:$0xff] }
  0xf7   :  { %v378_v49 = vpack.c.bf16 %v288_v3, %v288_v3  ;;  %v1721_v3 = vld [vmem:[#allocation2 + $0x110] sm:$0xff] }
  0xf8   :  { %v882_v63 = vpop.permute.xlu1 %881  ;;  %v1576_v13 = vshll.u32 %v377_v0, 16  ;;  %1556 = vst.msk [vmem:[#allocation2 + $0x270] sm:$0xff] %vm415_vm1, %v377_v0  ;;  %v1574_v50 = vshrl.u32 %v377_v0, 16  ;;  %v1645_v40 = vrot.slane %v377_v0, 1  ;;  %v1726_v0 = vld [vmem:[#allocation2 + $0x138] sm:$0xff] }
  0xf9   :  { %954 = vst.msk [vmem:[#allocation2 + $0x3c0] sm:$0xff] %vm929_vm3, %v882_v63  ;;  %1631 = vst.msk [vmem:[#allocation2 + $0x388] sm:$0xff] %vm929_vm3, %v882_v63  ;;  %v1581_v9 = vshll.u32 %v378_v49, 16  ;;  %v1646_v7 = vrot.slane %v378_v49, 1  ;;  %v1407_v63 = vrot.slane %v16295_v35, 1  ;;  %v1767_v35 = vld [vmem:[#allocation2 + $0x280] sm:$0xff] }
  0xfa   :  { %v1240_v30 = vpop.permute.xlu0 %1239  ;;  %v1578_v33 = vrot.slane %v1576_v13, 1 }
  0xfb   :  { %1310 = vst.msk [vmem:[#allocation2 + $0x3f0] sm:$0xff] %vm929_vm3, %v1240_v30  ;;  %v1583_v41 = vrot.slane %v1581_v9, 1  ;;  %v1647_v36 = vsel %vm1026_vm2, %v1645_v40, %v1646_v7 }
  0xfc   :  { %v1579_v30 = vor.u32 %v1578_v33, %v1574_v50  ;;  %1670 = vst.msk [vmem:[#allocation2 + $0x278] sm:$0xff] %vm415_vm1, %v1647_v36  ;;  %v1802_v13 = vld [vmem:[#allocation2 + $0x398] sm:$0xff]  ;;  %v1808_v50 = vld [vmem:[#allocation2 + $0x3c8] sm:$0xff] }
  0xfd   :  { %2376 = vmatmul.mubr.bf16.gmra.mrb[56].mxu0 %v1757_v56  ;;  %v1408_v56 = vrot.slane %v13054_v51, 1  ;;  %v1696_v51 = vld [vmem:[#allocation2 + $0x48] sm:$0xff] }
  0xfe   :  { %2383 = vmatprep.mubr.bf16.mxu0 %v1763_v1  ;;  %v1242_v47 = vpop.permute.xlu0 %1241  ;;  %v1691_v1 = vld [vmem:[#allocation2 + $0x20] sm:$0xff]  ;;  %v1584_v4 = vsel %vm448_vm0, %v1579_v30, %v1583_v41  ;;  %v1736_v33 = vld [vmem:[#allocation2 + $0x188] sm:$0xff]  ;;  %v1746_v30 = vld [vmem:[#allocation2 + $0x1d8] sm:$0xff] }
  0xff   :  { %1311 = vst.msk [vmem:[#allocation2 + $0x418] sm:$0xff] %vm929_vm3, %v1242_v47  ;;  %v1409_v2 = vsel %vm1026_vm2, %v1407_v63, %v1408_v56  ;;  %10434 = vmatprep.mubr.msk.bf16.mxu1 %vm415_vm1, %v1691_v1  ;;  %1599 = vrot.lane.b32.xlu0 %v1584_v4, %s11458_s9  ;;  %v1701_v47 = vld [vmem:[#allocation2 + $0x70] sm:$0xff] }
 0x100   :  { %v884_v22 = vpop.permute.xlu1 %883  ;;  %1669 = vst.msk [vmem:[#allocation2 + $0x250] sm:$0xff] %vm415_vm1, %v1409_v2  ;;  %1443 = vrot.lane.b32.xlu1 %v1409_v2, %s11458_s9  ;;  %10435 = vmatmul.mubr.msk.bf16.vlgmr.msra.gmra.mrb[0].mxu1 %vm415_vm1, %v1696_v51  ;;  %v1741_v56 = vld [vmem:[#allocation2 + $0x1b0] sm:$0xff] }
 0x101   :  { %955 = vst.msk [vmem:[#allocation2 + $0x3e8] sm:$0xff] %vm929_vm3, %v884_v22  ;;  %1632 = vst.msk [vmem:[#allocation2 + $0x3b0] sm:$0xff] %vm929_vm3, %v884_v22  ;;  %10438 = vmatprep.mubr.msk.bf16.mxu1 %vm415_vm1, %v1701_v47  ;;  %v1798_v22 = vld [vmem:[#allocation2 + $0x378] sm:$0xff] }
 0x102   :  { %v1813_v26 = vld [vmem:[#allocation2 + $0x3f0] sm:$0xff] }
 0x103   :  { %1445 = vrot.lane.b32.xlu0 %v12807_v10, %s11458_s9  ;;  %v1766_v47 = vld [vmem:[#allocation2 + $0x278] sm:$0xff] }
 0x104   :  { %v886_v55 = vpop.permute.xlu1 %885  ;;  %1447 = vrot.lane.b32.xlu1 %v12816_v6, %s11458_s9  ;;  %v1778_v6 = vld [vmem:[#allocation2 + $0x2d8] sm:$0xff] }
 0x105   :  { %2384 = vmatmul.mubr.bf16.gmra.mrb[60].mxu0 %v1762_v58  ;;  %956 = vst.msk [vmem:[#allocation2 + $0x410] sm:$0xff] %vm929_vm3, %v886_v55  ;;  %1633 = vst.msk [vmem:[#allocation2 + $0x3d8] sm:$0xff] %vm929_vm3, %v886_v55  ;;  %v1244_v15 = vpop.permute.xlu0 %1243  ;;  %v1731_v55 = vld [vmem:[#allocation2 + $0x160] sm:$0xff] }
 0x106   :  { %2391 = vmatprep.mubr.bf16.mxu0 %v1768_v57  ;;  %1312 = vst.msk [vmem:[#allocation2 + $0x440] sm:$0xff] %vm929_vm3, %v1244_v15  ;;  %v1803_v57 = vld [vmem:[#allocation2 + $0x3a0] sm:$0xff]  ;;  %v1818_v63 = vld [vmem:[#allocation2 + $0x418] sm:$0xff] }
 0x107   :  { %1449 = vrot.lane.b32.xlu0 %v12827_v37, %s11458_s9  ;;  %v1777_v37 = vld [vmem:[#allocation2 + $0x2d0] sm:$0xff]  ;;  %v1807_v15 = vld [vmem:[#allocation2 + $0x3c0] sm:$0xff] }
 0x108   :  { %1451 = vrot.lane.b32.xlu1 %v12830_v16, %s11458_s9  ;;  %10439 = vmatmul.mubr.msk.bf16.gmra.mrb[4].mxu1 %vm415_vm1, %v1706_v27  ;;  %v1812_v7 = vld [vmem:[#allocation2 + $0x3e8] sm:$0xff]  ;;  %v123_v27 = vld [vmem:[%s16092_s0 + $0x340] sm:$0x3] }
 0x109   :  { %10442 = vmatprep.mubr.msk.bf16.mxu1 %vm415_vm1, %v1711_v32  ;;  %v124_v32 = vld [vmem:[%s16092_s0 + $0x348] sm:$0xff] }
 0x10a   :  { %v1246_v11 = vpop.permute.xlu0 %1245 }
 0x10b   :  { %1313 = vst.msk [vmem:[#allocation2 + $0x468] sm:$0xff] %vm929_vm3, %v1246_v11  ;;  %1453 = vrot.lane.b32.xlu0 %v12846_v59, %s11458_s9  ;;  %v1756_v11 = vld [vmem:[#allocation2 + $0x228] sm:$0xff] }
 0x10c   :  { %v888_v23 = vpop.permute.xlu1 %887  ;;  %1455 = vrot.lane.b32.xlu1 %v12863_v21, %s11458_s9  ;;  %v1817_v1 = vld [vmem:[#allocation2 + $0x410] sm:$0xff] }
 0x10d   :  { %957 = vst.msk [vmem:[#allocation2 + $0x438] sm:$0xff] %vm929_vm3, %v888_v23  ;;  %1634 = vst.msk [vmem:[#allocation2 + $0x400] sm:$0xff] %vm929_vm3, %v888_v23  ;;  %2392 = vmatmul.mubr.bf16.gmra.mrb[64].mxu0 %v1767_v35  ;;  %v1823_v36 = vld [vmem:[#allocation2 + $0x440] sm:$0xff] }
 0x10e   :  { %2399 = vmatprep.mubr.bf16.mxu0 %v1773_v42  ;;  %v1751_v35 = vld [vmem:[#allocation2 + $0x200] sm:$0xff] }
 0x10f   :  { %v1248_v48 = vpop.permute.xlu0 %1247  ;;  %1457 = vrot.lane.b32.xlu0 %v12891_v29, %s11458_s9  ;;  %v1782_v29 = vld [vmem:[#allocation2 + $0x2f8] sm:$0xff] }
 0x110   :  { %v890_v17 = vpop.permute.xlu1 %889  ;;  %1314 = vst.msk [vmem:[#allocation2 + $0x490] sm:$0xff] %vm929_vm3, %v1248_v48  ;;  %1459 = vrot.lane.b32.xlu1 %v12918_v14, %s11458_s9  ;;  %10443 = vmatmul.mubr.msk.bf16.gmra.mrb[8].mxu1 %vm415_vm1, %v1716_v60  ;;  %v125_v60 = vld [vmem:[%s16092_s0 + $0x350] sm:$0xff] }
 0x111   :  { %958 = vst.msk [vmem:[#allocation2 + $0x460] sm:$0xff] %vm929_vm3, %v890_v17  ;;  %1635 = vst.msk [vmem:[#allocation2 + $0x428] sm:$0xff] %vm929_vm3, %v890_v17  ;;  %10446 = vmatprep.mubr.msk.bf16.mxu1 %vm415_vm1, %v1721_v3  ;;  %v126_v3 = vld [vmem:[%s16092_s0 + $0x358] sm:$0x3] }
 0x112   :  { %v1828_v51 = vld [vmem:[#allocation2 + $0x468] sm:$0xff] }
 0x113   :  { %1461 = vrot.lane.b32.xlu0 %v12939_v31, %s11458_s9 }
 0x114   :  { %1463 = vrot.lane.b32.xlu1 %v12959_v24, %s11458_s9  ;;  %v1788_v24 = vld [vmem:[#allocation2 + $0x328] sm:$0xff]  ;;  %v1822_v4 = vld [vmem:[#allocation2 + $0x438] sm:$0xff] }
 0x115   :  { %2400 = vmatmul.mubr.bf16.gmra.mrb[68].mxu0 %v1772_v19 }
 0x116   :  { %v1250_v28 = vpop.permute.xlu0 %1249  ;;  %2407 = vmatprep.mubr.bf16.mxu0 %v1778_v6 }
 0x117   :  { %1315 = vst.msk [vmem:[#allocation2 + $0x4b8] sm:$0xff] %vm929_vm3, %v1250_v28  ;;  %1465 = vrot.lane.b32.xlu0 %v12972_v8, %s11458_s9  ;;  %v1833_v48 = vld [vmem:[#allocation2 + $0x490] sm:$0xff] }
 0x118   :  { %v892_v10 = vpop.permute.xlu1 %891  ;;  %1467 = vrot.lane.b32.xlu1 %v12988_v25, %s11458_s9  ;;  %v1787_v25 = vld [vmem:[#allocation2 + $0x320] sm:$0xff]  ;;  %10447 = vmatmul.mubr.msk.bf16.gmra.mrb[12].mxu1 %vm415_vm1, %v1726_v0  ;;  %v233_v0 = vmax.f32 %v125_v60, 0.0 }
 0x119   :  { %959 = vst.msk [vmem:[#allocation2 + $0x488] sm:$0xff] %vm929_vm3, %v892_v10  ;;  %1636 = vst.msk [vmem:[#allocation2 + $0x450] sm:$0xff] %vm929_vm3, %v892_v10  ;;  %10450 = vmatprep.mubr.msk.bf16.mxu1 %vm415_vm1, %v1731_v55  ;;  %v1827_v23 = vld [vmem:[#allocation2 + $0x460] sm:$0xff]  ;;  %v1761_v10 = vld [vmem:[#allocation2 + $0x250] sm:$0xff] }
 0x11a   :  { %v1715_v60 = vld [vmem:[#allocation2 + $0xe0] sm:$0xff] }
 0x11b   :  { %1469 = vrot.lane.b32.xlu0 %v13003_v43, %s11458_s9 }
 0x11c   :  { %v894_v16 = vpop.permute.xlu1 %893  ;;  %1471 = vrot.lane.b32.xlu1 %v13018_v18, %s11458_s9  ;;  %v1793_v18 = vld [vmem:[#allocation2 + $0x350] sm:$0xff] }
 0x11d   :  { %v1252_v21 = vpop.permute.xlu0 %1251  ;;  %960 = vst.msk [vmem:[#allocation2 + $0x4b0] sm:$0xff] %vm929_vm3, %v894_v16  ;;  %1637 = vst.msk [vmem:[#allocation2 + $0x478] sm:$0xff] %vm929_vm3, %v894_v16  ;;  %2408 = vmatmul.mubr.bf16.gmra.mrb[72].mxu0 %v1777_v37  ;;  %v231_v37 = vmax.f32 %v123_v27, 0.0 }
 0x11e   :  { %1316 = vst.msk [vmem:[#allocation2 + $0x4e0] sm:$0xff] %vm929_vm3, %v1252_v21  ;;  %2415 = vmatprep.mubr.bf16.mxu0 %v1783_v62  ;;  %v1838_v6 = vld [vmem:[#allocation2 + $0x4b8] sm:$0xff]  ;;  %v11307_v21 = vld [vmem:[%s16092_s0 + $0x330] sm:$0xff] }
 0x11f   :  { %v339_v16 = vmul.f32 1.7139589, %v231_v37  ;;  %v9140_v62 = vrot.slane %v11307_v21, 1  ;;  %v1781_v37 = vld [vmem:[#allocation2 + $0x2f0] sm:$0xff] }
 0x120   :  { %1473 = vrot.lane.b32.xlu1 %v13040_v61, %s11458_s9  ;;  %v1797_v61 = vld [vmem:[#allocation2 + $0x370] sm:$0xff]  ;;  %10451 = vmatmul.mubr.msk.bf16.gmra.mrb[16].mxu1 %vm415_vm1, %v1736_v33  ;;  %v1832_v19 = vld [vmem:[#allocation2 + $0x488] sm:$0xff] }
 0x121   :  { %v1414_v59 = vpop.permute.xlu0 %1413  ;;  %10454 = vmatprep.mubr.msk.bf16.mxu1 %vm415_vm1, %v1741_v56 }
 0x122   :  { %1509 = vst.msk [vmem:[#allocation2 + $0x10] sm:$0xff] %vm929_vm3, %v1414_v59  ;;  %v896_v14 = vpop.permute.xlu1 %895  ;;  %v11308_v59 = vld [vmem:[%s16092_s0 + $0x338] sm:$0xff] }
 0x123   :  { %961 = vst.msk [vmem:[#allocation2 + $0x4d8] sm:$0xff] %vm929_vm3, %v896_v14  ;;  %1638 = vst.msk [vmem:[#allocation2 + $0x4a0] sm:$0xff] %vm929_vm3, %v896_v14  ;;  %v9141_v14 = vrot.slane %v11308_v59, 1  ;;  %v1705_v59 = vld [vmem:[#allocation2 + $0x90] sm:$0xff] }
 0x125   :  { %v1418_v46 = vpop.permute.xlu0 %1417  ;;  %2416 = vmatmul.mubr.bf16.gmra.mrb[76].mxu0 %v1782_v29  ;;  %v1837_v29 = vld [vmem:[#allocation2 + $0x4b0] sm:$0xff] }
 0x126   :  { %1511 = vst.msk [vmem:[#allocation2 + $0x60] sm:$0xff] %vm929_vm3, %v1418_v46  ;;  %v1416_v34 = vpop.permute.xlu1 %1415  ;;  %2423 = vmatprep.mubr.bf16.mxu0 %v1788_v24  ;;  %v412_v46 = vpack.c.bf16 %v339_v16, %v339_v16  ;;  %v1332_v24 = vshll.u32 %v12789_v44, 16  ;;  %v1786_v16 = vld [vmem:[#allocation2 + $0x318] sm:$0xff] }
 0x127   :  { %1510 = vst.msk [vmem:[#allocation2 + $0x38] sm:$0xff] %vm929_vm3, %v1416_v34  ;;  %v1843_v34 = vld [vmem:[#allocation2 + $0x4e0] sm:$0xff] }
 0x128   :  { %10455 = vmatmul.mubr.msk.bf16.gmra.mrb[20].mxu1 %vm415_vm1, %v1746_v30 }
 0x129   :  { %v1422_v31 = vpop.permute.xlu0 %1421  ;;  %10458 = vmatprep.mubr.msk.bf16.mxu1 %vm415_vm1, %v1751_v35  ;;  %v1771_v35 = vld [vmem:[#allocation2 + $0x2a0] sm:$0xff] }
 0x12a   :  { %1513 = vst.msk [vmem:[#allocation2 + $0xb0] sm:$0xff] %vm929_vm3, %v1422_v31  ;;  %v1420_v8 = vpop.permute.xlu1 %1419 }
 0x12b   :  { %1512 = vst.msk [vmem:[#allocation2 + $0x88] sm:$0xff] %vm929_vm3, %v1420_v8 }
 0x12d   :  { %2424 = vmatmul.mubr.bf16.gmra.mrb[80].mxu0 %v1787_v25  ;;  %v1426_v43 = vpop.permute.xlu0 %1425  ;;  %v1330_v25 = vshrl.u32 %v12789_v44, 16 }
 0x12e   :  { %v1424_v52 = vpop.permute.xlu1 %1423  ;;  %2431 = vmatprep.mubr.bf16.mxu0 %v1793_v18  ;;  %1515 = vst.msk [vmem:[#allocation2 + $0x100] sm:$0xff] %vm929_vm3, %v1426_v43  ;;  %v1334_v18 = vrot.slane %v1332_v24, 1  ;;  %v232_v43 = vmax.f32 %v124_v32, 0.0  ;;  %v1791_v24 = vld [vmem:[#allocation2 + $0x340] sm:$0xff] }
 0x12f   :  { %1514 = vst.msk [vmem:[#allocation2 + $0xd8] sm:$0xff] %vm929_vm3, %v1424_v52  ;;  %v1337_v52 = vshll.u32 %v412_v46, 16 }
 0x130   :  { %10459 = vmatmul.mubr.msk.bf16.gmra.mrb[24].mxu1 %vm415_vm1, %v1756_v11  ;;  %v1776_v11 = vld [vmem:[#allocation2 + $0x2c8] sm:$0xff] }
 0x131   :  { %v1430_v49 = vpop.permute.xlu0 %1429  ;;  %10462 = vmatprep.mubr.msk.bf16.mxu1 %vm415_vm1, %v1761_v10  ;;  %v1709_v32 = vld [vmem:[#allocation2 + $0xb0] sm:$0xff] }
 0x132   :  { %v1428_v58 = vpop.permute.xlu1 %1427  ;;  %1517 = vst.msk [vmem:[#allocation2 + $0x150] sm:$0xff] %vm929_vm3, %v1430_v49  ;;  %v340_v49 = vmul.f32 1.7139589, %v232_v43  ;;  %v1806_v43 = vld [vmem:[#allocation2 + $0x3b8] sm:$0xff] }
 0x133   :  { %1516 = vst.msk [vmem:[#allocation2 + $0x128] sm:$0xff] %vm929_vm3, %v1428_v58  ;;  %v1335_v58 = vor.u32 %v1334_v18, %v1330_v25  ;;  %v1720_v18 = vld [vmem:[#allocation2 + $0x108] sm:$0xff] }
 0x135   :  { %2432 = vmatmul.mubr.bf16.gmra.mrb[84].mxu0 %v1792_v20  ;;  %v1434_v40 = vpop.permute.xlu0 %1433  ;;  %v13206_v20 = vsel %vm1026_vm2, %v9140_v62, %v9141_v14  ;;  %v1699_v62 = vld [vmem:[#allocation2 + $0x60] sm:$0xff] }
 0x136   :  { %2439 = vmatprep.mubr.bf16.mxu0 %v1798_v22  ;;  %v1432_v9 = vpop.permute.xlu1 %1431  ;;  %1519 = vst.msk [vmem:[#allocation2 + $0x1a0] sm:$0xff] %vm929_vm3, %v1434_v40  ;;  %16298 = vst [vmem:[#allocation32_spill] sm:$0xff] %v13206_v20  ;;  %v9143_v22 = vrot.slane %v123_v27, 1  ;;  %v1842_v40 = vld [vmem:[#allocation2 + $0x4d8] sm:$0xff]  ;;  %v1700_v27 = vld [vmem:[#allocation2 + $0x68] sm:$0xff] }
 0x137   :  { %1518 = vst.msk [vmem:[#allocation2 + $0x178] sm:$0xff] %vm929_vm3, %v1432_v9  ;;  %v1714_v25 = vld [vmem:[#allocation2 + $0xd8] sm:$0xff] }
 0x138   :  { %10463 = vmatmul.mubr.msk.bf16.gmra.mrb[28].mxu1 %vm415_vm1, %v1766_v47  ;;  %v1694_v47 = vld [vmem:[#allocation2 + $0x38] sm:$0xff] }
 0x139   :  { %v1438_v2 = vpop.permute.xlu0 %1437  ;;  %10466 = vmatprep.mubr.msk.bf16.mxu1 %vm415_vm1, %v1771_v35  ;;  %v1745_v35 = vld [vmem:[#allocation2 + $0x1d0] sm:$0xff] }
 0x13a   :  { %v1436_v41 = vpop.permute.xlu1 %1435  ;;  %1521 = vst.msk [vmem:[#allocation2 + $0x1f0] sm:$0xff] %vm929_vm3, %v1438_v2 }
 0x13b   :  { %1520 = vst.msk [vmem:[#allocation2 + $0x1c8] sm:$0xff] %vm929_vm3, %v1436_v41  ;;  %v1690_v41 = vld [vmem:[#allocation2 + $0x18] sm:$0xff] }
 0x13d   :  { %2440 = vmatmul.mubr.bf16.gmra.mrb[88].mxu0 %v1797_v61  ;;  %v1339_v61 = vrot.slane %v1337_v52, 1  ;;  %v1801_v52 = vld [vmem:[#allocation2 + $0x390] sm:$0xff] }
 0x13e   :  { %2447 = vmatprep.mubr.bf16.mxu0 %v1803_v57  ;;  %v1440_v42 = vpop.permute.xlu1 %1439  ;;  %v234_v57 = vmax.f32 %v126_v3, 0.0  ;;  %v1719_v3 = vld [vmem:[#allocation2 + $0x100] sm:$0xff] }
 0x13f   :  { %1522 = vst.msk [vmem:[#allocation2 + $0x218] sm:$0xff] %vm929_vm3, %v1440_v42  ;;  %v1340_v55 = vsel %vm448_vm0, %v1335_v58, %v1339_v61  ;;  %v1724_v61 = vld [vmem:[#allocation2 + $0x128] sm:$0xff] }
 0x140   :  { %1404 = vst.msk [vmem:[#allocation2 + $0x4e8] sm:$0xff] %vm415_vm1, %v1340_v55  ;;  %1601 = vrot.lane.b32.xlu0 %v1340_v55, %s11458_s9  ;;  %10467 = vmatmul.mubr.msk.bf16.gmra.mrb[32].mxu1 %vm415_vm1, %v1776_v11 }
 0x141   :  { %10470 = vmatprep.mubr.msk.bf16.mxu1 %vm415_vm1, %v1781_v37  ;;  %v16303_v37 = vmov 0 }
 0x142   :  { %v1442_v17 = vpop.permute.xlu1 %1441  ;;  %v16304_v37 = vsel %vm13303_vm8, 4294967295, %v16303_v37 }
 0x143   :  { %1523 = vst.msk [vmem:[#allocation2 + $0x240] sm:$0xff] %vm929_vm3, %v1442_v17  ;;  %16305 = vst [vmem:[#allocation22_spill] sm:$0xff] %v16304_v37 }
 0x145   :  { %2448 = vmatmul.mubr.bf16.gmra.mrb[92].mxu0 %v1802_v13  ;;  %v13212_v13 = vsel %vm1026_vm2, %v9141_v14, %v9143_v22 }
 0x146   :  { %2455 = vmatprep.mubr.bf16.mxu0 %v1808_v50  ;;  %16299 = vst [vmem:[#allocation38_spill] sm:$0xff] %v13212_v13  ;;  %v341_v50 = vmul.f32 1.7139589, %v233_v0  ;;  %v1725_v0 = vld [vmem:[#allocation2 + $0x130] sm:$0xff] }
 0x148   :  { %10471 = vmatmul.mubr.msk.bf16.gmra.mrb[36].mxu1 %vm415_vm1, %v1786_v16  ;;  %v3355_v16 = vld [vmem:[#allocation3 + $0x14] sm:$0x1] }
 0x149   :  { %10474 = vmatprep.mubr.msk.bf16.mxu1 %vm415_vm1, %v1791_v24  ;;  %v3248_v24 = vld [vmem:[#allocation3 + $0x18] sm:$0x1] }
 0x14d   :  { %2456 = vmatmul.mubr.bf16.gmra.mrb[96].mxu0 %v1807_v15  ;;  %v342_v15 = vmul.f32 1.7139589, %v234_v57  ;;  %v1730_v57 = vld [vmem:[#allocation2 + $0x158] sm:$0xff] }
 0x14e   :  { %2463 = vmatprep.mubr.bf16.mxu0 %v1813_v26  ;;  %v413_v26 = vpack.c.bf16 %v341_v50, %v340_v49  ;;  %v1811_v49 = vld [vmem:[#allocation2 + $0x3e0] sm:$0xff]  ;;  %v1816_v50 = vld [vmem:[#allocation2 + $0x408] sm:$0xff] }
 0x150   :  { %1572 = vst.msk [vmem:[#allocation2 + $0x4f0] sm:$0xff] %vm415_vm1, %v413_v26  ;;  %v1586_v56 = vshrl.u32 %v413_v26, 16  ;;  %v1648_v2 = vrot.slane %v413_v26, 1 }
 0x155   :  { %2464 = vmatmul.mubr.bf16.gmra.mrb[100].mxu0 %v1812_v7  ;;  %v414_v7 = vpack.c.bf16 %v342_v15, %v342_v15  ;;  %v11193_v15 = vld [vmem:[%s16094_s2] sm:$0xff]  }
 0x156   :  { %2471 = vmatprep.mubr.bf16.mxu0 %v1818_v63  ;;  %v1588_v63 = vshll.u32 %v413_v26, 16  ;;  %v1735_v26 = vld [vmem:[#allocation2 + $0x180] sm:$0xff]  ;;  %10666 = vmatpush1.bf16.msra.mxu1 %v11193_v15 }
 0x157   :  { %v1593_v30 = vshll.u32 %v414_v7, 16  ;;  %10651 = vmatprep.subr.bf16.mxu1 %v16270_v45 }
 0x15d   :  { %2472 = vmatmul.mubr.bf16.gmra.mrb[104].mxu0 %v1817_v1  ;;  %v1590_v1 = vrot.slane %v1588_v63, 1  ;;  %v1734_v63 = vld [vmem:[#allocation2 + $0x178] sm:$0xff] }
 0x15e   :  { %2479 = vmatprep.mubr.bf16.mxu0 %v1823_v36  ;;  %v1595_v36 = vrot.slane %v1593_v30, 1  ;;  %v1740_v30 = vld [vmem:[#allocation2 + $0x1a8] sm:$0xff] }
 0x161   :  { %v1598_v28 = vpop.permute.xlu0 %1597 }
 0x162   :  { %1623 = vst.msk [vmem:[#allocation2 + $0x248] sm:$0xff] %vm929_vm3, %v1598_v28  ;;  %v1695_v28 = vld [vmem:[#allocation2 + $0x40] sm:$0xff] }
 0x165   :  { %2480 = vmatmul.mubr.bf16.gmra.mrb[108].mxu0 %v1822_v4  ;;  %v1649_v4 = vrot.slane %v414_v7, 1 }
 0x166   :  { %2487 = vmatprep.mubr.bf16.mxu0 %v1828_v51  ;;  %v1410_v51 = vrot.slane %v12789_v44, 1  ;;  %v1689_v44 = vld [vmem:[#allocation2 + $0x10] sm:$0xff] }
 0x167   :  { %v1650_v17 = vsel %vm1026_vm2, %v1648_v2, %v1649_v4  ;;  %v1739_v4 = vld [vmem:[#allocation2 + $0x1a0] sm:$0xff] }
 0x168   :  { %1686 = vst.msk [vmem:[#allocation2 + $0x4f8] sm:$0xff] %vm415_vm1, %v1650_v17  ;;  %v1744_v17 = vld [vmem:[#allocation2 + $0x1c8] sm:$0xff] }
 0x16d   :  { %2488 = vmatmul.mubr.bf16.gmra.mrb[112].mxu0 %v1827_v23  ;;  %v1591_v23 = vor.u32 %v1590_v1, %v1586_v56  ;;  %v11195_v56 = vld [vmem:[%s16094_s2 + $0x10] sm:$0xff]   ;;  %v1826_v1 = vld [vmem:[#allocation2 + $0x458] sm:$0xff] }
 0x16e   :  { %2495 = vmatprep.mubr.bf16.mxu0 %v1833_v48  ;;  %v1411_v48 = vrot.slane %v412_v46, 1  ;;  %v1710_v46 = vld [vmem:[#allocation2 + $0xb8] sm:$0xff] }
 0x171   :  { %v1600_v8 = vpop.permute.xlu0 %1599 }
 0x172   :  { %v1444_v31 = vpop.permute.xlu1 %1443  ;;  %1624 = vst.msk [vmem:[#allocation2 + $0x270] sm:$0xff] %vm929_vm3, %v1600_v8 }
 0x173   :  { %1524 = vst.msk [vmem:[#allocation2 + $0x268] sm:$0xff] %vm929_vm3, %v1444_v31 }
 0x175   :  { %2496 = vmatmul.mubr.bf16.gmra.mrb[116].mxu0 %v1832_v19  ;;  %v1446_v9 = vpop.permute.xlu0 %1445  ;;  %v1596_v19 = vsel %vm448_vm0, %v1591_v23, %v1595_v36  ;;  %v11196_v36 = vld [vmem:[%s16094_s2 + $0x18] sm:$0xff]   ;;  %v11198_v23 = vld [vmem:[%s16094_s2 + $0x28] sm:$0xff]   ;;  %vm5816_vm0 = vcmask 1042432  }
 0x176   :  { %2503 = vmatprep.mubr.bf16.mxu0 %v1838_v6  ;;  %1525 = vst.msk [vmem:[#allocation2 + $0x290] sm:$0xff] %vm929_vm3, %v1446_v9  ;;  %v1448_v42 = vpop.permute.xlu1 %1447  ;;  %v1412_v6 = vsel %vm1026_vm2, %v1410_v51, %v1411_v48  ;;  %1603 = vrot.lane.b32.xlu0 %v1596_v19, %s11458_s9  ;;  %v1729_v9 = vld [vmem:[#allocation2 + $0x150] sm:$0xff]  ;;  %v11197_v51 = vld [vmem:[%s16094_s2 + $0x20] sm:$0xff]  }
 0x177   :  { %1526 = vst.msk [vmem:[#allocation2 + $0x2b8] sm:$0xff] %vm929_vm3, %v1448_v42  ;;  %1475 = vrot.lane.b32.xlu1 %v1412_v6, %s11458_s9 }
 0x178   :  { %1685 = vst.msk [vmem:[#allocation2 + $0x4d0] sm:$0xff] %vm415_vm1, %v1412_v6 }
 0x179   :  { %v1450_v10 = vpop.permute.xlu0 %1449 }
 0x17a   :  { %1527 = vst.msk [vmem:[#allocation2 + $0x2e0] sm:$0xff] %vm929_vm3, %v1450_v10  ;;  %v1452_v21 = vpop.permute.xlu1 %1451  ;;  %v16300_v10 = vmov 0 }
 0x17b   :  { %1528 = vst.msk [vmem:[#allocation2 + $0x308] sm:$0xff] %vm929_vm3, %v1452_v21  ;;  %v16301_v10 = vsel %vm13294_vm6, 4294967295, %v16300_v10  ;;  %v1831_v21 = vld [vmem:[#allocation2 + $0x480] sm:$0xff] }
 0x17c   :  { %16302 = vst [vmem:[#allocation37_spill] sm:$0xff] %v16301_v10 }
 0x17d   :  { %2504 = vmatmul.mubr.bf16.gmra.mrb[120].mxu0 %v1837_v29  ;;  %v1454_v14 = vpop.permute.xlu0 %1453  ;;  %v1704_v29 = vld [vmem:[#allocation2 + $0x88] sm:$0xff] }
 0x17e   :  { %2511 = vmatprep.mubr.bf16.mxu0 %v1843_v34  ;;  %1529 = vst.msk [vmem:[#allocation2 + $0x330] sm:$0xff] %vm929_vm3, %v1454_v14  ;;  %v1796_v34 = vld [vmem:[#allocation2 + $0x368] sm:$0xff]  ;;  %v1456_v31 = vpop.permute.xlu1 %1455  ;;  %v11200_v14 = vld [vmem:[%s16094_s2 + $0x38] sm:$0xff]  }
 0x17f   :  { %1530 = vst.msk [vmem:[#allocation2 + $0x358] sm:$0xff] %vm929_vm3, %v1456_v31  ;;  %10475 = vmatmul.mubr.msk.bf16.gmra.mrb[40].mxu1 %vm415_vm1, %v1796_v34  ;;  %v11201_v31 = vld [vmem:[%s16094_s2 + $0x40] sm:$0xff]  }
 0x180   :  { %10478 = vmatprep.mubr.msk.bf16.mxu1 %vm415_vm1, %v1801_v52  ;;  %v11202_v52 = vld [vmem:[%s16094_s2 + $0x48] sm:$0xff]  }
 0x181   :  { %v1458_v8 = vpop.permute.xlu0 %1457 }
 0x182   :  { %1531 = vst.msk [vmem:[#allocation2 + $0x380] sm:$0xff] %vm929_vm3, %v1458_v8  ;;  %v1460_v22 = vpop.permute.xlu1 %1459 }
 0x183   :  { %1532 = vst.msk [vmem:[#allocation2 + $0x3a8] sm:$0xff] %vm929_vm3, %v1460_v22 }
 0x185   :  { %2512 = vmatmul.mubr.bf16.gmra.mrb[124].mxu0 %v1842_v40  ;;  %v1462_v58 = vpop.permute.xlu0 %1461  ;;  %v11194_v40 = vld [vmem:[%s16094_s2 + $0x8] sm:$0xff]  }
 0x186   :  { %2552 = vmatprep.mubr.bf16.mxu0 %v1690_v41  ;;  %1533 = vst.msk [vmem:[#allocation2 + $0x3d0] sm:$0xff] %vm929_vm3, %v1462_v58  ;;  %v1464_v55 = vpop.permute.xlu1 %1463  ;;  %10667 = vmatpush1.bf16.msra.mxu1 %v11194_v40  ;;  %v1821_v41 = vld [vmem:[#allocation2 + $0x430] sm:$0xff] }
 0x187   :  { %10479 = vmatmul.mubr.msk.bf16.gmra.mrb[44].mxu1 %vm415_vm1, %v1806_v43  ;;  %1534 = vst.msk [vmem:[#allocation2 + $0x3f8] sm:$0xff] %vm929_vm3, %v1464_v55  ;;  %10652 = vmatprep.subr.bf16.mxu1 %v16270_v45  ;;  %v1754_v43 = vld [vmem:[#allocation2 + $0x218] sm:$0xff]  ;;  %v3361_v55 = vld [vmem:[#allocation3 + $0x2c] sm:$0x1] }
 0x188   :  { %10482 = vmatprep.mubr.msk.bf16.mxu1 %vm415_vm1, %v1811_v49  ;;  %v3251_v49 = vld [vmem:[#allocation3 + $0x24] sm:$0x1] }
 0x189   :  { %v1466_v7 = vpop.permute.xlu0 %1465 }
 0x18a   :  { %1535 = vst.msk [vmem:[#allocation2 + $0x420] sm:$0xff] %vm929_vm3, %v1466_v7  ;;  %v1468_v2 = vpop.permute.xlu1 %1467  ;;  %10668 = vmatpush1.bf16.msra.mxu1 %v11195_v56  ;;  %v11204_v7 = vld [vmem:[%s16094_s2 + $0x58] sm:$0xff]  }
 0x18b   :  { %1536 = vst.msk [vmem:[#allocation2 + $0x448] sm:$0xff] %vm929_vm3, %v1468_v2  ;;  %10653 = vmatprep.subr.bf16.mxu1 %v16270_v45  ;;  %v11205_v2 = vld [vmem:[%s16094_s2 + $0x60] sm:$0xff]  }
 0x18d   :  { %2553 = vmatmul.mubr.bf16.vlgmr.msra.gmra.mrb[0].mxu0 %v1689_v44  ;;  %v1470_v6 = vpop.permute.xlu0 %1469  ;;  %v11199_v44 = vld [vmem:[%s16094_s2 + $0x30] sm:$0xff]  }
 0x18e   :  { %2560 = vmatprep.mubr.bf16.mxu0 %v1695_v28  ;;  %7444 = vmatpush1.bf16.msra.mxu0 %v11193_v15  ;;  %v1750_v28 = vld [vmem:[#allocation2 + $0x1f8] sm:$0xff]  ;;  %1537 = vst.msk [vmem:[#allocation2 + $0x470] sm:$0xff] %vm929_vm3, %v1470_v6  ;;  %v1472_v34 = vpop.permute.xlu1 %1471  ;;  %v3242_v15 = vld [vmem:[#allocation3] sm:$0x1] }
 0x18f   :  { %10483 = vmatmul.mubr.msk.bf16.gmra.mrb[48].mxu1 %vm415_vm1, %v1816_v50  ;;  %7445 = vmatprep.subr.bf16.mxu0 %v16270_v45  ;;  %1538 = vst.msk [vmem:[#allocation2 + $0x498] sm:$0xff] %vm929_vm3, %v1472_v34  ;;  %v3252_v50 = vsel %vm13294_vm6, 0, %v3251_v49  ;;  %v1769_v34 = vld [vmem:[#allocation2 + $0x290] sm:$0xff] }
 0x190   :  { %10486 = vmatprep.mubr.msk.bf16.mxu1 %vm415_vm1, %v1821_v41  ;;  %10669 = vmatpush1.bf16.msra.mxu1 %v11196_v36  ;;  %3253 = vst [vmem:[#allocation3 + $0x24] sm:$0x1] %v3252_v50  ;;  %v1779_v50 = vld [vmem:[#allocation2 + $0x2e0] sm:$0xff] }
 0x191   :  { %10654 = vmatprep.subr.bf16.mxu1 %v16270_v45 }
 0x192   :  { %7446 = vmatpush1.bf16.msra.mxu0 %v11194_v40  ;;  %v1846_v40 = vld [vmem:[#allocation2 + $0x4f8] sm:$0xff] }
 0x193   :  { %7447 = vmatprep.subr.bf16.mxu0 %v16270_v45 }
 0x194   :  { %10670 = vmatpush1.bf16.msra.mxu1 %v11197_v51 }
 0x195   :  { %2561 = vmatmul.mubr.bf16.gmra.mrb[4].mxu0 %v1694_v47  ;;  %10655 = vmatprep.subr.bf16.mxu1 %v16270_v45  ;;  %v3245_v47 = vld [vmem:[#allocation3 + $0xc] sm:$0x1] }
 0x196   :  { %2568 = vmatprep.mubr.bf16.mxu0 %v1700_v27  ;;  %7448 = vmatpush1.bf16.msra.mxu0 %v11195_v56  ;;  %v3246_v27 = vsel %vm13294_vm6, 0, %v3245_v47  ;;  %v1759_v56 = vld [vmem:[#allocation2 + $0x240] sm:$0xff]  ;;  %v1764_v47 = vld [vmem:[#allocation2 + $0x268] sm:$0xff] }
 0x197   :  { %7449 = vmatprep.subr.bf16.mxu0 %v16270_v45  ;;  %10487 = vmatmul.mubr.msk.bf16.gmra.mrb[52].mxu1 %vm415_vm1, %v1826_v1  ;;  %3247 = vst [vmem:[#allocation3 + $0xc] sm:$0x1] %v3246_v27  ;;  %v3352_v1 = vld [vmem:[#allocation3 + $0x8] sm:$0x1] }
 0x198   :  { %10671 = vmatpush1.bf16.msra.mxu1 %v11198_v23  ;;  %10490 = vmatprep.mubr.msk.bf16.mxu1 %vm415_vm1, %v1831_v21  ;;  %v1770_v21 = vld [vmem:[#allocation2 + $0x298] sm:$0xff] }
 0x199   :  { %10656 = vmatprep.subr.bf16.mxu1 %v16270_v45 }
 0x19a   :  { %7450 = vmatpush1.bf16.msra.mxu0 %v11196_v36 }
 0x19b   :  { %7451 = vmatprep.subr.bf16.mxu0 %v16270_v45 }
 0x19c   :  { %10672 = vmatpush1.bf16.msra.mxu1 %v11199_v44 }
 0x19d   :  { %2569 = vmatmul.mubr.bf16.gmra.mrb[8].mxu0 %v1699_v62  ;;  %v3356_v62 = vsel %vm13303_vm8, 0, %v3355_v16  ;;  %10657 = vmatprep.subr.bf16.mxu1 %v16270_v45 }
 0x19e   :  { %2576 = vmatprep.mubr.bf16.mxu0 %v1705_v59  ;;  %7452 = vmatpush1.bf16.msra.mxu0 %v11197_v51  ;;  %v1836_v59 = vld [vmem:[#allocation2 + $0x4a8] sm:$0xff]  ;;  %3357 = vst [vmem:[#allocation3 + $0x14] sm:$0x1] %v3356_v62  ;;  %v3254_v51 = vld [vmem:[#allocation3 + $0x30] sm:$0x1] }
 0x19f   :  { %7453 = vmatprep.subr.bf16.mxu0 %v16270_v45  ;;  %10491 = vmatmul.mubr.msk.bf16.gmra.mrb[56].mxu1 %vm415_vm1, %v1836_v59  ;;  %v11207_v62 = vld [vmem:[%s16094_s2 + $0x70] sm:$0xff]   ;;  %v3257_v59 = vld [vmem:[#allocation3 + $0x3c] sm:$0x1] }
 0x1a0   :  { %10673 = vmatpush1.bf16.msra.mxu1 %v11200_v14 }
 0x1a1   :  { %10658 = vmatprep.subr.bf16.mxu1 %v16270_v45 }
 0x1a2   :  { %7454 = vmatpush1.bf16.msra.mxu0 %v11198_v23  ;;  %v3364_v23 = vld [vmem:[#allocation3 + $0x38] sm:$0x1] }
 0x1a3   :  { %7455 = vmatprep.subr.bf16.mxu0 %v16270_v45  ;;  %v3365_v6 = vsel %vm13303_vm8, 0, %v3364_v23  ;;  %v1795_v23 = vld [vmem:[#allocation2 + $0x360] sm:$0xff] }
 0x1a4   :  { %10674 = vmatpush1.bf16.msra.mxu1 %v11201_v31  ;;  %3366 = vst [vmem:[#allocation3 + $0x38] sm:$0x1] %v3365_v6 }
 0x1a5   :  { %2577 = vmatmul.mubr.bf16.gmra.mrb[12].mxu0 %v1704_v29  ;;  %v1749_v29 = vld [vmem:[#allocation2 + $0x1f0] sm:$0xff]  ;;  %10659 = vmatprep.subr.bf16.mxu1 %v16270_v45 }
 0x1a6   :  { %2584 = vmatprep.mubr.bf16.mxu0 %v1710_v46  ;;  %7456 = vmatpush1.bf16.msra.mxu0 %v11199_v44  ;;  %v1755_v46 = vld [vmem:[#allocation2 + $0x220] sm:$0xff] }
 0x1a7   :  { %7457 = vmatprep.subr.bf16.mxu0 %v16270_v45 }
 0x1a8   :  { %10675 = vmatpush1.bf16.msra.mxu1 %v11202_v52 }
 0x1a9   :  { %10660 = vmatprep.subr.bf16.mxu1 %v16270_v45 }
 0x1aa   :  { %7458 = vmatpush1.bf16.msra.mxu0 %v11200_v14  ;;  %v3258_v14 = vsel %vm13294_vm6, 0, %v3257_v59  ;;  %v3272_v59 = vld [vmem:[#allocation3 + $0x78] sm:$0x1] }
 0x1ab   :  { %7459 = vmatprep.subr.bf16.mxu0 %v16270_v45  ;;  %3259 = vst [vmem:[#allocation3 + $0x3c] sm:$0x1] %v3258_v14  ;;  %v3273_v14 = vsel %vm13294_vm6, 0, %v3272_v59 }
 0x1ac   :  { %3274 = vst [vmem:[#allocation3 + $0x78] sm:$0x1] %v3273_v14  ;;  %v1819_v14 = vld [vmem:[#allocation2 + $0x420] sm:$0xff] }
 0x1ad   :  { %2585 = vmatmul.mubr.bf16.gmra.mrb[16].mxu0 %v1709_v32  ;;  %v3249_v32 = vsel %vm13294_vm6, 0, %v3248_v24  ;;  %v11208_v24 = vld [vmem:[%s16094_s2 + $0x78] sm:$0xff]  }
 0x1ae   :  { %2592 = vmatprep.mubr.bf16.mxu0 %v1715_v60  ;;  %3250 = vst [vmem:[#allocation3 + $0x18] sm:$0x1] %v3249_v32  ;;  %7460 = vmatpush1.bf16.msra.mxu0 %v11201_v31  ;;  %v3358_v60 = vld [vmem:[#allocation3 + $0x20] sm:$0x1]  ;;  %v3260_v32 = vld [vmem:[#allocation3 + $0x48] sm:$0x1] }
 0x1af   :  { %7461 = vmatprep.subr.bf16.mxu0 %v16270_v45  ;;  %v1775_v31 = vld [vmem:[#allocation2 + $0x2c0] sm:$0xff] }
 0x1b2   :  { %7462 = vmatpush1.bf16.msra.mxu0 %v11202_v52  ;;  %v1602_v58 = vpop.permute.xlu0 %1601 }
 0x1b3   :  { %7463 = vmatprep.subr.bf16.mxu0 %v16270_v45  ;;  %1639 = vst.msk [vmem:[#allocation2 + $0x4c8] sm:$0xff] %vm929_vm3, %v1602_v58 }
 0x1b5   :  { %2593 = vmatmul.mubr.bf16.gmra.mrb[20].mxu0 %v1714_v25  ;;  %v3359_v25 = vsel %vm13303_vm8, 0, %v3358_v60  ;;  %v3261_v60 = vsel %vm13294_vm6, 0, %v3260_v32  ;;  %v3275_v32 = vld [vmem:[#allocation3 + $0x84] sm:$0x1] }
 0x1b6   :  { %2600 = vmatprep.mubr.bf16.mxu0 %v1720_v18  ;;  %3360 = vst [vmem:[#allocation3 + $0x20] sm:$0x1] %v3359_v25  ;;  %3262 = vst [vmem:[#allocation3 + $0x48] sm:$0x1] %v3261_v60  ;;  %v3370_v25 = vld [vmem:[#allocation3 + $0x50] sm:$0x1] }
 0x1b7   :  { %v3371_v52 = vsel %vm13303_vm8, 0, %v3370_v25  ;;  %v1805_v60 = vld [vmem:[#allocation2 + $0x3b0] sm:$0xff] }
 0x1b8   :  { %3372 = vst [vmem:[#allocation3 + $0x50] sm:$0x1] %v3371_v52  ;;  %v3276_v52 = vsel %vm13294_vm6, 0, %v3275_v32  ;;  %v3394_v32 = vld [vmem:[#allocation3 + $0xb0] sm:$0x1] }
 0x1b9   :  { %3277 = vst [vmem:[#allocation3 + $0x84] sm:$0x1] %v3276_v52 }
 0x1bd   :  { %2601 = vmatmul.mubr.bf16.gmra.mrb[24].mxu0 %v1719_v3  ;;  %v1760_v3 = vld [vmem:[#allocation2 + $0x248] sm:$0xff] }
 0x1be   :  { %2608 = vmatprep.mubr.bf16.mxu0 %v1725_v0 }
 0x1c5   :  { %2609 = vmatmul.mubr.bf16.gmra.mrb[28].mxu0 %v1724_v61  ;;  %v1474_v61 = vpop.permute.xlu1 %1473 }
 0x1c6   :  { %2616 = vmatprep.mubr.bf16.mxu0 %v1730_v57  ;;  %v11203_v57 = vld [vmem:[%s16094_s2 + $0x50] sm:$0xff]   ;;  %1539 = vst.msk [vmem:[#allocation2 + $0x4c0] sm:$0xff] %vm929_vm3, %v1474_v61 }
 0x1c7   :  { %7464 = vmatpush1.bf16.msra.mxu0 %v11203_v57  ;;  %10676 = vmatpush1.bf16.msra.mxu1 %v11203_v57 }
 0x1c8   :  { %7465 = vmatprep.subr.bf16.mxu0 %v16270_v45  ;;  %10661 = vmatprep.subr.bf16.mxu1 %v16270_v45 }
 0x1cb   :  { %7466 = vmatpush1.bf16.msra.mxu0 %v11204_v7  ;;  %10677 = vmatpush1.bf16.msra.mxu1 %v11204_v7  ;;  %v1784_v7 = vld [vmem:[#allocation2 + $0x308] sm:$0xff] }
 0x1cc   :  { %7467 = vmatprep.subr.bf16.mxu0 %v16270_v45  ;;  %10662 = vmatprep.subr.bf16.mxu1 %v16270_v45 }
 0x1cd   :  { %2617 = vmatmul.mubr.bf16.gmra.mrb[32].mxu0 %v1729_v9  ;;  %v1841_v9 = vld [vmem:[#allocation2 + $0x4d0] sm:$0xff] }
 0x1ce   :  { %2624 = vmatprep.mubr.bf16.mxu0 %v1735_v26  ;;  %v3362_v26 = vsel %vm13303_vm8, 0, %v3361_v55  ;;  %10494 = vmatprep.mubr.msk.bf16.mxu1 %vm415_vm1, %v1841_v9  ;;  %v3263_v55 = vld [vmem:[#allocation3 + $0x54] sm:$0x1] }
 0x1cf   :  { %3363 = vst [vmem:[#allocation3 + $0x2c] sm:$0x1] %v3362_v26  ;;  %10495 = vmatmul.mubr.msk.bf16.gmra.mrb[60].mxu1 %vm415_vm1, %v1846_v40  ;;  %7468 = vmatpush1.bf16.msra.mxu0 %v11205_v2  ;;  %v3264_v9 = vsel %vm13294_vm6, 0, %v3263_v55  ;;  %v3373_v26 = vld [vmem:[#allocation3 + $0x5c] sm:$0x1] }
 0x1d0   :  { %7469 = vmatprep.subr.bf16.mxu0 %v16270_v45  ;;  %10678 = vmatpush1.bf16.msra.mxu1 %v11205_v2  ;;  %3265 = vst [vmem:[#allocation3 + $0x54] sm:$0x1] %v3264_v9  ;;  %v3374_v40 = vsel %vm13303_vm8, 0, %v3373_v26  ;;  %v3278_v26 = vld [vmem:[#allocation3 + $0x90] sm:$0x1] }
 0x1d1   :  { %10663 = vmatprep.subr.bf16.mxu1 %v16270_v45  ;;  %3375 = vst [vmem:[#allocation3 + $0x5c] sm:$0x1] %v3374_v40  ;;  %v3279_v40 = vsel %vm13294_vm6, 0, %v3278_v26  ;;  %v13472_v26 = vld [vmem:[#allocation3 + $0x4] sm:$0xf] }
 0x1d2   :  { %3280 = vst [vmem:[#allocation3 + $0x90] sm:$0x1] %v3279_v40 }
 0x1d3   :  { %v13274_v11 = vpop.f32.mrb[0].mxu1 }
 0x1d4   :  { %v13278_v42 = vpop.f32.mrb[1].mxu1 }
 0x1d5   :  { %2625 = vmatmul.mubr.bf16.gmra.mrb[36].mxu0 %v1734_v63  ;;  %v13283_v48 = vpop.f32.mrb[2].mxu1  ;;  %v3243_v63 = vsel %vm13294_vm6, 0, %v3242_v15  ;;  %v1785_v15 = vld [vmem:[#allocation2 + $0x310] sm:$0xff] }
 0x1d6   :  { %2632 = vmatprep.mubr.bf16.mxu0 %v1740_v30  ;;  %v13285_v19 = vpop.f32.mrb[3].mxu1  ;;  %3244 = vst [vmem:[#allocation3] sm:$0x1] %v3243_v63  ;;  %v1765_v30 = vld [vmem:[#allocation2 + $0x270] sm:$0xff]  ;;  %v3266_v63 = vld [vmem:[#allocation3 + $0x60] sm:$0x1] }
 0x1d7   :  { %v4315_v5 = vld [vmem:[#allocation3 + $0x2c] sm:$0x1] }
 0x1db   :  { %v13325_v8 = vpop.f32.mrb[4].mxu1 }
 0x1dc   :  { %v13330_v18 = vpop.f32.mrb[5].mxu1 }
 0x1dd   :  { %2633 = vmatmul.mubr.bf16.gmra.mrb[40].mxu0 %v1739_v4  ;;  %v13335_v22 = vpop.f32.mrb[6].mxu1  ;;  %v3353_v4 = vsel %vm13303_vm8, 0, %v3352_v1 }
 0x1de   :  { %2640 = vmatprep.mubr.bf16.mxu0 %v1745_v35  ;;  %v13337_v0 = vpop.f32.mrb[7].mxu1  ;;  %3354 = vst [vmem:[#allocation3 + $0x8] sm:$0x1] %v3353_v4  ;;  %v3255_v35 = vsel %vm13294_vm6, 0, %v3254_v51  ;;  %v3269_v4 = vld [vmem:[#allocation3 + $0x6c] sm:$0x1] }
 0x1df   :  { %3256 = vst [vmem:[#allocation3 + $0x30] sm:$0x1] %v3255_v35  ;;  %v3270_v35 = vsel %vm13294_vm6, 0, %v3269_v4 }
 0x1e0   :  { %3271 = vst [vmem:[#allocation3 + $0x6c] sm:$0x1] %v3270_v35 }
 0x1e5   :  { %2641 = vmatmul.mubr.bf16.gmra.mrb[44].mxu0 %v1744_v17  ;;  %v13370_v17 = vpop.f32.mrb[8].mxu1 }
 0x1e6   :  { %2648 = vmatprep.mubr.bf16.mxu0 %v1750_v28  ;;  %v13376_v44 = vpop.f32.mrb[9].mxu1  ;;  %v11206_v28 = vld [vmem:[%s16094_s2 + $0x68] sm:$0xff]  }
 0x1e7   :  { %v13381_v27 = vpop.f32.mrb[10].mxu1  ;;  %7470 = vmatpush1.bf16.msra.mxu0 %v11206_v28  ;;  %10679 = vmatpush1.bf16.msra.mxu1 %v11206_v28  ;;  %v3379_v28 = vld [vmem:[#allocation3 + $0x74] sm:$0x1] }
 0x1e8   :  { %v1604_v41 = vpop.permute.xlu0 %1603  ;;  %v13383_v16 = vpop.f32.mrb[11].mxu1  ;;  %7471 = vmatprep.subr.bf16.mxu0 %v16270_v45  ;;  %10664 = vmatprep.subr.bf16.mxu1 %v16270_v45 }
 0x1e9   :  { %1640 = vst.msk [vmem:[#allocation2 + $0x4f0] sm:$0xff] %vm929_vm3, %v1604_v41  ;;  %v1476_v36 = vpop.permute.xlu1 %1475  ;;  %v3376_v41 = vld [vmem:[#allocation3 + $0x68] sm:$0x1] }
 0x1ea   :  { %1540 = vst.msk [vmem:[#allocation2 + $0x4e8] sm:$0xff] %vm929_vm3, %v1476_v36  ;;  %v3377_v1 = vsel %vm13303_vm8, 0, %v3376_v41  ;;  %v1789_v36 = vld [vmem:[#allocation2 + $0x330] sm:$0xff]  ;;  %vm5817_vm3 = vcmask 1046532  }
 0x1eb   :  { %7472 = vmatpush1.bf16.msra.mxu0 %v11207_v62  ;;  %10680 = vmatpush1.bf16.msra.mxu1 %v11207_v62  ;;  %v13405_v58 = vpop.f32.mrb[12].mxu1  ;;  %3378 = vst [vmem:[#allocation3 + $0x68] sm:$0x1] %v3377_v1  ;;  %v3380_v62 = vsel %vm13303_vm8, 0, %v3379_v28  ;;  %v3281_v1 = vld [vmem:[#allocation3 + $0x9c] sm:$0x1]  ;;  %vm14323_vm4 = vmor %vm5816_vm0, %vm5817_vm3 }
 0x1ec   :  { %7473 = vmatprep.subr.bf16.mxu0 %v16270_v45  ;;  %10665 = vmatprep.subr.bf16.mxu1 %v16270_v45  ;;  %v13407_v61 = vpop.f32.mrb[13].mxu1  ;;  %3381 = vst [vmem:[#allocation3 + $0x74] sm:$0x1] %v3380_v62  ;;  %v3282_v35 = vsel %vm13294_vm6, 0, %v3281_v1 }
 0x1ed   :  { %2649 = vmatmul.mubr.bf16.gmra.mrb[48].mxu0 %v1749_v29  ;;  %v3367_v29 = vld [vmem:[#allocation3 + $0x44] sm:$0x1]  ;;  %v13409_v57 = vpop.f32.mrb[14].mxu1  ;;  %3283 = vst [vmem:[#allocation3 + $0x9c] sm:$0x1] %v3282_v35 }
 0x1ee   :  { %2656 = vmatprep.mubr.bf16.mxu0 %v1755_v46  ;;  %v3368_v46 = vsel %vm13303_vm8, 0, %v3367_v29  ;;  %v13411_v49 = vpop.f32.mrb[15].mxu1  ;;  %v1800_v29 = vld [vmem:[#allocation2 + $0x388] sm:$0xff] }
 0x1ef   :  { %3369 = vst [vmem:[#allocation3 + $0x44] sm:$0x1] %v3368_v46  ;;  %7474 = vmatpush1.bf16.msra.mxu0 %v11208_v24  ;;  %10681 = vmatpush1.bf16.msra.mxu1 %v11208_v24  ;;  %v3382_v46 = vld [vmem:[#allocation3 + $0x80] sm:$0x1] }
 0x1f0   :  { %7732 = vmatprep.subr.bf16.mxu1 %v16270_v45  ;;  %v1799_v24 = vld [vmem:[#allocation2 + $0x380] sm:$0xff] }
 0x1f3   :  { %v13421_v2 = vpop.f32.mrb[16].mxu1 }
 0x1f4   :  { %v13423_v51 = vpop.f32.mrb[17].mxu1 }
 0x1f5   :  { %2657 = vmatmul.mubr.bf16.gmra.mrb[52].mxu0 %v1754_v43  ;;  %v1774_v43 = vld [vmem:[#allocation2 + $0x2b8] sm:$0xff]  ;;  %v13427_v6 = vpop.f32.mrb[18].mxu1 }
 0x1f6   :  { %2664 = vmatprep.mubr.bf16.mxu0 %v1760_v3  ;;  %v1780_v3 = vld [vmem:[#allocation2 + $0x2e8] sm:$0xff] }
 0x1fd   :  { %2665 = vmatmul.mubr.bf16.gmra.mrb[56].mxu0 %v1759_v56  ;;  %v3267_v56 = vsel %vm13294_vm6, 0, %v3266_v63  ;;  %v3388_v63 = vld [vmem:[#allocation3 + $0x98] sm:$0x1] }
 0x1fe   :  { %2672 = vmatprep.mubr.bf16.mxu0 %v1765_v30  ;;  %3268 = vst [vmem:[#allocation3 + $0x60] sm:$0x1] %v3267_v56  ;;  %v1790_v30 = vld [vmem:[#allocation2 + $0x338] sm:$0xff]  ;;  %v1815_v56 = vld [vmem:[#allocation2 + $0x400] sm:$0xff] }
 0x205   :  { %2673 = vmatmul.mubr.bf16.gmra.mrb[60].mxu0 %v1764_v47  ;;  %v1794_v47 = vld [vmem:[#allocation2 + $0x358] sm:$0xff] }
 0x206   :  { %2680 = vmatprep.mubr.bf16.mxu0 %v1770_v21  ;;  %v13429_v21 = vpop.f32.mrb[19].mxu1 }
 0x20d   :  { %2681 = vmatmul.mubr.bf16.gmra.mrb[64].mxu0 %v1769_v34  ;;  %v3383_v34 = vsel %vm13303_vm8, 0, %v3382_v46 }
 0x20e   :  { %2688 = vmatprep.mubr.bf16.mxu0 %v1775_v31  ;;  %3384 = vst [vmem:[#allocation3 + $0x80] sm:$0x1] %v3383_v34  ;;  %v13437_v31 = vpop.f32.mrb[20].mxu1 }
 0x20f   :  { %v13439_v25 = vpop.f32.mrb[21].mxu1 }
 0x215   :  { %2689 = vmatmul.mubr.bf16.gmra.mrb[68].mxu0 %v1774_v43  ;;  %v1804_v43 = vld [vmem:[#allocation2 + $0x3a8] sm:$0xff] }
 0x216   :  { %2696 = vmatprep.mubr.bf16.mxu0 %v1780_v3  ;;  %v13443_v3 = vpop.f32.mrb[22].mxu1 }
 0x217   :  { %v13445_v55 = vpop.f32.mrb[23].mxu1 }
 0x218   :  { %v13453_v41 = vpop.f32.mrb[24].mxu1 }
 0x219   :  { %v13455_v4 = vpop.f32.mrb[25].mxu1 }
 0x21a   :  { %v13459_v28 = vpop.f32.mrb[26].mxu1 }
 0x21b   :  { %v13461_v62 = vpop.f32.mrb[27].mxu1 }
 0x21d   :  { %2697 = vmatmul.mubr.bf16.gmra.mrb[72].mxu0 %v1779_v50  ;;  %v3385_v50 = vld [vmem:[#allocation3 + $0x8c] sm:$0x1] }
 0x21e   :  { %2704 = vmatprep.mubr.bf16.mxu0 %v1785_v15  ;;  %v3386_v9 = vsel %vm13303_vm8, 0, %v3385_v50  ;;  %v1810_v15 = vld [vmem:[#allocation2 + $0x3d8] sm:$0xff]  ;;  %v3395_v50 = vsel %vm13303_vm8, 0, %v3394_v32 }
 0x21f   :  { %3387 = vst [vmem:[#allocation3 + $0x8c] sm:$0x1] %v3386_v9  ;;  %3396 = vst [vmem:[#allocation3 + $0xb0] sm:$0x1] %v3395_v50 }
 0x225   :  { %2705 = vmatmul.mubr.bf16.gmra.mrb[76].mxu0 %v1784_v7  ;;  %v1809_v7 = vld [vmem:[#allocation2 + $0x3d0] sm:$0xff] }
 0x226   :  { %2712 = vmatprep.mubr.bf16.mxu0 %v1790_v30  ;;  %v3389_v30 = vsel %vm13303_vm8, 0, %v3388_v63 }
 0x227   :  { %3390 = vst [vmem:[#allocation3 + $0x98] sm:$0x1] %v3389_v30  ;;  %v3287_v30 = vld [vmem:[#allocation3 + $0xb4] sm:$0x1] }
 0x228   :  { %v3288_v35 = vsel %vm13294_vm6, 0, %v3287_v30 }
 0x229   :  { %3289 = vst [vmem:[#allocation3 + $0xb4] sm:$0x1] %v3288_v35 }
 0x22d   :  { %2713 = vmatmul.mubr.bf16.gmra.mrb[80].mxu0 %v1789_v36  ;;  %v1814_v36 = vld [vmem:[#allocation2 + $0x3f8] sm:$0xff] }
 0x22e   :  { %2720 = vmatprep.mubr.bf16.mxu0 %v1795_v23  ;;  %v1820_v23 = vld [vmem:[#allocation2 + $0x428] sm:$0xff] }
 0x235   :  { %2721 = vmatmul.mubr.bf16.gmra.mrb[84].mxu0 %v1794_v47  ;;  %v3391_v47 = vld [vmem:[#allocation3 + $0xa4] sm:$0x1] }
 0x236   :  { %2728 = vmatprep.mubr.bf16.mxu0 %v1800_v29  ;;  %v3392_v59 = vsel %vm13303_vm8, 0, %v3391_v47  ;;  %v3284_v29 = vld [vmem:[#allocation3 + $0xa8] sm:$0x1] }
 0x237   :  { %3393 = vst [vmem:[#allocation3 + $0xa4] sm:$0x1] %v3392_v59  ;;  %v3285_v46 = vsel %vm13294_vm6, 0, %v3284_v29  ;;  %v1830_v59 = vld [vmem:[#allocation2 + $0x478] sm:$0xff] }
 0x238   :  { %3286 = vst [vmem:[#allocation3 + $0xa8] sm:$0x1] %v3285_v46 }
 0x23d   :  { %2729 = vmatmul.mubr.bf16.gmra.mrb[88].mxu0 %v1799_v24  ;;  %v1825_v24 = vld [vmem:[#allocation2 + $0x450] sm:$0xff] }
 0x23e   :  { %2736 = vmatprep.mubr.bf16.mxu0 %v1805_v60 }
 0x245   :  { %2737 = vmatmul.mubr.bf16.gmra.mrb[92].mxu0 %v1804_v43  ;;  %v13468_v43 = vld [vmem:[#allocation3] sm:$0xf] }
 0x246   :  { %2744 = vmatprep.mubr.bf16.mxu0 %v1810_v15  ;;  %v1824_v15 = vld [vmem:[#allocation2 + $0x448] sm:$0xff]  ;;  %v4860_v1 = vshll.u32 %v13468_v43, 16 }
 0x24d   :  { %2745 = vmatmul.mubr.bf16.gmra.mrb[96].mxu0 %v1809_v7 }
 0x24e   :  { %2752 = vmatprep.mubr.bf16.mxu0 %v1815_v56  ;;  %v13475_v56 = vpop.f32.mrb[28].mxu1 }
 0x255   :  { %2753 = vmatmul.mubr.bf16.gmra.mrb[100].mxu0 %v1814_v36  ;;  %v13479_v36 = vpop.f32.mrb[29].mxu1 }
 0x256   :  { %2760 = vmatprep.mubr.bf16.mxu0 %v1820_v23  ;;  %v13488_v35 = vpop.f32.mrb[30].mxu1 }
 0x25d   :  { %2761 = vmatmul.mubr.bf16.gmra.mrb[104].mxu0 %v1819_v14  ;;  %v4870_v14 = vshrl.u32 %v13472_v26, 16 }
 0x25e   :  { %2768 = vmatprep.mubr.bf16.mxu0 %v1825_v24 }
 0x25f   :  { %v4872_v30 = vrot.slane %v4870_v14, 4  ;;  %v1835_v14 = vld [vmem:[#allocation2 + $0x4a0] sm:$0xff] }
 0x260   :  { %v2554_v34 = vpop.f32.mrb[0].mxu0 }
 0x261   :  { %v2844_v60 = vadd.f32 %v13278_v42, %v2554_v34  ;;  %v2556_v52 = vpop.f32.mrb[1].mxu0  ;;  %v4857_v42 = vshrl.u32 %v13468_v43, 16  ;;  %v1829_v34 = vld [vmem:[#allocation2 + $0x470] sm:$0xff] }
 0x262   :  { %v2557_v9 = vpop.f32.mrb[2].mxu0 }
 0x263   :  { %v3098_v40 = vmax.f32 %v2844_v60, 0.0  ;;  %v2847_v7 = vadd.f32 %v13285_v19, %v2557_v9  ;;  %v2559_v63 = vpop.f32.mrb[3].mxu0  ;;  %v4866_v19 = vshll.u32 %v13472_v26, 16  ;;  %v4859_v32 = vrot.slane %v4857_v42, 4 }
 0x264   :  { %v4862_v60 = vrot.slane %v4860_v1, 5  ;;  %v13490_v1 = vpop.f32.mrb[31].mxu1 }
 0x265   :  { %v3162_v23 = vmul.f32 1.7139589, %v3098_v40  ;;  %v3099_v47 = vmax.f32 %v2847_v7, 0.0  ;;  %2769 = vmatmul.mubr.bf16.gmra.mrb[108].mxu0 %v1824_v15  ;;  %v4523_v40 = vld [vmem:[#allocation3 + $0x8] sm:$0x1]  ;;  %v13486_v63 = vrot.slane %v4866_v19, 5 }
 0x266   :  { %2776 = vmatprep.mubr.bf16.mxu0 %v1830_v59 }
 0x267   :  { %v10250_v29 = vpack.c.bf16 %v3162_v23, %v3162_v23  ;;  %v3163_v46 = vmul.f32 1.7139589, %v3099_v47  ;;  %v3397_v23 = vld [vmem:[#allocation3 + $0xbc] sm:$0x1] }
 0x268   :  { %v2562_v24 = vpop.f32.mrb[4].mxu0 }
 0x269   :  { %v3655_v52 = vshrl.u32 %v10250_v29, 16  ;;  %v10251_v50 = vpack.c.bf16 %v3163_v46, %v3163_v46  ;;  %v2852_v9 = vadd.f32 %v13274_v11, %v2562_v24  ;;  %v2564_v15 = vpop.f32.mrb[5].mxu0  ;;  %v3658_v59 = vshll.u32 %v10250_v29, 16  ;;  %v4297_v46 = vld [vmem:[#allocation3 + $0xc] sm:$0xf] }
 0x26a   :  { %v2565_v7 = vpop.f32.mrb[6].mxu0  ;;  %v4863_v24 = vor.u32 %v4862_v60, %v4859_v32  ;;  %v3398_v29 = vsel %vm13303_vm8, 0, %v3397_v23  ;;  %v4873_v32 = vor.u32 %v4872_v30, %v13486_v63  ;;  %v4876_v60 = vshll.u32 %v4523_v40, 16 }
 0x26b   :  { %v3657_v47 = vrot.slane %v3655_v52, 7  ;;  %v3663_v33 = vshrl.u32 %v10251_v50, 16  ;;  %v3100_v12 = vmax.f32 %v2852_v9, 0.0  ;;  %v2567_v42 = vpop.f32.mrb[7].mxu0  ;;  %v2855_v19 = vadd.f32 %v13283_v48, %v2565_v7  ;;  %3399 = vst [vmem:[#allocation3 + $0xbc] sm:$0x1] %v3398_v29 }
 0x26c   :  { %v3666_v15 = vshll.u32 %v10251_v50, 16  ;;  %v4301_v42 = vld [vmem:[#allocation3 + $0x14] sm:$0x1]  ;;  %v3290_v7 = vld [vmem:[#allocation3 + $0xc0] sm:$0x1]  ;;  %v4864_v29 = vrot.slane %v4863_v24, 4 }
 0x26d   :  { %v3660_v52 = vor.u32 %v3658_v59, %v3657_v47  ;;  %v3665_v9 = vrot.slane %v3663_v33, 7  ;;  %v3164_v54 = vmul.f32 1.7139589, %v3100_v12  ;;  %2777 = vmatmul.mubr.bf16.gmra.mrb[112].mxu0 %v1829_v34  ;;  %v3661_v20 = vrot.slane %v3657_v47, 4 }
 0x26e   :  { %v3101_v48 = vmax.f32 %v2855_v19, 0.0  ;;  %2784 = vmatprep.mubr.bf16.mxu0 %v1835_v14  ;;  %v3291_v59 = vsel %vm13294_vm6, 0, %v3290_v7  ;;  %v3400_v7 = vld [vmem:[#allocation3 + $0xc8] sm:$0x1] }
 0x26f   :  { %v4298_v33 = vsel %vm13494_vm11, %v3660_v52, %v4297_v46  ;;  %v3668_v50 = vor.u32 %v3666_v15, %v3665_v9  ;;  %v3670_v12 = vrot.slane %v3665_v9, 4  ;;  %v10252_v34 = vpack.c.bf16 %v3164_v54, %v3164_v54  ;;  %3292 = vst [vmem:[#allocation3 + $0xc0] sm:$0x1] %v3291_v59  ;;  %v1834_v9 = vld [vmem:[#allocation2 + $0x498] sm:$0xff] }
 0x270   :  { %4299 = vst [vmem:[#allocation3 + $0xc] sm:$0xf] %v4298_v33  ;;  %v3165_v23 = vmul.f32 1.7139589, %v3101_v48  ;;  %v2570_v47 = vpop.f32.mrb[8].mxu0  ;;  %v4874_v15 = vrot.slane %v4873_v32, 4 }
 0x271   :  { %v3669_v19 = vsel %vm13503_vm13, %v3661_v20, %v3668_v50  ;;  %v4302_v40 = vsel %vm13294_vm6, %v3670_v12, %v4301_v42  ;;  %v3672_v30 = vshrl.u32 %v10252_v34, 16  ;;  %v2572_v14 = vpop.f32.mrb[9].mxu0  ;;  %v2860_v46 = vadd.f32 %v13330_v18, %v2570_v47  ;;  %v1840_v42 = vld [vmem:[#allocation2 + $0x4c8] sm:$0xff]  ;;  %v4304_v12 = vld [vmem:[#allocation3 + $0x18] sm:$0xf] }
 0x272   :  { %4300 = vst [vmem:[#allocation3 + $0x10] sm:$0xf] %v3669_v19  ;;  %4303 = vst [vmem:[#allocation3 + $0x14] sm:$0x1] %v4302_v40  ;;  %v10253_v54 = vpack.c.bf16 %v3165_v23, %v3165_v23  ;;  %v2573_v52 = vpop.f32.mrb[10].mxu0  ;;  %v4878_v48 = vrot.slane %v4876_v60, 5 }
 0x273   :  { %v3674_v33 = vrot.slane %v3672_v30, 7  ;;  %v3675_v38 = vshll.u32 %v10252_v34, 16  ;;  %v2863_v20 = vadd.f32 %v13337_v0, %v2573_v52  ;;  %v2575_v50 = vpop.f32.mrb[11].mxu0  ;;  %v3401_v24 = vsel %vm13303_vm8, 0, %v3400_v7  ;;  %v4308_v47 = vld [vmem:[#allocation3 + $0x20] sm:$0x1] }
 0x274   :  { %v3680_v59 = vshrl.u32 %v10253_v54, 16  ;;  %v3102_v19 = vmax.f32 %v2860_v46, 0.0  ;;  %3402 = vst [vmem:[#allocation3 + $0xc8] sm:$0x1] %v3401_v24  ;;  %v4869_v0 = vsel %vm13522_vm15, %v4864_v29, %v13486_v63  ;;  %v3683_v23 = vshll.u32 %v10253_v54, 16  ;;  %v13538_v50 = vpop.f32.mrb[32].mxu1 }
 0x275   :  { %v3677_v32 = vor.u32 %v3675_v38, %v3674_v33  ;;  %v3103_v60 = vmax.f32 %v2863_v20, 0.0  ;;  %2785 = vmatmul.mubr.bf16.gmra.mrb[116].mxu0 %v1834_v9  ;;  %v4879_v30 = vsel %vm13522_vm15, %v4874_v15, %v4878_v48  ;;  %v3678_v14 = vrot.slane %v3674_v33, 4  ;;  %16312 = vst [vmem:[#allocation42_spill] sm:$0xff] %v13538_v50 }
 0x276   :  { %v3682_v34 = vrot.slane %v3680_v59, 7  ;;  %v3166_v40 = vmul.f32 1.7139589, %v3102_v19  ;;  %2792 = vmatprep.mubr.bf16.mxu0 %v1840_v42  ;;  %v13541_v42 = vcombine.low %v4869_v0, %v4879_v30 }
 0x277   :  { %v4305_v46 = vsel %vm13494_vm11, %v3677_v32, %v4304_v12  ;;  %v3167_v52 = vmul.f32 1.7139589, %v3103_v60  ;;  %v13535_v9 = vld [vmem:[#allocation3 + $0xc] sm:$0xf] }
 0x278   :  { %4306 = vst [vmem:[#allocation3 + $0x18] sm:$0xf] %v4305_v46  ;;  %v3685_v63 = vor.u32 %v3683_v23, %v3682_v34  ;;  %v3687_v29 = vrot.slane %v3682_v34, 4  ;;  %v10254_v54 = vpack.c.bf16 %v3166_v40, %v3166_v40  ;;  %v2578_v7 = vpop.f32.mrb[12].mxu0  ;;  %v4881_v20 = vshrl.u32 %v13535_v9, 16  ;;  %v1839_v23 = vld [vmem:[#allocation2 + $0x4c0] sm:$0xff] }
 0x279   :  { %v10255_v15 = vpack.c.bf16 %v3167_v52, %v3167_v52  ;;  %v2868_v48 = vadd.f32 %v13325_v8, %v2578_v7  ;;  %v2580_v33 = vpop.f32.mrb[13].mxu0  ;;  %v13543_v24 = vld [vmem:[#allocation3 + $0x10] sm:$0xf]  ;;  %v4884_v12 = vshll.u32 %v13535_v9, 16  ;;  %v13550_v40 = vpop.f32.mrb[33].mxu1 }
 0x27a   :  { %v3686_v59 = vsel %vm13503_vm13, %v3678_v14, %v3685_v63  ;;  %v4309_v19 = vsel %vm13294_vm6, %v3687_v29, %v4308_v47  ;;  %v3689_v32 = vshrl.u32 %v10254_v54, 16  ;;  %v3692_v60 = vshll.u32 %v10254_v54, 16  ;;  %v2581_v34 = vpop.f32.mrb[14].mxu0  ;;  %v4311_v8 = vld [vmem:[#allocation3 + $0x24] sm:$0xf]  ;;  %v1845_v33 = vld [vmem:[#allocation2 + $0x4f0] sm:$0xff] }
 0x27b   :  { %4307 = vst [vmem:[#allocation3 + $0x1c] sm:$0xf] %v3686_v59  ;;  %4310 = vst [vmem:[#allocation3 + $0x20] sm:$0x1] %v4309_v19  ;;  %v3697_v0 = vshrl.u32 %v10255_v15, 16  ;;  %v3700_v30 = vshll.u32 %v10255_v15, 16  ;;  %v2871_v52 = vadd.f32 %v13335_v22, %v2581_v34 }
 0x27c   :  { %v3104_v46 = vmax.f32 %v2868_v48, 0.0  ;;  %v2583_v7 = vpop.f32.mrb[15].mxu0  ;;  %v3691_v14 = vrot.slane %v3689_v32, 7  ;;  %v4526_v63 = vld [vmem:[#allocation3 + $0x14] sm:$0x1]  ;;  %v4883_v38 = vrot.slane %v4881_v20, 4 }
 0x27d   :  { %v4886_v47 = vrot.slane %v4884_v12, 5  ;;  %v4890_v29 = vshll.u32 %v13543_v24, 16  ;;  %v3699_v54 = vrot.slane %v3697_v0, 7  ;;  %v3105_v53 = vmax.f32 %v2871_v52, 0.0  ;;  %2793 = vmatmul.mubr.bf16.gmra.mrb[120].mxu0 %v1839_v23  ;;  %v13555_v19 = vpop.f32.mrb[34].mxu1 }
 0x27e   :  { %v3168_v39 = vmul.f32 1.7139589, %v3104_v46  ;;  %v4894_v59 = vshrl.u32 %v13543_v24, 16  ;;  %v3694_v15 = vor.u32 %v3692_v60, %v3691_v14  ;;  %v3695_v48 = vrot.slane %v3691_v14, 4  ;;  %2800 = vmatprep.mubr.bf16.mxu0 %v1845_v33  ;;  %v13557_v32 = vpop.f32.mrb[35].mxu1 }
 0x27f   :  { %v4887_v22 = vor.u32 %v4886_v47, %v4883_v38  ;;  %v4892_v34 = vrot.slane %v4890_v29, 5  ;;  %v3702_v20 = vor.u32 %v3700_v30, %v3699_v54  ;;  %v3704_v12 = vrot.slane %v3699_v54, 4  ;;  %v1844_v47 = vld [vmem:[#allocation2 + $0x4e8] sm:$0xff]  ;;  %v13568_v54 = vld [vmem:[#allocation3 + $0x18] sm:$0xf] }
 0x280   :  { %v10256_v7 = vpack.c.bf16 %v3168_v39, %v3168_v39  ;;  %v3169_v45 = vmul.f32 1.7139589, %v3105_v53  ;;  %v4312_v0 = vsel %vm13494_vm11, %v3694_v15, %v4311_v8  ;;  %v2586_v23 = vpop.f32.mrb[16].mxu0  ;;  %v4896_v52 = vrot.slane %v4894_v59, 4 }
 0x281   :  { %v4888_v46 = vrot.slane %v4887_v22, 4  ;;  %v4900_v50 = vshll.u32 %v4526_v63, 16  ;;  %4313 = vst [vmem:[#allocation3 + $0x24] sm:$0xf] %v4312_v0  ;;  %v3703_v60 = vsel %vm13503_vm13, %v3695_v48, %v3702_v20  ;;  %v4316_v38 = vsel %vm13294_vm6, %v3704_v12, %v4315_v5  ;;  %v2588_v30 = vpop.f32.mrb[17].mxu0 }
 0x282   :  { %v3706_v33 = vshrl.u32 %v10256_v7, 16  ;;  %v3709_v14 = vshll.u32 %v10256_v7, 16  ;;  %4314 = vst [vmem:[#allocation3 + $0x28] sm:$0xf] %v3703_v60  ;;  %4317 = vst [vmem:[#allocation3 + $0x2c] sm:$0x1] %v4316_v38  ;;  %v10257_v39 = vpack.c.bf16 %v3169_v45, %v3169_v45  ;;  %v2876_v53 = vadd.f32 %v13376_v44, %v2586_v23 }
 0x283   :  { %v2589_v8 = vpop.f32.mrb[18].mxu0  ;;  %v4893_v63 = vsel %vm13522_vm15, %v4888_v46, %v4892_v34  ;;  %v4897_v29 = vor.u32 %v4896_v52, %v4892_v34  ;;  %v4902_v48 = vrot.slane %v4900_v50, 5  ;;  %v13573_v22 = vcombine.low %v13535_v9, %v13543_v24  ;;  %v4318_v45 = vld [vmem:[#allocation3 + $0x30] sm:$0xf]  ;;  %v13579_v9 = vld [vmem:[#allocation3 + $0x1c] sm:$0xf] }
 0x284   :  { %v3708_v59 = vrot.slane %v3706_v33, 7  ;;  %v2879_v15 = vadd.f32 %v13383_v16, %v2589_v8  ;;  %v2591_v5 = vpop.f32.mrb[19].mxu0  ;;  %v3714_v20 = vshrl.u32 %v10257_v39, 16  ;;  %v3717_v44 = vshll.u32 %v10257_v39, 16  ;;  %v4322_v38 = vld [vmem:[#allocation3 + $0x38] sm:$0x1] }
 0x285   :  { %16313 = vst [vmem:[#allocation43_spill] sm:$0xff] %v13573_v22  ;;  %v3106_v12 = vmax.f32 %v2876_v53, 0.0  ;;  %v4898_v7 = vrot.slane %v4897_v29, 4  ;;  %2801 = vmatmul.mubr.bf16.gmra.mrb[124].mxu0 %v1844_v47  ;;  %v4905_v34 = vshrl.u32 %v13568_v54, 16  ;;  %v4908_v50 = vshll.u32 %v13568_v54, 16 }
 0x286   :  { %v3711_v0 = vor.u32 %v3709_v14, %v3708_v59  ;;  %v3712_v23 = vrot.slane %v3708_v59, 4  ;;  %v3107_v46 = vmax.f32 %v2879_v15, 0.0  ;;  %v3716_v52 = vrot.slane %v3714_v20, 7  ;;  %7475 = vmatprep.mubr.bf16.mxu0 %v13541_v42 }
 0x287   :  { %v3170_v60 = vmul.f32 1.7139589, %v3106_v12  ;;  %v4903_v16 = vsel %vm13522_vm15, %v4898_v7, %v4902_v48  ;;  %v4907_v30 = vrot.slane %v4905_v34, 4  ;;  %v4910_v47 = vrot.slane %v4908_v50, 5  ;;  %v4529_v7 = vld [vmem:[#allocation3 + $0x20] sm:$0x1] }
 0x288   :  { %v4319_v24 = vsel %vm13494_vm11, %v3711_v0, %v4318_v45  ;;  %v3171_v33 = vmul.f32 1.7139589, %v3107_v46  ;;  %v13584_v14 = vcombine.low %v4893_v63, %v4903_v16  ;;  %v3719_v39 = vor.u32 %v3717_v44, %v3716_v52  ;;  %v2594_v42 = vpop.f32.mrb[20].mxu0  ;;  %v4325_v16 = vld [vmem:[#allocation3 + $0x3c] sm:$0xf] }
 0x289   :  { %4320 = vst [vmem:[#allocation3 + $0x30] sm:$0xf] %v4319_v24  ;;  %v3721_v53 = vrot.slane %v3716_v52, 4  ;;  %v10258_v8 = vpack.c.bf16 %v3170_v60, %v3170_v60  ;;  %v2884_v59 = vadd.f32 %v13370_v17, %v2594_v42  ;;  %v2596_v15 = vpop.f32.mrb[21].mxu0  ;;  %v4914_v5 = vshll.u32 %v13579_v9, 16 }
 0x28a   :  { %16314 = vst [vmem:[#allocation44_spill] sm:$0xff] %v13584_v14  ;;  %v10259_v29 = vpack.c.bf16 %v3171_v33, %v3171_v33  ;;  %v4918_v48 = vshrl.u32 %v13579_v9, 16  ;;  %v3720_v45 = vsel %vm13503_vm13, %v3712_v23, %v3719_v39  ;;  %v2597_v12 = vpop.f32.mrb[22].mxu0  ;;  %v4911_v50 = vor.u32 %v4910_v47, %v4907_v30  ;;  %v13594_v33 = vpop.f32.mrb[36].mxu1  ;;  %v4329_v15 = vld [vmem:[#allocation3 + $0x44] sm:$0x1] }
 0x28b   :  { %v4323_v63 = vsel %vm13294_vm6, %v3721_v53, %v4322_v38  ;;  %v3723_v20 = vshrl.u32 %v10258_v8, 16  ;;  %v3726_v44 = vshll.u32 %v10258_v8, 16  ;;  %4321 = vst [vmem:[#allocation3 + $0x34] sm:$0xf] %v3720_v45  ;;  %v3108_v17 = vmax.f32 %v2884_v59, 0.0  ;;  %v2599_v52 = vpop.f32.mrb[23].mxu0 }
 0x28c   :  { %4324 = vst [vmem:[#allocation3 + $0x38] sm:$0x1] %v4323_v63  ;;  %v3731_v0 = vshrl.u32 %v10259_v29, 16  ;;  %v3734_v46 = vshll.u32 %v10259_v29, 16  ;;  %v2887_v34 = vadd.f32 %v13381_v27, %v2597_v12  ;;  %v4916_v24 = vrot.slane %v4914_v5, 5  ;;  %v13599_v29 = vpop.f32.mrb[37].mxu1 }
 0x28d   :  { %v3725_v60 = vrot.slane %v3723_v20, 7  ;;  %v4920_v23 = vrot.slane %v4918_v48, 4  ;;  %v3172_v39 = vmul.f32 1.7139589, %v3108_v17  ;;  %v16315_v8 = vcombine.low %v13468_v43, %v13472_v26 }
 0x28e   :  { %v3733_v38 = vrot.slane %v3731_v0, 7  ;;  %v3109_v53 = vmax.f32 %v2887_v34, 0.0  ;;  %v4924_v42 = vshll.u32 %v4529_v7, 16  ;;  %v4912_v30 = vrot.slane %v4911_v50, 4 }
 0x28f   :  { %7476 = vmatmul.mubr.bf16.vlgmr.msra.gmra.mrb[128].mxu0 %v16315_v8  ;;  %v3728_v59 = vor.u32 %v3726_v44, %v3725_v60  ;;  %v3729_v27 = vrot.slane %v3725_v60, 4  ;;  %v4921_v47 = vor.u32 %v4920_v23, %v4916_v24  ;;  %v10260_v45 = vpack.c.bf16 %v3172_v39, %v3172_v39  ;;  %v13606_v44 = vld [vmem:[#allocation3 + $0x24] sm:$0xf]  ;;  %v13612_v60 = vpop.f32.mrb[38].mxu1 }
 0x290   :  { %7483 = vmatprep.mubr.bf16.mxu0 %v13584_v14  ;;  %v3736_v5 = vor.u32 %v3734_v46, %v3733_v38  ;;  %v3738_v48 = vrot.slane %v3733_v38, 4  ;;  %v3173_v63 = vmul.f32 1.7139589, %v3109_v53  ;;  %v2602_v12 = vpop.f32.mrb[24].mxu0  ;;  %v4917_v43 = vsel %vm13522_vm15, %v4912_v30, %v4916_v24  ;;  %v13621_v53 = vpop.f32.mrb[39].mxu1 }
 0x291   :  { %v4326_v20 = vsel %vm13494_vm11, %v3728_v59, %v4325_v16  ;;  %v4922_v26 = vrot.slane %v4921_v47, 4  ;;  %v4926_v7 = vrot.slane %v4924_v42, 5  ;;  %v3740_v17 = vshrl.u32 %v10260_v45, 16  ;;  %v2604_v52 = vpop.f32.mrb[25].mxu0  ;;  %v4332_v16 = vld [vmem:[#allocation3 + $0x48] sm:$0xf] }
 0x292   :  { %4327 = vst [vmem:[#allocation3 + $0x3c] sm:$0xf] %v4326_v20  ;;  %v3737_v0 = vsel %vm13503_vm13, %v3729_v27, %v3736_v5  ;;  %v4330_v46 = vsel %vm13294_vm6, %v3738_v48, %v4329_v15  ;;  %v3743_v34 = vshll.u32 %v10260_v45, 16  ;;  %v10261_v50 = vpack.c.bf16 %v3173_v63, %v3173_v63  ;;  %v2605_v23 = vpop.f32.mrb[26].mxu0  ;;  %v13626_v15 = vld [vmem:[#allocation3 + $0x28] sm:$0xf] }
 0x293   :  { %4328 = vst [vmem:[#allocation3 + $0x40] sm:$0xf] %v3737_v0  ;;  %4331 = vst [vmem:[#allocation3 + $0x44] sm:$0x1] %v4330_v46  ;;  %v2892_v24 = vadd.f32 %v13407_v61, %v2602_v12  ;;  %v4927_v38 = vsel %vm13522_vm15, %v4922_v26, %v4926_v7  ;;  %v13619_v39 = vcombine.low %v13568_v54, %v13579_v9  ;;  %v3742_v8 = vrot.slane %v3740_v17, 7  ;;  %v2607_v59 = vpop.f32.mrb[27].mxu0 }
 0x294   :  { %v2895_v42 = vadd.f32 %v13411_v49, %v2605_v23  ;;  %v13624_v27 = vcombine.low %v4917_v43, %v4927_v38  ;;  %v4929_v61 = vshrl.u32 %v13606_v44, 16  ;;  %v3748_v30 = vshrl.u32 %v10261_v50, 16  ;;  %v13629_v48 = vld [vmem:[#allocation3 + $0x2c] sm:$0x1]  ;;  %v4336_v0 = vld [vmem:[#allocation3 + $0x50] sm:$0x1] }
 0x295   :  { %16316 = vst [vmem:[#allocation45_spill] sm:$0xff] %v13619_v39  ;;  %v3751_v47 = vshll.u32 %v10261_v50, 16  ;;  %v3110_v5 = vmax.f32 %v2892_v24, 0.0  ;;  %v4932_v54 = vshll.u32 %v13606_v44, 16  ;;  %v3745_v9 = vor.u32 %v3743_v34, %v3742_v8 }
 0x296   :  { %16317 = vst [vmem:[#allocation46_spill] sm:$0xff] %v13624_v27  ;;  %v3746_v45 = vrot.slane %v3742_v8, 4  ;;  %v3111_v63 = vmax.f32 %v2895_v42, 0.0  ;;  %v4931_v49 = vrot.slane %v4929_v61, 4  ;;  %v3750_v20 = vrot.slane %v3748_v30, 7 }
 0x297   :  { %7484 = vmatmul.mubr.bf16.gmra.mrb[132].mxu0 %v13573_v22  ;;  %v3174_v12 = vmul.f32 1.7139589, %v3110_v5  ;;  %v4934_v43 = vrot.slane %v4932_v54, 5  ;;  %v4938_v26 = vshll.u32 %v13626_v15, 16  ;;  %v4333_v7 = vsel %vm13494_vm11, %v3745_v9, %v4332_v16 }
 0x298   :  { %7491 = vmatprep.mubr.bf16.mxu0 %v13624_v27  ;;  %v3175_v46 = vmul.f32 1.7139589, %v3111_v63  ;;  %v4942_v17 = vshrl.u32 %v13626_v15, 16  ;;  %v4948_v34 = vshll.u32 %v13629_v48, 16  ;;  %4334 = vst [vmem:[#allocation3 + $0x48] sm:$0xf] %v4333_v7  ;;  %v3753_v52 = vor.u32 %v3751_v47, %v3750_v20 }
 0x299   :  { %v3755_v50 = vrot.slane %v3750_v20, 4  ;;  %v10262_v24 = vpack.c.bf16 %v3174_v12, %v3174_v12  ;;  %v2610_v23 = vpop.f32.mrb[28].mxu0  ;;  %v4935_v38 = vor.u32 %v4934_v43, %v4931_v49  ;;  %v4940_v61 = vrot.slane %v4938_v26, 5  ;;  %v4339_v47 = vld [vmem:[#allocation3 + $0x54] sm:$0xf] }
 0x29a   :  { %v10263_v8 = vpack.c.bf16 %v3175_v46, %v3175_v46  ;;  %v2900_v42 = vadd.f32 %v13405_v58, %v2610_v23  ;;  %v2612_v59 = vpop.f32.mrb[29].mxu0  ;;  %v4944_v30 = vrot.slane %v4942_v17, 4  ;;  %v3754_v16 = vsel %vm13503_vm13, %v3746_v45, %v3753_v52  ;;  %v13645_v45 = vld [vmem:[#allocation3 + $0x30] sm:$0xf]  ;;  %v13649_v23 = vpop.f32.mrb[40].mxu1 }
 0x29b   :  { %v4337_v5 = vsel %vm13294_vm6, %v3755_v50, %v4336_v0  ;;  %v3757_v54 = vshrl.u32 %v10262_v24, 16  ;;  %v3760_v9 = vshll.u32 %v10262_v24, 16  ;;  %v2613_v63 = vpop.f32.mrb[30].mxu0  ;;  %4335 = vst [vmem:[#allocation3 + $0x4c] sm:$0xf] %v3754_v16  ;;  %v4936_v7 = vrot.slane %v4935_v38, 4 }
 0x29c   :  { %4338 = vst [vmem:[#allocation3 + $0x50] sm:$0x1] %v4337_v5  ;;  %v3765_v20 = vshrl.u32 %v10263_v8, 16  ;;  %v3768_v49 = vshll.u32 %v10263_v8, 16  ;;  %v3112_v12 = vmax.f32 %v2900_v42, 0.0  ;;  %v2903_v58 = vadd.f32 %v13409_v57, %v2613_v63  ;;  %v2615_v43 = vpop.f32.mrb[31].mxu0 }
 0x29d   :  { %v3759_v26 = vrot.slane %v3757_v54, 7  ;;  %v4945_v46 = vor.u32 %v4944_v30, %v4940_v61  ;;  %v4950_v17 = vrot.slane %v4948_v34, 5  ;;  %v4343_v59 = vld [vmem:[#allocation3 + $0x5c] sm:$0x1]  ;;  %v4941_v57 = vsel %vm13522_vm15, %v4936_v7, %v4940_v61  ;;  %v13653_v30 = vpop.f32.mrb[41].mxu1 }
 0x29e   :  { %v3767_v52 = vrot.slane %v3765_v20, 7  ;;  %v3176_v0 = vmul.f32 1.7139589, %v3112_v12  ;;  %v3113_v50 = vmax.f32 %v2903_v58, 0.0  ;;  %v13655_v63 = vpop.f32.mrb[42].mxu1  ;;  %v13663_v58 = vcombine.low %v13606_v44, %v13626_v15 }
 0x29f   :  { %7492 = vmatmul.mubr.bf16.gmra.mrb[136].mxu0 %v13619_v39  ;;  %v3762_v8 = vor.u32 %v3760_v9, %v3759_v26  ;;  %v3763_v42 = vrot.slane %v3759_v26, 4  ;;  %v4946_v38 = vrot.slane %v4945_v46, 4  ;;  %v13665_v61 = vld [vmem:[#allocation3 + $0x34] sm:$0xf] }
 0x2a0   :  { %v3770_v34 = vor.u32 %v3768_v49, %v3767_v52  ;;  %v3772_v16 = vrot.slane %v3767_v52, 4  ;;  %v10264_v5 = vpack.c.bf16 %v3176_v0, %v3176_v0  ;;  %v3177_v54 = vmul.f32 1.7139589, %v3113_v50  ;;  %v2618_v12 = vpop.f32.mrb[32].mxu0  ;;  %16318 = vst [vmem:[#allocation47_spill] sm:$0xff] %v13663_v58 }
 0x2a1   :  { %v4340_v20 = vsel %vm13494_vm11, %v3762_v8, %v4339_v47  ;;  %v4951_v9 = vsel %vm13522_vm15, %v4946_v38, %v4950_v17  ;;  %v4953_v49 = vshrl.u32 %v13645_v45, 16  ;;  %v2620_v46 = vpop.f32.mrb[33].mxu0  ;;  %v13672_v17 = vpop.f32.mrb[43].mxu1  ;;  %v2908_v52 = vadd.f32 %v13423_v51, %v2618_v12  ;;  %v4346_v38 = vld [vmem:[#allocation3 + $0x60] sm:$0xf] }
 0x2a2   :  { %4341 = vst [vmem:[#allocation3 + $0x54] sm:$0xf] %v4340_v20  ;;  %v3771_v43 = vsel %vm13503_vm13, %v3763_v42, %v3770_v34  ;;  %v4344_v26 = vsel %vm13294_vm6, %v3772_v16, %v4343_v59  ;;  %v3774_v47 = vshrl.u32 %v10264_v5, 16  ;;  %v3777_v7 = vshll.u32 %v10264_v5, 16  ;;  %v2621_v0 = vpop.f32.mrb[34].mxu0 }
 0x2a3   :  { %4342 = vst [vmem:[#allocation3 + $0x58] sm:$0xf] %v3771_v43  ;;  %4345 = vst [vmem:[#allocation3 + $0x5c] sm:$0x1] %v4344_v26  ;;  %v10265_v44 = vpack.c.bf16 %v3177_v54, %v3177_v54  ;;  %v13674_v15 = vcombine.low %v4941_v57, %v4951_v9  ;;  %v4955_v50 = vrot.slane %v4953_v49, 4  ;;  %v2911_v42 = vadd.f32 %v13429_v21, %v2621_v0  ;;  %v2623_v34 = vpop.f32.mrb[35].mxu0 }
 0x2a4   :  { %v3776_v8 = vrot.slane %v3774_v47, 7  ;;  %v4956_v59 = vshll.u32 %v13645_v45, 16  ;;  %v4962_v16 = vshll.u32 %v13665_v61, 16  ;;  %v3114_v54 = vmax.f32 %v2908_v52, 0.0  ;;  %v4535_v57 = vld [vmem:[#allocation3 + $0x38] sm:$0x1] }
 0x2a5   :  { %16319 = vst [vmem:[#allocation48_spill] sm:$0xff] %v13674_v15  ;;  %v3782_v5 = vshrl.u32 %v10265_v44, 16  ;;  %v3785_v20 = vshll.u32 %v10265_v44, 16  ;;  %7499 = vmatprep.mubr.bf16.mxu0 %v13674_v15  ;;  %v4966_v9 = vshrl.u32 %v13665_v61, 16  ;;  %v3115_v49 = vmax.f32 %v2911_v42, 0.0 }
 0x2a6   :  { %v3779_v51 = vor.u32 %v3777_v7, %v3776_v8  ;;  %v3780_v12 = vrot.slane %v3776_v8, 4  ;;  %v4958_v43 = vrot.slane %v4956_v59, 5  ;;  %v3178_v26 = vmul.f32 1.7139589, %v3114_v54  ;;  %v4350_v44 = vld [vmem:[#allocation3 + $0x68] sm:$0x1] }
 0x2a7   :  { %7500 = vmatmul.mubr.bf16.gmra.mrb[140].mxu0 %v13663_v58  ;;  %v3784_v21 = vrot.slane %v3782_v5, 7  ;;  %v4964_v47 = vrot.slane %v4962_v16, 5  ;;  %v4968_v46 = vrot.slane %v4966_v9, 4  ;;  %v3179_v34 = vmul.f32 1.7139589, %v3115_v49 }
 0x2a8   :  { %v4347_v0 = vsel %vm13494_vm11, %v3779_v51, %v4346_v38  ;;  %v4959_v24 = vor.u32 %v4958_v43, %v4955_v50  ;;  %v4972_v52 = vshll.u32 %v4535_v57, 16  ;;  %v10266_v7 = vpack.c.bf16 %v3178_v26, %v3178_v26  ;;  %v2626_v42 = vpop.f32.mrb[36].mxu0  ;;  %v4353_v26 = vld [vmem:[#allocation3 + $0x6c] sm:$0xf] }
 0x2a9   :  { %4348 = vst [vmem:[#allocation3 + $0x60] sm:$0xf] %v4347_v0  ;;  %v3787_v15 = vor.u32 %v3785_v20, %v3784_v21  ;;  %v3789_v27 = vrot.slane %v3784_v21, 4  ;;  %v4969_v8 = vor.u32 %v4968_v46, %v4964_v47  ;;  %v10267_v14 = vpack.c.bf16 %v3179_v34, %v3179_v34  ;;  %v2628_v16 = vpop.f32.mrb[37].mxu0  ;;  %v4536_v20 = vld [vmem:[#allocation3 + $0x3c] sm:$0xf] }
 0x2aa   :  { %v4960_v58 = vrot.slane %v4959_v24, 4  ;;  %v4974_v59 = vrot.slane %v4972_v52, 5  ;;  %v2916_v5 = vadd.f32 %v13421_v2, %v2626_v42  ;;  %v3791_v50 = vshrl.u32 %v10266_v7, 16  ;;  %v2629_v9 = vpop.f32.mrb[38].mxu0  ;;  %v13699_v52 = vpop.f32.mrb[44].mxu1 }
 0x2ab   :  { %v3788_v54 = vsel %vm13503_vm13, %v3780_v12, %v3787_v15  ;;  %v4351_v38 = vsel %vm13294_vm6, %v3789_v27, %v4350_v44  ;;  %v3794_v57 = vshll.u32 %v10266_v7, 16  ;;  %v3799_v51 = vshrl.u32 %v10267_v14, 16  ;;  %v2631_v2 = vpop.f32.mrb[39].mxu0  ;;  %v4537_v44 = vld [vmem:[#allocation3 + $0x40] sm:$0xf] }
 0x2ac   :  { %4349 = vst [vmem:[#allocation3 + $0x64] sm:$0xf] %v3788_v54  ;;  %4352 = vst [vmem:[#allocation3 + $0x68] sm:$0x1] %v4351_v38  ;;  %v3802_v49 = vshll.u32 %v10267_v14, 16  ;;  %v4965_v24 = vsel %vm13522_vm15, %v4960_v58, %v4964_v47  ;;  %v4970_v43 = vrot.slane %v4969_v8, 4  ;;  %v2919_v15 = vadd.f32 %v13427_v6, %v2629_v9 }
 0x2ad   :  { %v3793_v21 = vrot.slane %v3791_v50, 7  ;;  %v3116_v46 = vmax.f32 %v2916_v5, 0.0  ;;  %v13695_v27 = vcombine.low %v13645_v45, %v13665_v61  ;;  %v3801_v12 = vrot.slane %v3799_v51, 7  ;;  %v4357_v7 = vld [vmem:[#allocation3 + $0x74] sm:$0x1] }
 0x2ae   :  { %v4975_v0 = vsel %vm13522_vm15, %v4970_v43, %v4974_v59  ;;  %v4977_v14 = vshrl.u32 %v4536_v20, 16  ;;  %v4980_v34 = vshll.u32 %v4536_v20, 16  ;;  %v3117_v16 = vmax.f32 %v2919_v15, 0.0  ;;  %v4538_v54 = vld [vmem:[#allocation3 + $0x44] sm:$0x1] }
 0x2af   :  { %16320 = vst [vmem:[#allocation49_spill] sm:$0xff] %v13695_v27  ;;  %v3796_v58 = vor.u32 %v3794_v57, %v3793_v21  ;;  %v3797_v47 = vrot.slane %v3793_v21, 4  ;;  %v13701_v8 = vcombine.low %v4965_v24, %v4975_v0  ;;  %v3180_v42 = vmul.f32 1.7139589, %v3116_v46 }
 0x2b0   :  { %v3804_v6 = vor.u32 %v3802_v49, %v3801_v12  ;;  %v3806_v5 = vrot.slane %v3801_v12, 4  ;;  %v4979_v45 = vrot.slane %v4977_v14, 4  ;;  %v4982_v38 = vrot.slane %v4980_v34, 5  ;;  %v2634_v9 = vpop.f32.mrb[40].mxu0  ;;  %v4360_v12 = vld [vmem:[#allocation3 + $0x78] sm:$0xf] }
 0x2b1   :  { %16321 = vst [vmem:[#allocation50_spill] sm:$0xff] %v13701_v8  ;;  %v4354_v61 = vsel %vm13494_vm11, %v3796_v58, %v4353_v26  ;;  %7507 = vmatprep.mubr.bf16.mxu0 %v13701_v8  ;;  %v10268_v59 = vpack.c.bf16 %v3180_v42, %v3180_v42  ;;  %v4986_v50 = vshll.u32 %v4537_v44, 16  ;;  %v3181_v49 = vmul.f32 1.7139589, %v3117_v16  ;;  %v2636_v43 = vpop.f32.mrb[41].mxu0 }
 0x2b2   :  { %4355 = vst [vmem:[#allocation3 + $0x6c] sm:$0xf] %v4354_v61  ;;  %v3805_v57 = vsel %vm13503_vm13, %v3797_v47, %v3804_v6  ;;  %v4358_v51 = vsel %vm13294_vm6, %v3806_v5, %v4357_v7  ;;  %7508 = vmatmul.mubr.bf16.gmra.mrb[144].mxu0 %v13695_v27  ;;  %v4990_v24 = vshrl.u32 %v4537_v44, 16  ;;  %v4983_v26 = vor.u32 %v4982_v38, %v4979_v45  ;;  %v2637_v15 = vpop.f32.mrb[42].mxu0  ;;  %v13712_v7 = vpop.f32.mrb[45].mxu1 }
 0x2b3   :  { %4356 = vst [vmem:[#allocation3 + $0x70] sm:$0xf] %v3805_v57  ;;  %4359 = vst [vmem:[#allocation3 + $0x74] sm:$0x1] %v4358_v51  ;;  %v3808_v2 = vshrl.u32 %v10268_v59, 16  ;;  %v3811_v21 = vshll.u32 %v10268_v59, 16  ;;  %v10269_v0 = vpack.c.bf16 %v3181_v49, %v3181_v49  ;;  %v2924_v58 = vadd.f32 %v13439_v25, %v2634_v9 }
 0x2b4   :  { %v4988_v46 = vrot.slane %v4986_v50, 5  ;;  %v4992_v14 = vrot.slane %v4990_v24, 4  ;;  %v4996_v34 = vshll.u32 %v4538_v54, 16  ;;  %v2639_v47 = vpop.f32.mrb[43].mxu0  ;;  %v4984_v6 = vrot.slane %v4983_v26, 4  ;;  %v13717_v59 = vpop.f32.mrb[46].mxu1 }
 0x2b5   :  { %v3810_v42 = vrot.slane %v3808_v2, 7  ;;  %v2927_v5 = vadd.f32 %v13445_v55, %v2637_v15  ;;  %v13715_v16 = vcombine.low %v4536_v20, %v4537_v44  ;;  %v4539_v61 = vld [vmem:[#allocation3 + $0x48] sm:$0xf]  ;;  %v3816_v45 = vshrl.u32 %v10269_v0, 16  ;;  %v4540_v51 = vld [vmem:[#allocation3 + $0x4c] sm:$0xf] }
 0x2b6   :  { %v3819_v38 = vshll.u32 %v10269_v0, 16  ;;  %v4993_v50 = vor.u32 %v4992_v14, %v4988_v46  ;;  %v4998_v57 = vrot.slane %v4996_v34, 5  ;;  %v4364_v25 = vld [vmem:[#allocation3 + $0x80] sm:$0x1]  ;;  %v4989_v9 = vsel %vm13522_vm15, %v4984_v6, %v4988_v46  ;;  %v13721_v44 = vpop.f32.mrb[47].mxu1 }
 0x2b7   :  { %16322 = vst [vmem:[#allocation51_spill] sm:$0xff] %v13715_v16  ;;  %v3813_v54 = vor.u32 %v3811_v21, %v3810_v42  ;;  %v3814_v49 = vrot.slane %v3810_v42, 4  ;;  %v3118_v24 = vmax.f32 %v2924_v58, 0.0  ;;  %v3818_v43 = vrot.slane %v3816_v45, 7  ;;  %v4541_v45 = vld [vmem:[#allocation3 + $0x50] sm:$0x1] }
 0x2b8   :  { %v4994_v2 = vrot.slane %v4993_v50, 4  ;;  %v3119_v55 = vmax.f32 %v2927_v5, 0.0  ;;  %v5001_v20 = vshrl.u32 %v4539_v61, 16  ;;  %v5004_v0 = vshll.u32 %v4539_v61, 16  ;;  %v2642_v34 = vpop.f32.mrb[44].mxu0 }
 0x2b9   :  { %v4361_v26 = vsel %vm13494_vm11, %v3813_v54, %v4360_v12  ;;  %v3182_v15 = vmul.f32 1.7139589, %v3118_v24  ;;  %v5010_v14 = vshll.u32 %v4540_v51, 16  ;;  %v3821_v21 = vor.u32 %v3819_v38, %v3818_v43  ;;  %v2644_v42 = vpop.f32.mrb[45].mxu0 }
 0x2ba   :  { %4362 = vst [vmem:[#allocation3 + $0x78] sm:$0xf] %v4361_v26  ;;  %v3823_v47 = vrot.slane %v3818_v43, 4  ;;  %v4999_v46 = vsel %vm13522_vm15, %v4994_v2, %v4998_v57  ;;  %v3183_v58 = vmul.f32 1.7139589, %v3119_v55  ;;  %v5003_v50 = vrot.slane %v5001_v20, 4 }
 0x2bb   :  { %v13727_v6 = vcombine.low %v4989_v9, %v4999_v46  ;;  %v10270_v5 = vpack.c.bf16 %v3182_v15, %v3182_v15  ;;  %v5006_v8 = vrot.slane %v5004_v0, 5  ;;  %v2645_v27 = vpop.f32.mrb[46].mxu0  ;;  %v3822_v12 = vsel %vm13503_vm13, %v3814_v49, %v3821_v21  ;;  %v11227_v46 = vld [vmem:[%s16094_s2 + $0x200] sm:$0xff]  }
 0x2bc   :  { %v4365_v54 = vsel %vm13294_vm6, %v3823_v47, %v4364_v25  ;;  %v10271_v38 = vpack.c.bf16 %v3183_v58, %v3183_v58  ;;  %v5012_v24 = vrot.slane %v5010_v14, 5  ;;  %v2647_v43 = vpop.f32.mrb[47].mxu0  ;;  %4363 = vst [vmem:[#allocation3 + $0x7c] sm:$0xf] %v3822_v12  ;;  %v5014_v55 = vshrl.u32 %v4540_v51, 16  ;;  %10498 = vmatprep.subr.bf16.mxu0 %v11227_v46 }
 0x2bd   :  { %16323 = vst [vmem:[#allocation52_spill] sm:$0xff] %v13727_v6  ;;  %4366 = vst [vmem:[#allocation3 + $0x80] sm:$0x1] %v4365_v54  ;;  %7515 = vmatprep.mubr.bf16.mxu0 %v13727_v6  ;;  %v3825_v57 = vshrl.u32 %v10270_v5, 16  ;;  %v3828_v9 = vshll.u32 %v10270_v5, 16  ;;  %v5007_v2 = vor.u32 %v5006_v8, %v5003_v50  ;;  %v5020_v15 = vshll.u32 %v4541_v45, 16  ;;  %10499 = vmatpush3.bf16.msra.mxu0 %v11227_v46 }
 0x2be   :  { %v3833_v20 = vshrl.u32 %v10271_v38, 16  ;;  %v3836_v26 = vshll.u32 %v10271_v38, 16  ;;  %7516 = vmatmul.mubr.bf16.gmra.mrb[148].mxu0 %v13715_v16  ;;  %v2932_v49 = vadd.f32 %v13437_v31, %v2642_v34  ;;  %v4367_v25 = vld [vmem:[#allocation3 + $0x84] sm:$0xf]  ;;  %v5016_v14 = vrot.slane %v5014_v55, 4 }
 0x2bf   :  { %v3827_v0 = vrot.slane %v3825_v57, 7  ;;  %v5008_v21 = vrot.slane %v5007_v2, 4  ;;  %v2935_v47 = vadd.f32 %v13443_v3, %v2645_v27  ;;  %v5022_v8 = vrot.slane %v5020_v15, 5  ;;  %v13742_v50 = vld [vmem:[#allocation3 + $0x54] sm:$0xf] }
 0x2c0   :  { %v3835_v58 = vrot.slane %v3833_v20, 7  ;;  %v3120_v42 = vmax.f32 %v2932_v49, 0.0  ;;  %v13740_v5 = vcombine.low %v4539_v61, %v4540_v51  ;;  %v4371_v31 = vld [vmem:[#allocation3 + $0x8c] sm:$0x1]  ;;  %v5017_v54 = vor.u32 %v5016_v14, %v5012_v24  ;;  %v13746_v38 = vld [vmem:[#allocation3 + $0x58] sm:$0xf] }
 0x2c1   :  { %v3830_v45 = vor.u32 %v3828_v9, %v3827_v0  ;;  %v3831_v12 = vrot.slane %v3827_v0, 4  ;;  %v5013_v34 = vsel %vm13522_vm15, %v5008_v21, %v5012_v24  ;;  %v2650_v3 = vpop.f32.mrb[48].mxu0  ;;  %v3121_v2 = vmax.f32 %v2935_v47, 0.0  ;;  %v4544_v21 = vld [vmem:[#allocation3 + $0x5c] sm:$0x1] }
 0x2c2   :  { %16324 = vst [vmem:[#allocation53_spill] sm:$0xff] %v13740_v5  ;;  %v3838_v27 = vor.u32 %v3836_v26, %v3835_v58  ;;  %v3840_v43 = vrot.slane %v3835_v58, 4  ;;  %v3184_v57 = vmul.f32 1.7139589, %v3120_v42  ;;  %v2652_v55 = vpop.f32.mrb[49].mxu0  ;;  %v5018_v51 = vrot.slane %v5017_v54, 4 }
 0x2c3   :  { %v4368_v61 = vsel %vm13494_vm11, %v3830_v45, %v4367_v25  ;;  %v5025_v9 = vshrl.u32 %v13742_v50, 16  ;;  %v5028_v20 = vshll.u32 %v13742_v50, 16  ;;  %v2653_v15 = vpop.f32.mrb[50].mxu0  ;;  %v3185_v0 = vmul.f32 1.7139589, %v3121_v2 }
 0x2c4   :  { %4369 = vst [vmem:[#allocation3 + $0x84] sm:$0xf] %v4368_v61  ;;  %v3839_v24 = vsel %vm13503_vm13, %v3831_v12, %v3838_v27  ;;  %v4372_v26 = vsel %vm13294_vm6, %v3840_v43, %v4371_v31  ;;  %v10272_v49 = vpack.c.bf16 %v3184_v57, %v3184_v57  ;;  %v2655_v14 = vpop.f32.mrb[51].mxu0  ;;  %v5023_v25 = vsel %vm13522_vm15, %v5018_v51, %v5022_v8  ;;  %v11228_v31 = vld [vmem:[%s16094_s2 + $0x208] sm:$0xff]   ;;  %v4374_v27 = vld [vmem:[#allocation3 + $0x90] sm:$0xf] }
 0x2c5   :  { %4370 = vst [vmem:[#allocation3 + $0x88] sm:$0xf] %v3839_v24  ;;  %4373 = vst [vmem:[#allocation3 + $0x8c] sm:$0x1] %v4372_v26  ;;  %v5027_v47 = vrot.slane %v5025_v9, 4  ;;  %v5030_v46 = vrot.slane %v5028_v20, 5  ;;  %v13759_v42 = vcombine.low %v5013_v34, %v5023_v25  ;;  %v10273_v54 = vpack.c.bf16 %v3185_v0, %v3185_v0  ;;  %10500 = vmatprep.subr.bf16.mxu0 %v11228_v31 }
 0x2c6   :  { %v5034_v58 = vshll.u32 %v13746_v38, 16  ;;  %v3842_v45 = vshrl.u32 %v10272_v49, 16  ;;  %v3845_v12 = vshll.u32 %v10272_v49, 16  ;;  %v5038_v2 = vshrl.u32 %v13746_v38, 16  ;;  %v13767_v9 = vld [vmem:[#allocation3 + $0x60] sm:$0xf]  ;;  %10501 = vmatpush3.bf16.msra.mxu0 %v11228_v31 }
 0x2c7   :  { %16325 = vst [vmem:[#allocation54_spill] sm:$0xff] %v13759_v42  ;;  %v5031_v43 = vor.u32 %v5030_v46, %v5027_v47  ;;  %v5044_v55 = vshll.u32 %v4544_v21, 16  ;;  %7523 = vmatprep.mubr.bf16.mxu0 %v13759_v42  ;;  %v3850_v61 = vshrl.u32 %v10273_v54, 16  ;;  %v3853_v51 = vshll.u32 %v10273_v54, 16  ;;  %v4378_v20 = vld [vmem:[#allocation3 + $0x98] sm:$0x1] }
 0x2c8   :  { %v5036_v57 = vrot.slane %v5034_v58, 5  ;;  %v3844_v8 = vrot.slane %v3842_v45, 7  ;;  %v2940_v34 = vadd.f32 %v13455_v4, %v2650_v3  ;;  %7524 = vmatmul.mubr.bf16.gmra.mrb[152].mxu0 %v13740_v5  ;;  %v5040_v26 = vrot.slane %v5038_v2, 4  ;;  %v2658_v14 = vpop.f32.mrb[52].mxu0  ;;  %v13771_v21 = vpop.f32.mrb[48].mxu1  ;;  %v11230_v25 = vld [vmem:[%s16094_s2 + $0x210] sm:$0xff]  }
 0x2c9   :  { %v5032_v24 = vrot.slane %v5031_v43, 4  ;;  %v5046_v49 = vrot.slane %v5044_v55, 5  ;;  %v2943_v0 = vadd.f32 %v13461_v62, %v2653_v15  ;;  %v3852_v3 = vrot.slane %v3850_v61, 7  ;;  %v2660_v58 = vpop.f32.mrb[53].mxu0  ;;  %v13776_v45 = vpop.f32.mrb[49].mxu1  ;;  %10502 = vmatprep.subr.bf16.mxu0 %v11230_v25 }
 0x2ca   :  { %v3847_v47 = vor.u32 %v3845_v12, %v3844_v8  ;;  %v3848_v4 = vrot.slane %v3844_v8, 4  ;;  %v3122_v46 = vmax.f32 %v2940_v34, 0.0  ;;  %v5041_v43 = vor.u32 %v5040_v26, %v5036_v57  ;;  %v4546_v2 = vld [vmem:[#allocation3 + $0x64] sm:$0xf]  ;;  %v2661_v55 = vpop.f32.mrb[54].mxu0  ;;  %v13784_v12 = vpop.f32.mrb[50].mxu1  ;;  %10503 = vmatpush3.bf16.msra.mxu0 %v11230_v25 }
 0x2cb   :  { %v5037_v54 = vsel %vm13522_vm15, %v5032_v24, %v5036_v57  ;;  %v3123_v62 = vmax.f32 %v2943_v0, 0.0  ;;  %v13782_v15 = vcombine.low %v13742_v50, %v13746_v38  ;;  %v3855_v31 = vor.u32 %v3853_v51, %v3852_v3  ;;  %v2663_v58 = vpop.f32.mrb[55].mxu0  ;;  %v13790_v38 = vpop.f32.mrb[51].mxu1 }
 0x2cc   :  { %v4375_v8 = vsel %vm13494_vm11, %v3847_v47, %v4374_v27  ;;  %v3857_v61 = vrot.slane %v3852_v3, 4  ;;  %v3186_v34 = vmul.f32 1.7139589, %v3122_v46  ;;  %v5042_v24 = vrot.slane %v5041_v43, 4  ;;  %v4547_v46 = vld [vmem:[#allocation3 + $0x68] sm:$0x1] }
 0x2cd   :  { %16326 = vst [vmem:[#allocation55_spill] sm:$0xff] %v13782_v15  ;;  %4376 = vst [vmem:[#allocation3 + $0x90] sm:$0xf] %v4375_v8  ;;  %v3187_v57 = vmul.f32 1.7139589, %v3123_v62  ;;  %v5049_v26 = vshrl.u32 %v13767_v9, 16  ;;  %v3856_v0 = vsel %vm13503_vm13, %v3848_v4, %v3855_v31 }
 0x2ce   :  { %v5052_v50 = vshll.u32 %v13767_v9, 16  ;;  %v4379_v42 = vsel %vm13294_vm6, %v3857_v61, %v4378_v20  ;;  %v10274_v27 = vpack.c.bf16 %v3186_v34, %v3186_v34  ;;  %v5058_v51 = vshll.u32 %v4546_v2, 16  ;;  %4377 = vst [vmem:[#allocation3 + $0x94] sm:$0xf] %v3856_v0  ;;  %v11231_v20 = vld [vmem:[%s16094_s2 + $0x218] sm:$0xff]  }
 0x2cf   :  { %4380 = vst [vmem:[#allocation3 + $0x98] sm:$0x1] %v4379_v42  ;;  %v5047_v47 = vsel %vm13522_vm15, %v5042_v24, %v5046_v49  ;;  %v10275_v3 = vpack.c.bf16 %v3187_v57, %v3187_v57  ;;  %v5051_v43 = vrot.slane %v5049_v26, 4  ;;  %v5062_v42 = vshrl.u32 %v4546_v2, 16  ;;  %v4381_v24 = vld [vmem:[#allocation3 + $0x9c] sm:$0xf]  ;;  %10504 = vmatprep.subr.bf16.mxu0 %v11231_v20 }
 0x2d0   :  { %v5054_v62 = vrot.slane %v5052_v50, 5  ;;  %v13798_v8 = vcombine.low %v5037_v54, %v5047_v47  ;;  %v3859_v58 = vshrl.u32 %v10274_v27, 16  ;;  %v3862_v6 = vshll.u32 %v10274_v27, 16  ;;  %v13803_v34 = vpop.f32.mrb[56].mxu0  ;;  %10505 = vmatpush3.bf16.msra.mxu0 %v11231_v20 }
 0x2d1   :  { %v5060_v4 = vrot.slane %v5058_v51, 5  ;;  %v3867_v31 = vshrl.u32 %v10275_v3, 16  ;;  %v3870_v25 = vshll.u32 %v10275_v3, 16  ;;  %v5068_v57 = vshll.u32 %v4547_v46, 16  ;;  %v2668_v50 = vpop.f32.mrb[57].mxu0 }
 0x2d2   :  { %16327 = vst [vmem:[#allocation56_spill] sm:$0xff] %v13798_v8  ;;  %v5055_v61 = vor.u32 %v5054_v62, %v5051_v43  ;;  %7531 = vmatprep.mubr.bf16.mxu0 %v13798_v8  ;;  %v3861_v49 = vrot.slane %v3859_v58, 7  ;;  %v2948_v54 = vadd.f32 %v13453_v41, %v2658_v14  ;;  %v2951_v26 = vadd.f32 %v13459_v28, %v2661_v55  ;;  %v4548_v3 = vld [vmem:[#allocation3 + $0x6c] sm:$0xf]  ;;  %v2669_v43 = vpop.f32.mrb[58].mxu0 }
 0x2d3   :  { %v3869_v0 = vrot.slane %v3867_v31, 7  ;;  %7532 = vmatmul.mubr.bf16.gmra.mrb[156].mxu0 %v13782_v15  ;;  %v5064_v51 = vrot.slane %v5062_v42, 4  ;;  %v13810_v47 = vcombine.low %v13767_v9, %v4546_v2  ;;  %v4385_v8 = vld [vmem:[#allocation3 + $0xa4] sm:$0x1]  ;;  %v5070_v46 = vrot.slane %v5068_v57, 5  ;;  %v2671_v41 = vpop.f32.mrb[59].mxu0 }
 0x2d4   :  { %v5056_v27 = vrot.slane %v5055_v61, 4  ;;  %v3864_v62 = vor.u32 %v3862_v6, %v3861_v49  ;;  %v3865_v58 = vrot.slane %v3861_v49, 4  ;;  %v3124_v5 = vmax.f32 %v2948_v54, 0.0  ;;  %v4549_v61 = vld [vmem:[#allocation3 + $0x70] sm:$0xf]  ;;  %v11233_v9 = vld [vmem:[%s16094_s2 + $0x220] sm:$0xff]  }
 0x2d5   :  { %16328 = vst [vmem:[#allocation57_spill] sm:$0xff] %v13810_v47  ;;  %v3872_v28 = vor.u32 %v3870_v25, %v3869_v0  ;;  %v3874_v14 = vrot.slane %v3869_v0, 4  ;;  %v5065_v31 = vor.u32 %v5064_v51, %v5060_v4  ;;  %v3125_v42 = vmax.f32 %v2951_v26, 0.0  ;;  %v4550_v49 = vld [vmem:[#allocation3 + $0x74] sm:$0x1]  ;;  %10506 = vmatprep.subr.bf16.mxu0 %v11233_v9 }
 0x2d6   :  { %v5061_v55 = vsel %vm13522_vm15, %v5056_v27, %v5060_v4  ;;  %v4382_v6 = vsel %vm13494_vm11, %v3864_v62, %v4381_v24  ;;  %v3188_v2 = vmul.f32 1.7139589, %v3124_v5  ;;  %v5073_v57 = vshrl.u32 %v4548_v3, 16  ;;  %10507 = vmatpush3.bf16.msra.mxu0 %v11233_v9 }
 0x2d7   :  { %4383 = vst [vmem:[#allocation3 + $0x9c] sm:$0xf] %v4382_v6  ;;  %v3873_v20 = vsel %vm13503_vm13, %v3865_v58, %v3872_v28  ;;  %v4386_v25 = vsel %vm13294_vm6, %v3874_v14, %v4385_v8  ;;  %v5066_v4 = vrot.slane %v5065_v31, 4  ;;  %v5076_v54 = vshll.u32 %v4548_v3, 16 }
 0x2d8   :  { %4384 = vst [vmem:[#allocation3 + $0xa0] sm:$0xf] %v3873_v20  ;;  %4387 = vst [vmem:[#allocation3 + $0xa4] sm:$0x1] %v4386_v25  ;;  %v10276_v50 = vpack.c.bf16 %v3188_v2, %v3188_v2  ;;  %v3189_v0 = vmul.f32 1.7139589, %v3125_v42 }
 0x2d9   :  { %v5075_v27 = vrot.slane %v5073_v57, 4  ;;  %v5082_v24 = vshll.u32 %v4549_v61, 16  ;;  %v5071_v5 = vsel %vm13522_vm15, %v5066_v4, %v5070_v46  ;;  %v5078_v26 = vrot.slane %v5076_v54, 5  ;;  %v13825_v58 = vpop.f32.mrb[60].mxu0  ;;  %v4388_v54 = vld [vmem:[#allocation3 + $0xa8] sm:$0xf] }
 0x2da   :  { %v5086_v51 = vshrl.u32 %v4549_v61, 16  ;;  %v5092_v62 = vshll.u32 %v4550_v49, 16  ;;  %v13827_v41 = vcombine.low %v5061_v55, %v5071_v5  ;;  %v3876_v8 = vshrl.u32 %v10276_v50, 16  ;;  %v2676_v31 = vpop.f32.mrb[61].mxu0  ;;  %v13834_v55 = vld [vmem:[#allocation3 + $0x78] sm:$0xf] }
 0x2db   :  { %v3879_v28 = vshll.u32 %v10276_v50, 16  ;;  %v10277_v14 = vpack.c.bf16 %v3189_v0, %v3189_v0  ;;  %v5079_v6 = vor.u32 %v5078_v26, %v5075_v27  ;;  %v5084_v2 = vrot.slane %v5082_v24, 5  ;;  %v13829_v20 = vpop.f32.mrb[62].mxu0  ;;  %v4552_v31 = vld [vmem:[#allocation3 + $0x7c] sm:$0xf] }
 0x2dc   :  { %16329 = vst [vmem:[#allocation58_spill] sm:$0xff] %v13827_v41  ;;  %v5088_v42 = vrot.slane %v5086_v51, 4  ;;  %v5094_v57 = vrot.slane %v5092_v62, 5  ;;  %7539 = vmatprep.mubr.bf16.mxu0 %v13827_v41  ;;  %v3878_v46 = vrot.slane %v3876_v8, 7  ;;  %v2956_v49 = vadd.f32 %v13479_v36, %v13803_v34  ;;  %v2679_v4 = vpop.f32.mrb[63].mxu0 }
 0x2dd   :  { %v3884_v9 = vshrl.u32 %v10277_v14, 16  ;;  %v3887_v25 = vshll.u32 %v10277_v14, 16  ;;  %7540 = vmatmul.mubr.bf16.gmra.mrb[160].mxu0 %v13810_v47  ;;  %v5080_v50 = vrot.slane %v5079_v6, 4  ;;  %v2959_v27 = vadd.f32 %v13490_v1, %v2669_v43  ;;  %v4392_v62 = vld [vmem:[#allocation3 + $0xb0] sm:$0x1] }
 0x2de   :  { %v5089_v0 = vor.u32 %v5088_v42, %v5084_v2  ;;  %v13838_v24 = vcombine.low %v4548_v3, %v4549_v61  ;;  %v3881_v5 = vor.u32 %v3879_v28, %v3878_v46  ;;  %v3882_v26 = vrot.slane %v3878_v46, 4  ;;  %v4553_v43 = vld [vmem:[#allocation3 + $0x80] sm:$0x1] }
 0x2df   :  { %v3886_v51 = vrot.slane %v3884_v9, 7  ;;  %v3126_v8 = vmax.f32 %v2956_v49, 0.0  ;;  %v5085_v36 = vsel %vm13522_vm15, %v5080_v50, %v5084_v2  ;;  %v3127_v14 = vmax.f32 %v2959_v27, 0.0  ;;  %v11236_v49 = vld [vmem:[%s16094_s2 + $0x228] sm:$0xff]  }
 0x2e0   :  { %16330 = vst [vmem:[#allocation59_spill] sm:$0xff] %v13838_v24  ;;  %v5090_v34 = vrot.slane %v5089_v0, 4  ;;  %v5097_v4 = vshrl.u32 %v13834_v55, 16  ;;  %v4389_v6 = vsel %vm13494_vm11, %v3881_v5, %v4388_v54  ;;  %v5100_v2 = vshll.u32 %v13834_v55, 16  ;;  %v13848_v9 = vpop.f32.mrb[64].mxu0  ;;  %10508 = vmatprep.subr.bf16.mxu0 %v11236_v49 }
 0x2e1   :  { %v3889_v42 = vor.u32 %v3887_v25, %v3886_v51  ;;  %v3891_v1 = vrot.slane %v3886_v51, 4  ;;  %v3190_v3 = vmul.f32 1.7139589, %v3126_v8  ;;  %4390 = vst [vmem:[#allocation3 + $0xa8] sm:$0xf] %v4389_v6  ;;  %v5106_v51 = vshll.u32 %v4552_v31, 16  ;;  %10509 = vmatpush3.bf16.msra.mxu0 %v11236_v49 }
 0x2e2   :  { %v5095_v61 = vsel %vm13522_vm15, %v5090_v34, %v5094_v57  ;;  %v3191_v28 = vmul.f32 1.7139589, %v3127_v14  ;;  %v5099_v46 = vrot.slane %v5097_v4, 4  ;;  %v2684_v57 = vpop.f32.mrb[65].mxu0  ;;  %v5102_v5 = vrot.slane %v5100_v2, 5  ;;  %v13861_v14 = vpop.f32.mrb[52].mxu1 }
 0x2e3   :  { %v3890_v25 = vsel %vm13503_vm13, %v3882_v26, %v3889_v42  ;;  %v4393_v54 = vsel %vm13294_vm6, %v3891_v1, %v4392_v62  ;;  %v13857_v50 = vcombine.low %v5085_v36, %v5095_v61  ;;  %v10278_v0 = vpack.c.bf16 %v3190_v3, %v3190_v3  ;;  %v13859_v34 = vpop.f32.mrb[66].mxu0  ;;  %v13866_v42 = vpop.f32.mrb[53].mxu1  ;;  %v11239_v1 = vld [vmem:[%s16094_s2 + $0x230] sm:$0xff]  }
 0x2e4   :  { %4391 = vst [vmem:[#allocation3 + $0xac] sm:$0xf] %v3890_v25  ;;  %4394 = vst [vmem:[#allocation3 + $0xb0] sm:$0x1] %v4393_v54  ;;  %v10279_v27 = vpack.c.bf16 %v3191_v28, %v3191_v28  ;;  %v5110_v8 = vshrl.u32 %v4552_v31, 16  ;;  %v5116_v62 = vshll.u32 %v4553_v43, 16  ;;  %v2964_v36 = vadd.f32 %v13475_v56, %v13825_v58  ;;  %10510 = vmatprep.subr.bf16.mxu0 %v11239_v1 }
 0x2e5   :  { %16331 = vst [vmem:[#allocation60_spill] sm:$0xff] %v13857_v50  ;;  %7547 = vmatprep.mubr.bf16.mxu0 %v13857_v50  ;;  %v3893_v26 = vshrl.u32 %v10278_v0, 16  ;;  %v3896_v4 = vshll.u32 %v10278_v0, 16  ;;  %v2687_v6 = vpop.f32.mrb[67].mxu0  ;;  %v5103_v28 = vor.u32 %v5102_v5, %v5099_v46  ;;  %v5108_v2 = vrot.slane %v5106_v51, 5  ;;  %v13872_v25 = vpop.f32.mrb[54].mxu1  ;;  %10511 = vmatpush3.bf16.msra.mxu0 %v11239_v1 }
 0x2e6   :  { %v3901_v3 = vshrl.u32 %v10279_v27, 16  ;;  %v3904_v61 = vshll.u32 %v10279_v27, 16  ;;  %7548 = vmatmul.mubr.bf16.gmra.mrb[164].mxu0 %v13838_v24  ;;  %v5112_v54 = vrot.slane %v5110_v8, 4  ;;  %v5118_v0 = vrot.slane %v5116_v62, 5  ;;  %v13874_v58 = vpop.f32.mrb[55].mxu1 }
 0x2e7   :  { %v3895_v43 = vrot.slane %v3893_v26, 7  ;;  %v3128_v56 = vmax.f32 %v2964_v36, 0.0  ;;  %v4395_v49 = vld [vmem:[#allocation3 + $0xb4] sm:$0xf]  ;;  %v5104_v6 = vrot.slane %v5103_v28, 4  ;;  %v2967_v50 = vadd.f32 %v13488_v35, %v13829_v20 }
 0x2e8   :  { %v3903_v57 = vrot.slane %v3901_v3, 7  ;;  %v13879_v27 = vcombine.low %v13834_v55, %v4552_v31  ;;  %v13881_v46 = vld [vmem:[#allocation3 + $0x84] sm:$0xf]  ;;  %v4399_v26 = vld [vmem:[#allocation3 + $0xbc] sm:$0x1]  ;;  %v5113_v8 = vor.u32 %v5112_v54, %v5108_v2  ;;  %v13885_v24 = vpop.f32.mrb[68].mxu0 }
 0x2e9   :  { %v3898_v5 = vor.u32 %v3896_v4, %v3895_v43  ;;  %v3899_v51 = vrot.slane %v3895_v43, 4  ;;  %v3192_v62 = vmul.f32 1.7139589, %v3128_v56  ;;  %v5109_v3 = vsel %vm13522_vm15, %v5104_v6, %v5108_v2  ;;  %v13889_v31 = vld [vmem:[#allocation3 + $0x88] sm:$0xf]  ;;  %v2692_v43 = vpop.f32.mrb[69].mxu0 }
 0x2ea   :  { %16332 = vst [vmem:[#allocation61_spill] sm:$0xff] %v13879_v27  ;;  %v3906_v36 = vor.u32 %v3904_v61, %v3903_v57  ;;  %v3908_v41 = vrot.slane %v3903_v57, 4  ;;  %v3129_v28 = vmax.f32 %v2967_v50, 0.0  ;;  %v5114_v20 = vrot.slane %v5113_v8, 4  ;;  %v4556_v2 = vld [vmem:[#allocation3 + $0x8c] sm:$0x1] }
 0x2eb   :  { %v4396_v35 = vsel %vm13494_vm11, %v3898_v5, %v4395_v49  ;;  %v10280_v55 = vpack.c.bf16 %v3192_v62, %v3192_v62  ;;  %v5121_v4 = vshrl.u32 %v13881_v46, 16  ;;  %v5124_v54 = vshll.u32 %v13881_v46, 16  ;;  %v13897_v56 = vpop.f32.mrb[70].mxu0  ;;  %v13999_v39 = vld [vmem:[#allocation3 + $0xa8] sm:$0xf] }
 0x2ec   :  { %4397 = vst [vmem:[#allocation3 + $0xb4] sm:$0xf] %v4396_v35  ;;  %v3907_v1 = vsel %vm13503_vm13, %v3899_v51, %v3906_v36  ;;  %v4400_v61 = vsel %vm13294_vm6, %v3908_v41, %v4399_v26  ;;  %v3193_v50 = vmul.f32 1.7139589, %v3129_v28  ;;  %v5119_v49 = vsel %vm13522_vm15, %v5114_v20, %v5118_v0  ;;  %v2695_v8 = vpop.f32.mrb[71].mxu0  ;;  %v11242_v0 = vld [vmem:[%s16094_s2 + $0x238] sm:$0xff]  }
 0x2ed   :  { %4398 = vst [vmem:[#allocation3 + $0xb8] sm:$0xf] %v3907_v1  ;;  %4401 = vst [vmem:[#allocation3 + $0xbc] sm:$0x1] %v4400_v61  ;;  %v3910_v57 = vshrl.u32 %v10280_v55, 16  ;;  %v3913_v6 = vshll.u32 %v10280_v55, 16  ;;  %v13901_v62 = vcombine.low %v5109_v3, %v5119_v49  ;;  %v2972_v1 = vadd.f32 %v13550_v40, %v13848_v9  ;;  %10512 = vmatprep.subr.bf16.mxu0 %v11242_v0 }
 0x2ee   :  { %v5123_v5 = vrot.slane %v5121_v4, 4  ;;  %v4402_v51 = vld [vmem:[#allocation3 + $0xc0] sm:$0xf]  ;;  %v10281_v36 = vpack.c.bf16 %v3193_v50, %v3193_v50  ;;  %v5126_v41 = vrot.slane %v5124_v54, 5  ;;  %v5130_v26 = vshll.u32 %v13889_v31, 16  ;;  %10513 = vmatpush3.bf16.msra.mxu0 %v11242_v0 }
 0x2ef   :  { %16333 = vst [vmem:[#allocation62_spill] sm:$0xff] %v13901_v62  ;;  %v3912_v28 = vrot.slane %v3910_v57, 7  ;;  %v5134_v35 = vshrl.u32 %v13889_v31, 16  ;;  %v5140_v43 = vshll.u32 %v4556_v2, 16  ;;  %v3299_v61 = vld [vmem:[#allocation3 + $0xe4] sm:$0x1]  ;;  %7555 = vmatprep.mubr.bf16.mxu0 %v13901_v62 }
 0x2f0   :  { %v3918_v3 = vshrl.u32 %v10281_v36, 16  ;;  %v3921_v20 = vshll.u32 %v10281_v36, 16  ;;  %v5127_v55 = vor.u32 %v5126_v41, %v5123_v5  ;;  %v5132_v4 = vrot.slane %v5130_v26, 5  ;;  %v3409_v50 = vld [vmem:[#allocation3 + $0xec] sm:$0x1]  ;;  %7556 = vmatmul.mubr.bf16.gmra.mrb[168].mxu0 %v13879_v27  ;;  %v13916_v15 = vpop.f32.mrb[72].mxu0 }
 0x2f1   :  { %v3915_v54 = vor.u32 %v3913_v6, %v3912_v28  ;;  %v3916_v49 = vrot.slane %v3912_v28, 4  ;;  %v5136_v2 = vrot.slane %v5134_v35, 4  ;;  %v5142_v57 = vrot.slane %v5140_v43, 5  ;;  %v13912_v8 = vld [vmem:[#allocation3 + $0x90] sm:$0xf]  ;;  %v2700_v28 = vpop.f32.mrb[73].mxu0 }
 0x2f2   :  { %v3920_v40 = vrot.slane %v3918_v3, 7  ;;  %v5128_v9 = vrot.slane %v5127_v55, 4  ;;  %v3130_v47 = vmax.f32 %v2972_v1, 0.0  ;;  %v3300_v62 = vsel %vm13294_vm6, 0, %v3299_v61  ;;  %v4406_v5 = vld [vmem:[#allocation3 + $0xc8] sm:$0x1] }
 0x2f3   :  { %v4403_v6 = vsel %vm13494_vm11, %v3915_v54, %v4402_v51  ;;  %v5137_v36 = vor.u32 %v5136_v2, %v5132_v4  ;;  %3301 = vst [vmem:[#allocation3 + $0xe4] sm:$0x1] %v3300_v62  ;;  %v2975_v41 = vadd.f32 %v13557_v32, %v13859_v34  ;;  %v3410_v26 = vsel %vm13303_vm8, 0, %v3409_v50  ;;  %v4558_v0 = vld [vmem:[#allocation3 + $0x94] sm:$0xf]  ;;  %v13926_v51 = vpop.f32.mrb[74].mxu0 }
 0x2f4   :  { %4404 = vst [vmem:[#allocation3 + $0xc0] sm:$0xf] %v4403_v6  ;;  %v3923_v35 = vor.u32 %v3921_v20, %v3920_v40  ;;  %v3925_v43 = vrot.slane %v3920_v40, 4  ;;  %v5133_v1 = vsel %vm13522_vm15, %v5128_v9, %v5132_v4  ;;  %v3194_v61 = vmul.f32 1.7139589, %v3130_v47  ;;  %v2703_v55 = vpop.f32.mrb[75].mxu0 }
 0x2f5   :  { %3411 = vst [vmem:[#allocation3 + $0xec] sm:$0x1] %v3410_v26  ;;  %v5138_v3 = vrot.slane %v5137_v36, 4  ;;  %v3131_v62 = vmax.f32 %v2975_v41, 0.0  ;;  %v13930_v32 = vcombine.low %v13881_v46, %v13889_v31  ;;  %v5145_v34 = vshrl.u32 %v13912_v8, 16  ;;  %v16336_v55 = vld [vmem:[#allocation42_spill] sm:$0xff] }
 0x2f6   :  { %v3924_v20 = vsel %vm13503_vm13, %v3916_v49, %v3923_v35  ;;  %v4407_v4 = vsel %vm13294_vm6, %v3925_v43, %v4406_v5  ;;  %v10282_v47 = vpack.c.bf16 %v3194_v61, %v3194_v61  ;;  %v4559_v50 = vld [vmem:[#allocation3 + $0x98] sm:$0x1]  ;;  %v5148_v54 = vshll.u32 %v13912_v8, 16  ;;  %v3302_v9 = vld [vmem:[#allocation3 + $0xf0] sm:$0x1] }
 0x2f7   :  { %16334 = vst [vmem:[#allocation63_spill] sm:$0xff] %v13930_v32  ;;  %4405 = vst [vmem:[#allocation3 + $0xc4] sm:$0xf] %v3924_v20  ;;  %v5143_v2 = vsel %vm13522_vm15, %v5138_v3, %v5142_v57  ;;  %v3195_v46 = vmul.f32 1.7139589, %v3131_v62  ;;  %v5147_v31 = vrot.slane %v5145_v34, 4  ;;  %v2980_v57 = vadd.f32 %v16336_v55, %v13885_v24 }
 0x2f8   :  { %4408 = vst [vmem:[#allocation3 + $0xc8] sm:$0x1] %v4407_v4  ;;  %v5154_v40 = vshll.u32 %v4558_v0, 16  ;;  %v13940_v6 = vcombine.low %v5133_v1, %v5143_v2  ;;  %v3927_v36 = vshrl.u32 %v10282_v47, 16  ;;  %v3930_v49 = vshll.u32 %v10282_v47, 16  ;;  %v13947_v1 = vpop.f32.mrb[76].mxu0 }
 0x2f9   :  { %v5150_v41 = vrot.slane %v5148_v54, 5  ;;  %v10283_v26 = vpack.c.bf16 %v3195_v46, %v3195_v46  ;;  %v5158_v28 = vshrl.u32 %v4558_v0, 16  ;;  %v5164_v35 = vshll.u32 %v4559_v50, 16  ;;  %v3412_v62 = vld [vmem:[#allocation3 + $0xf8] sm:$0x1]  ;;  %v2708_v24 = vpop.f32.mrb[77].mxu0 }
 0x2fa   :  { %16335 = vst [vmem:[#allocation64_spill] sm:$0xff] %v13940_v6  ;;  %v5156_v5 = vrot.slane %v5154_v40, 5  ;;  %7563 = vmatprep.mubr.bf16.mxu0 %v13940_v6  ;;  %v3929_v43 = vrot.slane %v3927_v36, 7  ;;  %v3303_v3 = vsel %vm13294_vm6, 0, %v3302_v9  ;;  %v4409_v34 = vld [vmem:[#allocation3 + $0xe4] sm:$0xf] }
 0x2fb   :  { %v5151_v61 = vor.u32 %v5150_v41, %v5147_v31  ;;  %v3935_v20 = vshrl.u32 %v10283_v26, 16  ;;  %v3938_v4 = vshll.u32 %v10283_v26, 16  ;;  %7564 = vmatmul.mubr.bf16.gmra.mrb[172].mxu0 %v13930_v32  ;;  %v5160_v47 = vrot.slane %v5158_v28, 4  ;;  %3304 = vst [vmem:[#allocation3 + $0xf0] sm:$0x1] %v3303_v3  ;;  %v13958_v28 = vpop.f32.mrb[78].mxu0 }
 0x2fc   :  { %v5166_v50 = vrot.slane %v5164_v35, 5  ;;  %v3932_v54 = vor.u32 %v3930_v49, %v3929_v43  ;;  %v3933_v2 = vrot.slane %v3929_v43, 4  ;;  %v3132_v31 = vmax.f32 %v2980_v57, 0.0  ;;  %v13950_v40 = vld [vmem:[#allocation3 + $0x9c] sm:$0xf] }
 0x2fd   :  { %v5152_v46 = vrot.slane %v5151_v61, 4  ;;  %v3937_v36 = vrot.slane %v3935_v20, 7  ;;  %v5161_v9 = vor.u32 %v5160_v47, %v5156_v5  ;;  %v2983_v41 = vadd.f32 %v13555_v19, %v13897_v56  ;;  %v13956_v55 = vld [vmem:[#allocation3 + $0xa0] sm:$0xf]  ;;  %v4413_v35 = vld [vmem:[#allocation3 + $0xec] sm:$0x1] }
 0x2fe   :  { %v3413_v26 = vsel %vm13303_vm8, 0, %v3412_v62  ;;  %v4410_v49 = vsel %vm13494_vm11, %v3932_v54, %v4409_v34  ;;  %v3196_v61 = vmul.f32 1.7139589, %v3132_v31  ;;  %v13965_v57 = vcombine.low %v13912_v8, %v4558_v0  ;;  %v2711_v19 = vpop.f32.mrb[79].mxu0  ;;  %v13967_v56 = vpop.f32.mrb[56].mxu1 }
 0x2ff   :  { %v5157_v43 = vsel %vm13522_vm15, %v5152_v46, %v5156_v5  ;;  %3414 = vst [vmem:[#allocation3 + $0xf8] sm:$0x1] %v3413_v26  ;;  %4411 = vst [vmem:[#allocation3 + $0xe4] sm:$0xf] %v4410_v49  ;;  %v3940_v3 = vor.u32 %v3938_v4, %v3937_v36  ;;  %v3942_v62 = vrot.slane %v3937_v36, 4  ;;  %v5162_v20 = vrot.slane %v5161_v9, 4 }
 0x300   :  { %16337 = vst [vmem:[#allocation42_spill] sm:$0xff] %v13965_v57  ;;  %v3133_v47 = vmax.f32 %v2983_v41, 0.0  ;;  %v13969_v24 = vpop.f32.mrb[57].mxu1  ;;  %v10284_v34 = vpack.c.bf16 %v3196_v61, %v3196_v61  ;;  %v5169_v54 = vshrl.u32 %v13950_v40, 16  ;;  %v5172_v5 = vshll.u32 %v13950_v40, 16  ;;  %v13986_v32 = vpop.f32.mrb[80].mxu0 }
 0x301   :  { %v5178_v46 = vshll.u32 %v13956_v55, 16  ;;  %v3305_v31 = vld [vmem:[#allocation3 + $0xfc] sm:$0x1]  ;;  %v13974_v8 = vpop.f32.mrb[58].mxu1  ;;  %v3941_v0 = vsel %vm13503_vm13, %v3933_v2, %v3940_v3  ;;  %v4414_v4 = vsel %vm13294_vm6, %v3942_v62, %v4413_v35  ;;  %v5167_v36 = vsel %vm13522_vm15, %v5162_v20, %v5166_v50  ;;  %v4562_v41 = vld [vmem:[#allocation3 + $0xa4] sm:$0x1] }
 0x302   :  { %v3197_v9 = vmul.f32 1.7139589, %v3133_v47  ;;  %v13982_v26 = vpop.f32.mrb[59].mxu1  ;;  %4412 = vst [vmem:[#allocation3 + $0xe8] sm:$0xf] %v3941_v0  ;;  %v13984_v49 = vcombine.low %v5157_v43, %v5167_v36  ;;  %v3944_v61 = vshrl.u32 %v10284_v34, 16  ;;  %v2988_v47 = vadd.f32 %v13599_v29, %v13916_v15 }
 0x303   :  { %4415 = vst [vmem:[#allocation3 + $0xec] sm:$0x1] %v4414_v4  ;;  %v3947_v19 = vshll.u32 %v10284_v34, 16  ;;  %v5171_v6 = vrot.slane %v5169_v54, 4  ;;  %v5174_v3 = vrot.slane %v5172_v5, 5  ;;  %v5180_v27 = vrot.slane %v5178_v46, 5 }
 0x304   :  { %16338 = vst [vmem:[#allocation65_spill] sm:$0xff] %v13984_v49  ;;  %v10285_v2 = vpack.c.bf16 %v3197_v9, %v3197_v9  ;;  %v5182_v35 = vshrl.u32 %v13956_v55, 16  ;;  %v2716_v62 = vpop.f32.mrb[81].mxu0  ;;  %7571 = vmatprep.mubr.bf16.mxu0 %v13984_v49  ;;  %v3946_v50 = vrot.slane %v3944_v61, 7  ;;  %v5188_v20 = vshll.u32 %v4562_v41, 16 }
 0x305   :  { %v3306_v43 = vsel %vm13294_vm6, 0, %v3305_v31  ;;  %v3415_v34 = vld [vmem:[#allocation3 + $0x104] sm:$0x1]  ;;  %v13994_v54 = vpop.f32.mrb[82].mxu0  ;;  %v4416_v0 = vld [vmem:[#allocation3 + $0xf0] sm:$0xf]  ;;  %7572 = vmatmul.mubr.bf16.gmra.mrb[176].mxu0 %v13965_v57  ;;  %v5175_v46 = vor.u32 %v5174_v3, %v5171_v6  ;;  %v2991_v31 = vadd.f32 %v13621_v53, %v13926_v51 }
 0x306   :  { %v3952_v4 = vshrl.u32 %v10285_v2, 16  ;;  %v3955_v5 = vshll.u32 %v10285_v2, 16  ;;  %v5184_v36 = vrot.slane %v5182_v35, 4  ;;  %3307 = vst [vmem:[#allocation3 + $0xfc] sm:$0x1] %v3306_v43  ;;  %v2719_v9 = vpop.f32.mrb[83].mxu0  ;;  %v3949_v61 = vor.u32 %v3947_v19, %v3946_v50 }
 0x307   :  { %v3950_v41 = vrot.slane %v3946_v50, 4  ;;  %v5190_v62 = vrot.slane %v5188_v20, 5  ;;  %v3134_v49 = vmax.f32 %v2988_v47, 0.0  ;;  %v5176_v15 = vrot.slane %v5175_v46, 4  ;;  %v14001_v22 = vld [vmem:[#allocation3 + $0xac] sm:$0xf] }
 0x308   :  { %v3954_v29 = vrot.slane %v3952_v4, 7  ;;  %v5185_v16 = vor.u32 %v5184_v36, %v5180_v27  ;;  %v4417_v6 = vsel %vm13494_vm11, %v3949_v61, %v4416_v0  ;;  %v4420_v2 = vld [vmem:[#allocation3 + $0xf8] sm:$0x1]  ;;  %v3416_v19 = vsel %vm13303_vm8, 0, %v3415_v34  ;;  %v14015_v4 = vpop.f32.mrb[84].mxu0 }
 0x309   :  { %v3198_v3 = vmul.f32 1.7139589, %v3134_v49  ;;  %v14009_v35 = vcombine.low %v13950_v40, %v13956_v55  ;;  %4418 = vst [vmem:[#allocation3 + $0xf0] sm:$0xf] %v4417_v6  ;;  %v5181_v53 = vsel %vm13522_vm15, %v5176_v15, %v5180_v27  ;;  %3417 = vst [vmem:[#allocation3 + $0x104] sm:$0x1] %v3416_v19 }
 0x30a   :  { %v3957_v50 = vor.u32 %v3955_v5, %v3954_v29  ;;  %v3959_v20 = vrot.slane %v3954_v29, 4  ;;  %v5186_v51 = vrot.slane %v5185_v16, 4  ;;  %v3135_v43 = vmax.f32 %v2991_v31, 0.0  ;;  %v4565_v27 = vld [vmem:[#allocation3 + $0xb0] sm:$0x1]  ;;  %v2724_v5 = vpop.f32.mrb[85].mxu0 }
 0x30b   :  { %16339 = vst [vmem:[#allocation66_spill] sm:$0xff] %v14009_v35  ;;  %v10286_v47 = vpack.c.bf16 %v3198_v3, %v3198_v3  ;;  %v5193_v0 = vshrl.u32 %v13999_v39, 16  ;;  %v5196_v49 = vshll.u32 %v13999_v39, 16  ;;  %v5202_v16 = vshll.u32 %v14001_v22, 16  ;;  %v3308_v29 = vld [vmem:[#allocation3 + $0x108] sm:$0x1] }
 0x30c   :  { %v3958_v40 = vsel %vm13503_vm13, %v3950_v41, %v3957_v50  ;;  %v4421_v55 = vsel %vm13294_vm6, %v3959_v20, %v4420_v2  ;;  %v5191_v34 = vsel %vm13522_vm15, %v5186_v51, %v5190_v62  ;;  %v3199_v61 = vmul.f32 1.7139589, %v3135_v43  ;;  %v14027_v2 = vpop.f32.mrb[86].mxu0 }
 0x30d   :  { %4419 = vst [vmem:[#allocation3 + $0xf4] sm:$0xf] %v3958_v40  ;;  %4422 = vst [vmem:[#allocation3 + $0xf8] sm:$0x1] %v4421_v55  ;;  %v14024_v46 = vcombine.low %v5181_v53, %v5191_v34  ;;  %v3961_v36 = vshrl.u32 %v10286_v47, 16  ;;  %v3964_v9 = vshll.u32 %v10286_v47, 16  ;;  %v2996_v50 = vadd.f32 %v13594_v33, %v13947_v1 }
 0x30e   :  { %v5195_v15 = vrot.slane %v5193_v0, 4  ;;  %v5198_v41 = vrot.slane %v5196_v49, 5  ;;  %v5204_v31 = vrot.slane %v5202_v16, 5  ;;  %v5206_v6 = vshrl.u32 %v14001_v22, 16  ;;  %v2727_v20 = vpop.f32.mrb[87].mxu0 }
 0x30f   :  { %16340 = vst [vmem:[#allocation67_spill] sm:$0xff] %v14024_v46  ;;  %7579 = vmatprep.mubr.bf16.mxu0 %v14024_v46  ;;  %v3963_v62 = vrot.slane %v3961_v36, 7  ;;  %v10287_v3 = vpack.c.bf16 %v3199_v61, %v3199_v61  ;;  %v5212_v19 = vshll.u32 %v4565_v27, 16  ;;  %v4423_v53 = vld [vmem:[#allocation3 + $0xfc] sm:$0xf]  ;;  %v3309_v43 = vsel %vm13294_vm6, 0, %v3308_v29 }
 0x310   :  { %7580 = vmatmul.mubr.bf16.gmra.mrb[180].mxu0 %v14009_v35  ;;  %v5199_v51 = vor.u32 %v5198_v41, %v5195_v15  ;;  %v5208_v47 = vrot.slane %v5206_v6, 4  ;;  %v2999_v0 = vadd.f32 %v13612_v60, %v13958_v28  ;;  %v3418_v49 = vld [vmem:[#allocation3 + $0x110] sm:$0x1]  ;;  %3310 = vst [vmem:[#allocation3 + $0x108] sm:$0x1] %v3309_v43  ;;  %v3136_v5 = vmax.f32 %v2996_v50, 0.0 }
 0x311   :  { %v3966_v40 = vor.u32 %v3964_v9, %v3963_v62  ;;  %v3967_v55 = vrot.slane %v3963_v62, 4  ;;  %v3969_v34 = vshrl.u32 %v10287_v3, 16  ;;  %v3972_v27 = vshll.u32 %v10287_v3, 16  ;;  %v14037_v36 = vld [vmem:[#allocation3 + $0xb4] sm:$0xf]  ;;  %v14045_v9 = vpop.f32.mrb[88].mxu0 }
 0x312   :  { %v5200_v16 = vrot.slane %v5199_v51, 4  ;;  %v5209_v33 = vor.u32 %v5208_v47, %v5204_v31  ;;  %v5214_v1 = vrot.slane %v5212_v19, 5  ;;  %v3137_v29 = vmax.f32 %v2999_v0, 0.0  ;;  %v14043_v28 = vld [vmem:[#allocation3 + $0xb8] sm:$0xf]  ;;  %v2732_v50 = vpop.f32.mrb[89].mxu0 }
 0x313   :  { %v4424_v61 = vsel %vm13494_vm11, %v3966_v40, %v4423_v53  ;;  %v3971_v15 = vrot.slane %v3969_v34, 7  ;;  %v3419_v60 = vsel %vm13303_vm8, 0, %v3418_v49  ;;  %v4427_v41 = vld [vmem:[#allocation3 + $0x104] sm:$0x1]  ;;  %v3200_v3 = vmul.f32 1.7139589, %v3136_v5 }
 0x314   :  { %4425 = vst [vmem:[#allocation3 + $0xfc] sm:$0xf] %v4424_v61  ;;  %v5205_v6 = vsel %vm13522_vm15, %v5200_v16, %v5204_v31  ;;  %v5210_v62 = vrot.slane %v5209_v33, 4  ;;  %3420 = vst [vmem:[#allocation3 + $0x110] sm:$0x1] %v3419_v60  ;;  %v14051_v19 = vcombine.low %v13999_v39, %v14001_v22  ;;  %v5217_v47 = vshrl.u32 %v14037_v36, 16 }
 0x315   :  { %v3974_v20 = vor.u32 %v3972_v27, %v3971_v15  ;;  %v3976_v53 = vrot.slane %v3971_v15, 4  ;;  %v3201_v51 = vmul.f32 1.7139589, %v3137_v29  ;;  %v14054_v43 = vpop.f32.mrb[90].mxu0  ;;  %v10288_v49 = vpack.c.bf16 %v3200_v3, %v3200_v3  ;;  %v4568_v33 = vld [vmem:[#allocation3 + $0xbc] sm:$0x1] }
 0x316   :  { %16341 = vst [vmem:[#allocation68_spill] sm:$0xff] %v14051_v19  ;;  %v5215_v0 = vsel %vm13522_vm15, %v5210_v62, %v5214_v1  ;;  %v5220_v31 = vshll.u32 %v14037_v36, 16  ;;  %v5226_v40 = vshll.u32 %v14043_v28, 16  ;;  %v2735_v34 = vpop.f32.mrb[91].mxu0  ;;  %v5219_v61 = vrot.slane %v5217_v47, 4 }
 0x317   :  { %v3975_v22 = vsel %vm13503_vm13, %v3967_v55, %v3974_v20  ;;  %v4428_v39 = vsel %vm13294_vm6, %v3976_v53, %v4427_v41  ;;  %v14064_v27 = vcombine.low %v5205_v6, %v5215_v0  ;;  %v10289_v16 = vpack.c.bf16 %v3201_v51, %v3201_v51  ;;  %v3311_v29 = vld [vmem:[#allocation3 + $0x114] sm:$0x1]  ;;  %v3421_v53 = vld [vmem:[#allocation3 + $0x11c] sm:$0x1]  ;;  %v4430_v51 = vld [vmem:[#allocation3 + $0x108] sm:$0xf] }
 0x318   :  { %4426 = vst [vmem:[#allocation3 + $0x100] sm:$0xf] %v3975_v22  ;;  %4429 = vst [vmem:[#allocation3 + $0x104] sm:$0x1] %v4428_v39  ;;  %v3978_v5 = vshrl.u32 %v10288_v49, 16  ;;  %v3981_v1 = vshll.u32 %v10288_v49, 16  ;;  %v3004_v20 = vadd.f32 %v13653_v30, %v13986_v32 }
 0x319   :  { %16342 = vst [vmem:[#allocation69_spill] sm:$0xff] %v14064_v27  ;;  %v5222_v15 = vrot.slane %v5220_v31, 5  ;;  %7587 = vmatprep.mubr.bf16.mxu0 %v14064_v27  ;;  %v3986_v60 = vshrl.u32 %v10289_v16, 16  ;;  %v3989_v62 = vshll.u32 %v10289_v16, 16  ;;  %v5228_v3 = vrot.slane %v5226_v40, 5  ;;  %v14075_v40 = vpop.f32.mrb[92].mxu0 }
 0x31a   :  { %v5230_v55 = vshrl.u32 %v14043_v28, 16  ;;  %v3980_v50 = vrot.slane %v3978_v5, 7  ;;  %7588 = vmatmul.mubr.bf16.gmra.mrb[184].mxu0 %v14051_v19  ;;  %v5236_v6 = vshll.u32 %v4568_v33, 16  ;;  %v3312_v49 = vsel %vm13294_vm6, 0, %v3311_v29  ;;  %v2740_v5 = vpop.f32.mrb[93].mxu0  ;;  %v14079_v29 = vpop.f32.mrb[60].mxu1 }
 0x31b   :  { %v5223_v41 = vor.u32 %v5222_v15, %v5219_v61  ;;  %v3988_v47 = vrot.slane %v3986_v60, 7  ;;  %v3007_v31 = vadd.f32 %v13672_v17, %v13994_v54  ;;  %v4434_v39 = vld [vmem:[#allocation3 + $0x110] sm:$0x1]  ;;  %3313 = vst [vmem:[#allocation3 + $0x114] sm:$0x1] %v3312_v49  ;;  %v3138_v15 = vmax.f32 %v3004_v20, 0.0 }
 0x31c   :  { %v5232_v0 = vrot.slane %v5230_v55, 4  ;;  %v3983_v34 = vor.u32 %v3981_v1, %v3980_v50  ;;  %v3984_v22 = vrot.slane %v3980_v50, 4  ;;  %v5238_v33 = vrot.slane %v5236_v6, 5  ;;  %v3314_v60 = vld [vmem:[#allocation3 + $0x120] sm:$0x1]  ;;  %v14077_v55 = vpop.f32.mrb[94].mxu0 }
 0x31d   :  { %v5224_v16 = vrot.slane %v5223_v41, 4  ;;  %v3991_v30 = vor.u32 %v3989_v62, %v3988_v47  ;;  %v3993_v32 = vrot.slane %v3988_v47, 4  ;;  %v3139_v1 = vmax.f32 %v3007_v31, 0.0  ;;  %v3424_v41 = vld [vmem:[#allocation3 + $0x128] sm:$0x1]  ;;  %v2743_v62 = vpop.f32.mrb[95].mxu0 }
 0x31e   :  { %v5233_v61 = vor.u32 %v5232_v0, %v5228_v3  ;;  %v4431_v17 = vsel %vm13494_vm11, %v3983_v34, %v4430_v51  ;;  %v3422_v50 = vsel %vm13303_vm8, 0, %v3421_v53  ;;  %v14087_v6 = vpop.f32.mrb[61].mxu1  ;;  %v3202_v51 = vmul.f32 1.7139589, %v3138_v15  ;;  %v3296_v49 = vld [vmem:[#allocation3 + $0xd8] sm:$0x1] }
 0x31f   :  { %v5229_v54 = vsel %vm13522_vm15, %v5224_v16, %v5228_v3  ;;  %4432 = vst [vmem:[#allocation3 + $0x108] sm:$0xf] %v4431_v17  ;;  %v3992_v20 = vsel %vm13503_vm13, %v3984_v22, %v3991_v30  ;;  %v4435_v47 = vsel %vm13294_vm6, %v3993_v32, %v4434_v39  ;;  %3423 = vst [vmem:[#allocation3 + $0x11c] sm:$0x1] %v3422_v50  ;;  %v14093_v3 = vpop.f32.mrb[62].mxu1  ;;  %v3315_v22 = vsel %vm13294_vm6, 0, %v3314_v60 }
 0x320   :  { %v5234_v0 = vrot.slane %v5233_v61, 4  ;;  %4433 = vst [vmem:[#allocation3 + $0x10c] sm:$0xf] %v3992_v20  ;;  %4436 = vst [vmem:[#allocation3 + $0x110] sm:$0x1] %v4435_v47  ;;  %v14097_v31 = vcombine.low %v14037_v36, %v14043_v28  ;;  %v3012_v34 = vadd.f32 %v13649_v23, %v14015_v4  ;;  %v14103_v16 = vpop.f32.mrb[63].mxu1  ;;  %v10290_v30 = vpack.c.bf16 %v3202_v51, %v3202_v51 }
 0x321   :  { %v3203_v53 = vmul.f32 1.7139589, %v3139_v1  ;;  %v3406_v39 = vld [vmem:[#allocation3 + $0xe0] sm:$0x1]  ;;  %3316 = vst [vmem:[#allocation3 + $0x120] sm:$0x1] %v3315_v22  ;;  %v3015_v32 = vadd.f32 %v13655_v63, %v14027_v2 }
 0x322   :  { %16343 = vst [vmem:[#allocation70_spill] sm:$0xff] %v14097_v31  ;;  %v5239_v5 = vsel %vm13522_vm15, %v5234_v0, %v5238_v33  ;;  %v3425_v36 = vsel %vm13303_vm8, 0, %v3424_v41  ;;  %v14111_v28 = vld [vmem:[#allocation3 + $0xdc] sm:$0xf]  ;;  %v3140_v61 = vmax.f32 %v3012_v34, 0.0  ;;  %v3297_v15 = vsel %vm13294_vm6, 0, %v3296_v49 }
 0x323   :  { %v14113_v23 = vcombine.low %v5229_v54, %v5239_v5  ;;  %v10291_v4 = vpack.c.bf16 %v3203_v53, %v3203_v53  ;;  %3426 = vst [vmem:[#allocation3 + $0x128] sm:$0x1] %v3425_v36  ;;  %v14117_v60 = vld [vmem:[#allocation3 + $0xe4] sm:$0xf]  ;;  %v3995_v33 = vshrl.u32 %v10290_v30, 16  ;;  %v3998_v17 = vshll.u32 %v10290_v30, 16 }
 0x324   :  { %v3141_v1 = vmax.f32 %v3015_v32, 0.0  ;;  %3298 = vst [vmem:[#allocation3 + $0xd8] sm:$0x1] %v3297_v15  ;;  %v3407_v63 = vsel %vm13303_vm8, 0, %v3406_v39  ;;  %v3204_v50 = vmul.f32 1.7139589, %v3140_v61 }
 0x325   :  { %16344 = vst [vmem:[#allocation71_spill] sm:$0xff] %v14113_v23  ;;  %7595 = vmatprep.mubr.bf16.mxu0 %v14113_v23  ;;  %v4003_v2 = vshrl.u32 %v10291_v4, 16  ;;  %v4006_v54 = vshll.u32 %v10291_v4, 16  ;;  %3408 = vst [vmem:[#allocation3 + $0xe0] sm:$0x1] %v3407_v63  ;;  %v5250_v41 = vshll.u32 %v14111_v28, 16 }
 0x326   :  { %v14123_v62 = vpop.f32.mrb[96].mxu0  ;;  %v3997_v20 = vrot.slane %v3995_v33, 7  ;;  %7596 = vmatmul.mubr.bf16.gmra.mrb[188].mxu0 %v14097_v31  ;;  %v3205_v47 = vmul.f32 1.7139589, %v3141_v1  ;;  %v5254_v0 = vshrl.u32 %v14111_v28, 16  ;;  %v5265_v51 = vshrl.u32 %v14117_v60, 16 }
 0x327   :  { %v2748_v49 = vpop.f32.mrb[97].mxu0  ;;  %v4437_v53 = vld [vmem:[#allocation3 + $0x114] sm:$0xf]  ;;  %v4005_v34 = vrot.slane %v4003_v2, 7  ;;  %v10292_v22 = vpack.c.bf16 %v3204_v50, %v3204_v50  ;;  %v14128_v39 = vrot.slane %v5250_v41, 5  ;;  %v5268_v5 = vshll.u32 %v14117_v60, 16 }
 0x328   :  { %v14131_v30 = vpop.f32.mrb[98].mxu0  ;;  %v4000_v32 = vor.u32 %v3998_v17, %v3997_v20  ;;  %v4001_v36 = vrot.slane %v3997_v20, 4  ;;  %v4441_v4 = vld [vmem:[#allocation3 + $0x11c] sm:$0x1]  ;;  %v10293_v61 = vpack.c.bf16 %v3205_v47, %v3205_v47  ;;  %v5256_v15 = vrot.slane %v5254_v0, 4 }
 0x329   :  { %v2751_v33 = vpop.f32.mrb[99].mxu0  ;;  %v4008_v1 = vor.u32 %v4006_v54, %v4005_v34  ;;  %v4010_v63 = vrot.slane %v4005_v34, 4  ;;  %v4012_v23 = vshrl.u32 %v10292_v22, 16  ;;  %v4015_v27 = vshll.u32 %v10292_v22, 16  ;;  %v4579_v46 = vld [vmem:[#allocation3 + $0xe8] sm:$0xf] }
 0x32a   :  { %v4438_v2 = vsel %vm13494_vm11, %v4000_v32, %v4437_v53  ;;  %v4020_v50 = vshrl.u32 %v10293_v61, 16  ;;  %v4023_v41 = vshll.u32 %v10293_v61, 16  ;;  %v5257_v49 = vor.u32 %v5256_v15, %v14128_v39  ;;  %v4444_v54 = vld [vmem:[#allocation3 + $0x120] sm:$0xf] }
 0x32b   :  { %4439 = vst [vmem:[#allocation3 + $0x114] sm:$0xf] %v4438_v2  ;;  %v4009_v17 = vsel %vm13503_vm13, %v4001_v36, %v4008_v1  ;;  %v4442_v20 = vsel %vm13294_vm6, %v4010_v63, %v4441_v4  ;;  %v4014_v47 = vrot.slane %v4012_v23, 7  ;;  %v14140_v0 = vld [vmem:[#allocation3 + $0xd8] sm:$0xf]  ;;  %v5267_v34 = vrot.slane %v5265_v51, 4 }
 0x32c   :  { %4440 = vst [vmem:[#allocation3 + $0x118] sm:$0xf] %v4009_v17  ;;  %4443 = vst [vmem:[#allocation3 + $0x11c] sm:$0x1] %v4442_v20  ;;  %v4022_v53 = vrot.slane %v4020_v50, 7  ;;  %v5241_v32 = vshrl.u32 %v14140_v0, 16  ;;  %v10014_v23 = vcombine.low %v14140_v0, %v14111_v28 }
 0x32d   :  { %v4577_v22 = vld [vmem:[#allocation3 + $0xe0] sm:$0x1]  ;;  %v5244_v61 = vshll.u32 %v14140_v0, 16  ;;  %v5258_v15 = vrot.slane %v5257_v49, 4  ;;  %v4017_v33 = vor.u32 %v4015_v27, %v4014_v47  ;;  %v4018_v2 = vrot.slane %v4014_v47, 4  ;;  %v14146_v4 = vpop.f32.mrb[100].mxu0 }
 0x32e   :  { %v4448_v36 = vld [vmem:[#allocation3 + $0x128] sm:$0x1]  ;;  %v5260_v1 = vshll.u32 %v4577_v22, 16  ;;  %v4025_v63 = vor.u32 %v4023_v41, %v4022_v53  ;;  %v4027_v51 = vrot.slane %v4022_v53, 4  ;;  %v5243_v17 = vrot.slane %v5241_v32, 4  ;;  %v2756_v31 = vpop.f32.mrb[101].mxu0 }
 0x32f   :  { %v5246_v20 = vrot.slane %v5244_v61, 5  ;;  %v4580_v50 = vld [vmem:[#allocation3 + $0xec] sm:$0x1]  ;;  %v4445_v19 = vsel %vm13494_vm11, %v4017_v33, %v4444_v54  ;;  %v5270_v49 = vrot.slane %v5268_v5, 5  ;;  %v5274_v27 = vshll.u32 %v4579_v46, 16  ;;  %v14150_v57 = vpop.f32.mrb[102].mxu0 }
 0x330   :  { %v5262_v35 = vrot.slane %v5260_v1, 5  ;;  %v3317_v47 = vld [vmem:[#allocation3 + $0x12c] sm:$0x1]  ;;  %4446 = vst [vmem:[#allocation3 + $0x120] sm:$0xf] %v4445_v19  ;;  %v4026_v28 = vsel %vm13503_vm13, %v4018_v2, %v4025_v63  ;;  %v4449_v41 = vsel %vm13294_vm6, %v4027_v51, %v4448_v36  ;;  %v5278_v53 = vshrl.u32 %v4579_v46, 16 }
 0x331   :  { %v5247_v0 = vor.u32 %v5246_v20, %v5243_v17  ;;  %v3427_v22 = vld [vmem:[#allocation3 + $0x134] sm:$0x1]  ;;  %v2759_v31 = vpop.f32.mrb[103].mxu0  ;;  %4447 = vst [vmem:[#allocation3 + $0x124] sm:$0xf] %v4026_v28  ;;  %v5271_v54 = vor.u32 %v5270_v49, %v5267_v34  ;;  %v5276_v32 = vrot.slane %v5274_v27, 5  ;;  %v3020_v2 = vadd.f32 %v13712_v7, %v14045_v9 }
 0x332   :  { %4450 = vst [vmem:[#allocation3 + $0x128] sm:$0x1] %v4449_v41  ;;  %v5263_v5 = vsel %vm13522_vm15, %v5258_v15, %v5262_v35  ;;  %v5284_v61 = vshll.u32 %v4580_v50, 16  ;;  %v5280_v19 = vrot.slane %v5278_v53, 4  ;;  %v3318_v36 = vsel %vm13294_vm6, 0, %v3317_v47  ;;  %v14172_v49 = vpop.f32.mrb[104].mxu0 }
 0x333   :  { %v5248_v33 = vrot.slane %v5247_v0, 4  ;;  %v4581_v1 = vld [vmem:[#allocation3 + $0xf0] sm:$0xf]  ;;  %v5272_v63 = vrot.slane %v5271_v54, 4  ;;  %3319 = vst [vmem:[#allocation3 + $0x12c] sm:$0x1] %v3318_v36  ;;  %v3023_v17 = vadd.f32 %v13721_v44, %v14054_v43  ;;  %v14170_v9 = vcombine.low %v14117_v60, %v4579_v46 }
 0x334   :  { %v5286_v51 = vrot.slane %v5284_v61, 5  ;;  %v3428_v35 = vsel %vm13303_vm8, 0, %v3427_v22  ;;  %v4582_v34 = vld [vmem:[#allocation3 + $0xf4] sm:$0xf]  ;;  %v5281_v20 = vor.u32 %v5280_v19, %v5276_v32  ;;  %v3142_v7 = vmax.f32 %v3020_v2, 0.0  ;;  %v2764_v28 = vpop.f32.mrb[105].mxu0 }
 0x335   :  { %v5253_v15 = vsel %vm13522_vm15, %v5248_v33, %v14128_v39  ;;  %3429 = vst [vmem:[#allocation3 + $0x134] sm:$0x1] %v3428_v35  ;;  %v4583_v50 = vld [vmem:[#allocation3 + $0xf8] sm:$0x1]  ;;  %v5277_v44 = vsel %vm13522_vm15, %v5272_v63, %v5276_v32  ;;  %v3143_v43 = vmax.f32 %v3023_v17, 0.0  ;;  %v5289_v47 = vshrl.u32 %v4581_v1, 16 }
 0x336   :  { %v10046_v27 = vcombine.low %v5253_v15, %v5263_v5  ;;  %v5282_v41 = vrot.slane %v5281_v20, 4  ;;  %v3206_v0 = vmul.f32 1.7139589, %v3142_v7  ;;  %v5292_v53 = vshll.u32 %v4581_v1, 16  ;;  %v14176_v22 = vpop.f32.mrb[106].mxu0 }
 0x337   :  { %v5298_v39 = vshll.u32 %v4582_v34, 16  ;;  %v3207_v31 = vmul.f32 1.7139589, %v3143_v43  ;;  %v5291_v46 = vrot.slane %v5289_v47, 4  ;;  %v5302_v60 = vshrl.u32 %v4582_v34, 16  ;;  %v2767_v61 = vpop.f32.mrb[107].mxu0 }
 0x338   :  { %7603 = vmatprep.mubr.bf16.mxu0 %v10046_v27  ;;  %v5308_v54 = vshll.u32 %v4583_v50, 16  ;;  %v5287_v5 = vsel %vm13522_vm15, %v5282_v41, %v5286_v51  ;;  %v10294_v32 = vpack.c.bf16 %v3206_v0, %v3206_v0  ;;  %v5294_v33 = vrot.slane %v5292_v53, 5  ;;  %v3320_v2 = vld [vmem:[#allocation3 + $0x138] sm:$0x1]  ;;  %v3430_v27 = vld [vmem:[#allocation3 + $0x140] sm:$0x1] }
 0x339   :  { %7604 = vmatmul.mubr.bf16.gmra.mrb[192].mxu0 %v10014_v23  ;;  %v5300_v19 = vrot.slane %v5298_v39, 5  ;;  %v14180_v36 = vcombine.low %v5277_v44, %v5287_v5  ;;  %v10295_v63 = vpack.c.bf16 %v3207_v31, %v3207_v31  ;;  %v5304_v17 = vrot.slane %v5302_v60, 4  ;;  %v14189_v53 = vld [vmem:[#allocation3 + $0xfc] sm:$0xf]  ;;  %v14191_v39 = vpop.f32.mrb[108].mxu0 }
 0x33a   :  { %v5310_v35 = vrot.slane %v5308_v54, 5  ;;  %v4029_v15 = vshrl.u32 %v10294_v32, 16  ;;  %v4032_v20 = vshll.u32 %v10294_v32, 16  ;;  %v5295_v7 = vor.u32 %v5294_v33, %v5291_v46  ;;  %v2772_v54 = vpop.f32.mrb[109].mxu0 }
 0x33b   :  { %16345 = vst [vmem:[#allocation72_spill] sm:$0xff] %v14180_v36  ;;  %v3028_v50 = vadd.f32 %v13699_v52, %v14075_v40  ;;  %7611 = vmatprep.mubr.bf16.mxu0 %v14180_v36  ;;  %v4037_v23 = vshrl.u32 %v10295_v63, 16  ;;  %v4040_v51 = vshll.u32 %v10295_v63, 16  ;;  %v5305_v43 = vor.u32 %v5304_v17, %v5300_v19  ;;  %v4451_v52 = vld [vmem:[#allocation3 + $0x12c] sm:$0xf] }
 0x33c   :  { %v3321_v47 = vsel %vm13294_vm6, 0, %v3320_v2  ;;  %v4031_v44 = vrot.slane %v4029_v15, 7  ;;  %v5296_v28 = vrot.slane %v5295_v7, 4  ;;  %v3031_v0 = vadd.f32 %v13717_v59, %v14077_v55  ;;  %v4455_v32 = vld [vmem:[#allocation3 + $0x134] sm:$0x1]  ;;  %v14199_v55 = vpop.f32.mrb[110].mxu0 }
 0x33d   :  { %v3144_v41 = vmax.f32 %v3028_v50, 0.0  ;;  %3322 = vst [vmem:[#allocation3 + $0x138] sm:$0x1] %v3321_v47  ;;  %v4039_v40 = vrot.slane %v4037_v23, 7  ;;  %v5306_v31 = vrot.slane %v5305_v43, 4  ;;  %v3431_v46 = vsel %vm13303_vm8, 0, %v3430_v27 }
 0x33e   :  { %v14195_v60 = vcombine.low %v4581_v1, %v4582_v34  ;;  %v4034_v61 = vor.u32 %v4032_v20, %v4031_v44  ;;  %v4035_v5 = vrot.slane %v4031_v44, 4  ;;  %v5301_v33 = vsel %vm13522_vm15, %v5296_v28, %v5300_v19  ;;  %3432 = vst [vmem:[#allocation3 + $0x140] sm:$0x1] %v3431_v46  ;;  %v4585_v7 = vld [vmem:[#allocation3 + $0x100] sm:$0xf]  ;;  %v2775_v1 = vpop.f32.mrb[111].mxu0 }
 0x33f   :  { %v3208_v59 = vmul.f32 1.7139589, %v3144_v41  ;;  %v4042_v2 = vor.u32 %v4040_v51, %v4039_v40  ;;  %v4044_v63 = vrot.slane %v4039_v40, 4  ;;  %v5311_v17 = vsel %vm13522_vm15, %v5306_v31, %v5310_v35  ;;  %v4586_v50 = vld [vmem:[#allocation3 + $0x104] sm:$0x1] }
 0x340   :  { %v3145_v15 = vmax.f32 %v3031_v0, 0.0  ;;  %v4452_v34 = vsel %vm13494_vm11, %v4034_v61, %v4451_v52  ;;  %v14206_v20 = vcombine.low %v5301_v33, %v5311_v17  ;;  %v5313_v27 = vshrl.u32 %v14189_v53, 16  ;;  %v3323_v47 = vld [vmem:[#allocation3 + $0x144] sm:$0x1]  ;;  %v3433_v33 = vld [vmem:[#allocation3 + $0x14c] sm:$0x1] }
 0x341   :  { %7612 = vmatmul.mubr.bf16.gmra.mrb[196].mxu0 %v14170_v9  ;;  %v10296_v19 = vpack.c.bf16 %v3208_v59, %v3208_v59  ;;  %4453 = vst [vmem:[#allocation3 + $0x12c] sm:$0xf] %v4452_v34  ;;  %v4043_v23 = vsel %vm13503_vm13, %v4035_v5, %v4042_v2  ;;  %v4456_v35 = vsel %vm13294_vm6, %v4044_v63, %v4455_v32  ;;  %v5316_v43 = vshll.u32 %v14189_v53, 16  ;;  %v14219_v59 = vpop.f32.mrb[112].mxu0 }
 0x342   :  { %16346 = vst [vmem:[#allocation73_spill] sm:$0xff] %v14206_v20  ;;  %v3209_v51 = vmul.f32 1.7139589, %v3145_v15  ;;  %4454 = vst [vmem:[#allocation3 + $0x130] sm:$0xf] %v4043_v23  ;;  %7619 = vmatprep.mubr.bf16.mxu0 %v14206_v20  ;;  %v5315_v41 = vrot.slane %v5313_v27, 4  ;;  %v3036_v5 = vadd.f32 %v13776_v45, %v14123_v62 }
 0x343   :  { %4457 = vst [vmem:[#allocation3 + $0x134] sm:$0x1] %v4456_v35  ;;  %v4046_v44 = vshrl.u32 %v10296_v19, 16  ;;  %v4049_v28 = vshll.u32 %v10296_v19, 16  ;;  %v5322_v0 = vshll.u32 %v4585_v7, 16  ;;  %v5318_v40 = vrot.slane %v5316_v43, 5 }
 0x344   :  { %v10297_v52 = vpack.c.bf16 %v3209_v51, %v3209_v51  ;;  %v5326_v31 = vshrl.u32 %v4585_v7, 16  ;;  %v5332_v46 = vshll.u32 %v4586_v50, 16  ;;  %v3324_v32 = vsel %vm13294_vm6, 0, %v3323_v47  ;;  %v4458_v2 = vld [vmem:[#allocation3 + $0x138] sm:$0xf]  ;;  %v2780_v34 = vpop.f32.mrb[113].mxu0 }
 0x345   :  { %v4048_v54 = vrot.slane %v4046_v44, 7  ;;  %v5324_v61 = vrot.slane %v5322_v0, 5  ;;  %v5319_v15 = vor.u32 %v5318_v40, %v5315_v41  ;;  %3325 = vst [vmem:[#allocation3 + $0x144] sm:$0x1] %v3324_v32  ;;  %v3146_v23 = vmax.f32 %v3036_v5, 0.0  ;;  %v14223_v45 = vpop.f32.mrb[114].mxu0 }
 0x346   :  { %v4054_v63 = vshrl.u32 %v10297_v52, 16  ;;  %v4057_v17 = vshll.u32 %v10297_v52, 16  ;;  %v5328_v1 = vrot.slane %v5326_v31, 4  ;;  %v5334_v27 = vrot.slane %v5332_v46, 5  ;;  %v14221_v35 = vld [vmem:[#allocation3 + $0x114] sm:$0xf] }
 0x347   :  { %v4051_v19 = vor.u32 %v4049_v28, %v4048_v54  ;;  %v4052_v50 = vrot.slane %v4048_v54, 4  ;;  %v5320_v51 = vrot.slane %v5319_v15, 4  ;;  %v3039_v47 = vadd.f32 %v13790_v38, %v14131_v30  ;;  %v14227_v44 = vld [vmem:[#allocation3 + $0x118] sm:$0xf]  ;;  %v2783_v41 = vpop.f32.mrb[115].mxu0 }
 0x348   :  { %v4056_v62 = vrot.slane %v4054_v63, 7  ;;  %v5329_v43 = vor.u32 %v5328_v1, %v5324_v61  ;;  %v4462_v28 = vld [vmem:[#allocation3 + $0x140] sm:$0x1]  ;;  %v3210_v52 = vmul.f32 1.7139589, %v3146_v23  ;;  %v3434_v40 = vsel %vm13303_vm8, 0, %v3433_v33 }
 0x349   :  { %v4459_v0 = vsel %vm13494_vm11, %v4051_v19, %v4458_v2  ;;  %7620 = vmatmul.mubr.bf16.gmra.mrb[200].mxu0 %v14195_v60  ;;  %v14235_v31 = vcombine.low %v14189_v53, %v4585_v7  ;;  %v5325_v38 = vsel %vm13522_vm15, %v5320_v51, %v5324_v61  ;;  %3435 = vst [vmem:[#allocation3 + $0x14c] sm:$0x1] %v3434_v40  ;;  %v3147_v32 = vmax.f32 %v3039_v47, 0.0  ;;  %v14248_v15 = vld [vmem:[#allocation3 + $0x108] sm:$0xf] }
 0x34a   :  { %4460 = vst [vmem:[#allocation3 + $0x138] sm:$0xf] %v4459_v0  ;;  %v4059_v46 = vor.u32 %v4057_v17, %v4056_v62  ;;  %v4061_v54 = vrot.slane %v4056_v62, 4  ;;  %v5330_v30 = vrot.slane %v5329_v43, 4  ;;  %v10298_v5 = vpack.c.bf16 %v3210_v52, %v3210_v52  ;;  %v4592_v17 = vld [vmem:[#allocation3 + $0x11c] sm:$0x1] }
 0x34b   :  { %v5361_v2 = vshrl.u32 %v14221_v35, 16  ;;  %v5364_v63 = vshll.u32 %v14221_v35, 16  ;;  %v5370_v61 = vshll.u32 %v14227_v44, 16  ;;  %v3211_v23 = vmul.f32 1.7139589, %v3147_v32 }
 0x34c   :  { %v4060_v33 = vsel %vm13503_vm13, %v4052_v50, %v4059_v46  ;;  %v4463_v53 = vsel %vm13294_vm6, %v4061_v54, %v4462_v28  ;;  %v5335_v7 = vsel %vm13522_vm15, %v5330_v30, %v5334_v27  ;;  %v4063_v34 = vshrl.u32 %v10298_v5, 16  ;;  %v14252_v62 = vld [vmem:[#allocation3 + $0x10c] sm:$0xf]  ;;  %v14255_v27 = vpop.f32.mrb[116].mxu0  ;;  %v4465_v46 = vld [vmem:[#allocation3 + $0x144] sm:$0xf] }
 0x34d   :  { %4461 = vst [vmem:[#allocation3 + $0x13c] sm:$0xf] %v4060_v33  ;;  %4464 = vst [vmem:[#allocation3 + $0x140] sm:$0x1] %v4463_v53  ;;  %v14250_v1 = vcombine.low %v5325_v38, %v5335_v7  ;;  %v4066_v19 = vshll.u32 %v10298_v5, 16  ;;  %v5363_v50 = vrot.slane %v5361_v2, 4  ;;  %v10299_v0 = vpack.c.bf16 %v3211_v23, %v3211_v23 }
 0x34e   :  { %v5366_v51 = vrot.slane %v5364_v63, 5  ;;  %v5372_v43 = vrot.slane %v5370_v61, 5  ;;  %v5374_v47 = vshrl.u32 %v14227_v44, 16  ;;  %v4065_v41 = vrot.slane %v4063_v34, 7  ;;  %v2788_v40 = vpop.f32.mrb[117].mxu0 }
 0x34f   :  { %16347 = vst [vmem:[#allocation74_spill] sm:$0xff] %v14250_v1  ;;  %7627 = vmatprep.mubr.bf16.mxu0 %v14250_v1  ;;  %v5380_v28 = vshll.u32 %v4592_v17, 16  ;;  %v5337_v52 = vshrl.u32 %v14248_v15, 16  ;;  %v5340_v30 = vshll.u32 %v14248_v15, 16  ;;  %v5346_v5 = vshll.u32 %v14252_v62, 16  ;;  %v14261_v32 = vpop.f32.mrb[118].mxu0 }
 0x350   :  { %v5367_v54 = vor.u32 %v5366_v51, %v5363_v50  ;;  %v5376_v38 = vrot.slane %v5374_v47, 4  ;;  %v4068_v2 = vor.u32 %v4066_v19, %v4065_v41  ;;  %v4069_v63 = vrot.slane %v4065_v41, 4  ;;  %v4589_v7 = vld [vmem:[#allocation3 + $0x110] sm:$0x1]  ;;  %v2791_v17 = vpop.f32.mrb[119].mxu0 }
 0x351   :  { %v4071_v33 = vshrl.u32 %v10299_v0, 16  ;;  %v4074_v53 = vshll.u32 %v10299_v0, 16  ;;  %7628 = vmatmul.mubr.bf16.gmra.mrb[204].mxu0 %v14235_v31  ;;  %v5382_v23 = vrot.slane %v5380_v28, 5  ;;  %v5339_v40 = vrot.slane %v5337_v52, 4  ;;  %v4469_v20 = vld [vmem:[#allocation3 + $0x14c] sm:$0x1] }
 0x352   :  { %v5368_v61 = vrot.slane %v5367_v54, 4  ;;  %v5377_v34 = vor.u32 %v5376_v38, %v5372_v43  ;;  %v4466_v50 = vsel %vm13494_vm11, %v4068_v2, %v4465_v46  ;;  %v5342_v47 = vrot.slane %v5340_v30, 5  ;;  %v3326_v52 = vld [vmem:[#allocation3 + $0x150] sm:$0x1]  ;;  %v3436_v46 = vld [vmem:[#allocation3 + $0x158] sm:$0x1] }
 0x353   :  { %v4073_v51 = vrot.slane %v4071_v33, 7  ;;  %v5348_v1 = vrot.slane %v5346_v5, 5  ;;  %4467 = vst [vmem:[#allocation3 + $0x144] sm:$0xf] %v4466_v50  ;;  %v5350_v0 = vshrl.u32 %v14252_v62, 16  ;;  %v5356_v36 = vshll.u32 %v4589_v7, 16 }
 0x354   :  { %v5373_v19 = vsel %vm13522_vm15, %v5368_v61, %v5372_v43  ;;  %v5378_v41 = vrot.slane %v5377_v34, 4  ;;  %v5343_v38 = vor.u32 %v5342_v47, %v5339_v40  ;;  %v14271_v28 = vcombine.low %v14221_v35, %v14227_v44  ;;  %v14273_v30 = vpop.f32.mrb[120].mxu0  ;;  %v4594_v40 = vld [vmem:[#allocation3 + $0x124] sm:$0xf]  ;;  %v4595_v50 = vld [vmem:[#allocation3 + $0x128] sm:$0x1] }
 0x355   :  { %v4076_v17 = vor.u32 %v4074_v53, %v4073_v51  ;;  %v4078_v54 = vrot.slane %v4073_v51, 4  ;;  %v5352_v5 = vrot.slane %v5350_v0, 4  ;;  %v5358_v2 = vrot.slane %v5356_v36, 5  ;;  %v4593_v53 = vld [vmem:[#allocation3 + $0x120] sm:$0xf]  ;;  %v2796_v7 = vpop.f32.mrb[121].mxu0 }
 0x356   :  { %16348 = vst [vmem:[#allocation75_spill] sm:$0xff] %v14271_v28  ;;  %v5383_v43 = vsel %vm13522_vm15, %v5378_v41, %v5382_v23  ;;  %v3044_v33 = vadd.f32 %v13771_v21, %v14146_v4  ;;  %v5344_v34 = vrot.slane %v5343_v38, 4  ;;  %v11235_v23 = vld [vmem:[%s16094_s2 + $0x80] sm:$0xff]   ;;  %v14288_v36 = vpop.f32.mrb[122].mxu0  ;;  %v14301_v41 = vcombine.low %v14248_v15, %v14252_v62 }
 0x357   :  { %v4077_v35 = vsel %vm13503_vm13, %v4069_v63, %v4076_v17  ;;  %v4470_v44 = vsel %vm13294_vm6, %v4078_v54, %v4469_v20  ;;  %v14283_v61 = vcombine.low %v5373_v19, %v5383_v43  ;;  %v5353_v21 = vor.u32 %v5352_v5, %v5348_v1  ;;  %v2799_v51 = vpop.f32.mrb[123].mxu0 }
 0x358   :  { %4468 = vst [vmem:[#allocation3 + $0x148] sm:$0xf] %v4077_v35  ;;  %4471 = vst [vmem:[#allocation3 + $0x14c] sm:$0x1] %v4470_v44  ;;  %v3148_v4 = vmax.f32 %v3044_v33, 0.0  ;;  %v3327_v63 = vsel %vm13294_vm6, 0, %v3326_v52  ;;  %v3047_v20 = vadd.f32 %v13784_v12, %v14150_v57  ;;  %v5349_v47 = vsel %vm13522_vm15, %v5344_v34, %v5348_v1 }
 0x359   :  { %16349 = vst [vmem:[#allocation76_spill] sm:$0xff] %v14283_v61  ;;  %7643 = vmatprep.mubr.bf16.mxu1 %v14283_v61  ;;  %3328 = vst [vmem:[#allocation3 + $0x150] sm:$0x1] %v3327_v63  ;;  %v3437_v19 = vsel %vm13303_vm8, 0, %v3436_v46  ;;  %v5385_v0 = vshrl.u32 %v4593_v53, 16  ;;  %v5354_v17 = vrot.slane %v5353_v21, 4 }
 0x35a   :  { %7644 = vmatmul.mubr.bf16.vlgmr.msra.gmra.mrb[64].mxu1 %v14271_v28  ;;  %v3212_v12 = vmul.f32 1.7139589, %v3148_v4  ;;  %v3149_v57 = vmax.f32 %v3047_v20, 0.0  ;;  %3438 = vst [vmem:[#allocation3 + $0x158] sm:$0x1] %v3437_v19  ;;  %v5388_v54 = vshll.u32 %v4593_v53, 16  ;;  %v14315_v19 = vcombine.low %v4593_v53, %v4594_v40 }
 0x35b   :  { %7733 = vmatpush1.bf16.msra.mxu1 %v11235_v23  ;;  %v11237_v1 = vld [vmem:[%s16094_s2 + $0x88] sm:$0xff]   ;;  %v5387_v38 = vrot.slane %v5385_v0, 4  ;;  %v5394_v52 = vshll.u32 %v4594_v40, 16  ;;  %v5398_v46 = vshrl.u32 %v4594_v40, 16  ;;  %v5404_v43 = vshll.u32 %v4595_v50, 16  ;;  %v14312_v21 = vpop.f32.mrb[124].mxu0 }
 0x35c   :  { %v5359_v15 = vsel %vm13522_vm15, %v5354_v17, %v5358_v2  ;;  %v10300_v62 = vpack.c.bf16 %v3212_v12, %v3212_v12  ;;  %v3213_v5 = vmul.f32 1.7139589, %v3149_v57  ;;  %v16350_v33 = vmov 0   ;;  %v2804_v50 = vpop.f32.mrb[125].mxu0  ;;  %16352 = vst [vmem:[#allocation78_spill] sm:$0xff] %v14315_v19  ;;  %v11241_v57 = vld [vmem:[%s16094_s2 + $0x90] sm:$0xff]  }
 0x35d   :  { %7734 = vmatprep.subr.bf16.mxu1 %v16350_v33  ;;  %v5390_v7 = vrot.slane %v5388_v54, 5  ;;  %v14310_v35 = vcombine.low %v5349_v47, %v5359_v15  ;;  %v5396_v44 = vrot.slane %v5394_v52, 5  ;;  %v5400_v34 = vrot.slane %v5398_v46, 4  ;;  %v11309_v0 = vld [vmem:[#allocation3 + $0x18] sm:$0xf] }
 0x35e   :  { %v5406_v23 = vrot.slane %v5404_v43, 5  ;;  %v4080_v4 = vshrl.u32 %v10300_v62, 16  ;;  %v4083_v63 = vshll.u32 %v10300_v62, 16  ;;  %v10301_v20 = vpack.c.bf16 %v3213_v5, %v3213_v5  ;;  %v11310_v47 = vld [vmem:[#allocation3 + $0x1c] sm:$0xf] }
 0x35f   :  { %16351 = vst [vmem:[#allocation77_spill] sm:$0xff] %v14310_v35  ;;  %v5391_v51 = vor.u32 %v5390_v7, %v5387_v38  ;;  %7635 = vmatprep.mubr.bf16.mxu0 %v14310_v35  ;;  %7735 = vmatpush1.bf16.msra.mxu1 %v11237_v1  ;;  %v5401_v2 = vor.u32 %v5400_v34, %v5396_v44  ;;  %v10064_v17 = vrot.slane %v11309_v0, 9  ;;  %v5835_v12 = vrot.slane %v11310_v47, 5  ;;  %v3329_v53 = vld [vmem:[#allocation3 + $0x15c] sm:$0x1]  ;;  %v14330_v34 = vpop.f32.mrb[126].mxu0 }
 0x360   :  { %v4082_v54 = vrot.slane %v4080_v4, 7  ;;  %v4088_v52 = vshrl.u32 %v10301_v20, 16  ;;  %v4091_v46 = vshll.u32 %v10301_v20, 16  ;;  %7636 = vmatmul.mubr.bf16.gmra.mrb[208].mxu0 %v14301_v41  ;;  %7736 = vmatprep.subr.bf16.mxu1 %v16350_v33  ;;  %v4472_v40 = vld [vmem:[#allocation3 + $0x150] sm:$0xf]  ;;  %v2807_v47 = vpop.f32.mrb[127].mxu0 }
 0x361   :  { %v5392_v38 = vrot.slane %v5391_v51, 4  ;;  %v5402_v43 = vrot.slane %v5401_v2, 4  ;;  %v5836_v15 = vsel %vm14323_vm4, %v10064_v17, %v5835_v12  ;;  %v5837_v62 = vrot.slane %v5835_v12, 4  ;;  %v11311_v5 = vld [vmem:[#allocation3 + $0x20] sm:$0x1] }
 0x362   :  { %v5838_v7 = vrot.slane %v11311_v5, 5  ;;  %v4085_v4 = vor.u32 %v4083_v63, %v4082_v54  ;;  %v4086_v20 = vrot.slane %v4082_v54, 4  ;;  %v4090_v51 = vrot.slane %v4088_v52, 7  ;;  %v3439_v0 = vld [vmem:[#allocation3 + $0x164] sm:$0x1] }
 0x363   :  { %v5397_v50 = vsel %vm13522_vm15, %v5392_v38, %v5396_v44  ;;  %v4476_v61 = vld [vmem:[#allocation3 + $0x158] sm:$0x1]  ;;  %v5407_v2 = vsel %vm13522_vm15, %v5402_v43, %v5406_v23  ;;  %v3052_v12 = vadd.f32 %v13866_v42, %v14172_v49  ;;  %v3330_v63 = vsel %vm13294_vm6, 0, %v3329_v53  ;;  %7737 = vmatpush1.bf16.msra.mxu1 %v11241_v57  ;;  %v4596_v54 = vld [vmem:[#allocation3 + $0x12c] sm:$0xf]  ;;  %v14356_v43 = vpop.f32.mrb[128].mxu0 }
 0x364   :  { %v5839_v17 = vsel %vm14323_vm4, %v5837_v62, %v5838_v7  ;;  %v4473_v44 = vsel %vm13494_vm11, %v4085_v4, %v4472_v40  ;;  %v4093_v52 = vor.u32 %v4091_v46, %v4090_v51  ;;  %v4095_v38 = vrot.slane %v4090_v51, 4  ;;  %3331 = vst [vmem:[#allocation3 + $0x15c] sm:$0x1] %v3330_v63  ;;  %v4597_v23 = vld [vmem:[#allocation3 + $0x130] sm:$0xf]  ;;  %7738 = vmatprep.subr.bf16.mxu1 %v16350_v33  ;;  %v11244_v42 = vld [vmem:[%s16094_s2 + $0x98] sm:$0xff]  }
 0x365   :  { %v14344_v5 = vcombine.low %v5397_v50, %v5407_v2  ;;  %4474 = vst [vmem:[#allocation3 + $0x150] sm:$0xf] %v4473_v44  ;;  %v14350_v49 = vcombine.low %v5836_v15, %v5839_v17  ;;  %v3150_v57 = vmax.f32 %v3052_v12, 0.0  ;;  %v3055_v53 = vadd.f32 %v13874_v58, %v14176_v22  ;;  %v4598_v40 = vld [vmem:[#allocation3 + $0x134] sm:$0x1]  ;;  %16356 = vst [vmem:[#allocation80_spill] sm:$0xff] %v14356_v43 }
 0x366   :  { %v3440_v46 = vsel %vm13303_vm8, 0, %v3439_v0  ;;  %v4094_v62 = vsel %vm13503_vm13, %v4086_v20, %v4093_v52  ;;  %v4477_v7 = vsel %vm13294_vm6, %v4095_v38, %v4476_v61  ;;  %v5409_v15 = vshrl.u32 %v4596_v54, 16  ;;  %v7479_v51 = vpop.f32.mrb[129].mxu0  ;;  %v11312_v17 = vld [vmem:[#allocation3 + $0x24] sm:$0xf] }
 0x367   :  { %16355 = vst [vmem:[#allocation79_spill] sm:$0xff] %v14344_v5  ;;  %7651 = vmatprep.mubr.bf16.mxu1 %v14344_v5  ;;  %3441 = vst [vmem:[#allocation3 + $0x164] sm:$0x1] %v3440_v46  ;;  %v5412_v4 = vshll.u32 %v4596_v54, 16  ;;  %10514 = vmatprep.mubr.bf16.mxu0 %v14350_v49  ;;  %v3214_v58 = vmul.f32 1.7139589, %v3150_v57 }
 0x368   :  { %4475 = vst [vmem:[#allocation3 + $0x154] sm:$0xf] %v4094_v62  ;;  %4478 = vst [vmem:[#allocation3 + $0x158] sm:$0x1] %v4477_v7  ;;  %7652 = vmatmul.mubr.bf16.gmra.mrb[68].mxu1 %v14315_v19  ;;  %v3151_v22 = vmax.f32 %v3055_v53, 0.0  ;;  %v5418_v50 = vshll.u32 %v4597_v23, 16 }
 0x369   :  { %v5422_v0 = vshrl.u32 %v4597_v23, 16  ;;  %v14365_v20 = vpop.f32.mrb[130].mxu0  ;;  %v5411_v47 = vrot.slane %v5409_v15, 4  ;;  %v5414_v61 = vrot.slane %v5412_v4, 5  ;;  %v5428_v2 = vshll.u32 %v4598_v40, 16  ;;  %7739 = vmatpush1.bf16.msra.mxu1 %v11244_v42  ;;  %v11245_v63 = vld [vmem:[%s16094_s2 + $0xa0] sm:$0xff]  }
 0x36a   :  { %16357 = vst [vmem:[#allocation81_spill] sm:$0xff] %v14365_v20  ;;  %v10065_v12 = vrot.slane %v11312_v17, 9  ;;  %v7482_v44 = vpop.f32.mrb[131].mxu0  ;;  %v10302_v52 = vpack.c.bf16 %v3214_v58, %v3214_v58  ;;  %v3215_v38 = vmul.f32 1.7139589, %v3151_v22  ;;  %v5420_v46 = vrot.slane %v5418_v50, 5  ;;  %7740 = vmatprep.subr.bf16.mxu1 %v16350_v33 }
 0x36b   :  { %v5424_v57 = vrot.slane %v5422_v0, 4  ;;  %v5415_v53 = vor.u32 %v5414_v61, %v5411_v47  ;;  %v5430_v62 = vrot.slane %v5428_v2, 5  ;;  %v11313_v7 = vld [vmem:[#allocation3 + $0x28] sm:$0xf]  ;;  %v14371_v4 = vcombine.low %v4596_v54, %v4597_v23  ;;  %v11314_v22 = vld [vmem:[#allocation3 + $0x30] sm:$0xf] }
 0x36c   :  { %v5842_v15 = vrot.slane %v11313_v7, 5  ;;  %v4097_v40 = vshrl.u32 %v10302_v52, 16  ;;  %v4100_v51 = vshll.u32 %v10302_v52, 16  ;;  %v10303_v42 = vpack.c.bf16 %v3215_v38, %v3215_v38  ;;  %v11247_v0 = vld [vmem:[%s16094_s2 + $0xa8] sm:$0xff]   ;;  %v4479_v2 = vld [vmem:[#allocation3 + $0x15c] sm:$0xf] }
 0x36d   :  { %16358 = vst [vmem:[#allocation82_spill] sm:$0xff] %v14371_v4  ;;  %v5425_v17 = vor.u32 %v5424_v57, %v5420_v46  ;;  %v5416_v20 = vrot.slane %v5415_v53, 4  ;;  %v10066_v50 = vrot.slane %v11314_v22, 9  ;;  %7741 = vmatpush1.bf16.msra.mxu1 %v11245_v63  ;;  %v11315_v63 = vld [vmem:[#allocation3 + $0x34] sm:$0xf]  ;;  %v14387_v5 = vpop.f32.mrb[132].mxu0 }
 0x36e   :  { %v5843_v44 = vsel %vm14323_vm4, %v10065_v12, %v5842_v15  ;;  %v5844_v58 = vrot.slane %v5842_v15, 4  ;;  %v4099_v47 = vrot.slane %v4097_v40, 7  ;;  %v4105_v61 = vshrl.u32 %v10303_v42, 16  ;;  %7742 = vmatprep.subr.bf16.mxu1 %v16350_v33  ;;  %v11316_v53 = vld [vmem:[#allocation3 + $0x38] sm:$0x1]  ;;  %16360 = vst [vmem:[#allocation83_spill] sm:$0xff] %v14387_v5 }
 0x36f   :  { %v4108_v54 = vshll.u32 %v10303_v42, 16  ;;  %v5426_v23 = vrot.slane %v5425_v17, 4  ;;  %v5421_v52 = vsel %vm13522_vm15, %v5416_v20, %v5420_v46  ;;  %v16359_v12 = vrot.slane %v13629_v48, 5  ;;  %v3332_v15 = vld [vmem:[#allocation3 + $0x168] sm:$0x1] }
 0x370   :  { %v5849_v57 = vrot.slane %v11315_v63, 5  ;;  %v5852_v7 = vrot.slane %v11316_v53, 5  ;;  %v4102_v40 = vor.u32 %v4100_v51, %v4099_v47  ;;  %v4103_v22 = vrot.slane %v4099_v47, 4  ;;  %v3442_v43 = vld [vmem:[#allocation3 + $0x170] sm:$0x1]  ;;  %v7487_v47 = vpop.f32.mrb[133].mxu0 }
 0x371   :  { %v5846_v38 = vsel %vm14323_vm4, %v5844_v58, %v16359_v12  ;;  %v4107_v42 = vrot.slane %v4105_v61, 7  ;;  %v5431_v17 = vsel %vm13522_vm15, %v5426_v23, %v5430_v62  ;;  %v4483_v20 = vld [vmem:[#allocation3 + $0x164] sm:$0x1]  ;;  %7743 = vmatpush1.bf16.msra.mxu1 %v11247_v0  ;;  %v11249_v51 = vld [vmem:[%s16094_s2 + $0xb0] sm:$0xff]  }
 0x372   :  { %v14389_v46 = vcombine.low %v5421_v52, %v5431_v17  ;;  %v14391_v48 = vcombine.low %v5843_v44, %v5846_v38  ;;  %v5850_v58 = vsel %vm14323_vm4, %v10066_v50, %v5849_v57  ;;  %v5851_v12 = vrot.slane %v5849_v57, 4  ;;  %v4599_v44 = vld [vmem:[#allocation3 + $0x138] sm:$0xf]  ;;  %v4600_v38 = vld [vmem:[#allocation3 + $0x13c] sm:$0xf]  ;;  %7744 = vmatprep.subr.bf16.mxu1 %v16350_v33  ;;  %v14403_v50 = vpop.f32.mrb[134].mxu0 }
 0x373   :  { %v4480_v62 = vsel %vm13494_vm11, %v4102_v40, %v4479_v2  ;;  %v4110_v61 = vor.u32 %v4108_v54, %v4107_v42  ;;  %v4112_v23 = vrot.slane %v4107_v42, 4  ;;  %v3060_v52 = vadd.f32 %v13861_v14, %v14191_v39  ;;  %16362 = vst [vmem:[#allocation85_spill] sm:$0xff] %v14403_v50  ;;  %v4601_v2 = vld [vmem:[#allocation3 + $0x140] sm:$0x1]  ;;  %v7490_v63 = vpop.f32.mrb[135].mxu0 }
 0x374   :  { %16361 = vst [vmem:[#allocation84_spill] sm:$0xff] %v14389_v46  ;;  %4481 = vst [vmem:[#allocation3 + $0x15c] sm:$0xf] %v4480_v62  ;;  %7659 = vmatprep.mubr.bf16.mxu1 %v14389_v46  ;;  %10515 = vmatmul.mubr.bf16.vlgmr.msra.gmra.mrb[212].mxu0 %v14391_v48  ;;  %v5853_v0 = vsel %vm14323_vm4, %v5851_v12, %v5852_v7  ;;  %v3333_v54 = vsel %vm13294_vm6, 0, %v3332_v15  ;;  %v3063_v14 = vadd.f32 %v13872_v25, %v14199_v55  ;;  %v14427_v47 = vpop.f32.mrb[136].mxu0 }
 0x375   :  { %v3443_v39 = vsel %vm13303_vm8, 0, %v3442_v43  ;;  %v4111_v57 = vsel %vm13503_vm13, %v4103_v22, %v4110_v61  ;;  %v4484_v53 = vsel %vm13294_vm6, %v4112_v23, %v4483_v20  ;;  %7660 = vmatmul.mubr.bf16.gmra.mrb[72].mxu1 %v14371_v4  ;;  %v14420_v7 = vcombine.low %v5850_v58, %v5853_v0  ;;  %3334 = vst [vmem:[#allocation3 + $0x168] sm:$0x1] %v3333_v54  ;;  %v11250_v22 = vld [vmem:[%s16094_s2 + $0xb8] sm:$0xff]   ;;  %v11334_v46 = vld [vmem:[#allocation3 + $0x80] sm:$0x1] }
 0x376   :  { %v3152_v40 = vmax.f32 %v3060_v52, 0.0  ;;  %3444 = vst [vmem:[#allocation3 + $0x170] sm:$0x1] %v3443_v39  ;;  %4482 = vst [vmem:[#allocation3 + $0x160] sm:$0xf] %v4111_v57  ;;  %v3153_v25 = vmax.f32 %v3063_v14, 0.0  ;;  %7745 = vmatpush1.bf16.msra.mxu1 %v11249_v51  ;;  %v14431_v50 = vcombine.low %v4599_v44, %v4600_v38 }
 0x377   :  { %4485 = vst [vmem:[#allocation3 + $0x164] sm:$0x1] %v4484_v53  ;;  %v5433_v55 = vshrl.u32 %v4599_v44, 16  ;;  %v5436_v43 = vshll.u32 %v4599_v44, 16  ;;  %v5442_v15 = vshll.u32 %v4600_v38, 16  ;;  %10518 = vmatprep.mubr.bf16.mxu0 %v14420_v7  ;;  %v5446_v17 = vshrl.u32 %v4600_v38, 16  ;;  %7746 = vmatprep.subr.bf16.mxu1 %v16350_v33 }
 0x378   :  { %v3216_v42 = vmul.f32 1.7139589, %v3152_v40  ;;  %v5452_v20 = vshll.u32 %v4601_v2, 16  ;;  %v11317_v58 = vld [vmem:[#allocation3 + $0x3c] sm:$0xf]  ;;  %16363 = vst [vmem:[#allocation86_spill] sm:$0xff] %v14427_v47  ;;  %v3068_v44 = vadd.f32 %v13969_v24, %v14219_v59  ;;  %v3071_v38 = vadd.f32 %v13982_v26, %v14223_v45 }
 0x379   :  { %v10067_v12 = vrot.slane %v11317_v58, 9  ;;  %v3217_v62 = vmul.f32 1.7139589, %v3153_v25  ;;  %v5435_v61 = vrot.slane %v5433_v55, 4  ;;  %v5438_v23 = vrot.slane %v5436_v43, 5  ;;  %v7495_v51 = vpop.f32.mrb[137].mxu0 }
 0x37a   :  { %v5444_v52 = vrot.slane %v5442_v15, 5  ;;  %v10304_v0 = vpack.c.bf16 %v3216_v42, %v3216_v42  ;;  %v5448_v54 = vrot.slane %v5446_v17, 4  ;;  %v5454_v14 = vrot.slane %v5452_v20, 5  ;;  %v11318_v39 = vld [vmem:[#allocation3 + $0x40] sm:$0xf]  ;;  %v14429_v57 = vpop.f32.mrb[138].mxu0  ;;  %7747 = vmatpush1.bf16.msra.mxu1 %v11250_v22 }
 0x37b   :  { %v5856_v63 = vrot.slane %v11318_v39, 5  ;;  %16364 = vst [vmem:[#allocation87_spill] sm:$0xff] %v14429_v57  ;;  %v10305_v53 = vpack.c.bf16 %v3217_v62, %v3217_v62  ;;  %v5439_v2 = vor.u32 %v5438_v23, %v5435_v61  ;;  %v11319_v40 = vld [vmem:[#allocation3 + $0x44] sm:$0x1]  ;;  %16365 = vst [vmem:[#allocation88_spill] sm:$0xff] %v14431_v50  ;;  %v7498_v55 = vpop.f32.mrb[139].mxu0  ;;  %7748 = vmatprep.subr.bf16.mxu1 %v16350_v33 }
 0x37c   :  { %v5859_v58 = vrot.slane %v11319_v40, 5  ;;  %v11252_v25 = vld [vmem:[%s16094_s2 + $0xc0] sm:$0xff]   ;;  %v4114_v43 = vshrl.u32 %v10304_v0, 16  ;;  %v4117_v15 = vshll.u32 %v10304_v0, 16  ;;  %v5449_v42 = vor.u32 %v5448_v54, %v5444_v52  ;;  %v11254_v0 = vld [vmem:[%s16094_s2 + $0xc8] sm:$0xff]  }
 0x37d   :  { %v5857_v17 = vsel %vm14323_vm4, %v10067_v12, %v5856_v63  ;;  %v4122_v20 = vshrl.u32 %v10305_v53, 16  ;;  %v4125_v62 = vshll.u32 %v10305_v53, 16  ;;  %v5440_v61 = vrot.slane %v5439_v2, 4  ;;  %v4486_v54 = vld [vmem:[#allocation3 + $0x168] sm:$0xf] }
 0x37e   :  { %v4116_v22 = vrot.slane %v4114_v43, 7  ;;  %v5450_v23 = vrot.slane %v5449_v42, 4  ;;  %v5858_v51 = vrot.slane %v5856_v63, 4  ;;  %v11320_v39 = vld [vmem:[#allocation3 + $0x48] sm:$0xf]  ;;  %7749 = vmatpush1.bf16.msra.mxu1 %v11252_v25  ;;  %v14451_v43 = vpop.f32.mrb[140].mxu0 }
 0x37f   :  { %v4124_v12 = vrot.slane %v4122_v20, 7  ;;  %v10068_v40 = vrot.slane %v11320_v39, 9  ;;  %v11321_v55 = vld [vmem:[#allocation3 + $0x4c] sm:$0xf]  ;;  %v11322_v57 = vld [vmem:[#allocation3 + $0x50] sm:$0x1]  ;;  %v5445_v45 = vsel %vm13522_vm15, %v5440_v61, %v5444_v52  ;;  %7750 = vmatprep.subr.bf16.mxu1 %v16350_v33 }
 0x380   :  { %v5863_v53 = vrot.slane %v11321_v55, 5  ;;  %v5866_v47 = vrot.slane %v11322_v57, 5  ;;  %v4119_v24 = vor.u32 %v4117_v15, %v4116_v22  ;;  %v4120_v59 = vrot.slane %v4116_v22, 4  ;;  %v4490_v26 = vld [vmem:[#allocation3 + $0x170] sm:$0x1]  ;;  %16366 = vst [vmem:[#allocation89_spill] sm:$0xff] %v14451_v43 }
 0x381   :  { %v5455_v63 = vsel %vm13522_vm15, %v5450_v23, %v5454_v14  ;;  %v3335_v2 = vld [vmem:[#allocation3 + $0x174] sm:$0x1]  ;;  %v4127_v42 = vor.u32 %v4125_v62, %v4124_v12  ;;  %v4129_v20 = vrot.slane %v4124_v12, 4  ;;  %v5860_v57 = vsel %vm14323_vm4, %v5858_v51, %v5859_v58  ;;  %v3445_v25 = vld [vmem:[#allocation3 + $0x17c] sm:$0x1]  ;;  %v7503_v22 = vpop.f32.mrb[141].mxu0 }
 0x382   :  { %v14453_v39 = vcombine.low %v5445_v45, %v5455_v63  ;;  %v14457_v15 = vld [vmem:[#allocation3 + $0x144] sm:$0xf]  ;;  %v4487_v52 = vsel %vm13494_vm11, %v4119_v24, %v4486_v54  ;;  %v14461_v14 = vcombine.low %v5857_v17, %v5860_v57  ;;  %v5864_v61 = vsel %vm14323_vm4, %v10068_v40, %v5863_v53  ;;  %v14465_v62 = vld [vmem:[#allocation3 + $0x148] sm:$0xf]  ;;  %v14467_v12 = vpop.f32.mrb[142].mxu0  ;;  %7751 = vmatpush1.bf16.msra.mxu1 %v11254_v0  ;;  %v11255_v40 = vld [vmem:[%s16094_s2 + $0xd0] sm:$0xff]  }
 0x383   :  { %v5865_v23 = vrot.slane %v5863_v53, 4  ;;  %16368 = vst [vmem:[#allocation91_spill] sm:$0xff] %v14467_v12  ;;  %4488 = vst [vmem:[#allocation3 + $0x168] sm:$0xf] %v4487_v52  ;;  %v4128_v58 = vsel %vm13503_vm13, %v4120_v59, %v4127_v42  ;;  %v4491_v51 = vsel %vm13294_vm6, %v4129_v20, %v4490_v26  ;;  %v3154_v54 = vmax.f32 %v3068_v44, 0.0  ;;  %v7506_v53 = vpop.f32.mrb[143].mxu0  ;;  %7752 = vmatprep.subr.bf16.mxu1 %v16350_v33 }
 0x384   :  { %16367 = vst [vmem:[#allocation90_spill] sm:$0xff] %v14453_v39  ;;  %7667 = vmatprep.mubr.bf16.mxu1 %v14453_v39  ;;  %v3336_v17 = vsel %vm13294_vm6, 0, %v3335_v2  ;;  %v14476_v55 = vld [vmem:[#allocation3 + $0x14c] sm:$0x1]  ;;  %4489 = vst [vmem:[#allocation3 + $0x16c] sm:$0xf] %v4128_v58  ;;  %10519 = vmatmul.mubr.bf16.gmra.mrb[216].mxu0 %v14461_v14 }
 0x385   :  { %4492 = vst [vmem:[#allocation3 + $0x170] sm:$0x1] %v4491_v51  ;;  %7668 = vmatmul.mubr.bf16.gmra.mrb[76].mxu1 %v14431_v50  ;;  %v5867_v44 = vsel %vm14323_vm4, %v5865_v23, %v5866_v47  ;;  %3337 = vst [vmem:[#allocation3 + $0x174] sm:$0x1] %v3336_v17  ;;  %v3155_v24 = vmax.f32 %v3071_v38, 0.0  ;;  %v3446_v59 = vsel %vm13303_vm8, 0, %v3445_v25 }
 0x386   :  { %v5457_v0 = vshrl.u32 %v14457_v15, 16  ;;  %v14488_v26 = vcombine.low %v5864_v61, %v5867_v44  ;;  %v3218_v45 = vmul.f32 1.7139589, %v3154_v54  ;;  %3447 = vst [vmem:[#allocation3 + $0x17c] sm:$0x1] %v3446_v59  ;;  %v5460_v63 = vshll.u32 %v14457_v15, 16  ;;  %7753 = vmatpush1.bf16.msra.mxu1 %v11255_v40 }
 0x387   :  { %v5466_v2 = vshll.u32 %v14465_v62, 16  ;;  %v3219_v42 = vmul.f32 1.7139589, %v3155_v24  ;;  %v5470_v47 = vshrl.u32 %v14465_v62, 16  ;;  %v5476_v38 = vshll.u32 %v14476_v55, 16  ;;  %v11257_v61 = vld [vmem:[%s16094_s2 + $0xd8] sm:$0xff]   ;;  %7754 = vmatprep.subr.bf16.mxu1 %v16350_v33 }
 0x388   :  { %v5459_v20 = vrot.slane %v5457_v0, 4  ;;  %10522 = vmatprep.mubr.bf16.mxu0 %v14488_v26  ;;  %v10306_v57 = vpack.c.bf16 %v3218_v45, %v3218_v45  ;;  %v5462_v25 = vrot.slane %v5460_v63, 5  ;;  %v10087_v52 = vrot.slane %v14457_v15, 9  ;;  %v11259_v12 = vld [vmem:[%s16094_s2 + $0xe0] sm:$0xff]  }
 0x389   :  { %v5468_v22 = vrot.slane %v5466_v2, 5  ;;  %v10307_v23 = vpack.c.bf16 %v3219_v42, %v3219_v42  ;;  %v5472_v58 = vrot.slane %v5470_v47, 4  ;;  %v5478_v51 = vrot.slane %v5476_v38, 5  ;;  %v11323_v47 = vld [vmem:[#allocation3 + $0x54] sm:$0xf] }
 0x38a   :  { %v5996_v54 = vrot.slane %v14465_v62, 5  ;;  %v4131_v17 = vshrl.u32 %v10306_v57, 16  ;;  %v4134_v53 = vshll.u32 %v10306_v57, 16  ;;  %v5463_v44 = vor.u32 %v5462_v25, %v5459_v20  ;;  %7755 = vmatpush1.bf16.msra.mxu1 %v11257_v61  ;;  %v16622_v18 = vld [vmem:[#allocation91_spill] sm:$0xff] }
 0x38b   :  { %v5999_v24 = vrot.slane %v14476_v55, 5  ;;  %v4139_v59 = vshrl.u32 %v10307_v23, 16  ;;  %v4142_v0 = vshll.u32 %v10307_v23, 16  ;;  %v5473_v45 = vor.u32 %v5472_v58, %v5468_v22  ;;  %v11324_v55 = vld [vmem:[#allocation3 + $0x58] sm:$0xf]  ;;  %7756 = vmatprep.subr.bf16.mxu1 %v16350_v33 }
 0x38c   :  { %v5997_v40 = vsel %vm14323_vm4, %v10087_v52, %v5996_v54  ;;  %v4133_v63 = vrot.slane %v4131_v17, 7  ;;  %v5464_v2 = vrot.slane %v5463_v44, 4  ;;  %v5998_v42 = vrot.slane %v5996_v54, 4  ;;  %v4493_v57 = vld [vmem:[#allocation3 + $0x174] sm:$0xf] }
 0x38d   :  { %v10069_v38 = vrot.slane %v11323_v47, 9  ;;  %v4141_v20 = vrot.slane %v4139_v59, 7  ;;  %v5474_v25 = vrot.slane %v5473_v45, 4  ;;  %v5870_v43 = vrot.slane %v11324_v55, 5  ;;  %v11325_v23 = vld [vmem:[#allocation3 + $0x5c] sm:$0x1] }
 0x38e   :  { %v5873_v58 = vrot.slane %v11325_v23, 5  ;;  %v4136_v52 = vor.u32 %v4134_v53, %v4133_v63  ;;  %v4137_v17 = vrot.slane %v4133_v63, 4  ;;  %v4497_v44 = vld [vmem:[#allocation3 + $0x17c] sm:$0x1]  ;;  %v5469_v54 = vsel %vm13522_vm15, %v5464_v2, %v5468_v22  ;;  %v14513_v47 = vpop.f32.mrb[144].mxu0  ;;  %7757 = vmatpush1.bf16.msra.mxu1 %v11259_v12 }
 0x38f   :  { %v6000_v61 = vsel %vm14323_vm4, %v5998_v42, %v5999_v24  ;;  %16369 = vst [vmem:[#allocation92_spill] sm:$0xff] %v14513_v47  ;;  %v4144_v5 = vor.u32 %v4142_v0, %v4141_v20  ;;  %v4146_v59 = vrot.slane %v4141_v20, 4  ;;  %v5479_v45 = vsel %vm13522_vm15, %v5474_v25, %v5478_v51  ;;  %v3338_v23 = vld [vmem:[#allocation3 + $0x180] sm:$0x1]  ;;  %v7511_v39 = vpop.f32.mrb[145].mxu0  ;;  %v11261_v0 = vld [vmem:[%s16094_s2 + $0xe8] sm:$0xff]   ;;  %7758 = vmatprep.subr.bf16.mxu1 %v16350_v33 }
 0x390   :  { %v14517_v55 = vcombine.low %v5997_v40, %v6000_v61  ;;  %v4494_v53 = vsel %vm13494_vm11, %v4136_v52, %v4493_v57  ;;  %v14521_v63 = vcombine.low %v5469_v54, %v5479_v45  ;;  %v5871_v22 = vsel %vm14323_vm4, %v10069_v38, %v5870_v43  ;;  %v3448_v2 = vld [vmem:[#allocation3 + $0x188] sm:$0x1]  ;;  %v14528_v51 = vpop.f32.mrb[146].mxu0  ;;  %v14538_v12 = vld [vmem:[#allocation3 + $0x150] sm:$0xf] }
 0x391   :  { %v5872_v24 = vrot.slane %v5870_v43, 4  ;;  %16371 = vst [vmem:[#allocation94_spill] sm:$0xff] %v14528_v51  ;;  %4495 = vst [vmem:[#allocation3 + $0x174] sm:$0xf] %v4494_v53  ;;  %v4145_v39 = vsel %vm13503_vm13, %v4137_v17, %v4144_v5  ;;  %v4498_v40 = vsel %vm13294_vm6, %v4146_v59, %v4497_v44  ;;  %v14536_v42 = vcombine.low %v14457_v15, %v14465_v62  ;;  %v11326_v43 = vld [vmem:[#allocation3 + $0x60] sm:$0xf] }
 0x392   :  { %16370 = vst [vmem:[#allocation93_spill] sm:$0xff] %v14521_v63  ;;  %v10070_v38 = vrot.slane %v11326_v43, 9  ;;  %v7514_v57 = vpop.f32.mrb[147].mxu0  ;;  %4496 = vst [vmem:[#allocation3 + $0x178] sm:$0xf] %v4145_v39  ;;  %7675 = vmatprep.mubr.bf16.mxu1 %v14521_v63  ;;  %v3076_v15 = vadd.f32 %v13967_v56, %v14255_v27  ;;  %v3339_v54 = vsel %vm13294_vm6, 0, %v3338_v23  ;;  %v3079_v61 = vadd.f32 %v13974_v8, %v14261_v32 }
 0x393   :  { %16372 = vst [vmem:[#allocation95_spill] sm:$0xff] %v14536_v42  ;;  %4499 = vst [vmem:[#allocation3 + $0x17c] sm:$0x1] %v4498_v40  ;;  %v5874_v5 = vsel %vm14323_vm4, %v5872_v24, %v5873_v58  ;;  %v11327_v20 = vld [vmem:[#allocation3 + $0x64] sm:$0xf]  ;;  %7676 = vmatmul.mubr.bf16.gmra.mrb[80].mxu1 %v14536_v42  ;;  %v3449_v58 = vsel %vm13303_vm8, 0, %v3448_v2 }
 0x394   :  { %v5877_v25 = vrot.slane %v11327_v20, 5  ;;  %v11328_v52 = vld [vmem:[#allocation3 + $0x68] sm:$0x1]  ;;  %v14546_v62 = vld [vmem:[#allocation3 + $0x154] sm:$0xf]  ;;  %v14548_v44 = vcombine.low %v5871_v22, %v5874_v5  ;;  %v3156_v45 = vmax.f32 %v3076_v15, 0.0  ;;  %7759 = vmatpush1.bf16.msra.mxu1 %v11261_v0 }
 0x395   :  { %v5880_v17 = vrot.slane %v11328_v52, 5  ;;  %v14557_v59 = vld [vmem:[#allocation3 + $0x158] sm:$0x1]  ;;  %3340 = vst [vmem:[#allocation3 + $0x180] sm:$0x1] %v3339_v54  ;;  %v5481_v53 = vshrl.u32 %v14538_v12, 16  ;;  %7760 = vmatprep.subr.bf16.mxu1 %v16350_v33 }
 0x396   :  { %v5878_v56 = vsel %vm14323_vm4, %v10070_v38, %v5877_v25  ;;  %v5879_v27 = vrot.slane %v5877_v25, 4  ;;  %3450 = vst [vmem:[#allocation3 + $0x188] sm:$0x1] %v3449_v58  ;;  %v11262_v23 = vld [vmem:[%s16094_s2 + $0xf0] sm:$0xff]   ;;  %10523 = vmatmul.mubr.bf16.gmra.mrb[220].mxu0 %v14548_v44  ;;  %v3157_v8 = vmax.f32 %v3079_v61, 0.0  ;;  %v5484_v32 = vshll.u32 %v14538_v12, 16 }
 0x397   :  { %v5490_v22 = vshll.u32 %v14546_v62, 16  ;;  %v5494_v24 = vshrl.u32 %v14546_v62, 16  ;;  %v3220_v39 = vmul.f32 1.7139589, %v3156_v45  ;;  %v5483_v0 = vrot.slane %v5481_v53, 4  ;;  %v11264_v61 = vld [vmem:[%s16094_s2 + $0xf8] sm:$0xff]  }
 0x398   :  { %v5881_v2 = vsel %vm14323_vm4, %v5879_v27, %v5880_v17  ;;  %v5500_v40 = vshll.u32 %v14557_v59, 16  ;;  %v3221_v38 = vmul.f32 1.7139589, %v3157_v8  ;;  %v5486_v57 = vrot.slane %v5484_v32, 5  ;;  %v11329_v15 = vld [vmem:[#allocation3 + $0x6c] sm:$0xf]  ;;  %7761 = vmatpush1.bf16.msra.mxu1 %v11262_v23 }
 0x399   :  { %v14573_v43 = vcombine.low %v5878_v56, %v5881_v2  ;;  %v5492_v5 = vrot.slane %v5490_v22, 5  ;;  %v10308_v20 = vpack.c.bf16 %v3220_v39, %v3220_v39  ;;  %v5496_v25 = vrot.slane %v5494_v24, 4  ;;  %v11330_v27 = vld [vmem:[#allocation3 + $0x70] sm:$0xf]  ;;  %v11331_v45 = vld [vmem:[#allocation3 + $0x74] sm:$0x1]  ;;  %7762 = vmatprep.subr.bf16.mxu1 %v16350_v33 }
 0x39a   :  { %v5502_v52 = vrot.slane %v5500_v40, 5  ;;  %v10071_v54 = vrot.slane %v11329_v15, 9  ;;  %v10309_v17 = vpack.c.bf16 %v3221_v38, %v3221_v38  ;;  %v5487_v58 = vor.u32 %v5486_v57, %v5483_v0  ;;  %v14584_v24 = vpop.f32.mrb[148].mxu0  ;;  %v11332_v51 = vld [vmem:[#allocation3 + $0x78] sm:$0xf] }
 0x39b   :  { %10526 = vmatprep.mubr.bf16.mxu0 %v14573_v43  ;;  %v5884_v56 = vrot.slane %v11330_v27, 5  ;;  %v5887_v53 = vrot.slane %v11331_v45, 5  ;;  %v4148_v8 = vshrl.u32 %v10308_v20, 16  ;;  %v4151_v32 = vshll.u32 %v10308_v20, 16  ;;  %16374 = vst [vmem:[#allocation97_spill] sm:$0xff] %v14584_v24 }
 0x39c   :  { %v5497_v22 = vor.u32 %v5496_v25, %v5492_v5  ;;  %v14582_v23 = vcombine.low %v14538_v12, %v14546_v62  ;;  %v4500_v2 = vld [vmem:[#allocation3 + $0x180] sm:$0xf]  ;;  %v4156_v39 = vshrl.u32 %v10309_v17, 16  ;;  %v4159_v40 = vshll.u32 %v10309_v17, 16  ;;  %7763 = vmatpush1.bf16.msra.mxu1 %v11264_v61  ;;  %v7519_v25 = vpop.f32.mrb[149].mxu0 }
 0x39d   :  { %v5885_v0 = vsel %vm14323_vm4, %v10071_v54, %v5884_v56  ;;  %v3084_v38 = vadd.f32 %v14087_v6, %v14273_v30  ;;  %v4150_v57 = vrot.slane %v4148_v8, 7  ;;  %v5488_v15 = vrot.slane %v5487_v58, 4  ;;  %v11333_v63 = vld [vmem:[#allocation3 + $0x7c] sm:$0xf]  ;;  %8021 = vmatprep.subr.bf16.mxu1 %v16350_v33  ;;  %v14591_v17 = vpop.f32.mrb[150].mxu0 }
 0x39e   :  { %16373 = vst [vmem:[#allocation96_spill] sm:$0xff] %v14582_v23  ;;  %v5498_v27 = vrot.slane %v5497_v22, 4  ;;  %v5886_v20 = vrot.slane %v5884_v56, 4  ;;  %v4158_v45 = vrot.slane %v4156_v39, 7  ;;  %v10072_v47 = vrot.slane %v11332_v51, 9  ;;  %16375 = vst [vmem:[#allocation98_spill] sm:$0xff] %v14591_v17 }
 0x39f   :  { %v5891_v24 = vrot.slane %v11333_v63, 5  ;;  %v5894_v35 = vrot.slane %v11334_v46, 5  ;;  %v4153_v54 = vor.u32 %v4151_v32, %v4150_v57  ;;  %v4154_v42 = vrot.slane %v4150_v57, 4  ;;  %v4504_v6 = vld [vmem:[#allocation3 + $0x188] sm:$0x1]  ;;  %v7522_v56 = vpop.f32.mrb[151].mxu0 }
 0x3a0   :  { %v5493_v30 = vsel %vm13522_vm15, %v5488_v15, %v5492_v5  ;;  %v5503_v61 = vsel %vm13522_vm15, %v5498_v27, %v5502_v52  ;;  %v3341_v58 = vld [vmem:[#allocation3 + $0x18c] sm:$0x1]  ;;  %v4161_v51 = vor.u32 %v4159_v40, %v4158_v45  ;;  %v4163_v8 = vrot.slane %v4158_v45, 4  ;;  %v3451_v22 = vld [vmem:[#allocation3 + $0x194] sm:$0x1] }
 0x3a1   :  { %v14597_v63 = vcombine.low %v5493_v30, %v5503_v61  ;;  %v5888_v46 = vsel %vm14323_vm4, %v5886_v20, %v5887_v53  ;;  %v14601_v39 = vld [vmem:[#allocation3 + $0x15c] sm:$0xf]  ;;  %v4501_v32 = vsel %vm13494_vm11, %v4153_v54, %v4500_v2  ;;  %v5892_v5 = vsel %vm14323_vm4, %v10072_v47, %v5891_v24  ;;  %v14609_v15 = vld [vmem:[#allocation3 + $0x160] sm:$0xf] }
 0x3a2   :  { %v14605_v57 = vcombine.low %v5885_v0, %v5888_v46  ;;  %v5893_v52 = vrot.slane %v5891_v24, 4  ;;  %4502 = vst [vmem:[#allocation3 + $0x180] sm:$0xf] %v4501_v32  ;;  %v4162_v40 = vsel %vm13503_vm13, %v4154_v42, %v4161_v51  ;;  %v4505_v53 = vsel %vm13294_vm6, %v4163_v8, %v4504_v6  ;;  %v4610_v0 = vld [vmem:[#allocation3 + $0x164] sm:$0x1] }
 0x3a3   :  { %16376 = vst [vmem:[#allocation99_spill] sm:$0xff] %v14597_v63  ;;  %7683 = vmatprep.mubr.bf16.mxu1 %v14597_v63  ;;  %v3158_v27 = vmax.f32 %v3084_v38, 0.0  ;;  %v3342_v2 = vsel %vm13294_vm6, 0, %v3341_v58  ;;  %4503 = vst [vmem:[#allocation3 + $0x184] sm:$0xf] %v4162_v40  ;;  %v3087_v42 = vadd.f32 %v14103_v16, %v14288_v36  ;;  %v3452_v24 = vsel %vm13303_vm8, 0, %v3451_v22 }
 0x3a4   :  { %4506 = vst [vmem:[#allocation3 + $0x188] sm:$0x1] %v4505_v53  ;;  %10527 = vmatmul.mubr.bf16.gmra.mrb[224].mxu0 %v14605_v57  ;;  %7684 = vmatmul.mubr.bf16.gmra.mrb[84].mxu1 %v14582_v23  ;;  %v5895_v47 = vsel %vm14323_vm4, %v5893_v52, %v5894_v35  ;;  %3343 = vst [vmem:[#allocation3 + $0x18c] sm:$0x1] %v3342_v2  ;;  %v5505_v38 = vshrl.u32 %v14601_v39, 16  ;;  %v5508_v45 = vshll.u32 %v14601_v39, 16 }
 0x3a5   :  { %v14627_v20 = vcombine.low %v5892_v5, %v5895_v47  ;;  %v3222_v25 = vmul.f32 1.7139589, %v3158_v27  ;;  %3453 = vst [vmem:[#allocation3 + $0x194] sm:$0x1] %v3452_v24  ;;  %v5514_v54 = vshll.u32 %v14609_v15, 16  ;;  %v3159_v6 = vmax.f32 %v3087_v42, 0.0 }
 0x3a6   :  { %v5507_v30 = vrot.slane %v5505_v38, 4  ;;  %v5518_v35 = vshrl.u32 %v14609_v15, 16  ;;  %v5524_v61 = vshll.u32 %v4610_v0, 16  ;;  %v14632_v58 = vpop.f32.mrb[152].mxu0  ;;  %v5510_v36 = vrot.slane %v5508_v45, 5 }
 0x3a7   :  { %16377 = vst [vmem:[#allocation100_spill] sm:$0xff] %v14632_v58  ;;  %10530 = vmatprep.mubr.bf16.mxu0 %v14627_v20  ;;  %v10310_v16 = vpack.c.bf16 %v3222_v25, %v3222_v25  ;;  %v5516_v56 = vrot.slane %v5514_v54, 5  ;;  %v10089_v51 = vrot.slane %v14601_v39, 9  ;;  %v7527_v8 = vpop.f32.mrb[153].mxu0  ;;  %v3223_v46 = vmul.f32 1.7139589, %v3159_v6 }
 0x3a8   :  { %v5520_v22 = vrot.slane %v5518_v35, 4  ;;  %v5526_v32 = vrot.slane %v5524_v61, 5  ;;  %v6010_v5 = vrot.slane %v14609_v15, 5  ;;  %v14637_v52 = vpop.f32.mrb[154].mxu0  ;;  %v5511_v27 = vor.u32 %v5510_v36, %v5507_v30  ;;  %v11335_v6 = vld [vmem:[#allocation3 + $0x84] sm:$0xf] }
 0x3a9   :  { %16378 = vst [vmem:[#allocation101_spill] sm:$0xff] %v14637_v52  ;;  %v4165_v40 = vshrl.u32 %v10310_v16, 16  ;;  %v4168_v53 = vshll.u32 %v10310_v16, 16  ;;  %v6013_v2 = vrot.slane %v4610_v0, 5  ;;  %v7530_v47 = vpop.f32.mrb[155].mxu0  ;;  %v10311_v42 = vpack.c.bf16 %v3223_v46, %v3223_v46 }
 0x3aa   :  { %v5521_v24 = vor.u32 %v5520_v22, %v5516_v56  ;;  %v6011_v38 = vsel %vm14323_vm4, %v10089_v51, %v6010_v5  ;;  %v6012_v25 = vrot.slane %v6010_v5, 4  ;;  %v5512_v54 = vrot.slane %v5511_v27, 4  ;;  %v11336_v61 = vld [vmem:[#allocation3 + $0x88] sm:$0xf]  ;;  %v3344_v27 = vld [vmem:[#allocation3 + $0x198] sm:$0x1] }
 0x3ab   :  { %v4167_v45 = vrot.slane %v4165_v40, 7  ;;  %v10073_v35 = vrot.slane %v11335_v6, 9  ;;  %v5898_v8 = vrot.slane %v11336_v61, 5  ;;  %v4507_v58 = vld [vmem:[#allocation3 + $0x18c] sm:$0xf]  ;;  %v4173_v17 = vshrl.u32 %v10311_v42, 16 }
 0x3ac   :  { %v4176_v52 = vshll.u32 %v10311_v42, 16  ;;  %v5522_v63 = vrot.slane %v5521_v24, 4  ;;  %v6014_v0 = vsel %vm14323_vm4, %v6012_v25, %v6013_v2  ;;  %v5517_v36 = vsel %vm13522_vm15, %v5512_v54, %v5516_v56  ;;  %v4511_v2 = vld [vmem:[#allocation3 + $0x194] sm:$0x1]  ;;  %v11337_v42 = vld [vmem:[#allocation3 + $0x8c] sm:$0x1] }
 0x3ad   :  { %v4170_v30 = vor.u32 %v4168_v53, %v4167_v45  ;;  %v4171_v16 = vrot.slane %v4167_v45, 4  ;;  %v14645_v51 = vcombine.low %v6011_v38, %v6014_v0  ;;  %v4175_v46 = vrot.slane %v4173_v17, 7  ;;  %v3454_v17 = vld [vmem:[#allocation3 + $0x1a0] sm:$0x1]  ;;  %v11338_v38 = vld [vmem:[#allocation3 + $0x90] sm:$0xf] }
 0x3ae   :  { %v5527_v22 = vsel %vm13522_vm15, %v5522_v63, %v5526_v32  ;;  %v5899_v5 = vsel %vm14323_vm4, %v10073_v35, %v5898_v8  ;;  %v5900_v40 = vrot.slane %v5898_v8, 4  ;;  %v5901_v24 = vrot.slane %v11337_v42, 5  ;;  %v11339_v45 = vld [vmem:[#allocation3 + $0x94] sm:$0xf]  ;;  %v14659_v6 = vld [vmem:[#allocation3 + $0x168] sm:$0xf] }
 0x3af   :  { %v4508_v47 = vsel %vm13494_vm11, %v4170_v30, %v4507_v58  ;;  %v14653_v53 = vcombine.low %v5517_v36, %v5527_v22  ;;  %v14657_v56 = vcombine.low %v14601_v39, %v14609_v15  ;;  %v4178_v63 = vor.u32 %v4176_v52, %v4175_v46  ;;  %v14661_v58 = vpop.f32.mrb[156].mxu0  ;;  %v11340_v61 = vld [vmem:[#allocation3 + $0x98] sm:$0x1]  ;;  %v14670_v8 = vld [vmem:[#allocation3 + $0x16c] sm:$0xf] }
 0x3b0   :  { %4509 = vst [vmem:[#allocation3 + $0x18c] sm:$0xf] %v4508_v47  ;;  %v4180_v32 = vrot.slane %v4175_v46, 4  ;;  %v10074_v25 = vrot.slane %v11338_v38, 9  ;;  %v5905_v54 = vrot.slane %v11339_v45, 5  ;;  %16381 = vst [vmem:[#allocation104_spill] sm:$0xff] %v14661_v58  ;;  %v5902_v35 = vsel %vm14323_vm4, %v5900_v40, %v5901_v24 }
 0x3b1   :  { %16379 = vst [vmem:[#allocation102_spill] sm:$0xff] %v14653_v53  ;;  %16380 = vst [vmem:[#allocation103_spill] sm:$0xff] %v14657_v56  ;;  %7691 = vmatprep.mubr.bf16.mxu1 %v14653_v53  ;;  %v5908_v39 = vrot.slane %v11340_v61, 5  ;;  %v3092_v15 = vadd.f32 %v14079_v29, %v14312_v21  ;;  %v3345_v52 = vsel %vm13294_vm6, 0, %v3344_v27  ;;  %v7535_v0 = vpop.f32.mrb[157].mxu0  ;;  %v4179_v30 = vsel %vm13503_vm13, %v4171_v16, %v4178_v63 }
 0x3b2   :  { %v4512_v36 = vsel %vm13294_vm6, %v4180_v32, %v4511_v2  ;;  %v14676_v46 = vcombine.low %v5899_v5, %v5902_v35  ;;  %7692 = vmatmul.mubr.bf16.gmra.mrb[88].mxu1 %v14657_v56  ;;  %v5906_v22 = vsel %vm14323_vm4, %v10074_v25, %v5905_v54  ;;  %3346 = vst [vmem:[#allocation3 + $0x198] sm:$0x1] %v3345_v52  ;;  %v14681_v29 = vld [vmem:[#allocation3 + $0x170] sm:$0x1]  ;;  %v14683_v21 = vpop.f32.mrb[158].mxu0  ;;  %v5907_v40 = vrot.slane %v5905_v54, 4 }
 0x3b3   :  { %16382 = vst [vmem:[#allocation105_spill] sm:$0xff] %v14683_v21  ;;  %4510 = vst [vmem:[#allocation3 + $0x190] sm:$0xf] %v4179_v30  ;;  %v3160_v27 = vmax.f32 %v3092_v15, 0.0  ;;  %v3095_v16 = vadd.f32 %v14093_v3, %v14330_v34  ;;  %v3455_v5 = vsel %vm13303_vm8, 0, %v3454_v17  ;;  %v7538_v47 = vpop.f32.mrb[159].mxu0 }
 0x3b4   :  { %4513 = vst [vmem:[#allocation3 + $0x194] sm:$0x1] %v4512_v36  ;;  %10531 = vmatmul.mubr.bf16.gmra.mrb[228].mxu0 %v14676_v46  ;;  %3456 = vst [vmem:[#allocation3 + $0x1a0] sm:$0x1] %v3455_v5  ;;  %v5529_v2 = vshrl.u32 %v14659_v6, 16  ;;  %v5532_v42 = vshll.u32 %v14659_v6, 16  ;;  %v5909_v32 = vsel %vm14323_vm4, %v5907_v40, %v5908_v39 }
 0x3b5   :  { %v5538_v24 = vshll.u32 %v14670_v8, 16  ;;  %v5542_v63 = vshrl.u32 %v14670_v8, 16  ;;  %v3224_v38 = vmul.f32 1.7139589, %v3160_v27  ;;  %v3161_v3 = vmax.f32 %v3095_v16, 0.0 }
 0x3b6   :  { %v5548_v34 = vshll.u32 %v14681_v29, 16  ;;  %v14697_v17 = vcombine.low %v5906_v22, %v5909_v32  ;;  %v5531_v25 = vrot.slane %v5529_v2, 4  ;;  %v5534_v45 = vrot.slane %v5532_v42, 5  ;;  %v11341_v30 = vld [vmem:[#allocation3 + $0x9c] sm:$0xf] }
 0x3b7   :  { %v5540_v54 = vrot.slane %v5538_v24, 5  ;;  %v10312_v35 = vpack.c.bf16 %v3224_v38, %v3224_v38  ;;  %v3225_v61 = vmul.f32 1.7139589, %v3161_v3  ;;  %v5544_v15 = vrot.slane %v5542_v63, 4  ;;  %v11342_v5 = vld [vmem:[#allocation3 + $0xa0] sm:$0xf] }
 0x3b8   :  { %v5550_v52 = vrot.slane %v5548_v34, 5  ;;  %10534 = vmatprep.mubr.bf16.mxu0 %v14697_v17  ;;  %v5535_v0 = vor.u32 %v5534_v45, %v5531_v25  ;;  %v10075_v36 = vrot.slane %v11341_v30, 9  ;;  %v5912_v39 = vrot.slane %v11342_v5, 5  ;;  %v11343_v40 = vld [vmem:[#allocation3 + $0xa4] sm:$0x1] }
 0x3b9   :  { %v5915_v27 = vrot.slane %v11343_v40, 5  ;;  %v4182_v16 = vshrl.u32 %v10312_v35, 16  ;;  %v4185_v47 = vshll.u32 %v10312_v35, 16  ;;  %v10313_v22 = vpack.c.bf16 %v3225_v61, %v3225_v61  ;;  %v14706_v45 = vld [vmem:[#allocation3 + $0x174] sm:$0xf] }
 0x3ba   :  { %v5545_v32 = vor.u32 %v5544_v15, %v5540_v54  ;;  %v5536_v2 = vrot.slane %v5535_v0, 4  ;;  %v5913_v42 = vsel %vm14323_vm4, %v10075_v36, %v5912_v39  ;;  %v5914_v24 = vrot.slane %v5912_v39, 4  ;;  %v4514_v30 = vld [vmem:[#allocation3 + $0x198] sm:$0xf]  ;;  %v11344_v15 = vld [vmem:[#allocation3 + $0xa8] sm:$0xf] }
 0x3bb   :  { %v14704_v63 = vcombine.low %v14659_v6, %v14670_v8  ;;  %v4184_v38 = vrot.slane %v4182_v16, 7  ;;  %v4190_v3 = vshrl.u32 %v10313_v22, 16  ;;  %v4193_v34 = vshll.u32 %v10313_v22, 16  ;;  %v11345_v36 = vld [vmem:[#allocation3 + $0xac] sm:$0xf]  ;;  %v14712_v39 = vpop.f32.mrb[160].mxu0 }
 0x3bc   :  { %v5546_v25 = vrot.slane %v5545_v32, 4  ;;  %v5541_v35 = vsel %vm13522_vm15, %v5536_v2, %v5540_v54  ;;  %v5916_v61 = vsel %vm14323_vm4, %v5914_v24, %v5915_v27  ;;  %v10076_v0 = vrot.slane %v11344_v15, 9  ;;  %16384 = vst [vmem:[#allocation107_spill] sm:$0xff] %v14712_v39  ;;  %v4615_v32 = vld [vmem:[#allocation3 + $0x178] sm:$0xf]  ;;  %v7543_v58 = vpop.f32.mrb[161].mxu0 }
 0x3bd   :  { %16383 = vst [vmem:[#allocation106_spill] sm:$0xff] %v14704_v63  ;;  %v5919_v5 = vrot.slane %v11345_v36, 5  ;;  %v4187_v40 = vor.u32 %v4185_v47, %v4184_v38  ;;  %v4188_v16 = vrot.slane %v4184_v38, 4  ;;  %v4192_v21 = vrot.slane %v4190_v3, 7  ;;  %v4518_v53 = vld [vmem:[#allocation3 + $0x1a0] sm:$0x1] }
 0x3be   :  { %v5551_v22 = vsel %vm13522_vm15, %v5546_v25, %v5550_v52  ;;  %v14718_v54 = vcombine.low %v5913_v42, %v5916_v61  ;;  %v4616_v24 = vld [vmem:[#allocation3 + $0x17c] sm:$0x1]  ;;  %v14722_v15 = vpop.f32.mrb[162].mxu0  ;;  %v11346_v52 = vld [vmem:[#allocation3 + $0xb0] sm:$0x1]  ;;  %v5553_v42 = vshrl.u32 %v14706_v45, 16 }
 0x3bf   :  { %v14716_v56 = vcombine.low %v5541_v35, %v5551_v22  ;;  %v5920_v27 = vsel %vm14323_vm4, %v10076_v0, %v5919_v5  ;;  %v5921_v2 = vrot.slane %v5919_v5, 4  ;;  %16386 = vst [vmem:[#allocation109_spill] sm:$0xff] %v14722_v15  ;;  %v4515_v47 = vsel %vm13494_vm11, %v4187_v40, %v4514_v30  ;;  %v7546_v58 = vpop.f32.mrb[163].mxu0 }
 0x3c0   :  { %v4195_v38 = vor.u32 %v4193_v34, %v4192_v21  ;;  %v4197_v3 = vrot.slane %v4192_v21, 4  ;;  %v5922_v25 = vrot.slane %v11346_v52, 5  ;;  %4516 = vst [vmem:[#allocation3 + $0x198] sm:$0xf] %v4515_v47  ;;  %10535 = vmatmul.mubr.bf16.gmra.mrb[232].mxu0 %v14718_v54  ;;  %v5556_v35 = vshll.u32 %v14706_v45, 16  ;;  %v14741_v13 = vpop.f32.mrb[164].mxu0 }
 0x3c1   :  { %16385 = vst [vmem:[#allocation108_spill] sm:$0xff] %v14716_v56  ;;  %7699 = vmatprep.mubr.bf16.mxu1 %v14716_v56  ;;  %v5562_v61 = vshll.u32 %v4615_v32, 16  ;;  %v5566_v0 = vshrl.u32 %v4615_v32, 16  ;;  %v5572_v30 = vshll.u32 %v4616_v24, 16  ;;  %v5555_v5 = vrot.slane %v5553_v42, 4  ;;  %16387 = vst [vmem:[#allocation110_spill] sm:$0xff] %v14741_v13 }
 0x3c2   :  { %v4196_v11 = vsel %vm13503_vm13, %v4188_v16, %v4195_v38  ;;  %v4519_v21 = vsel %vm13294_vm6, %v4197_v3, %v4518_v53  ;;  %7700 = vmatmul.mubr.bf16.gmra.mrb[92].mxu1 %v14704_v63  ;;  %v5923_v34 = vsel %vm14323_vm4, %v5921_v2, %v5922_v25  ;;  %v5558_v40 = vrot.slane %v5556_v35, 5  ;;  %v14739_v47 = vld [vmem:[#allocation3 + $0xc0] sm:$0xf]  ;;  %v7551_v52 = vpop.f32.mrb[165].mxu0  ;;  %v11347_v58 = vld [vmem:[#allocation3 + $0xb4] sm:$0xf] }
 0x3c3   :  { %4517 = vst [vmem:[#allocation3 + $0x19c] sm:$0xf] %v4196_v11  ;;  %4520 = vst [vmem:[#allocation3 + $0x1a0] sm:$0x1] %v4519_v21  ;;  %v14737_v36 = vcombine.low %v5920_v27, %v5923_v34  ;;  %v5564_v22 = vrot.slane %v5562_v61, 5  ;;  %v5568_v16 = vrot.slane %v5566_v0, 4 }
 0x3c4   :  { %v5574_v38 = vrot.slane %v5572_v30, 5  ;;  %v10091_v53 = vrot.slane %v14706_v45, 9  ;;  %v6024_v3 = vrot.slane %v4615_v32, 5  ;;  %v5559_v2 = vor.u32 %v5558_v40, %v5555_v5  ;;  %v11348_v11 = vld [vmem:[#allocation3 + $0xb8] sm:$0xf]  ;;  %v14747_v61 = vpop.f32.mrb[166].mxu0 }
 0x3c5   :  { %10538 = vmatprep.mubr.bf16.mxu0 %v14737_v36  ;;  %v6027_v25 = vrot.slane %v4616_v24, 5  ;;  %v10077_v27 = vrot.slane %v11347_v58, 9  ;;  %v5926_v42 = vrot.slane %v11348_v11, 5  ;;  %v14745_v35 = vld [vmem:[#allocation3 + $0xc4] sm:$0xf]  ;;  %16388 = vst [vmem:[#allocation111_spill] sm:$0xff] %v14747_v61  ;;  %v5569_v21 = vor.u32 %v5568_v16, %v5564_v22 }
 0x3c6   :  { %v6025_v0 = vsel %vm14323_vm4, %v10091_v53, %v6024_v3  ;;  %v6026_v34 = vrot.slane %v6024_v3, 4  ;;  %v11349_v30 = vld [vmem:[#allocation3 + $0xbc] sm:$0x1]  ;;  %v14751_v52 = vld [vmem:[#allocation3 + $0xc8] sm:$0x1]  ;;  %v7554_v15 = vpop.f32.mrb[167].mxu0  ;;  %v14756_v58 = vcombine.low %v14706_v45, %v4615_v32 }
 0x3c7   :  { %v5929_v13 = vrot.slane %v11349_v30, 5  ;;  %v5560_v5 = vrot.slane %v5559_v2, 4  ;;  %v5927_v24 = vsel %vm14323_vm4, %v10077_v27, %v5926_v42  ;;  %v5928_v40 = vrot.slane %v5926_v42, 4  ;;  %v14758_v11 = vld [vmem:[#allocation3 + $0x180] sm:$0xf]  ;;  %v14801_v63 = vpop.f32.mrb[168].mxu0 }
 0x3c8   :  { %16389 = vst [vmem:[#allocation112_spill] sm:$0xff] %v14756_v58  ;;  %v5570_v16 = vrot.slane %v5569_v21, 4  ;;  %v6028_v53 = vsel %vm14323_vm4, %v6026_v34, %v6027_v25  ;;  %v10130_v3 = vrot.slane %v14739_v47, 9  ;;  %v6339_v30 = vrot.slane %v14745_v35, 5  ;;  %v14764_v61 = vld [vmem:[#allocation3 + $0x184] sm:$0xf] }
 0x3c9   :  { %v5565_v15 = vsel %vm13522_vm15, %v5560_v5, %v5564_v22  ;;  %v14768_v2 = vcombine.low %v6025_v0, %v6028_v53  ;;  %v5930_v45 = vsel %vm14323_vm4, %v5928_v40, %v5929_v13  ;;  %v6342_v32 = vrot.slane %v14751_v52, 5  ;;  %v14773_v27 = vld [vmem:[#allocation3 + $0x188] sm:$0x1]  ;;  %v3293_v42 = vld [vmem:[#allocation3 + $0xcc] sm:$0x1]  ;;  %16392 = vst [vmem:[#allocation115_spill] sm:$0xff] %v14801_v63 }
 0x3ca   :  { %v5575_v25 = vsel %vm13522_vm15, %v5570_v16, %v5574_v38  ;;  %v14777_v21 = vcombine.low %v5927_v24, %v5930_v45  ;;  %v6340_v34 = vsel %vm14323_vm4, %v10130_v3, %v6339_v30  ;;  %v6341_v39 = vrot.slane %v6339_v30, 4  ;;  %v3403_v40 = vld [vmem:[#allocation3 + $0xd4] sm:$0x1]  ;;  %v4573_v56 = vld [vmem:[#allocation3 + $0xd0] sm:$0xf] }
 0x3cb   :  { %v14781_v22 = vcombine.low %v5565_v15, %v5575_v25  ;;  %v5577_v0 = vshrl.u32 %v14758_v11, 16  ;;  %v5580_v13 = vshll.u32 %v14758_v11, 16  ;;  %v5586_v5 = vshll.u32 %v14764_v61, 16  ;;  %v14796_v25 = vld [vmem:[#allocation3 + $0x18c] sm:$0xf] }
 0x3cc   :  { %10539 = vmatmul.mubr.bf16.gmra.mrb[236].mxu0 %v14777_v21  ;;  %v6343_v38 = vsel %vm14323_vm4, %v6341_v39, %v6342_v32  ;;  %v5590_v24 = vshrl.u32 %v14764_v61, 16  ;;  %v5596_v16 = vshll.u32 %v14773_v27, 16  ;;  %v3294_v53 = vsel %vm13294_vm6, 0, %v3293_v42 }
 0x3cd   :  { %16390 = vst [vmem:[#allocation113_spill] sm:$0xff] %v14781_v22  ;;  %7707 = vmatprep.mubr.bf16.mxu1 %v14781_v22  ;;  %v14794_v3 = vcombine.low %v6340_v34, %v6343_v38  ;;  %v5579_v30 = vrot.slane %v5577_v0, 4  ;;  %v5582_v15 = vrot.slane %v5580_v13, 5  ;;  %v5588_v45 = vrot.slane %v5586_v5, 5  ;;  %3295 = vst [vmem:[#allocation3 + $0xcc] sm:$0x1] %v3294_v53 }
 0x3ce   :  { %7708 = vmatmul.mubr.bf16.gmra.mrb[96].mxu1 %v14756_v58  ;;  %v5592_v39 = vrot.slane %v5590_v24, 4  ;;  %v3404_v32 = vsel %vm13303_vm8, 0, %v3403_v40  ;;  %v11350_v34 = vld [vmem:[#allocation3 + $0xf4] sm:$0xf]  ;;  %v14804_v13 = vld [vmem:[#allocation3 + $0x190] sm:$0xf]  ;;  %v14823_v19 = vcombine.low %v14758_v11, %v14764_v61 }
 0x3cf   :  { %16391 = vst [vmem:[#allocation114_spill] sm:$0xff] %v14794_v3  ;;  %10542 = vmatprep.mubr.bf16.mxu0 %v14794_v3  ;;  %v5583_v42 = vor.u32 %v5582_v15, %v5579_v30  ;;  %3405 = vst [vmem:[#allocation3 + $0xd4] sm:$0x1] %v3404_v32  ;;  %v5947_v0 = vrot.slane %v11350_v34, 5  ;;  %v7559_v5 = vpop.f32.mrb[169].mxu0  ;;  %v5601_v24 = vshrl.u32 %v14796_v25, 16 }
 0x3d0   :  { %v5593_v38 = vor.u32 %v5592_v39, %v5588_v45  ;;  %v14806_v53 = vld [vmem:[#allocation3 + $0x194] sm:$0x1]  ;;  %v14809_v22 = vpop.f32.mrb[170].mxu0  ;;  %v5598_v37 = vrot.slane %v5596_v16, 5  ;;  %v6527_v10 = vrot.slane %v4573_v56, 5  ;;  %v5604_v63 = vshll.u32 %v14796_v25, 16 }
 0x3d1   :  { %16393 = vst [vmem:[#allocation116_spill] sm:$0xff] %v14809_v22  ;;  %v5584_v40 = vrot.slane %v5583_v42, 4  ;;  %v7562_v3 = vpop.f32.mrb[171].mxu0  ;;  %v5603_v15 = vrot.slane %v5601_v24, 4  ;;  %v5610_v32 = vshll.u32 %v14804_v13, 16  ;;  %v5614_v34 = vshrl.u32 %v14804_v13, 16 }
 0x3d2   :  { %v5594_v30 = vrot.slane %v5593_v38, 4  ;;  %v5949_v5 = vrot.slane %v5947_v0, 4  ;;  %v5606_v58 = vrot.slane %v5604_v63, 5  ;;  %v5620_v23 = vshll.u32 %v14806_v53, 16  ;;  %16395 = vst [vmem:[#allocation118_spill] sm:$0xff] %v14823_v19 }
 0x3d3   :  { %v5589_v39 = vsel %vm13522_vm15, %v5584_v40, %v5588_v45  ;;  %v5612_v16 = vrot.slane %v5610_v32, 5  ;;  %v5616_v56 = vrot.slane %v5614_v34, 4  ;;  %v6529_v24 = vrot.slane %v6527_v10, 4  ;;  %v11351_v45 = vld [vmem:[#allocation3 + $0xf8] sm:$0x1] }
 0x3d4   :  { %v5599_v22 = vsel %vm13522_vm15, %v5594_v30, %v5598_v37  ;;  %v4572_v42 = vld [vmem:[#allocation3 + $0xcc] sm:$0xf]  ;;  %v5607_v50 = vor.u32 %v5606_v58, %v5603_v15  ;;  %v5950_v63 = vrot.slane %v11351_v45, 5  ;;  %v11352_v32 = vld [vmem:[#allocation3 + $0xf0] sm:$0xf]  ;;  %v14831_v45 = vpop.f32.mrb[172].mxu0 }
 0x3d5   :  { %v14819_v3 = vcombine.low %v5589_v39, %v5599_v22  ;;  %v10138_v38 = vrot.slane %v4572_v42, 9  ;;  %v5617_v40 = vor.u32 %v5616_v56, %v5612_v16  ;;  %v10080_v22 = vrot.slane %v11352_v32, 9  ;;  %v11353_v42 = vld [vmem:[#allocation3 + $0x100] sm:$0xf]  ;;  %16396 = vst [vmem:[#allocation119_spill] sm:$0xff] %v14831_v45 }
 0x3d6   :  { %v4574_v4 = vld [vmem:[#allocation3 + $0xd4] sm:$0x1]  ;;  %v5608_v34 = vrot.slane %v5607_v50, 4  ;;  %v5951_v58 = vsel %vm14323_vm4, %v5949_v5, %v5950_v63  ;;  %v5622_v39 = vrot.slane %v5620_v23, 5  ;;  %v5954_v28 = vrot.slane %v11353_v42, 5 }
 0x3d7   :  { %16394 = vst [vmem:[#allocation117_spill] sm:$0xff] %v14819_v3  ;;  %7715 = vmatprep.mubr.bf16.mxu1 %v14819_v3  ;;  %v6528_v37 = vsel %vm14323_vm4, %v10138_v38, %v6527_v10  ;;  %v6530_v30 = vrot.slane %v4574_v4, 5  ;;  %v5618_v15 = vrot.slane %v5617_v40, 4  ;;  %v7567_v3 = vpop.f32.mrb[173].mxu0  ;;  %v5948_v4 = vsel %vm14323_vm4, %v10080_v22, %v5947_v0  ;;  %v11356_v0 = vld [vmem:[#allocation3 + $0x104] sm:$0x1] }
 0x3d8   :  { %7716 = vmatmul.mubr.bf16.gmra.mrb[100].mxu1 %v14823_v19  ;;  %v5613_v50 = vsel %vm13522_vm15, %v5608_v34, %v5612_v16  ;;  %v14841_v38 = vpop.f32.mrb[174].mxu0  ;;  %v14843_v23 = vcombine.low %v5948_v4, %v5951_v58  ;;  %v5956_v40 = vrot.slane %v5954_v28, 4  ;;  %v11354_v3 = vld [vmem:[#allocation3 + $0x10c] sm:$0xf]  ;;  %v5957_v16 = vrot.slane %v11356_v0, 5 }
 0x3d9   :  { %v6531_v56 = vsel %vm14323_vm4, %v6529_v24, %v6530_v30  ;;  %v5623_v5 = vsel %vm13522_vm15, %v5618_v15, %v5622_v39  ;;  %16397 = vst [vmem:[#allocation120_spill] sm:$0xff] %v14841_v38  ;;  %v7570_v32 = vpop.f32.mrb[175].mxu0  ;;  %v5961_v24 = vrot.slane %v11354_v3, 5  ;;  %v11357_v22 = vld [vmem:[#allocation3] sm:$0xf]  ;;  %v14851_v39 = vcombine.low %v14796_v25, %v14804_v13 }
 0x3da   :  { %v10140_v10 = vcombine.low %v6528_v37, %v6531_v56  ;;  %v14845_v63 = vcombine.low %v5613_v50, %v5623_v5  ;;  %v11355_v37 = vld [vmem:[#allocation3 + $0x8] sm:$0x1]  ;;  %v10062_v34 = vrot.slane %v11357_v22, 9  ;;  %v11358_v15 = vld [vmem:[#allocation3 + $0x4] sm:$0xf]  ;;  %v5958_v3 = vsel %vm14323_vm4, %v5956_v40, %v5957_v16 }
 0x3db   :  { %v5824_v30 = vrot.slane %v11355_v37, 5  ;;  %v5821_v58 = vrot.slane %v11358_v15, 5  ;;  %16399 = vst [vmem:[#allocation122_spill] sm:$0xff] %v14851_v39  ;;  %v5963_v42 = vrot.slane %v5961_v24, 4  ;;  %v11359_v56 = vld [vmem:[#allocation3 + $0x110] sm:$0x1] }
 0x3dc   :  { %16398 = vst [vmem:[#allocation121_spill] sm:$0xff] %v14845_v63  ;;  %10543 = vmatmul.mubr.bf16.gmra.mrb[240].mxu0 %v10140_v10  ;;  %7723 = vmatprep.mubr.bf16.mxu1 %v14845_v63  ;;  %v5964_v10 = vrot.slane %v11359_v56, 5  ;;  %v11360_v4 = vld [vmem:[#allocation3 + $0x118] sm:$0xf]  ;;  %v11361_v5 = vld [vmem:[#allocation3 + $0xfc] sm:$0xf] }
 0x3dd   :  { %10546 = vmatprep.mubr.bf16.mxu0 %v14843_v23  ;;  %v5968_v50 = vrot.slane %v11360_v4, 5  ;;  %v10081_v32 = vrot.slane %v11361_v5, 9  ;;  %v5823_v37 = vrot.slane %v5821_v58, 4  ;;  %v11362_v0 = vld [vmem:[#allocation3 + $0x108] sm:$0xf]  ;;  %v5822_v4 = vsel %vm14323_vm4, %v10062_v34, %v5821_v58 }
 0x3de   :  { %v10082_v22 = vrot.slane %v11362_v0, 9  ;;  %v5965_v15 = vsel %vm14323_vm4, %v5963_v42, %v5964_v10  ;;  %v11363_v38 = vld [vmem:[#allocation3 + $0x124] sm:$0xf]  ;;  %v16400_v63 = vld [vmem:[#allocation43_spill] sm:$0xff]  ;;  %v14869_v42 = vpop.f32.mrb[176].mxu0 }
 0x3df   :  { %v5975_v45 = vrot.slane %v11363_v38, 5  ;;  %v5955_v56 = vsel %vm14323_vm4, %v10081_v32, %v5954_v28  ;;  %v5825_v40 = vsel %vm14323_vm4, %v5823_v37, %v5824_v30  ;;  %v5970_v0 = vrot.slane %v5968_v50, 4  ;;  %16401 = vst [vmem:[#allocation43_spill] sm:$0xff] %v14869_v42  ;;  %v7575_v10 = vpop.f32.mrb[177].mxu0  ;;  %v11364_v28 = vld [vmem:[#allocation3 + $0x11c] sm:$0x1] }
 0x3e0   :  { %7724 = vmatmul.mubr.bf16.gmra.mrb[104].mxu1 %v14851_v39  ;;  %v14865_v16 = vcombine.low %v5955_v56, %v5958_v3  ;;  %v5962_v5 = vsel %vm14323_vm4, %v10082_v22, %v5961_v24  ;;  %v10094_v32 = vcombine.low %v5822_v4, %v5825_v40  ;;  %v11365_v58 = vld [vmem:[#allocation3 + $0x10] sm:$0xf]  ;;  %v14874_v30 = vpop.f32.mrb[178].mxu0  ;;  %v11366_v3 = vld [vmem:[#allocation3 + $0x114] sm:$0xf]  ;;  %v11265_v37 = vld [vmem:[%s16094_s2 + $0x100] sm:$0xff]  }
 0x3e1   :  { %7764 = vmatprep.mubr.bf16.mxu1 %v16400_v63  ;;  %v14871_v38 = vcombine.low %v5962_v5, %v5965_v15  ;;  %v5971_v63 = vrot.slane %v11364_v28, 5  ;;  %v5977_v34 = vrot.slane %v5975_v45, 4  ;;  %v5828_v39 = vrot.slane %v11365_v58, 5  ;;  %16402 = vst [vmem:[#allocation123_spill] sm:$0xff] %v14874_v30  ;;  %v7578_v22 = vpop.f32.mrb[179].mxu0 }
 0x3e2   :  { %v10083_v24 = vrot.slane %v11366_v3, 9  ;;  %v11367_v56 = vld [vmem:[#allocation3 + $0x128] sm:$0x1]  ;;  %v11368_v4 = vld [vmem:[#allocation3 + $0x130] sm:$0xf]  ;;  %v10090_v22 = vrot.slane %v14659_v6, 9 }
 0x3e3   :  { %v5972_v15 = vsel %vm14323_vm4, %v5970_v0, %v5971_v63  ;;  %v5978_v5 = vrot.slane %v11367_v56, 5  ;;  %v5982_v40 = vrot.slane %v11368_v4, 5  ;;  %v11369_v28 = vld [vmem:[#allocation3 + $0x120] sm:$0xf]  ;;  %v5830_v30 = vrot.slane %v5828_v39, 4 }
 0x3e4   :  { %10547 = vmatmul.mubr.bf16.gmra.mrb[244].mxu0 %v14865_v16  ;;  %v5969_v10 = vsel %vm14323_vm4, %v10083_v24, %v5968_v50  ;;  %v10084_v58 = vrot.slane %v11369_v28, 9  ;;  %v11370_v42 = vld [vmem:[#allocation3 + $0x13c] sm:$0xf]  ;;  %v6017_v0 = vrot.slane %v14670_v8, 5  ;;  %v11371_v24 = vld [vmem:[#allocation3 + $0x14] sm:$0x1] }
 0x3e5   :  { %10550 = vmatprep.mubr.bf16.mxu0 %v14871_v38  ;;  %v5979_v3 = vsel %vm14323_vm4, %v5977_v34, %v5978_v5  ;;  %v5989_v19 = vrot.slane %v11370_v42, 5  ;;  %v14888_v63 = vcombine.low %v5969_v10, %v5972_v15  ;;  %v16403_v50 = vld [vmem:[#allocation45_spill] sm:$0xff]  ;;  %v5831_v4 = vrot.slane %v11371_v24, 5  ;;  %v11373_v10 = vld [vmem:[#allocation3 + $0x134] sm:$0x1] }
 0x3e6   :  { %v5976_v56 = vsel %vm14323_vm4, %v10084_v58, %v5975_v45  ;;  %v5984_v34 = vrot.slane %v5982_v40, 4  ;;  %v6018_v6 = vsel %vm14323_vm4, %v10090_v22, %v6017_v0  ;;  %v6019_v8 = vrot.slane %v6017_v0, 4  ;;  %v11372_v45 = vld [vmem:[#allocation3 + $0xc] sm:$0xf] }
 0x3e7   :  { %v6020_v42 = vrot.slane %v14681_v29, 5  ;;  %v10063_v15 = vrot.slane %v11372_v45, 9  ;;  %v5832_v5 = vsel %vm14323_vm4, %v5830_v30, %v5831_v4  ;;  %v5985_v28 = vrot.slane %v11373_v10, 5  ;;  %v11267_v30 = vld [vmem:[%s16094_s2 + $0x110] sm:$0xff]   ;;  %v11376_v10 = vld [vmem:[#allocation3 + $0x138] sm:$0xf] }
 0x3e8   :  { %7765 = vmatmul.mubr.bf16.vlgmr.msra.gmra.mrb[108].mxu1 %v10094_v32  ;;  %v11266_v32 = vld [vmem:[%s16094_s2 + $0x108] sm:$0xff]   ;;  %v5991_v58 = vrot.slane %v5989_v19, 4  ;;  %v14919_v0 = vcombine.low %v14739_v47, %v14745_v35 }
 0x3e9   :  { %8022 = vmatpush1.bf16.msra.mxu1 %v11265_v37  ;;  %7772 = vmatprep.mubr.bf16.mxu1 %v16403_v50  ;;  %v14900_v37 = vcombine.low %v5976_v56, %v5979_v3  ;;  %v6021_v24 = vsel %vm14323_vm4, %v6019_v8, %v6020_v42  ;;  %v14907_v50 = vpop.f32.mrb[180].mxu0  ;;  %v5829_v29 = vsel %vm14323_vm4, %v10063_v15, %v5828_v39  ;;  %v11374_v56 = vld [vmem:[#allocation3 + $0x12c] sm:$0xf]  ;;  %v11375_v39 = vld [vmem:[#allocation3 + $0x140] sm:$0x1] }
 0x3ea   :  { %8023 = vmatprep.subr.bf16.mxu1 %v16350_v33  ;;  %16404 = vst [vmem:[#allocation124_spill] sm:$0xff] %v14907_v50  ;;  %v14912_v3 = vcombine.low %v6018_v6, %v6021_v24  ;;  %v7583_v22 = vpop.f32.mrb[181].mxu0  ;;  %16405 = vst [vmem:[#allocation125_spill] sm:$0xff] %v14919_v0  ;;  %v10085_v4 = vrot.slane %v11374_v56, 9  ;;  %v5986_v8 = vsel %vm14323_vm4, %v5984_v34, %v5985_v28  ;;  %v10086_v24 = vrot.slane %v11376_v10, 9  ;;  %v16407_v28 = vld [vmem:[#allocation47_spill] sm:$0xff] }
 0x3eb   :  { %v14923_v42 = vcombine.low %v5829_v29, %v5832_v5  ;;  %v14926_v6 = vpop.f32.mrb[182].mxu0  ;;  %v6003_v34 = vrot.slane %v14546_v62, 5  ;;  %v11268_v29 = vld [vmem:[%s16094_s2 + $0x118] sm:$0xff]   ;;  %v6248_v56 = vshrl.u32 %v14739_v47, 16  ;;  %v6257_v62 = vshll.u32 %v14745_v35, 16 }
 0x3ec   :  { %10551 = vmatmul.mubr.bf16.gmra.mrb[248].mxu0 %v14888_v63  ;;  %16406 = vst [vmem:[#allocation126_spill] sm:$0xff] %v14926_v6  ;;  %v7586_v45 = vpop.f32.mrb[183].mxu0  ;;  %v5983_v15 = vsel %vm14323_vm4, %v10085_v4, %v5982_v40  ;;  %v5990_v40 = vsel %vm14323_vm4, %v10086_v24, %v5989_v19  ;;  %v11269_v19 = vld [vmem:[%s16094_s2 + $0x120] sm:$0xff]   ;;  %v6006_v10 = vrot.slane %v14557_v59, 5  ;;  %v11270_v59 = vld [vmem:[%s16094_s2 + $0x128] sm:$0xff]  }
 0x3ed   :  { %10554 = vmatprep.mubr.bf16.mxu0 %v14900_v37  ;;  %8024 = vmatpush1.bf16.msra.mxu1 %v11266_v32  ;;  %v5992_v32 = vrot.slane %v11375_v39, 5  ;;  %v14934_v5 = vcombine.low %v5983_v15, %v5986_v8  ;;  %v6261_v8 = vshrl.u32 %v14745_v35, 16  ;;  %v6250_v39 = vrot.slane %v6248_v56, 4  ;;  %v14957_v35 = vpop.f32.mrb[184].mxu0 }
 0x3ee   :  { %8025 = vmatprep.subr.bf16.mxu1 %v16350_v33  ;;  %v6259_v45 = vrot.slane %v6257_v62, 5  ;;  %v6267_v15 = vshll.u32 %v14751_v52, 16  ;;  %16408 = vst [vmem:[#allocation47_spill] sm:$0xff] %v14957_v35  ;;  %v16410_v52 = vld [vmem:[#allocation49_spill] sm:$0xff] }
 0x3ef   :  { %v5993_v22 = vsel %vm14323_vm4, %v5991_v58, %v5992_v32  ;;  %v6251_v58 = vshll.u32 %v14739_v47, 16  ;;  %v6263_v47 = vrot.slane %v6261_v8, 4 }
 0x3f0   :  { %7773 = vmatmul.mubr.bf16.gmra.mrb[112].mxu1 %v14923_v42  ;;  %v14946_v4 = vcombine.low %v5990_v40, %v5993_v22  ;;  %v7591_v22 = vpop.f32.mrb[185].mxu0 }
 0x3f1   :  { %7780 = vmatprep.mubr.bf16.mxu1 %v16407_v28  ;;  %8026 = vmatpush1.bf16.msra.mxu1 %v11267_v30  ;;  %v6005_v30 = vrot.slane %v6003_v34, 4  ;;  %v6253_v32 = vrot.slane %v6251_v58, 5  ;;  %v6264_v40 = vor.u32 %v6263_v47, %v6259_v45  ;;  %v14963_v58 = vpop.f32.mrb[186].mxu0  ;;  %v11272_v22 = vld [vmem:[%s16094_s2 + $0x138] sm:$0xff]  }
 0x3f2   :  { %8027 = vmatprep.subr.bf16.mxu1 %v16350_v33  ;;  %16409 = vst [vmem:[#allocation127_spill] sm:$0xff] %v14963_v58  ;;  %v7594_v8 = vpop.f32.mrb[187].mxu0  ;;  %v11377_v58 = vld [vmem:[#allocation3 + $0xdc] sm:$0xf] }
 0x3f3   :  { %v6254_v24 = vor.u32 %v6253_v32, %v6250_v39  ;;  %v6007_v56 = vsel %vm14323_vm4, %v6005_v30, %v6006_v10  ;;  %v6265_v39 = vrot.slane %v6264_v40, 4  ;;  %v6269_v32 = vrot.slane %v6267_v15, 5  ;;  %v16411_v15 = vld [vmem:[#allocation51_spill] sm:$0xff] }
 0x3f4   :  { %10555 = vmatmul.mubr.bf16.gmra.mrb[252].mxu0 %v14934_v5  ;;  %v6034_v8 = vrot.slane %v14773_v27, 5  ;;  %v11275_v27 = vld [vmem:[%s16094_s2 + $0x148] sm:$0xff]   ;;  %v5933_v35 = vrot.slane %v11377_v58, 5 }
 0x3f5   :  { %10558 = vmatprep.mubr.bf16.mxu0 %v14946_v4  ;;  %8028 = vmatpush1.bf16.msra.mxu1 %v11268_v29  ;;  %v10088_v29 = vrot.slane %v14538_v12, 9  ;;  %v6255_v62 = vrot.slane %v6254_v24, 4 }
 0x3f6   :  { %8029 = vmatprep.subr.bf16.mxu1 %v16350_v33 }
 0x3f7   :  { %v6004_v47 = vsel %vm14323_vm4, %v10088_v29, %v6003_v34  ;;  %v6260_v12 = vsel %vm13522_vm15, %v6255_v62, %v6259_v45  ;;  %v11271_v34 = vld [vmem:[%s16094_s2 + $0x130] sm:$0xff]   ;;  %v6031_v45 = vrot.slane %v14764_v61, 5  ;;  %v14999_v61 = vld [vmem:[#allocation3 + $0x19c] sm:$0xf] }
 0x3f8   :  { %7781 = vmatmul.mubr.bf16.gmra.mrb[116].mxu1 %v14350_v49  ;;  %v14974_v30 = vcombine.low %v6004_v47, %v6007_v56 }
 0x3f9   :  { %7788 = vmatprep.mubr.bf16.mxu1 %v16410_v52  ;;  %8030 = vmatpush1.bf16.msra.mxu1 %v11269_v19  ;;  %v6270_v19 = vsel %vm13522_vm15, %v6265_v39, %v6269_v32  ;;  %v14989_v24 = vpop.f32.mrb[188].mxu0  ;;  %v6033_v56 = vrot.slane %v6031_v45, 4  ;;  %v6038_v39 = vrot.slane %v14804_v13, 5  ;;  %v10092_v32 = vrot.slane %v14758_v11, 9  ;;  %v15021_v11 = vld [vmem:[#allocation3 + $0x1a0] sm:$0x1] }
 0x3fa   :  { %8031 = vmatprep.subr.bf16.mxu1 %v16350_v33  ;;  %v14979_v10 = vcombine.low %v6260_v12, %v6270_v19  ;;  %16412 = vst [vmem:[#allocation49_spill] sm:$0xff] %v14989_v24  ;;  %v7599_v40 = vpop.f32.mrb[189].mxu0  ;;  %v6346_v12 = vrot.slane %v14999_v61, 5  ;;  %v16414_v19 = vld [vmem:[#allocation53_spill] sm:$0xff] }
 0x3fb   :  { %v14995_v29 = vpop.f32.mrb[190].mxu0  ;;  %v6035_v47 = vsel %vm14323_vm4, %v6033_v56, %v6034_v8  ;;  %v6040_v13 = vrot.slane %v6038_v39, 4  ;;  %v6041_v56 = vrot.slane %v14806_v53, 5  ;;  %v10093_v8 = vrot.slane %v14796_v25, 9 }
 0x3fc   :  { %10559 = vmatmul.mubr.bf16.gmra.mrb[0].mxu0 %v14517_v55  ;;  %16413 = vst [vmem:[#allocation51_spill] sm:$0xff] %v14995_v29  ;;  %v7602_v62 = vpop.f32.mrb[191].mxu0  ;;  %v6348_v40 = vrot.slane %v6346_v12, 4 }
 0x3fd   :  { %10562 = vmatprep.mubr.bf16.mxu0 %v14974_v30  ;;  %8032 = vmatpush1.bf16.msra.mxu1 %v11270_v59  ;;  %v11274_v59 = vld [vmem:[%s16094_s2 + $0x140] sm:$0xff]   ;;  %v15026_v62 = vld [vmem:[#allocation3 + $0x198] sm:$0xf] }
 0x3fe   :  { %8033 = vmatprep.subr.bf16.mxu1 %v16350_v33  ;;  %v10131_v53 = vrot.slane %v15026_v62, 9 }
 0x400   :  { %7789 = vmatmul.mubr.bf16.gmra.mrb[120].mxu1 %v14391_v48  ;;  %v6347_v25 = vsel %vm14323_vm4, %v10131_v53, %v6346_v12  ;;  %v11277_v12 = vld [vmem:[%s16094_s2 + $0x158] sm:$0xff]  }
 0x401   :  { %7796 = vmatprep.mubr.bf16.mxu1 %v16411_v15  ;;  %8034 = vmatpush1.bf16.msra.mxu1 %v11271_v34  ;;  %v6032_v34 = vsel %vm14323_vm4, %v10092_v32, %v6031_v45  ;;  %v11276_v45 = vld [vmem:[%s16094_s2 + $0x150] sm:$0xff]   ;;  %v6042_v32 = vsel %vm14323_vm4, %v6040_v13, %v6041_v56 }
 0x402   :  { %8035 = vmatprep.subr.bf16.mxu1 %v16350_v33 }
 0x404   :  { %10563 = vmatmul.mubr.bf16.gmra.mrb[4].mxu0 %v14645_v51 }
 0x405   :  { %10566 = vmatprep.mubr.bf16.mxu0 %v14912_v3  ;;  %8036 = vmatpush1.bf16.msra.mxu1 %v11272_v22  ;;  %v15019_v22 = vcombine.low %v6032_v34, %v6035_v47  ;;  %v16415_v34 = vld [vmem:[#allocation55_spill] sm:$0xff] }
 0x406   :  { %8037 = vmatprep.subr.bf16.mxu1 %v16350_v33 }
 0x408   :  { %7797 = vmatmul.mubr.bf16.gmra.mrb[124].mxu1 %v14420_v7 }
 0x409   :  { %7804 = vmatprep.mubr.bf16.mxu1 %v16414_v19  ;;  %8038 = vmatpush1.bf16.msra.mxu1 %v11274_v59  ;;  %v6349_v59 = vrot.slane %v15021_v11, 5 }
 0x40a   :  { %8039 = vmatprep.subr.bf16.mxu1 %v16350_v33 }
 0x40b   :  { %v6350_v47 = vsel %vm14323_vm4, %v6348_v40, %v6349_v59 }
 0x40c   :  { %10567 = vmatmul.mubr.bf16.gmra.mrb[8].mxu0 %v14768_v2  ;;  %v15048_v13 = vcombine.low %v6347_v25, %v6350_v47  ;;  %v15050_v56 = vpop.f32.mrb[192].mxu0 }
 0x40d   :  { %10570 = vmatprep.mubr.bf16.mxu0 %v15019_v22  ;;  %8040 = vmatpush1.bf16.msra.mxu1 %v11275_v27  ;;  %v6039_v27 = vsel %vm14323_vm4, %v10093_v8, %v6038_v39  ;;  %16416 = vst [vmem:[#allocation53_spill] sm:$0xff] %v15050_v56  ;;  %v7607_v40 = vpop.f32.mrb[193].mxu0 }
 0x40e   :  { %8041 = vmatprep.subr.bf16.mxu1 %v16350_v33  ;;  %v15043_v29 = vcombine.low %v6039_v27, %v6042_v32  ;;  %v15054_v39 = vpop.f32.mrb[194].mxu0  ;;  %v16421_v27 = vld [vmem:[#allocation59_spill] sm:$0xff] }
 0x40f   :  { %16417 = vst [vmem:[#allocation55_spill] sm:$0xff] %v15054_v39  ;;  %v7610_v59 = vpop.f32.mrb[195].mxu0 }
 0x410   :  { %7805 = vmatmul.mubr.bf16.gmra.mrb[128].mxu1 %v14461_v14 }
 0x411   :  { %7812 = vmatprep.mubr.bf16.mxu1 %v16415_v34  ;;  %8042 = vmatpush1.bf16.msra.mxu1 %v11276_v45  ;;  %v16418_v45 = vld [vmem:[#allocation57_spill] sm:$0xff] }
 0x412   :  { %8043 = vmatprep.subr.bf16.mxu1 %v16350_v33 }
 0x414   :  { %10571 = vmatmul.mubr.bf16.gmra.mrb[12].mxu0 %v15043_v29  ;;  %v15061_v8 = vpop.f32.mrb[196].mxu0 }
 0x415   :  { %10574 = vmatprep.mubr.bf16.mxu0 %v15048_v13  ;;  %8044 = vmatpush1.bf16.msra.mxu1 %v11277_v12  ;;  %16419 = vst [vmem:[#allocation57_spill] sm:$0xff] %v15061_v8  ;;  %v7615_v32 = vpop.f32.mrb[197].mxu0  ;;  %v11278_v12 = vld [vmem:[%s16094_s2 + $0x160] sm:$0xff]  }
 0x416   :  { %8045 = vmatprep.subr.bf16.mxu1 %v16350_v33  ;;  %v15064_v53 = vpop.f32.mrb[198].mxu0  ;;  %v16424_v32 = vld [vmem:[#allocation61_spill] sm:$0xff] }
 0x417   :  { %16420 = vst [vmem:[#allocation128_spill] sm:$0xff] %v15064_v53  ;;  %v7618_v47 = vpop.f32.mrb[199].mxu0 }
 0x418   :  { %7813 = vmatmul.mubr.bf16.gmra.mrb[132].mxu1 %v14488_v26 }
 0x419   :  { %7820 = vmatprep.mubr.bf16.mxu1 %v16418_v45  ;;  %8046 = vmatpush1.bf16.msra.mxu1 %v11278_v12  ;;  %v11279_v12 = vld [vmem:[%s16094_s2 + $0x168] sm:$0xff]  }
 0x41a   :  { %8047 = vmatprep.subr.bf16.mxu1 %v16350_v33 }
 0x41c   :  { %v15068_v25 = vpop.f32.mrb[200].mxu0 }
 0x41d   :  { %16422 = vst [vmem:[#allocation59_spill] sm:$0xff] %v15068_v25  ;;  %v7623_v40 = vpop.f32.mrb[201].mxu0  ;;  %8048 = vmatpush1.bf16.msra.mxu1 %v11279_v12 }
 0x41e   :  { %v15070_v59 = vpop.f32.mrb[202].mxu0  ;;  %8049 = vmatprep.subr.bf16.mxu1 %v16350_v33 }
 0x41f   :  { %16423 = vst [vmem:[#allocation129_spill] sm:$0xff] %v15070_v59  ;;  %v7626_v39 = vpop.f32.mrb[203].mxu0  ;;  %v16428_v59 = vld [vmem:[#allocation42_spill] sm:$0xff] }
 0x420   :  { %7821 = vmatmul.mubr.bf16.gmra.mrb[136].mxu1 %v14548_v44  ;;  %v16427_v39 = vld [vmem:[#allocation63_spill] sm:$0xff] }
 0x421   :  { %7828 = vmatprep.mubr.bf16.mxu1 %v16421_v27 }
 0x424   :  { %v15077_v47 = vpop.f32.mrb[204].mxu0 }
 0x425   :  { %16425 = vst [vmem:[#allocation61_spill] sm:$0xff] %v15077_v47  ;;  %v7631_v53 = vpop.f32.mrb[205].mxu0 }
 0x426   :  { %v15080_v8 = vpop.f32.mrb[206].mxu0 }
 0x427   :  { %16426 = vst [vmem:[#allocation130_spill] sm:$0xff] %v15080_v8  ;;  %v7634_v40 = vpop.f32.mrb[207].mxu0  ;;  %v16432_v8 = vld [vmem:[#allocation68_spill] sm:$0xff] }
 0x428   :  { %7829 = vmatmul.mubr.bf16.gmra.mrb[140].mxu1 %v14573_v43  ;;  %v16431_v40 = vld [vmem:[#allocation66_spill] sm:$0xff] }
 0x429   :  { %7836 = vmatprep.mubr.bf16.mxu1 %v16424_v32 }
 0x430   :  { %7837 = vmatmul.mubr.bf16.gmra.mrb[144].mxu1 %v14605_v57 }
 0x431   :  { %7844 = vmatprep.mubr.bf16.mxu1 %v16427_v39 }
 0x433   :  { %v15086_v25 = vpop.f32.mrb[208].mxu0 }
 0x434   :  { %16429 = vst [vmem:[#allocation131_spill] sm:$0xff] %v15086_v25  ;;  %v7639_v47 = vpop.f32.mrb[209].mxu0  ;;  %v11280_v25 = vld [vmem:[%s16094_s2 + $0x170] sm:$0xff]  }
 0x435   :  { %v15091_v56 = vpop.f32.mrb[210].mxu0  ;;  %8050 = vmatpush1.bf16.msra.mxu1 %v11280_v25  ;;  %v11281_v25 = vld [vmem:[%s16094_s2 + $0x178] sm:$0xff]  }
 0x436   :  { %16430 = vst [vmem:[#allocation132_spill] sm:$0xff] %v15091_v56  ;;  %v7642_v53 = vpop.f32.mrb[211].mxu0  ;;  %8051 = vmatprep.subr.bf16.mxu1 %v16350_v33  ;;  %v16437_v56 = vld [vmem:[#allocation70_spill] sm:$0xff] }
 0x438   :  { %7845 = vmatmul.mubr.bf16.gmra.mrb[148].mxu1 %v14627_v20 }
 0x439   :  { %7852 = vmatprep.mubr.bf16.mxu1 %v16428_v59  ;;  %8052 = vmatpush1.bf16.msra.mxu1 %v11281_v25 }
 0x43a   :  { %8310 = vmatprep.subr.bf16.mxu1 %v16350_v33 }
 0x440   :  { %7853 = vmatmul.mubr.bf16.gmra.mrb[152].mxu1 %v14676_v46 }
 0x441   :  { %7860 = vmatprep.mubr.bf16.mxu1 %v16431_v40 }
 0x447   :  { %v15101_v24 = vpop.f32.mrb[212].mxu0 }
 0x448   :  { %7861 = vmatmul.mubr.bf16.gmra.mrb[156].mxu1 %v14697_v17  ;;  %16433 = vst [vmem:[#allocation133_spill] sm:$0xff] %v15101_v24  ;;  %v15103_v47 = vpop.f32.mrb[213].mxu0 }
 0x449   :  { %7868 = vmatprep.mubr.bf16.mxu1 %v16432_v8  ;;  %16434 = vst [vmem:[#allocation134_spill] sm:$0xff] %v15103_v47  ;;  %v15106_v12 = vpop.f32.mrb[214].mxu0  ;;  %v11379_v47 = vld [vmem:[#allocation3 + $0xe0] sm:$0x1] }
 0x44a   :  { %16435 = vst [vmem:[#allocation135_spill] sm:$0xff] %v15106_v12  ;;  %v15108_v53 = vpop.f32.mrb[215].mxu0  ;;  %v11378_v12 = vld [vmem:[#allocation3 + $0xd8] sm:$0xf] }
 0x44b   :  { %16436 = vst [vmem:[#allocation136_spill] sm:$0xff] %v15108_v53  ;;  %v10078_v24 = vrot.slane %v11378_v12, 9  ;;  %v5935_v53 = vrot.slane %v5933_v35, 4  ;;  %v11380_v12 = vld [vmem:[#allocation3 + $0xe8] sm:$0xf] }
 0x44d   :  { %v5934_v58 = vsel %vm14323_vm4, %v10078_v24, %v5933_v35 }
 0x450   :  { %7869 = vmatmul.mubr.bf16.gmra.mrb[160].mxu1 %v14718_v54 }
 0x451   :  { %7876 = vmatprep.mubr.bf16.mxu1 %v16437_v56  ;;  %v5936_v56 = vrot.slane %v11379_v47, 5 }
 0x453   :  { %v5937_v25 = vsel %vm14323_vm4, %v5935_v53, %v5936_v56 }
 0x457   :  { %v15117_v6 = vpop.f32.mrb[216].mxu0 }
 0x458   :  { %7877 = vmatmul.mubr.bf16.gmra.mrb[164].mxu1 %v14737_v36  ;;  %16438 = vst [vmem:[#allocation137_spill] sm:$0xff] %v15117_v6  ;;  %v15119_v50 = vpop.f32.mrb[217].mxu0  ;;  %v5940_v6 = vrot.slane %v11380_v12, 5 }
 0x459   :  { %7884 = vmatprep.mubr.bf16.mxu1 %v14919_v0  ;;  %16439 = vst [vmem:[#allocation138_spill] sm:$0xff] %v15119_v50  ;;  %v15121_v8 = vpop.f32.mrb[218].mxu0  ;;  %v10110_v50 = vcombine.low %v5934_v58, %v5937_v25  ;;  %v16452_v25 = vld [vmem:[#allocation78_spill] sm:$0xff] }
 0x45a   :  { %16440 = vst [vmem:[#allocation139_spill] sm:$0xff] %v15121_v8  ;;  %v15124_v0 = vpop.f32.mrb[219].mxu0  ;;  %v5942_v47 = vrot.slane %v5940_v6, 4  ;;  %v11381_v8 = vld [vmem:[#allocation3 + $0xec] sm:$0x1] }
 0x45b   :  { %16441 = vst [vmem:[#allocation140_spill] sm:$0xff] %v15124_v0  ;;  %v5943_v40 = vrot.slane %v11381_v8, 5  ;;  %v11382_v0 = vld [vmem:[#allocation3 + $0xe4] sm:$0xf] }
 0x45c   :  { %v10079_v59 = vrot.slane %v11382_v0, 9 }
 0x45e   :  { %v5941_v24 = vsel %vm14323_vm4, %v10079_v59, %v5940_v6  ;;  %v16450_v59 = vld [vmem:[#allocation75_spill] sm:$0xff] }
 0x460   :  { %7885 = vmatmul.mubr.bf16.gmra.mrb[168].mxu1 %v14777_v21 }
 0x461   :  { %7892 = vmatprep.mubr.bf16.mxu1 %v14170_v9  ;;  %v5944_v9 = vsel %vm14323_vm4, %v5942_v47, %v5943_v40 }
 0x462   :  { %v15143_v53 = vcombine.low %v5941_v24, %v5944_v9  ;;  %v16456_v24 = vld [vmem:[#allocation82_spill] sm:$0xff] }
 0x468   :  { %7893 = vmatmul.mubr.bf16.gmra.mrb[172].mxu1 %v10110_v50 }
 0x469   :  { %7900 = vmatprep.mubr.bf16.mxu1 %v14195_v60  ;;  %v15135_v39 = vpop.f32.mrb[220].mxu0 }
 0x46a   :  { %16442 = vst [vmem:[#allocation141_spill] sm:$0xff] %v15135_v39  ;;  %v15137_v35 = vpop.f32.mrb[221].mxu0  ;;  %v16471_v39 = vld [vmem:[#allocation103_spill] sm:$0xff] }
 0x46b   :  { %16443 = vst [vmem:[#allocation142_spill] sm:$0xff] %v15137_v35  ;;  %v15141_v56 = vpop.f32.mrb[222].mxu0  ;;  %v16476_v35 = vld [vmem:[#allocation106_spill] sm:$0xff] }
 0x46c   :  { %16444 = vst [vmem:[#allocation143_spill] sm:$0xff] %v15141_v56  ;;  %v15145_v50 = vpop.f32.mrb[223].mxu0 }
 0x46d   :  { %16445 = vst [vmem:[#allocation144_spill] sm:$0xff] %v15145_v50 }
 0x470   :  { %7901 = vmatmul.mubr.bf16.gmra.mrb[176].mxu1 %v15143_v53 }
 0x471   :  { %7908 = vmatprep.mubr.bf16.mxu1 %v14235_v31 }
 0x477   :  { %v15150_v0 = vpop.f32.mrb[224].mxu0 }
 0x478   :  { %7909 = vmatmul.mubr.bf16.gmra.mrb[180].mxu1 %v14843_v23  ;;  %16446 = vst [vmem:[#allocation145_spill] sm:$0xff] %v15150_v0  ;;  %v15153_v8 = vpop.f32.mrb[225].mxu0 }
 0x479   :  { %7916 = vmatprep.mubr.bf16.mxu1 %v14301_v41  ;;  %16447 = vst [vmem:[#allocation146_spill] sm:$0xff] %v15153_v8  ;;  %v15155_v40 = vpop.f32.mrb[226].mxu0 }
 0x47a   :  { %16448 = vst [vmem:[#allocation147_spill] sm:$0xff] %v15155_v40  ;;  %v15157_v6 = vpop.f32.mrb[227].mxu0 }
 0x47b   :  { %16449 = vst [vmem:[#allocation148_spill] sm:$0xff] %v15157_v6 }
 0x480   :  { %7917 = vmatmul.mubr.bf16.gmra.mrb[184].mxu1 %v14865_v16 }
 0x481   :  { %7924 = vmatprep.mubr.bf16.mxu1 %v16450_v59 }
 0x487   :  { %v15162_v58 = vpop.f32.mrb[228].mxu0 }
 0x488   :  { %7925 = vmatmul.mubr.bf16.gmra.mrb[188].mxu1 %v14871_v38  ;;  %16451 = vst [vmem:[#allocation75_spill] sm:$0xff] %v15162_v58  ;;  %v15165_v12 = vpop.f32.mrb[229].mxu0  ;;  %v16461_v58 = vld [vmem:[#allocation88_spill] sm:$0xff] }
 0x489   :  { %7932 = vmatprep.mubr.bf16.mxu1 %v16452_v25  ;;  %16453 = vst [vmem:[#allocation78_spill] sm:$0xff] %v15165_v12  ;;  %v15167_v47 = vpop.f32.mrb[230].mxu0 }
 0x48a   :  { %16454 = vst [vmem:[#allocation149_spill] sm:$0xff] %v15167_v47  ;;  %v15169_v9 = vpop.f32.mrb[231].mxu0 }
 0x48b   :  { %16455 = vst [vmem:[#allocation150_spill] sm:$0xff] %v15169_v9  ;;  %v16464_v9 = vld [vmem:[#allocation95_spill] sm:$0xff] }
 0x490   :  { %7933 = vmatmul.mubr.bf16.gmra.mrb[64].mxu1 %v14888_v63 }
 0x491   :  { %7940 = vmatprep.mubr.bf16.mxu1 %v16456_v24  ;;  %v16526_v24 = vld [vmem:[#allocation73_spill] sm:$0xff] }
 0x493   :  { %v15173_v40 = vpop.f32.mrb[232].mxu0 }
 0x494   :  { %16457 = vst [vmem:[#allocation151_spill] sm:$0xff] %v15173_v40  ;;  %v15175_v0 = vpop.f32.mrb[233].mxu0 }
 0x495   :  { %16458 = vst [vmem:[#allocation152_spill] sm:$0xff] %v15175_v0  ;;  %v15177_v6 = vpop.f32.mrb[234].mxu0 }
 0x496   :  { %16459 = vst [vmem:[#allocation153_spill] sm:$0xff] %v15177_v6  ;;  %v15179_v8 = vpop.f32.mrb[235].mxu0  ;;  %v16467_v6 = vld [vmem:[#allocation96_spill] sm:$0xff] }
 0x497   :  { %16460 = vst [vmem:[#allocation154_spill] sm:$0xff] %v15179_v8 }
 0x498   :  { %7941 = vmatmul.mubr.bf16.gmra.mrb[68].mxu1 %v14900_v37 }
 0x499   :  { %7948 = vmatprep.mubr.bf16.mxu1 %v16461_v58 }
 0x49f   :  { %v15183_v12 = vpop.f32.mrb[236].mxu0 }
 0x4a0   :  { %16462 = vst [vmem:[#allocation155_spill] sm:$0xff] %v15183_v12  ;;  %7949 = vmatmul.mubr.bf16.gmra.mrb[72].mxu1 %v14934_v5  ;;  %v15186_v47 = vpop.f32.mrb[237].mxu0 }
 0x4a1   :  { %16463 = vst [vmem:[#allocation156_spill] sm:$0xff] %v15186_v47  ;;  %7956 = vmatprep.mubr.bf16.mxu1 %v16464_v9  ;;  %v15189_v56 = vpop.f32.mrb[238].mxu0 }
 0x4a2   :  { %16465 = vst [vmem:[#allocation157_spill] sm:$0xff] %v15189_v56  ;;  %v15191_v40 = vpop.f32.mrb[239].mxu0 }
 0x4a3   :  { %16466 = vst [vmem:[#allocation158_spill] sm:$0xff] %v15191_v40 }
 0x4a8   :  { %7957 = vmatmul.mubr.bf16.gmra.mrb[76].mxu1 %v14946_v4 }
 0x4a9   :  { %7964 = vmatprep.mubr.bf16.mxu1 %v16467_v6 }
 0x4af   :  { %v15195_v8 = vpop.f32.mrb[240].mxu0 }
 0x4b0   :  { %16468 = vst [vmem:[#allocation159_spill] sm:$0xff] %v15195_v8  ;;  %v15197_v0 = vpop.f32.mrb[241].mxu0  ;;  %7965 = vmatmul.mubr.bf16.gmra.mrb[80].mxu1 %v14517_v55 }
 0x4b1   :  { %16469 = vst [vmem:[#allocation160_spill] sm:$0xff] %v15197_v0  ;;  %v15200_v12 = vpop.f32.mrb[242].mxu0  ;;  %7972 = vmatprep.mubr.bf16.mxu1 %v16471_v39 }
 0x4b2   :  { %16470 = vst [vmem:[#allocation161_spill] sm:$0xff] %v15200_v12  ;;  %v15203_v47 = vpop.f32.mrb[243].mxu0 }
 0x4b3   :  { %16472 = vst [vmem:[#allocation162_spill] sm:$0xff] %v15203_v47  ;;  %v16481_v47 = vld [vmem:[#allocation112_spill] sm:$0xff] }
 0x4b7   :  { %v15205_v50 = vpop.f32.mrb[244].mxu0 }
 0x4b8   :  { %16473 = vst [vmem:[#allocation163_spill] sm:$0xff] %v15205_v50  ;;  %v15207_v56 = vpop.f32.mrb[245].mxu0  ;;  %7973 = vmatmul.mubr.bf16.gmra.mrb[84].mxu1 %v14974_v30 }
 0x4b9   :  { %16474 = vst [vmem:[#allocation164_spill] sm:$0xff] %v15207_v56  ;;  %v15210_v40 = vpop.f32.mrb[246].mxu0  ;;  %7980 = vmatprep.mubr.bf16.mxu1 %v16476_v35 }
 0x4ba   :  { %16475 = vst [vmem:[#allocation165_spill] sm:$0xff] %v15210_v40  ;;  %v15213_v8 = vpop.f32.mrb[247].mxu0 }
 0x4bb   :  { %16477 = vst [vmem:[#allocation166_spill] sm:$0xff] %v15213_v8  ;;  %v16486_v8 = vld [vmem:[#allocation118_spill] sm:$0xff] }
 0x4bf   :  { %v15215_v0 = vpop.f32.mrb[248].mxu0 }
 0x4c0   :  { %16478 = vst [vmem:[#allocation167_spill] sm:$0xff] %v15215_v0  ;;  %v15217_v6 = vpop.f32.mrb[249].mxu0  ;;  %7981 = vmatmul.mubr.bf16.gmra.mrb[88].mxu1 %v14645_v51 }
 0x4c1   :  { %16479 = vst [vmem:[#allocation168_spill] sm:$0xff] %v15217_v6  ;;  %v15220_v12 = vpop.f32.mrb[250].mxu0  ;;  %7988 = vmatprep.mubr.bf16.mxu1 %v16481_v47 }
 0x4c2   :  { %16480 = vst [vmem:[#allocation169_spill] sm:$0xff] %v15220_v12  ;;  %v15223_v50 = vpop.f32.mrb[251].mxu0 }
 0x4c3   :  { %16482 = vst [vmem:[#allocation170_spill] sm:$0xff] %v15223_v50  ;;  %v16491_v50 = vld [vmem:[#allocation122_spill] sm:$0xff] }
 0x4c7   :  { %v15225_v56 = vpop.f32.mrb[252].mxu0 }
 0x4c8   :  { %16483 = vst [vmem:[#allocation171_spill] sm:$0xff] %v15225_v56  ;;  %v15227_v39 = vpop.f32.mrb[253].mxu0  ;;  %7989 = vmatmul.mubr.bf16.gmra.mrb[92].mxu1 %v14912_v3 }
 0x4c9   :  { %16484 = vst [vmem:[#allocation172_spill] sm:$0xff] %v15227_v39  ;;  %v15230_v40 = vpop.f32.mrb[254].mxu0  ;;  %7996 = vmatprep.mubr.bf16.mxu1 %v16486_v8 }
 0x4ca   :  { %16485 = vst [vmem:[#allocation173_spill] sm:$0xff] %v15230_v40  ;;  %v15233_v0 = vpop.f32.mrb[255].mxu0  ;;  %v15249_v40 = vcombine.low %v15026_v62, %v14999_v61 }
 0x4cb   :  { %16487 = vst [vmem:[#allocation174_spill] sm:$0xff] %v15233_v0 }
 0x4cc   :  { %16494 = vst [vmem:[#allocation180_spill] sm:$0xff] %v15249_v40 }
 0x4cf   :  { %v15235_v6 = vpop.f32.mrb[0].mxu0 }
 0x4d0   :  { %16488 = vst [vmem:[#allocation175_spill] sm:$0xff] %v15235_v6  ;;  %v15237_v35 = vpop.f32.mrb[1].mxu0  ;;  %7997 = vmatmul.mubr.bf16.gmra.mrb[96].mxu1 %v14768_v2 }
 0x4d1   :  { %16489 = vst [vmem:[#allocation176_spill] sm:$0xff] %v15237_v35  ;;  %v15240_v12 = vpop.f32.mrb[2].mxu0  ;;  %8004 = vmatprep.mubr.bf16.mxu1 %v16491_v50 }
 0x4d2   :  { %16490 = vst [vmem:[#allocation177_spill] sm:$0xff] %v15240_v12  ;;  %v15243_v56 = vpop.f32.mrb[3].mxu0 }
 0x4d3   :  { %16492 = vst [vmem:[#allocation178_spill] sm:$0xff] %v15243_v56 }
 0x4d7   :  { %v15245_v39 = vpop.f32.mrb[4].mxu0 }
 0x4d8   :  { %16493 = vst [vmem:[#allocation179_spill] sm:$0xff] %v15245_v39  ;;  %v15251_v8 = vpop.f32.mrb[5].mxu0  ;;  %8005 = vmatmul.mubr.bf16.gmra.mrb[100].mxu1 %v15019_v22 }
 0x4d9   :  { %16495 = vst [vmem:[#allocation181_spill] sm:$0xff] %v15251_v8  ;;  %v15254_v6 = vpop.f32.mrb[6].mxu0  ;;  %8012 = vmatprep.mubr.bf16.mxu1 %v15249_v40 }
 0x4da   :  { %16496 = vst [vmem:[#allocation182_spill] sm:$0xff] %v15254_v6  ;;  %v15257_v35 = vpop.f32.mrb[7].mxu0  ;;  %v11283_v6 = vld [vmem:[%s16094_s2 + $0x180] sm:$0xff]  }
 0x4db   :  { %16497 = vst [vmem:[#allocation183_spill] sm:$0xff] %v15257_v35  ;;  %v16504_v35 = vld [vmem:[#allocation44_spill] sm:$0xff] }
 0x4df   :  { %v15259_v12 = vpop.f32.mrb[8].mxu0 }
 0x4e0   :  { %16498 = vst [vmem:[#allocation184_spill] sm:$0xff] %v15259_v12  ;;  %v15261_v0 = vpop.f32.mrb[9].mxu0  ;;  %8013 = vmatmul.mubr.bf16.gmra.mrb[104].mxu1 %v15043_v29 }
 0x4e1   :  { %16499 = vst [vmem:[#allocation185_spill] sm:$0xff] %v15261_v0  ;;  %v15264_v39 = vpop.f32.mrb[10].mxu0  ;;  %8053 = vmatprep.mubr.bf16.mxu1 %v14923_v42  ;;  %v11284_v42 = vld [vmem:[%s16094_s2 + $0x188] sm:$0xff]  }
 0x4e2   :  { %16500 = vst [vmem:[#allocation186_spill] sm:$0xff] %v15264_v39  ;;  %v15267_v56 = vpop.f32.mrb[11].mxu0  ;;  %v15382_v0 = vld [vmem:[#allocation3 + $0x1a8] sm:$0xf] }
 0x4e3   :  { %16501 = vst [vmem:[#allocation187_spill] sm:$0xff] %v15267_v56 }
 0x4e7   :  { %v15272_v8 = vpop.f32.mrb[12].mxu0 }
 0x4e8   :  { %16502 = vst [vmem:[#allocation188_spill] sm:$0xff] %v15272_v8  ;;  %v15274_v40 = vpop.f32.mrb[13].mxu0  ;;  %8054 = vmatmul.mubr.bf16.vlgmr.msra.gmra.mrb[108].mxu1 %v16504_v35  ;;  %v11285_v8 = vld [vmem:[%s16094_s2 + $0x190] sm:$0xff]   ;;  %v16507_v35 = vld [vmem:[#allocation46_spill] sm:$0xff] }
 0x4e9   :  { %16503 = vst [vmem:[#allocation189_spill] sm:$0xff] %v15274_v40  ;;  %v15277_v12 = vpop.f32.mrb[14].mxu0  ;;  %8311 = vmatpush1.bf16.msra.mxu1 %v11283_v6  ;;  %8061 = vmatprep.mubr.bf16.mxu1 %v14350_v49  ;;  %v11286_v49 = vld [vmem:[%s16094_s2 + $0x198] sm:$0xff]   ;;  %v11287_v6 = vld [vmem:[%s16094_s2 + $0x1a0] sm:$0xff]   ;;  %16524 = vst [vmem:[#allocation46_spill] sm:$0xff] %v15382_v0 }
 0x4ea   :  { %16505 = vst [vmem:[#allocation44_spill] sm:$0xff] %v15277_v12  ;;  %v15283_v39 = vpop.f32.mrb[15].mxu0  ;;  %8312 = vmatprep.subr.bf16.mxu1 %v16350_v33  ;;  %v16514_v12 = vld [vmem:[#allocation60_spill] sm:$0xff] }
 0x4eb   :  { %16506 = vst [vmem:[#allocation190_spill] sm:$0xff] %v15283_v39  ;;  %v11299_v39 = vld [vmem:[%s16095_s3] sm:$0xff]   ;;  %v16525_v40 = vld [vmem:[#allocation72_spill] sm:$0xff] }
 0x4ec   :  { %10578 = vmatprep.subr.bf16.mxu0 %v11299_v39 }
 0x4ed   :  { %8313 = vmatpush1.bf16.msra.mxu1 %v11284_v42  ;;  %v16508_v42 = vld [vmem:[#allocation48_spill] sm:$0xff]  ;;  %10579 = vmatpush3.bf16.msra.mxu0 %v11299_v39 }
 0x4ee   :  { %8314 = vmatprep.subr.bf16.mxu1 %v16350_v33  ;;  %v11301_v39 = vld [vmem:[%s16095_s3 + $0x10] sm:$0xff]  }
 0x4f0   :  { %8062 = vmatmul.mubr.bf16.gmra.mrb[112].mxu1 %v16507_v35 }
 0x4f1   :  { %8069 = vmatprep.mubr.bf16.mxu1 %v14391_v48  ;;  %8315 = vmatpush1.bf16.msra.mxu1 %v11285_v8  ;;  %v11288_v48 = vld [vmem:[%s16094_s2 + $0x1a8] sm:$0xff]   ;;  %v11289_v8 = vld [vmem:[%s16094_s2 + $0x1b0] sm:$0xff]  }
 0x4f2   :  { %8316 = vmatprep.subr.bf16.mxu1 %v16350_v33 }
 0x4f5   :  { %8317 = vmatpush1.bf16.msra.mxu1 %v11286_v49  ;;  %v16509_v49 = vld [vmem:[#allocation50_spill] sm:$0xff] }
 0x4f6   :  { %8318 = vmatprep.subr.bf16.mxu1 %v16350_v33 }
 0x4f8   :  { %8070 = vmatmul.mubr.bf16.gmra.mrb[116].mxu1 %v16508_v42 }
 0x4f9   :  { %8077 = vmatprep.mubr.bf16.mxu1 %v14420_v7  ;;  %8319 = vmatpush1.bf16.msra.mxu1 %v11287_v6  ;;  %v11290_v7 = vld [vmem:[%s16094_s2 + $0x1b8] sm:$0xff]   ;;  %v11291_v6 = vld [vmem:[%s16094_s2 + $0x1c0] sm:$0xff]  }
 0x4fa   :  { %8320 = vmatprep.subr.bf16.mxu1 %v16350_v33 }
 0x4fd   :  { %8321 = vmatpush1.bf16.msra.mxu1 %v11288_v48  ;;  %v16510_v48 = vld [vmem:[#allocation52_spill] sm:$0xff] }
 0x4fe   :  { %8322 = vmatprep.subr.bf16.mxu1 %v16350_v33 }
 0x500   :  { %8078 = vmatmul.mubr.bf16.gmra.mrb[120].mxu1 %v16509_v49 }
 0x501   :  { %8085 = vmatprep.mubr.bf16.mxu1 %v14461_v14  ;;  %8323 = vmatpush1.bf16.msra.mxu1 %v11289_v8  ;;  %v11292_v14 = vld [vmem:[%s16094_s2 + $0x1c8] sm:$0xff]   ;;  %v11293_v8 = vld [vmem:[%s16094_s2 + $0x1d0] sm:$0xff]  }
 0x502   :  { %8324 = vmatprep.subr.bf16.mxu1 %v16350_v33 }
 0x505   :  { %8325 = vmatpush1.bf16.msra.mxu1 %v11290_v7  ;;  %v16511_v7 = vld [vmem:[#allocation54_spill] sm:$0xff] }
 0x506   :  { %8326 = vmatprep.subr.bf16.mxu1 %v16350_v33 }
 0x508   :  { %8086 = vmatmul.mubr.bf16.gmra.mrb[124].mxu1 %v16510_v48 }
 0x509   :  { %8093 = vmatprep.mubr.bf16.mxu1 %v14488_v26  ;;  %8327 = vmatpush1.bf16.msra.mxu1 %v11291_v6  ;;  %v16512_v26 = vld [vmem:[#allocation56_spill] sm:$0xff]  ;;  %v11294_v6 = vld [vmem:[%s16094_s2 + $0x1d8] sm:$0xff]  }
 0x50a   :  { %8328 = vmatprep.subr.bf16.mxu1 %v16350_v33 }
 0x50d   :  { %8329 = vmatpush1.bf16.msra.mxu1 %v11292_v14  ;;  %v16513_v14 = vld [vmem:[#allocation58_spill] sm:$0xff] }
 0x50e   :  { %8330 = vmatprep.subr.bf16.mxu1 %v16350_v33 }
 0x510   :  { %8094 = vmatmul.mubr.bf16.gmra.mrb[128].mxu1 %v16511_v7 }
 0x511   :  { %8101 = vmatprep.mubr.bf16.mxu1 %v14548_v44  ;;  %8331 = vmatpush1.bf16.msra.mxu1 %v11293_v8  ;;  %v11295_v44 = vld [vmem:[%s16094_s2 + $0x1e0] sm:$0xff]  }
 0x512   :  { %8332 = vmatprep.subr.bf16.mxu1 %v16350_v33  ;;  %v16515_v8 = vld [vmem:[#allocation62_spill] sm:$0xff] }
 0x515   :  { %8333 = vmatpush1.bf16.msra.mxu1 %v11294_v6  ;;  %v16517_v6 = vld [vmem:[#allocation65_spill] sm:$0xff] }
 0x516   :  { %8334 = vmatprep.subr.bf16.mxu1 %v16350_v33 }
 0x518   :  { %8102 = vmatmul.mubr.bf16.gmra.mrb[132].mxu1 %v16512_v26 }
 0x519   :  { %8109 = vmatprep.mubr.bf16.mxu1 %v14573_v43  ;;  %8335 = vmatpush1.bf16.msra.mxu1 %v11295_v44  ;;  %v16516_v43 = vld [vmem:[#allocation64_spill] sm:$0xff]  ;;  %v16519_v44 = vld [vmem:[#allocation69_spill] sm:$0xff] }
 0x51a   :  { %8336 = vmatprep.subr.bf16.mxu1 %v16350_v33 }
 0x520   :  { %8110 = vmatmul.mubr.bf16.gmra.mrb[136].mxu1 %v16513_v14 }
 0x521   :  { %8117 = vmatprep.mubr.bf16.mxu1 %v14605_v57  ;;  %v11296_v57 = vld [vmem:[%s16094_s2 + $0x1e8] sm:$0xff]  }
 0x522   :  { %8337 = vmatpush1.bf16.msra.mxu1 %v11296_v57  ;;  %v16521_v57 = vld [vmem:[#allocation114_spill] sm:$0xff] }
 0x523   :  { %8338 = vmatprep.subr.bf16.mxu1 %v16350_v33 }
 0x528   :  { %8118 = vmatmul.mubr.bf16.gmra.mrb[140].mxu1 %v16514_v12 }
 0x529   :  { %8125 = vmatprep.mubr.bf16.mxu1 %v14627_v20  ;;  %v16518_v20 = vld [vmem:[#allocation67_spill] sm:$0xff] }
 0x530   :  { %8126 = vmatmul.mubr.bf16.gmra.mrb[144].mxu1 %v16515_v8 }
 0x531   :  { %8133 = vmatprep.mubr.bf16.mxu1 %v14676_v46  ;;  %v11297_v46 = vld [vmem:[%s16094_s2 + $0x1f0] sm:$0xff]  }
 0x532   :  { %8339 = vmatpush1.bf16.msra.mxu1 %v11297_v46  ;;  %v11302_v46 = vld [vmem:[%s16095_s3 + $0x18] sm:$0xff]  }
 0x533   :  { %8340 = vmatprep.subr.bf16.mxu1 %v16350_v33  ;;  %v11300_v33 = vld [vmem:[%s16095_s3 + $0x8] sm:$0xff]  }
 0x534   :  { %10580 = vmatprep.subr.bf16.mxu0 %v11300_v33 }
 0x535   :  { %10581 = vmatpush3.bf16.msra.mxu0 %v11300_v33 }
 0x536   :  { %10582 = vmatprep.subr.bf16.mxu0 %v11301_v39 }
 0x538   :  { %8134 = vmatmul.mubr.bf16.gmra.mrb[148].mxu1 %v16516_v43 }
 0x539   :  { %8141 = vmatprep.mubr.bf16.mxu1 %v14697_v17  ;;  %v16520_v17 = vld [vmem:[#allocation71_spill] sm:$0xff]  ;;  %10583 = vmatpush3.bf16.msra.mxu0 %v11301_v39 }
 0x53a   :  { %10584 = vmatprep.subr.bf16.mxu0 %v11302_v46 }
 0x53d   :  { %10585 = vmatpush3.bf16.msra.mxu0 %v11302_v46 }
 0x540   :  { %8142 = vmatmul.mubr.bf16.gmra.mrb[152].mxu1 %v16517_v6 }
 0x541   :  { %8149 = vmatprep.mubr.bf16.mxu1 %v14718_v54  ;;  %v11298_v54 = vld [vmem:[%s16094_s2 + $0x1f8] sm:$0xff]  }
 0x542   :  { %8341 = vmatpush1.bf16.msra.mxu1 %v11298_v54  ;;  %v11383_v54 = vld [vmem:[%s16092_s0 + $0x28] sm:$0x3] }
 0x548   :  { %8150 = vmatmul.mubr.bf16.gmra.mrb[156].mxu1 %v16518_v20 }
 0x549   :  { %8157 = vmatprep.mubr.bf16.mxu1 %v14737_v36  ;;  %v3347_v36 = vld [vmem:[#allocation3 + $0x1a4] sm:$0x1] }
 0x550   :  { %8158 = vmatmul.mubr.bf16.gmra.mrb[160].mxu1 %v16519_v44 }
 0x551   :  { %8165 = vmatprep.mubr.bf16.mxu1 %v14777_v21  ;;  %v3457_v21 = vld [vmem:[#allocation3 + $0x1ac] sm:$0x1] }
 0x552   :  { %v3458_v56 = vsel %vm13303_vm8, 0, %v3457_v21 }
 0x553   :  { %3459 = vst [vmem:[#allocation3 + $0x1ac] sm:$0x1] %v3458_v56  ;;  %v11384_v56 = vld [vmem:[%s16092_s0 + $0x18] sm:$0xff] }
 0x554   :  { %v8985_v33 = vrot.slane %v11384_v56, 1 }
 0x558   :  { %8166 = vmatmul.mubr.bf16.gmra.mrb[164].mxu1 %v16520_v17 }
 0x559   :  { %8173 = vmatprep.mubr.bf16.mxu1 %v16521_v57  ;;  %v3348_v57 = vsel %vm13294_vm6, 0, %v3347_v36  ;;  %v8988_v36 = vrot.slane %v11383_v54, 1 }
 0x55a   :  { %3349 = vst [vmem:[#allocation3 + $0x1a4] sm:$0x1] %v3348_v57  ;;  %v11385_v57 = vld [vmem:[%s16092_s0 + $0x20] sm:$0xff]  ;;  %v15404_v39 = vld [vmem:[#allocation3 + $0x1ac] sm:$0x1] }
 0x55b   :  { %v8986_v54 = vrot.slane %v11385_v57, 1 }
 0x55d   :  { %v8989_v47 = vsel %vm1026_vm2, %v8986_v54, %v8988_v36  ;;  %v11386_v36 = vld [vmem:[%s16092_s0 + $0x58] sm:$0x3] }
 0x55e   :  { %v8998_v46 = vrot.slane %v11386_v36, 1  ;;  %v11389_v36 = vld [vmem:[%s16092_s0 + $0x88] sm:$0x3] }
 0x560   :  { %8174 = vmatmul.mubr.bf16.gmra.mrb[168].mxu1 %v14979_v10 }
 0x561   :  { %8181 = vmatprep.mubr.bf16.mxu1 %v15143_v53  ;;  %v6534_v53 = vrot.slane %v15382_v0, 5  ;;  %v15402_v50 = vld [vmem:[#allocation3 + $0x1a4] sm:$0xf]  ;;  %v8987_v0 = vsel %vm1026_vm2, %v8985_v33, %v8986_v54  ;;  %v16529_v54 = vld [vmem:[#allocation8_spill] sm:$0xff] }
 0x562   :  { %v9209_v9 = vpack.c.bf16 %v8989_v47, %v8987_v0  ;;  %v16527_v33 = vld [vmem:[#allocation74_spill] sm:$0xff] }
 0x563   :  { %v6536_v21 = vrot.slane %v6534_v53, 4 }
 0x568   :  { %8182 = vmatmul.mubr.bf16.gmra.mrb[172].mxu1 %v16525_v40  ;;  %v6537_v40 = vrot.slane %v15404_v39, 5 }
 0x569   :  { %8189 = vmatprep.mubr.bf16.mxu1 %v14843_v23  ;;  %v10139_v23 = vrot.slane %v15402_v50, 9 }
 0x56a   :  { %v6538_v57 = vsel %vm14323_vm4, %v6536_v21, %v6537_v40  ;;  %v16531_v40 = vld [vmem:[#allocation77_spill] sm:$0xff] }
 0x56b   :  { %v6535_v56 = vsel %vm14323_vm4, %v10139_v23, %v6534_v53  ;;  %v16528_v53 = vld [vmem:[#allocation9_spill] sm:$0xff] }
 0x56c   :  { %v10141_v58 = vcombine.low %v6535_v56, %v6538_v57  ;;  %v16530_v1 = vpack.c.bf16 %v16528_v53, %v16529_v54  ;;  %v16533_v56 = vld [vmem:[#allocation10_spill] sm:$0xff]  ;;  %v9008_v53 = vrot.slane %v11389_v36, 1  ;;  %v16535_v54 = vld [vmem:[#allocation76_spill] sm:$0xff]  ;;  %v11393_v36 = vld [vmem:[%s16092_s0 + $0xa8] sm:$0xff] }
 0x56e   :  { %10575 = vmatmul.mubr.bf16.gmra.mrb[16].mxu0 %v10141_v58  ;;  %v11388_v58 = vld [vmem:[%s16092_s0 + $0x50] sm:$0xff] }
 0x56f   :  { %10586 = vmatprep.mubr.msk.bf16.mxu0 %vm415_vm1, %v9209_v9  ;;  %v8996_v47 = vrot.slane %v11388_v58, 1 }
 0x570   :  { %8190 = vmatmul.mubr.bf16.gmra.mrb[176].mxu1 %v16526_v24 }
 0x571   :  { %8197 = vmatprep.mubr.bf16.mxu1 %v14865_v16  ;;  %v11387_v16 = vld [vmem:[%s16092_s0 + $0x48] sm:$0xff]  ;;  %v8999_v21 = vsel %vm1026_vm2, %v8996_v47, %v8998_v46  ;;  %v11390_v46 = vld [vmem:[%s16092_s0 + $0x78] sm:$0xff] }
 0x572   :  { %v8995_v0 = vrot.slane %v11387_v16, 1  ;;  %v11391_v16 = vld [vmem:[%s16092_s0 + $0x80] sm:$0xff] }
 0x574   :  { %v8997_v9 = vsel %vm1026_vm2, %v8995_v0, %v8996_v47  ;;  %v9006_v0 = vrot.slane %v11391_v16, 1 }
 0x575   :  { %v9211_v23 = vpack.c.bf16 %v8999_v21, %v8997_v9  ;;  %v16536_v9 = vld [vmem:[#allocation13_spill] sm:$0xff]  ;;  %v16537_v21 = vld [vmem:[#allocation12_spill] sm:$0xff] }
 0x576   :  { %10587 = vmatmul.mubr.msk.bf16.vlgmr.msra.gmra.mrb[20].mxu0 %vm415_vm1, %v16530_v1  ;;  %v9005_v1 = vrot.slane %v11390_v46, 1  ;;  %v9009_v58 = vsel %vm1026_vm2, %v9006_v0, %v9008_v53  ;;  %v9015_v53 = vrot.slane %v11393_v36, 1  ;;  %v11394_v46 = vld [vmem:[%s16092_s0 + $0xb0] sm:$0xff]  ;;  %v11397_v36 = vld [vmem:[%s16092_s0 + $0xe0] sm:$0xff] }
 0x577   :  { %10590 = vmatprep.mubr.msk.bf16.mxu0 %vm415_vm1, %v9211_v23  ;;  %v16539_v23 = vld [vmem:[#allocation79_spill] sm:$0xff] }
 0x578   :  { %8198 = vmatmul.mubr.bf16.gmra.mrb[180].mxu1 %v16527_v33 }
 0x579   :  { %8205 = vmatprep.mubr.bf16.mxu1 %v14871_v38  ;;  %v16532_v38 = vld [vmem:[#allocation11_spill] sm:$0xff] }
 0x57a   :  { %v16534_v57 = vpack.c.bf16 %v16532_v38, %v16533_v56  ;;  %v11392_v38 = vld [vmem:[%s16092_s0 + $0xb8] sm:$0x3] }
 0x57b   :  { %v9018_v56 = vrot.slane %v11392_v38, 1  ;;  %v11396_v38 = vld [vmem:[%s16092_s0 + $0xd8] sm:$0xff] }
 0x57e   :  { %10591 = vmatmul.mubr.msk.bf16.gmra.mrb[24].mxu0 %vm415_vm1, %v16534_v57  ;;  %v16540_v57 = vld [vmem:[#allocation84_spill] sm:$0xff] }
 0x580   :  { %8206 = vmatmul.mubr.bf16.gmra.mrb[184].mxu1 %v16531_v40 }
 0x581   :  { %8213 = vmatprep.mubr.bf16.mxu1 %v14888_v63  ;;  %v9007_v63 = vsel %vm1026_vm2, %v9005_v1, %v9006_v0  ;;  %v9016_v1 = vrot.slane %v11394_v46, 1 }
 0x582   :  { %v9213_v47 = vpack.c.bf16 %v9009_v58, %v9007_v63  ;;  %v16541_v63 = vld [vmem:[#allocation15_spill] sm:$0xff]  ;;  %v16542_v58 = vld [vmem:[#allocation14_spill] sm:$0xff] }
 0x583   :  { %v9019_v16 = vsel %vm1026_vm2, %v9016_v1, %v9018_v56  ;;  %v9025_v56 = vrot.slane %v11396_v38, 1  ;;  %v11400_v38 = vld [vmem:[%s16092_s0 + $0x110] sm:$0xff] }
 0x584   :  { %10594 = vmatprep.mubr.msk.bf16.mxu0 %vm415_vm1, %v9213_v47  ;;  %v16544_v47 = vld [vmem:[#allocation90_spill] sm:$0xff] }
 0x588   :  { %8214 = vmatmul.mubr.bf16.gmra.mrb[188].mxu1 %v16535_v54 }
 0x589   :  { %8221 = vmatprep.mubr.bf16.mxu1 %v14900_v37  ;;  %v16538_v37 = vpack.c.bf16 %v16536_v9, %v16537_v21  ;;  %v11395_v9 = vld [vmem:[%s16092_s0 + $0xe8] sm:$0x3] }
 0x58a   :  { %v9028_v21 = vrot.slane %v11395_v9, 1  ;;  %v11399_v9 = vld [vmem:[%s16092_s0 + $0x108] sm:$0xff] }
 0x58b   :  { %10595 = vmatmul.mubr.msk.bf16.gmra.mrb[28].mxu0 %vm415_vm1, %v16538_v37  ;;  %v16545_v37 = vld [vmem:[#allocation93_spill] sm:$0xff] }
 0x590   :  { %8222 = vmatmul.mubr.bf16.gmra.mrb[64].mxu1 %v16539_v23 }
 0x591   :  { %8229 = vmatprep.mubr.bf16.mxu1 %v14934_v5  ;;  %v9017_v5 = vsel %vm1026_vm2, %v9015_v53, %v9016_v1  ;;  %v9026_v53 = vrot.slane %v11397_v36, 1 }
 0x592   :  { %v9215_v0 = vpack.c.bf16 %v9019_v16, %v9017_v5  ;;  %v16546_v5 = vld [vmem:[#allocation17_spill] sm:$0xff]  ;;  %v16547_v16 = vld [vmem:[#allocation16_spill] sm:$0xff] }
 0x593   :  { %v9029_v46 = vsel %vm1026_vm2, %v9026_v53, %v9028_v21  ;;  %v9035_v21 = vrot.slane %v11399_v9, 1  ;;  %v11403_v9 = vld [vmem:[%s16092_s0 + $0x140] sm:$0xff] }
 0x594   :  { %10598 = vmatprep.mubr.msk.bf16.mxu0 %vm415_vm1, %v9215_v0  ;;  %v16549_v0 = vld [vmem:[#allocation99_spill] sm:$0xff] }
 0x598   :  { %8230 = vmatmul.mubr.bf16.gmra.mrb[68].mxu1 %v16540_v57 }
 0x599   :  { %8237 = vmatprep.mubr.bf16.mxu1 %v14946_v4  ;;  %v16543_v4 = vpack.c.bf16 %v16541_v63, %v16542_v58  ;;  %v11398_v63 = vld [vmem:[%s16092_s0 + $0x118] sm:$0x3] }
 0x59a   :  { %v9038_v58 = vrot.slane %v11398_v63, 1  ;;  %v11402_v63 = vld [vmem:[%s16092_s0 + $0x138] sm:$0xff] }
 0x59b   :  { %10599 = vmatmul.mubr.msk.bf16.gmra.mrb[32].mxu0 %vm415_vm1, %v16543_v4  ;;  %v16550_v4 = vld [vmem:[#allocation102_spill] sm:$0xff] }
 0x5a0   :  { %8238 = vmatmul.mubr.bf16.gmra.mrb[72].mxu1 %v16544_v47 }
 0x5a1   :  { %8245 = vmatprep.mubr.bf16.mxu1 %v14517_v55  ;;  %v9027_v55 = vsel %vm1026_vm2, %v9025_v56, %v9026_v53  ;;  %v9036_v56 = vrot.slane %v11400_v38, 1  ;;  %v6285_v38 = vshrl.u32 %v14999_v61, 16 }
 0x5a2   :  { %v9217_v1 = vpack.c.bf16 %v9029_v46, %v9027_v55  ;;  %v16551_v55 = vld [vmem:[#allocation19_spill] sm:$0xff]  ;;  %v16552_v46 = vld [vmem:[#allocation18_spill] sm:$0xff] }
 0x5a3   :  { %v9039_v36 = vsel %vm1026_vm2, %v9036_v56, %v9038_v58  ;;  %v9045_v58 = vrot.slane %v11402_v63, 1 }
 0x5a4   :  { %10602 = vmatprep.mubr.msk.bf16.mxu0 %vm415_vm1, %v9217_v1  ;;  %v16554_v1 = vld [vmem:[#allocation108_spill] sm:$0xff] }
 0x5a8   :  { %8246 = vmatmul.mubr.bf16.gmra.mrb[76].mxu1 %v16545_v37 }
 0x5a9   :  { %8253 = vmatprep.mubr.bf16.mxu1 %v14974_v30  ;;  %v16548_v30 = vpack.c.bf16 %v16546_v5, %v16547_v16  ;;  %v11401_v5 = vld [vmem:[%s16092_s0 + $0x148] sm:$0x3] }
 0x5aa   :  { %v9048_v16 = vrot.slane %v11401_v5, 1  ;;  %v16557_v5 = vld [vmem:[#allocation20_spill] sm:$0xff] }
 0x5ab   :  { %10603 = vmatmul.mubr.msk.bf16.gmra.mrb[36].mxu0 %vm415_vm1, %v16548_v30  ;;  %v16555_v30 = vld [vmem:[#allocation113_spill] sm:$0xff] }
 0x5b0   :  { %8254 = vmatmul.mubr.bf16.gmra.mrb[80].mxu1 %v16549_v0 }
 0x5b1   :  { %8261 = vmatprep.mubr.bf16.mxu1 %v14645_v51  ;;  %v9037_v51 = vsel %vm1026_vm2, %v9035_v21, %v9036_v56  ;;  %v9046_v21 = vrot.slane %v11403_v9, 1  ;;  %v16559_v9 = vld [vmem:[#allocation117_spill] sm:$0xff] }
 0x5b2   :  { %v9219_v53 = vpack.c.bf16 %v9039_v36, %v9037_v51 }
 0x5b3   :  { %v9047_v56 = vsel %vm1026_vm2, %v9045_v58, %v9046_v21  ;;  %v9049_v51 = vsel %vm1026_vm2, %v9046_v21, %v9048_v16 }
 0x5b4   :  { %10606 = vmatprep.mubr.msk.bf16.mxu0 %vm415_vm1, %v9219_v53  ;;  %v9221_v36 = vpack.c.bf16 %v9049_v51, %v9047_v56  ;;  %v6275_v53 = vshll.u32 %v15026_v62, 16  ;;  %v6291_v56 = vshll.u32 %v15021_v11, 16  ;;  %v16560_v51 = vld [vmem:[#allocation121_spill] sm:$0xff] }
 0x5b6   :  { %v6277_v16 = vrot.slane %v6275_v53, 5  ;;  %v6293_v53 = vrot.slane %v6291_v56, 5 }
 0x5b8   :  { %8262 = vmatmul.mubr.bf16.gmra.mrb[84].mxu1 %v16550_v4 }
 0x5b9   :  { %8269 = vmatprep.mubr.bf16.mxu1 %v14912_v3  ;;  %v16553_v3 = vpack.c.bf16 %v16551_v55, %v16552_v46  ;;  %v6287_v46 = vrot.slane %v6285_v38, 4 }
 0x5bb   :  { %10607 = vmatmul.mubr.msk.bf16.gmra.mrb[40].mxu0 %vm415_vm1, %v16553_v3  ;;  %v16556_v3 = vld [vmem:[#allocation21_spill] sm:$0xff] }
 0x5bc   :  { %10610 = vmatprep.mubr.msk.bf16.mxu0 %vm415_vm1, %v9221_v36  ;;  %v16558_v63 = vpack.c.bf16 %v16556_v3, %v16557_v5  ;;  %v11405_v36 = vld [vmem:[%s16092_s0 + $0x168] sm:$0xff] }
 0x5bd   :  { %v9055_v3 = vrot.slane %v11405_v36, 1  ;;  %v16562_v36 = vld [vmem:[#allocation29_spill] sm:$0xff] }
 0x5c0   :  { %8270 = vmatmul.mubr.bf16.gmra.mrb[88].mxu1 %v16554_v1 }
 0x5c1   :  { %8277 = vmatprep.mubr.bf16.mxu1 %v14768_v2  ;;  %v6281_v2 = vshll.u32 %v14999_v61, 16 }
 0x5c3   :  { %v6283_v55 = vrot.slane %v6281_v2, 5  ;;  %10611 = vmatmul.mubr.msk.bf16.gmra.mrb[44].mxu0 %vm415_vm1, %v16558_v63 }
 0x5c5   :  { %v6288_v58 = vor.u32 %v6287_v46, %v6283_v55 }
 0x5c7   :  { %v6289_v38 = vrot.slane %v6288_v58, 4 }
 0x5c8   :  { %8278 = vmatmul.mubr.bf16.gmra.mrb[92].mxu1 %v16555_v30 }
 0x5c9   :  { %8285 = vmatprep.mubr.bf16.mxu1 %v15019_v22  ;;  %v6272_v22 = vshrl.u32 %v15026_v62, 16  ;;  %v11404_v62 = vld [vmem:[%s16092_s0 + $0x178] sm:$0x3]  ;;  %v6294_v63 = vsel %vm13522_vm15, %v6289_v38, %v6293_v53  ;;  %v16565_v53 = vld [vmem:[#allocation24_spill] sm:$0xff] }
 0x5ca   :  { %v9058_v2 = vrot.slane %v11404_v62, 1  ;;  %v16561_v62 = vld [vmem:[#allocation33_spill] sm:$0xff] }
 0x5cb   :  { %v6274_v61 = vrot.slane %v6272_v22, 4 }
 0x5cd   :  { %v6278_v21 = vor.u32 %v6277_v16, %v6274_v61 }
 0x5cf   :  { %v6279_v11 = vrot.slane %v6278_v21, 4  ;;  %v11407_v21 = vld [vmem:[%s16092_s0 + $0x1d8] sm:$0x3] }
 0x5d0   :  { %8286 = vmatmul.mubr.bf16.gmra.mrb[96].mxu1 %v16559_v9  ;;  %v9068_v56 = vrot.slane %v11407_v21, 1  ;;  %v16569_v21 = vld [vmem:[#allocation25_spill] sm:$0xff] }
 0x5d1   :  { %8293 = vmatprep.mubr.bf16.mxu1 %v15043_v29  ;;  %v11406_v29 = vld [vmem:[%s16092_s0 + $0x170] sm:$0xff]  ;;  %v6284_v16 = vsel %vm13522_vm15, %v6279_v11, %v6283_v55  ;;  %v11408_v55 = vld [vmem:[%s16092_s0 + $0x1c8] sm:$0xff] }
 0x5d2   :  { %v9056_v22 = vrot.slane %v11406_v29, 1  ;;  %v15564_v58 = vcombine.low %v6284_v16, %v6294_v63  ;;  %v9065_v38 = vrot.slane %v11408_v55, 1  ;;  %v11414_v55 = vld [vmem:[%s16092_s0 + $0x228] sm:$0xff] }
 0x5d4   :  { %v9057_v46 = vsel %vm1026_vm2, %v9055_v3, %v9056_v22  ;;  %v9059_v5 = vsel %vm1026_vm2, %v9056_v22, %v9058_v2  ;;  %v16564_v2 = vld [vmem:[#allocation45_spill] sm:$0xff]  ;;  %v11409_v3 = vld [vmem:[%s16092_s0 + $0x1d0] sm:$0xff] }
 0x5d5   :  { %v9223_v61 = vpack.c.bf16 %v9059_v5, %v9057_v46  ;;  %v9066_v29 = vrot.slane %v11409_v3, 1  ;;  %v16566_v46 = vld [vmem:[#allocation23_spill] sm:$0xff] }
 0x5d6   :  { %v11410_v5 = vld [vmem:[%s16092_s0 + $0x208] sm:$0x3] }
 0x5d7   :  { %10614 = vmatprep.mubr.msk.bf16.mxu0 %vm415_vm1, %v9223_v61  ;;  %v9069_v22 = vsel %vm1026_vm2, %v9066_v29, %v9068_v56  ;;  %v9078_v63 = vrot.slane %v11410_v5, 1  ;;  %v11411_v61 = vld [vmem:[%s16092_s0 + $0x1f8] sm:$0xff] }
 0x5d8   :  { %8294 = vmatmul.mubr.bf16.gmra.mrb[100].mxu1 %v16560_v51  ;;  %v9075_v16 = vrot.slane %v11411_v61, 1  ;;  %v11413_v56 = vld [vmem:[%s16092_s0 + $0x238] sm:$0x3] }
 0x5d9   :  { %8301 = vmatprep.mubr.bf16.mxu1 %v15048_v13  ;;  %v16563_v13 = vpack.c.bf16 %v16561_v62, %v16562_v36 }
 0x5db   :  { %10615 = vmatmul.mubr.msk.bf16.gmra.mrb[48].mxu0 %vm415_vm1, %v16563_v13 }
 0x5e0   :  { %8302 = vmatmul.mubr.bf16.gmra.mrb[104].mxu1 %v15564_v58 }
 0x5e1   :  { %8342 = vmatprep.mubr.bf16.mxu1 %v16507_v35  ;;  %v9067_v35 = vsel %vm1026_vm2, %v9065_v38, %v9066_v29  ;;  %v9085_v38 = vrot.slane %v11414_v55, 1 }
 0x5e2   :  { %v9225_v11 = vpack.c.bf16 %v9069_v22, %v9067_v35  ;;  %v16572_v22 = vld [vmem:[#allocation27_spill] sm:$0xff] }
 0x5e4   :  { %10618 = vmatprep.mubr.msk.bf16.mxu0 %vm415_vm1, %v9225_v11  ;;  %v11416_v11 = vld [vmem:[%s16092_s0 + $0x268] sm:$0x3] }
 0x5e8   :  { %8343 = vmatmul.mubr.bf16.vlgmr.msra.gmra.mrb[108].mxu1 %v16564_v2  ;;  %v9088_v2 = vrot.slane %v11413_v56, 1  ;;  %v16580_v56 = vld [vmem:[#allocation63_spill] sm:$0xff] }
 0x5e9   :  { %8350 = vmatprep.mubr.bf16.mxu1 %v16508_v42  ;;  %v16567_v42 = vpack.c.bf16 %v16565_v53, %v16566_v46  ;;  %v9098_v53 = vrot.slane %v11416_v11, 1  ;;  %v11417_v46 = vld [vmem:[%s16092_s0 + $0x258] sm:$0xff]  ;;  %v16585_v11 = vld [vmem:[#allocation66_spill] sm:$0xff] }
 0x5eb   :  { %10619 = vmatmul.mubr.msk.bf16.gmra.mrb[52].mxu0 %vm415_vm1, %v16567_v42  ;;  %v9095_v42 = vrot.slane %v11417_v46, 1 }
 0x5f0   :  { %8351 = vmatmul.mubr.bf16.gmra.mrb[112].mxu1 %v16407_v28  ;;  %v11412_v28 = vld [vmem:[%s16092_s0 + $0x200] sm:$0xff] }
 0x5f1   :  { %8358 = vmatprep.mubr.bf16.mxu1 %v16509_v49  ;;  %v9076_v62 = vrot.slane %v11412_v28, 1  ;;  %v11419_v28 = vld [vmem:[%s16092_s0 + $0x298] sm:$0x3] }
 0x5f3   :  { %v9077_v49 = vsel %vm1026_vm2, %v9075_v16, %v9076_v62  ;;  %v9079_v36 = vsel %vm1026_vm2, %v9076_v62, %v9078_v63  ;;  %v16575_v16 = vld [vmem:[#allocation30_spill] sm:$0xff]  ;;  %v9108_v62 = vrot.slane %v11419_v28, 1 }
 0x5f4   :  { %v9227_v13 = vpack.c.bf16 %v9079_v36, %v9077_v49  ;;  %v11420_v49 = vld [vmem:[%s16092_s0 + $0x288] sm:$0xff] }
 0x5f5   :  { %v9105_v36 = vrot.slane %v11420_v49, 1 }
 0x5f6   :  { %10622 = vmatprep.mubr.msk.bf16.mxu0 %vm415_vm1, %v9227_v13 }
 0x5f8   :  { %8359 = vmatmul.mubr.bf16.gmra.mrb[116].mxu1 %v16410_v52  ;;  %v16568_v52 = vld [vmem:[#allocation26_spill] sm:$0xff] }
 0x5f9   :  { %8366 = vmatprep.mubr.bf16.mxu1 %v16510_v48  ;;  %v16570_v48 = vpack.c.bf16 %v16568_v52, %v16569_v21 }
 0x5fb   :  { %10623 = vmatmul.mubr.msk.bf16.gmra.mrb[56].mxu0 %vm415_vm1, %v16570_v48  ;;  %v16578_v48 = vld [vmem:[#allocation34_spill] sm:$0xff] }
 0x600   :  { %8367 = vmatmul.mubr.bf16.gmra.mrb[120].mxu1 %v16411_v15  ;;  %v11415_v15 = vld [vmem:[%s16092_s0 + $0x230] sm:$0xff] }
 0x601   :  { %8374 = vmatprep.mubr.bf16.mxu1 %v16511_v7  ;;  %v9086_v3 = vrot.slane %v11415_v15, 1  ;;  %v11423_v15 = vld [vmem:[%s16092_s0 + $0x2b8] sm:$0xff] }
 0x603   :  { %v9087_v7 = vsel %vm1026_vm2, %v9085_v38, %v9086_v3  ;;  %v9089_v29 = vsel %vm1026_vm2, %v9086_v3, %v9088_v2  ;;  %v11422_v2 = vld [vmem:[%s16092_s0 + $0x2c8] sm:$0x3]  ;;  %v16581_v38 = vld [vmem:[#allocation42_spill] sm:$0xff]  ;;  %v9115_v3 = vrot.slane %v11423_v15, 1 }
 0x604   :  { %v9229_v35 = vpack.c.bf16 %v9089_v29, %v9087_v7  ;;  %v9118_v55 = vrot.slane %v11422_v2, 1  ;;  %v11424_v7 = vld [vmem:[%s16092_s0 + $0x2c0] sm:$0xff] }
 0x605   :  { %v9116_v29 = vrot.slane %v11424_v7, 1 }
 0x606   :  { %10626 = vmatprep.mubr.msk.bf16.mxu0 %vm415_vm1, %v9229_v35 }
 0x607   :  { %v9119_v35 = vsel %vm1026_vm2, %v9116_v29, %v9118_v55 }
 0x608   :  { %8375 = vmatmul.mubr.bf16.gmra.mrb[124].mxu1 %v16414_v19  ;;  %v16571_v19 = vld [vmem:[#allocation28_spill] sm:$0xff] }
 0x609   :  { %8382 = vmatprep.mubr.bf16.mxu1 %v16512_v26  ;;  %v16573_v26 = vpack.c.bf16 %v16571_v19, %v16572_v22  ;;  %v16582_v22 = vld [vmem:[#allocation39_spill] sm:$0xff] }
 0x60b   :  { %10627 = vmatmul.mubr.msk.bf16.gmra.mrb[60].mxu0 %vm415_vm1, %v16573_v26  ;;  %v16583_v26 = vld [vmem:[#allocation36_spill] sm:$0xff] }
 0x610   :  { %8383 = vmatmul.mubr.bf16.gmra.mrb[128].mxu1 %v16415_v34  ;;  %v11418_v34 = vld [vmem:[%s16092_s0 + $0x260] sm:$0xff] }
 0x611   :  { %8390 = vmatprep.mubr.bf16.mxu1 %v16513_v14  ;;  %v9096_v5 = vrot.slane %v11418_v34, 1  ;;  %v11426_v34 = vld [vmem:[#allocation3 + $0xd0] sm:$0xf] }
 0x613   :  { %v9097_v14 = vsel %vm1026_vm2, %v9095_v42, %v9096_v5  ;;  %v9099_v63 = vsel %vm1026_vm2, %v9096_v5, %v9098_v53  ;;  %v11425_v53 = vld [vmem:[#allocation3 + $0xcc] sm:$0xf]  ;;  %v6445_v5 = vshll.u32 %v11426_v34, 16 }
 0x614   :  { %v9231_v61 = vpack.c.bf16 %v9099_v63, %v9097_v14  ;;  %v6436_v46 = vshrl.u32 %v11425_v53, 16  ;;  %v6439_v42 = vshll.u32 %v11425_v53, 16  ;;  %v6449_v14 = vshrl.u32 %v11426_v34, 16 }
 0x615   :  { %v6447_v28 = vrot.slane %v6445_v5, 5 }
 0x616   :  { %10630 = vmatprep.mubr.msk.bf16.mxu0 %vm415_vm1, %v9231_v61 }
 0x618   :  { %8391 = vmatmul.mubr.bf16.gmra.mrb[132].mxu1 %v16418_v45  ;;  %v16574_v45 = vld [vmem:[#allocation31_spill] sm:$0xff] }
 0x619   :  { %8398 = vmatprep.mubr.bf16.mxu1 %v16514_v12  ;;  %v16576_v12 = vpack.c.bf16 %v16574_v45, %v16575_v16  ;;  %v6438_v16 = vrot.slane %v6436_v46, 4  ;;  %v16592_v46 = vld [vmem:[#allocation40_spill] sm:$0xff] }
 0x61b   :  { %10631 = vmatmul.mubr.msk.bf16.gmra.mrb[64].mxu0 %vm415_vm1, %v16576_v12  ;;  %v6441_v12 = vrot.slane %v6439_v42, 5 }
 0x620   :  { %8399 = vmatmul.mubr.bf16.gmra.mrb[136].mxu1 %v16421_v27  ;;  %v11421_v27 = vld [vmem:[%s16092_s0 + $0x290] sm:$0xff] }
 0x621   :  { %8406 = vmatprep.mubr.bf16.mxu1 %v16515_v8  ;;  %v9106_v13 = vrot.slane %v11421_v27, 1 }
 0x623   :  { %v9107_v8 = vsel %vm1026_vm2, %v9105_v36, %v9106_v13  ;;  %v9109_v52 = vsel %vm1026_vm2, %v9106_v13, %v9108_v62  ;;  %v6451_v62 = vrot.slane %v6449_v14, 4  ;;  %v16589_v36 = vld [vmem:[#allocation68_spill] sm:$0xff]  ;;  %v6442_v13 = vor.u32 %v6441_v12, %v6438_v16  ;;  %v16594_v16 = vld [vmem:[#allocation125_spill] sm:$0xff]  ;;  %v11431_v12 = vld [vmem:[%s16092_s0 + $0x328] sm:$0x3] }
 0x624   :  { %v9233_v21 = vpack.c.bf16 %v9109_v52, %v9107_v8 }
 0x625   :  { %v6452_v8 = vor.u32 %v6451_v62, %v6447_v28  ;;  %v6443_v2 = vrot.slane %v6442_v13, 4  ;;  %v10134_v62 = vcombine.low %v11425_v53, %v11426_v34  ;;  %v11433_v13 = vld [vmem:[%s16092_s0 + $0x320] sm:$0xff] }
 0x626   :  { %10634 = vmatprep.mubr.msk.bf16.mxu0 %vm415_vm1, %v9233_v21  ;;  %v11428_v21 = vld [vmem:[%s16092_s0 + $0x2f8] sm:$0x3] }
 0x627   :  { %v6453_v55 = vrot.slane %v6452_v8, 4  ;;  %v9136_v8 = vrot.slane %v11433_v13, 1 }
 0x628   :  { %8407 = vmatmul.mubr.bf16.gmra.mrb[140].mxu1 %v16424_v32  ;;  %v16577_v32 = vld [vmem:[#allocation35_spill] sm:$0xff] }
 0x629   :  { %8414 = vmatprep.mubr.bf16.mxu1 %v16516_v43  ;;  %v16579_v43 = vpack.c.bf16 %v16577_v32, %v16578_v48  ;;  %v9128_v32 = vrot.slane %v11428_v21, 1 }
 0x62b   :  { %10635 = vmatmul.mubr.msk.bf16.gmra.mrb[68].mxu0 %vm415_vm1, %v16579_v43 }
 0x630   :  { %8415 = vmatmul.mubr.bf16.gmra.mrb[144].mxu1 %v16580_v56 }
 0x631   :  { %8422 = vmatprep.mubr.bf16.mxu1 %v16517_v6  ;;  %v9117_v6 = vsel %vm1026_vm2, %v9115_v3, %v9116_v29  ;;  %v11430_v3 = vld [vmem:[%s16092_s0 + $0x2f0] sm:$0xff]  ;;  %v16590_v29 = vld [vmem:[#allocation70_spill] sm:$0xff] }
 0x632   :  { %v9235_v19 = vpack.c.bf16 %v9119_v35, %v9117_v6  ;;  %v9126_v7 = vrot.slane %v11430_v3, 1 }
 0x634   :  { %10638 = vmatprep.mubr.msk.bf16.mxu0 %vm415_vm1, %v9235_v19  ;;  %v9129_v35 = vsel %vm1026_vm2, %v9126_v7, %v9128_v32 }
 0x638   :  { %8423 = vmatmul.mubr.bf16.gmra.mrb[148].mxu1 %v16581_v38 }
 0x639   :  { %8430 = vmatprep.mubr.bf16.mxu1 %v16518_v20  ;;  %v16584_v20 = vpack.c.bf16 %v16582_v22, %v16583_v26  ;;  %v6448_v22 = vsel %vm13522_vm15, %v6443_v2, %v6447_v28  ;;  %v9138_v28 = vrot.slane %v11431_v12, 1  ;;  %v16595_v2 = vld [vmem:[#allocation38_spill] sm:$0xff]  ;;  %v16604_v12 = vld [vmem:[#allocation80_spill] sm:$0xff] }
 0x63b   :  { %10639 = vmatmul.mubr.msk.bf16.gmra.mrb[72].mxu0 %vm415_vm1, %v16584_v20  ;;  %v9139_v32 = vsel %vm1026_vm2, %v9136_v8, %v9138_v28 }
 0x640   :  { %8431 = vmatmul.mubr.bf16.gmra.mrb[152].mxu1 %v16585_v11  ;;  %v16591_v11 = vld [vmem:[#allocation41_spill] sm:$0xff] }
 0x641   :  { %8438 = vmatprep.mubr.bf16.mxu1 %v16519_v44  ;;  %v15692_v63 = vpop.f32.mrb[16].mxu0  ;;  %v11427_v44 = vld [vmem:[#allocation3 + $0xd4] sm:$0x1]  ;;  %v16593_v42 = vpack.c.bf16 %v16591_v11, %v16592_v46  ;;  %v16602_v46 = vld [vmem:[#allocation103_spill] sm:$0xff] }
 0x642   :  { %16586 = vst [vmem:[#allocation48_spill] sm:$0xff] %v15692_v63  ;;  %v15694_v61 = vpop.f32.mrb[17].mxu0  ;;  %v6455_v27 = vshll.u32 %v11427_v44, 16  ;;  %v11432_v44 = vld [vmem:[%s16092_s0 + $0x318] sm:$0xff] }
 0x643   :  { %v15696_v45 = vpop.f32.mrb[18].mxu0 }
 0x644   :  { %16587 = vst [vmem:[#allocation50_spill] sm:$0xff] %v15696_v45  ;;  %v15698_v49 = vpop.f32.mrb[19].mxu0  ;;  %v6457_v43 = vrot.slane %v6455_v27, 5  ;;  %v9135_v27 = vrot.slane %v11432_v44, 1 }
 0x645   :  { %16588 = vst [vmem:[#allocation52_spill] sm:$0xff] %v15698_v49 }
 0x646   :  { %v6458_v26 = vsel %vm13522_vm15, %v6453_v55, %v6457_v43  ;;  %v9137_v21 = vsel %vm1026_vm2, %v9135_v27, %v9136_v8  ;;  %v16596_v55 = vld [vmem:[#allocation32_spill] sm:$0xff]  ;;  %v16605_v27 = vld [vmem:[#allocation134_spill] sm:$0xff] }
 0x647   :  { %v10136_v14 = vcombine.low %v6448_v22, %v6458_v26  ;;  %v9239_v53 = vpack.c.bf16 %v9139_v32, %v9137_v21  ;;  %v16601_v26 = vld [vmem:[#allocation96_spill] sm:$0xff] }
 0x648   :  { %8439 = vmatmul.mubr.bf16.gmra.mrb[156].mxu1 %v16589_v36  ;;  %v16607_v32 = vld [vmem:[#allocation136_spill] sm:$0xff] }
 0x649   :  { %8446 = vmatprep.mubr.bf16.mxu1 %v16520_v17  ;;  %v15702_v52 = vpop.f32.mrb[20].mxu0  ;;  %v11429_v17 = vld [vmem:[%s16092_s0 + $0x2e8] sm:$0xff]  ;;  %s11460_s0 = smov [#allocation5]  }
 0x64a   :  { %v15707_v48 = vpop.f32.mrb[21].mxu0  ;;  %v9125_v15 = vrot.slane %v11429_v17, 1  ;;  %v16597_v17 = vpack.c.bf16 %v16595_v2, %v16596_v55  ;;  %v16608_v2 = vld [vmem:[#allocation112_spill] sm:$0xff]  ;;  %s9855_s6 = sshll.u32 %s11460_s0, 4  ;;  %s9856_s6 = int_to_ptr.vmem [resolvable:$true] %s9855_s6 }
 0x64b   :  { %v15709_v56 = vpop.f32.mrb[22].mxu0  ;;  %s11434_s7 = scalar_lea.vmem %s9856_s6, 8192  ;;  %p11439_p1 = scmp.lt.s32.totalorder %s9856_s6, %s9856_s6 }
 0x64c   :  { %v15711_v38 = vpop.f32.mrb[23].mxu0  ;;  %v9127_v6 = vsel %vm1026_vm2, %v9125_v15, %v9126_v7  ;;  %p11435_p0 = scmp.ne.s32.totalorder %s9856_s6, %s11434_s7  ;;  %p11440_p2 = scmp.lt.s32.totalorder %s11434_s7, %s11434_s7 }
 0x64d   :  { %v9237_v19 = vpack.c.bf16 %v9129_v35, %v9127_v6  ;;  %v16599_v35 = vld [vmem:[#allocation88_spill] sm:$0xff] }
 0x64e   :  { %p11441_p3 = por %p11440_p2, %p11439_p1 }
 0x64f   :  { %10642 = vmatprep.mubr.msk.bf16.mxu0 %vm415_vm1, %v9237_v19 }
 0x650   :  { %8447 = vmatmul.mubr.bf16.gmra.mrb[160].mxu1 %v16590_v29  ;;  %10643 = vmatmul.mubr.msk.bf16.gmra.mrb[76].mxu0 %vm415_vm1, %v16593_v42  ;;  %p11442_p4 = pnand %p11441_p3, %p11435_p0 }
 0x651   :  { %8454 = vmatprep.mubr.bf16.mxu1 %v14979_v10  ;;  %v15728_v20 = vpop.f32.mrb[24].mxu0  ;;  %10646 = vmatprep.mubr.msk.bf16.mxu0 %vm415_vm1, %v9239_v53 }
 0x652   :  { %v15734_v5 = vpop.f32.mrb[25].mxu0 }
 0x653   :  { %v15736_v10 = vpop.f32.mrb[26].mxu0 }
 0x654   :  { %v15742_v36 = vpop.f32.mrb[27].mxu0 }
 0x658   :  { %8455 = vmatmul.mubr.bf16.gmra.mrb[164].mxu1 %v16594_v16  ;;  %10647 = vmatmul.mubr.msk.bf16.gmra.mrb[80].mxu0 %vm415_vm1, %v16597_v17  ;;  %v6463_v17 = vshll.u32 %v15402_v50, 16 }
 0x659   :  { %8462 = vmatprep.mubr.bf16.mxu1 %v10136_v14  ;;  %v16603_v14 = vld [vmem:[#allocation106_spill] sm:$0xff] }
 0x65e   :  { %v15753_v34 = vpop.f32.mrb[28].mxu0 }
 0x65f   :  { %v15756_v43 = vpop.f32.mrb[29].mxu0 }
 0x660   :  { %8463 = vmatmul.mubr.bf16.gmra.mrb[168].mxu1 %v10134_v62  ;;  %v15762_v15 = vpop.f32.mrb[30].mxu0 }
 0x661   :  { %8470 = vmatprep.mubr.bf16.mxu1 %v16526_v24  ;;  %v15766_v3 = vpop.f32.mrb[31].mxu0 }
 0x668   :  { %8471 = vmatmul.mubr.bf16.gmra.mrb[172].mxu1 %v14195_v60 }
 0x669   :  { %8478 = vmatprep.mubr.bf16.mxu1 %v16527_v33 }
 0x66e   :  { %v15770_v24 = vpop.f32.mrb[32].mxu0 }
 0x66f   :  { %v15772_v7 = vpop.f32.mrb[33].mxu0 }
 0x670   :  { %8479 = vmatmul.mubr.bf16.gmra.mrb[176].mxu1 %v14235_v31  ;;  %v15774_v29 = vpop.f32.mrb[34].mxu0 }
 0x671   :  { %8486 = vmatprep.mubr.bf16.mxu1 %v16531_v40  ;;  %v15778_v6 = vpop.f32.mrb[35].mxu0 }
 0x678   :  { %8487 = vmatmul.mubr.bf16.gmra.mrb[180].mxu1 %v14301_v41  ;;  %v16598_v41 = vld [vmem:[#allocation82_spill] sm:$0xff] }
 0x679   :  { %8494 = vmatprep.mubr.bf16.mxu1 %v16535_v54 }
 0x67e   :  { %v15782_v60 = vpop.f32.mrb[36].mxu0 }
 0x67f   :  { %v15784_v31 = vpop.f32.mrb[37].mxu0 }
 0x680   :  { %8495 = vmatmul.mubr.bf16.gmra.mrb[184].mxu1 %v16450_v59  ;;  %v15786_v33 = vpop.f32.mrb[38].mxu0 }
 0x681   :  { %8502 = vmatprep.mubr.bf16.mxu1 %v16539_v23  ;;  %v15790_v40 = vpop.f32.mrb[39].mxu0 }
 0x688   :  { %8503 = vmatmul.mubr.bf16.gmra.mrb[188].mxu1 %v16452_v25  ;;  %v16600_v25 = vld [vmem:[#allocation95_spill] sm:$0xff] }
 0x689   :  { %8510 = vmatprep.mubr.bf16.mxu1 %v16540_v57 }
 0x68e   :  { %v15794_v54 = vpop.f32.mrb[40].mxu0 }
 0x68f   :  { %v15796_v59 = vpop.f32.mrb[41].mxu0 }
 0x690   :  { %8511 = vmatmul.mubr.bf16.gmra.mrb[64].mxu1 %v16598_v41  ;;  %v15798_v23 = vpop.f32.mrb[42].mxu0 }
 0x691   :  { %8518 = vmatprep.mubr.bf16.mxu1 %v16544_v47  ;;  %v15802_v19 = vpop.f32.mrb[43].mxu0 }
 0x696   :  { %v15806_v57 = vpop.f32.mrb[44].mxu0 }
 0x697   :  { %v15808_v22 = vpop.f32.mrb[45].mxu0 }
 0x698   :  { %8519 = vmatmul.mubr.bf16.gmra.mrb[68].mxu1 %v16599_v35  ;;  %v15810_v47 = vpop.f32.mrb[46].mxu0 }
 0x699   :  { %8526 = vmatprep.mubr.bf16.mxu1 %v16545_v37  ;;  %v15814_v11 = vpop.f32.mrb[47].mxu0 }
 0x6a0   :  { %8527 = vmatmul.mubr.bf16.gmra.mrb[72].mxu1 %v16600_v25  ;;  %v16609_v25 = vld [vmem:[#allocation46_spill] sm:$0xff] }
 0x6a1   :  { %8534 = vmatprep.mubr.bf16.mxu1 %v16549_v0 }
 0x6a8   :  { %8535 = vmatmul.mubr.bf16.gmra.mrb[76].mxu1 %v16601_v26  ;;  %v6469_v26 = vshll.u32 %v16609_v25, 16 }
 0x6a9   :  { %8542 = vmatprep.mubr.bf16.mxu1 %v16550_v4 }
 0x6ae   :  { %v15818_v37 = vpop.f32.mrb[48].mxu0 }
 0x6af   :  { %v15820_v42 = vpop.f32.mrb[49].mxu0 }
 0x6b0   :  { %8543 = vmatmul.mubr.bf16.gmra.mrb[80].mxu1 %v16602_v46  ;;  %v15822_v0 = vpop.f32.mrb[50].mxu0  ;;  %v6473_v46 = vshrl.u32 %v16609_v25, 16 }
 0x6b1   :  { %8550 = vmatprep.mubr.bf16.mxu1 %v16554_v1  ;;  %v15827_v62 = vpop.f32.mrb[51].mxu0  ;;  %v16606_v1 = vld [vmem:[#allocation81_spill] sm:$0xff] }
 0x6b2   :  { %v6475_v45 = vrot.slane %v6473_v46, 4 }
 0x6b8   :  { %8551 = vmatmul.mubr.bf16.gmra.mrb[84].mxu1 %v16603_v14 }
 0x6b9   :  { %8558 = vmatprep.mubr.bf16.mxu1 %v16555_v30  ;;  %v6460_v30 = vshrl.u32 %v15402_v50, 16 }
 0x6bb   :  { %v8344_v16 = vpop.f32.mrb[108].mxu1 }
 0x6bc   :  { %v10682_v28 = vadd.f32 %v8344_v16, %v16604_v12  ;;  %v8346_v4 = vpop.f32.mrb[109].mxu1 }
 0x6bd   :  { %v8347_v44 = vpop.f32.mrb[110].mxu1 }
 0x6be   :  { %v8634_v13 = vadd.f32 %v10682_v28, %v16605_v27  ;;  %v10683_v8 = vadd.f32 %v8347_v44, %v16606_v1  ;;  %v8349_v21 = vpop.f32.mrb[111].mxu1  ;;  %v15839_v14 = vpop.f32.mrb[52].mxu0  ;;  %v16610_v28 = vld [vmem:[#allocation83_spill] sm:$0xff]  ;;  %v6465_v1 = vrot.slane %v6463_v17, 5 }
 0x6bf   :  { %v15841_v12 = vpop.f32.mrb[53].mxu0 }
 0x6c0   :  { %v8637_v53 = vadd.f32 %v10683_v8, %v16607_v32  ;;  %8559 = vmatmul.mubr.bf16.gmra.mrb[88].mxu1 %v16608_v2  ;;  %v9658_v55 = vmul.f32 0.2, %v8634_v13  ;;  %v15845_v27 = vpop.f32.mrb[54].mxu0  ;;  %v16611_v8 = vld [vmem:[#allocation133_spill] sm:$0xff] }
 0x6c1   :  { %8566 = vmatprep.mubr.bf16.mxu1 %v16559_v9  ;;  %v16612_v32 = vld [vmem:[#allocation85_spill] sm:$0xff] }
 0x6c2   :  { %v9722_v41 = vadd.f32 %v9658_v55, %v15707_v48  ;;  %v9659_v35 = vmul.f32 0.2, %v8637_v53  ;;  %v6462_v48 = vrot.slane %v6460_v30, 4  ;;  %v6471_v55 = vrot.slane %v6469_v26, 5  ;;  %v16615_v26 = vld [vmem:[#allocation86_spill] sm:$0xff] }
 0x6c3   :  { %v8352_v16 = vpop.f32.mrb[112].mxu1 }
 0x6c4   :  { %9786 = vst [vmem:[#allocation5] sm:$0xff] %v9722_v41  ;;  %v10684_v4 = vadd.f32 %v8352_v16, %v16610_v28  ;;  %v9723_v9 = vadd.f32 %v9659_v35, %v15711_v38  ;;  %v8354_v44 = vpop.f32.mrb[113].mxu1  ;;  %v16613_v41 = vld [vmem:[#allocation135_spill] sm:$0xff]  ;;  %v16614_v16 = vld [vmem:[#allocation118_spill] sm:$0xff]  ;;  %v6479_v38 = vshll.u32 %v15404_v39, 16  ;;  %v6466_v35 = vor.u32 %v6465_v1, %v6462_v48 }
 0x6c5   :  { %v8355_v13 = vpop.f32.mrb[114].mxu1  ;;  %v6476_v28 = vor.u32 %v6475_v45, %v6471_v55  ;;  %v16617_v39 = vld [vmem:[#allocation87_spill] sm:$0xff]  ;;  %v16618_v45 = vld [vmem:[#allocation140_spill] sm:$0xff]  ;;  %v16619_v1 = vld [vmem:[#allocation122_spill] sm:$0xff] }
 0x6c6   :  { %v8642_v21 = vadd.f32 %v10684_v4, %v16611_v8  ;;  %9787 = vst [vmem:[#allocation5 + $0x8] sm:$0xff] %v9723_v9  ;;  %v10685_v53 = vadd.f32 %v8355_v13, %v16612_v32  ;;  %v8357_v2 = vpop.f32.mrb[115].mxu1  ;;  %v15856_v13 = vpop.f32.mrb[55].mxu0 }
 0x6c8   :  { %v9660_v63 = vmul.f32 0.2, %v8642_v21  ;;  %v8645_v49 = vadd.f32 %v10685_v53, %v16613_v41  ;;  %8567 = vmatmul.mubr.bf16.gmra.mrb[92].mxu1 %v16614_v16  ;;  %v6481_v21 = vrot.slane %v6479_v38, 5 }
 0x6c9   :  { %8574 = vmatprep.mubr.bf16.mxu1 %v16560_v51  ;;  %v16616_v51 = vld [vmem:[#allocation138_spill] sm:$0xff] }
 0x6ca   :  { %v9724_v30 = vadd.f32 %v15702_v52, %v9660_v63  ;;  %v9661_v17 = vmul.f32 0.2, %v8645_v49  ;;  %v6467_v49 = vrot.slane %v6466_v35, 4  ;;  %v6477_v52 = vrot.slane %v6476_v28, 4  ;;  %v16620_v28 = vld [vmem:[#allocation89_spill] sm:$0xff] }
 0x6cb   :  { %v8360_v4 = vpop.f32.mrb[116].mxu1 }
 0x6cc   :  { %9788 = vst [vmem:[#allocation5 + $0x10] sm:$0xff] %v9724_v30  ;;  %v9725_v9 = vadd.f32 %v15709_v56, %v9661_v17  ;;  %v10686_v46 = vadd.f32 %v8360_v4, %v16615_v26  ;;  %v8362_v44 = vpop.f32.mrb[117].mxu1  ;;  %v6472_v16 = vsel %vm13522_vm15, %v6467_v49, %v6471_v55  ;;  %v6482_v38 = vsel %vm13522_vm15, %v6477_v52, %v6481_v21 }
 0x6cd   :  { %v8363_v8 = vpop.f32.mrb[118].mxu1  ;;  %v16621_v44 = vld [vmem:[#allocation137_spill] sm:$0xff] }
 0x6ce   :  { %9789 = vst [vmem:[#allocation5 + $0x18] sm:$0xff] %v9725_v9  ;;  %v8650_v32 = vadd.f32 %v10686_v46, %v16616_v51  ;;  %v10687_v53 = vadd.f32 %v8363_v8, %v16617_v39  ;;  %v8365_v63 = vpop.f32.mrb[119].mxu1  ;;  %v15868_v30 = vpop.f32.mrb[56].mxu0  ;;  %v10137_v46 = vcombine.low %v6472_v16, %v6482_v38  ;;  %v16626_v16 = vld [vmem:[#allocation142_spill] sm:$0xff] }
 0x6cf   :  { %v15870_v35 = vpop.f32.mrb[57].mxu0 }
 0x6d0   :  { %v8653_v48 = vadd.f32 %v10687_v53, %v16618_v45  ;;  %8575 = vmatmul.mubr.bf16.gmra.mrb[96].mxu1 %v16619_v1  ;;  %v9662_v56 = vmul.f32 0.2, %v8650_v32  ;;  %v15874_v26 = vpop.f32.mrb[58].mxu0  ;;  %v16623_v32 = vld [vmem:[#allocation139_spill] sm:$0xff]  ;;  %v16624_v53 = vld [vmem:[#allocation180_spill] sm:$0xff] }
 0x6d1   :  { %8582 = vmatprep.mubr.bf16.mxu1 %v15564_v58  ;;  %v16625_v45 = vld [vmem:[#allocation92_spill] sm:$0xff] }
 0x6d2   :  { %v9726_v2 = vadd.f32 %v9662_v56, %v15734_v5  ;;  %v9663_v41 = vmul.f32 0.2, %v8653_v48  ;;  %v10135_v56 = vcombine.low %v15402_v50, %v16609_v25  ;;  %v16629_v25 = vld [vmem:[#allocation97_spill] sm:$0xff] }
 0x6d3   :  { %v8368_v17 = vpop.f32.mrb[120].mxu1 }
 0x6d4   :  { %9790 = vst [vmem:[#allocation5 + $0x20] sm:$0xff] %v9726_v2  ;;  %v10688_v4 = vadd.f32 %v8368_v17, %v16620_v28  ;;  %v9727_v9 = vadd.f32 %v9663_v41, %v15742_v36  ;;  %v8370_v58 = vpop.f32.mrb[121].mxu1  ;;  %v15885_v2 = vpop.f32.mrb[59].mxu0  ;;  %v16627_v17 = vld [vmem:[#allocation94_spill] sm:$0xff] }
 0x6d5   :  { %v8371_v5 = vpop.f32.mrb[122].mxu1 }
 0x6d6   :  { %v8658_v55 = vadd.f32 %v10688_v4, %v16621_v44  ;;  %9791 = vst [vmem:[#allocation5 + $0x28] sm:$0xff] %v9727_v9  ;;  %v10689_v8 = vadd.f32 %v8371_v5, %v16622_v18  ;;  %v8373_v21 = vpop.f32.mrb[123].mxu1  ;;  %v16628_v4 = vld [vmem:[#allocation144_spill] sm:$0xff] }
 0x6d8   :  { %v9664_v51 = vmul.f32 0.2, %v8658_v55  ;;  %v8661_v39 = vadd.f32 %v10689_v8, %v16623_v32  ;;  %8583 = vmatmul.mubr.bf16.gmra.mrb[100].mxu1 %v16624_v53  ;;  %v16630_v32 = vld [vmem:[#allocation141_spill] sm:$0xff]  ;;  %v16631_v53 = vld [vmem:[#allocation98_spill] sm:$0xff] }
 0x6d9   :  { %8590 = vmatprep.mubr.bf16.mxu1 %v10137_v46 }
 0x6da   :  { %v9728_v63 = vadd.f32 %v15728_v20, %v9664_v51  ;;  %v9665_v36 = vmul.f32 0.2, %v8661_v39 }
 0x6db   :  { %v8376_v49 = vpop.f32.mrb[124].mxu1 }
 0x6dc   :  { %9792 = vst [vmem:[#allocation5 + $0x30] sm:$0xff] %v9728_v63  ;;  %v9729_v52 = vadd.f32 %v15736_v10, %v9665_v36  ;;  %v10690_v48 = vadd.f32 %v8376_v49, %v16625_v45  ;;  %v8378_v1 = vpop.f32.mrb[125].mxu1  ;;  %v16632_v49 = vld [vmem:[#allocation143_spill] sm:$0xff] }
 0x6dd   :  { %v8379_v41 = vpop.f32.mrb[126].mxu1 }
 0x6de   :  { %9793 = vst [vmem:[#allocation5 + $0x38] sm:$0xff] %v9729_v52  ;;  %v8666_v38 = vadd.f32 %v10690_v48, %v16626_v16  ;;  %v10691_v28 = vadd.f32 %v8379_v41, %v16627_v17  ;;  %v8381_v20 = vpop.f32.mrb[127].mxu1  ;;  %v15891_v46 = vpop.f32.mrb[60].mxu0  ;;  %v16633_v41 = vld [vmem:[#allocation100_spill] sm:$0xff] }
 0x6df   :  { %v15893_v50 = vpop.f32.mrb[61].mxu0 }
 0x6e0   :  { %v8669_v9 = vadd.f32 %v10691_v28, %v16628_v4  ;;  %8591 = vmatmul.mubr.bf16.gmra.mrb[104].mxu1 %v10135_v56  ;;  %v9666_v58 = vmul.f32 0.2, %v8666_v38  ;;  %v15897_v21 = vpop.f32.mrb[62].mxu0  ;;  %v16634_v28 = vld [vmem:[#allocation146_spill] sm:$0xff]  ;;  %v16635_v4 = vld [vmem:[#allocation101_spill] sm:$0xff] }
 0x6e1   :  { %v15903_v1 = vpop.f32.mrb[63].mxu0 }
 0x6e2   :  { %v9730_v10 = vadd.f32 %v9666_v58, %v15756_v43  ;;  %v9667_v5 = vmul.f32 0.2, %v8669_v9 }
 0x6e3   :  { %v8384_v44 = vpop.f32.mrb[128].mxu1 }
 0x6e4   :  { %9794 = vst [vmem:[#allocation5 + $0x40] sm:$0xff] %v9730_v10  ;;  %v10692_v55 = vadd.f32 %v8384_v44, %v16629_v25  ;;  %v9731_v18 = vadd.f32 %v9667_v5, %v15766_v3  ;;  %v8386_v8 = vpop.f32.mrb[129].mxu1  ;;  %v16636_v10 = vld [vmem:[#allocation148_spill] sm:$0xff] }
 0x6e5   :  { %v8387_v51 = vpop.f32.mrb[130].mxu1  ;;  %v16637_v8 = vld [vmem:[#allocation104_spill] sm:$0xff] }
 0x6e6   :  { %v8674_v39 = vadd.f32 %v10692_v55, %v16630_v32  ;;  %9795 = vst [vmem:[#allocation5 + $0x48] sm:$0xff] %v9731_v18  ;;  %v10693_v43 = vadd.f32 %v8387_v51, %v16631_v53  ;;  %v8389_v63 = vpop.f32.mrb[131].mxu1 }
 0x6e8   :  { %v9668_v36 = vmul.f32 0.2, %v8674_v39  ;;  %v8677_v52 = vadd.f32 %v10693_v43, %v16632_v49 }
 0x6ea   :  { %v9732_v45 = vadd.f32 %v15753_v34, %v9668_v36  ;;  %v9669_v48 = vmul.f32 0.2, %v8677_v52  ;;  %v16638_v36 = vld [vmem:[#allocation145_spill] sm:$0xff] }
 0x6eb   :  { %v8392_v56 = vpop.f32.mrb[132].mxu1 }
 0x6ec   :  { %9796 = vst [vmem:[#allocation5 + $0x50] sm:$0xff] %v9732_v45  ;;  %v9733_v3 = vadd.f32 %v15762_v15, %v9669_v48  ;;  %v10694_v16 = vadd.f32 %v8392_v56, %v16633_v41  ;;  %v8394_v38 = vpop.f32.mrb[133].mxu1  ;;  %v16640_v56 = vld [vmem:[#allocation147_spill] sm:$0xff] }
 0x6ed   :  { %v8395_v17 = vpop.f32.mrb[134].mxu1 }
 0x6ee   :  { %9797 = vst [vmem:[#allocation5 + $0x58] sm:$0xff] %v9733_v3  ;;  %v8682_v20 = vadd.f32 %v10694_v16, %v16634_v28  ;;  %v10695_v9 = vadd.f32 %v8395_v17, %v16635_v4  ;;  %v8397_v58 = vpop.f32.mrb[135].mxu1  ;;  %v15911_v55 = vpop.f32.mrb[64].mxu0  ;;  %v16641_v17 = vld [vmem:[#allocation107_spill] sm:$0xff] }
 0x6ef   :  { %v15913_v15 = vpop.f32.mrb[65].mxu0 }
 0x6f0   :  { %v8685_v5 = vadd.f32 %v10695_v9, %v16636_v10  ;;  %v9670_v34 = vmul.f32 0.2, %v8682_v20  ;;  %v15917_v53 = vpop.f32.mrb[66].mxu0  ;;  %v16642_v9 = vld [vmem:[#allocation78_spill] sm:$0xff]  ;;  %v16643_v10 = vld [vmem:[#allocation109_spill] sm:$0xff] }
 0x6f1   :  { %v15919_v63 = vpop.f32.mrb[67].mxu0 }
 0x6f2   :  { %v9734_v44 = vadd.f32 %v9670_v34, %v15772_v7  ;;  %v9671_v25 = vmul.f32 0.2, %v8685_v5  ;;  %v16639_v7 = vld [vmem:[#allocation105_spill] sm:$0xff] }
 0x6f3   :  { %v8400_v18 = vpop.f32.mrb[136].mxu1 }
 0x6f4   :  { %9798 = vst [vmem:[#allocation5 + $0x60] sm:$0xff] %v9734_v44  ;;  %v10696_v51 = vadd.f32 %v8400_v18, %v16637_v8  ;;  %v9735_v32 = vadd.f32 %v9671_v25, %v15778_v6  ;;  %v8402_v39 = vpop.f32.mrb[137].mxu1  ;;  %v16644_v44 = vld [vmem:[#allocation150_spill] sm:$0xff] }
 0x6f5   :  { %v8403_v43 = vpop.f32.mrb[138].mxu1  ;;  %v16645_v39 = vld [vmem:[#allocation110_spill] sm:$0xff] }
 0x6f6   :  { %v8690_v49 = vadd.f32 %v10696_v51, %v16638_v36  ;;  %9799 = vst [vmem:[#allocation5 + $0x68] sm:$0xff] %v9735_v32  ;;  %v10697_v52 = vadd.f32 %v8403_v43, %v16639_v7  ;;  %v8405_v45 = vpop.f32.mrb[139].mxu1 }
 0x6f8   :  { %v9672_v48 = vmul.f32 0.2, %v8690_v49  ;;  %v8693_v3 = vadd.f32 %v10697_v52, %v16640_v56 }
 0x6fa   :  { %v9736_v41 = vadd.f32 %v15770_v24, %v9672_v48  ;;  %v9673_v16 = vmul.f32 0.2, %v8693_v3  ;;  %v16646_v48 = vld [vmem:[#allocation75_spill] sm:$0xff] }
 0x6fb   :  { %v8408_v38 = vpop.f32.mrb[140].mxu1 }
 0x6fc   :  { %9800 = vst [vmem:[#allocation5 + $0x70] sm:$0xff] %v9736_v41  ;;  %v9737_v6 = vadd.f32 %v15774_v29, %v9673_v16  ;;  %v10698_v28 = vadd.f32 %v8408_v38, %v16641_v17  ;;  %v8410_v20 = vpop.f32.mrb[141].mxu1  ;;  %v16648_v38 = vld [vmem:[#allocation149_spill] sm:$0xff] }
 0x6fd   :  { %v8411_v4 = vpop.f32.mrb[142].mxu1 }
 0x6fe   :  { %9801 = vst [vmem:[#allocation5 + $0x78] sm:$0xff] %v9737_v6  ;;  %v8698_v58 = vadd.f32 %v10698_v28, %v16642_v9  ;;  %v10699_v5 = vadd.f32 %v8411_v4, %v16643_v10  ;;  %v8413_v34 = vpop.f32.mrb[143].mxu1  ;;  %v15931_v51 = vpop.f32.mrb[68].mxu0  ;;  %v16649_v4 = vld [vmem:[#allocation115_spill] sm:$0xff] }
 0x6ff   :  { %v15933_v29 = vpop.f32.mrb[69].mxu0 }
 0x700   :  { %v8701_v25 = vadd.f32 %v10699_v5, %v16644_v44  ;;  %v9674_v18 = vmul.f32 0.2, %v8698_v58  ;;  %v15937_v7 = vpop.f32.mrb[70].mxu0  ;;  %v16650_v5 = vld [vmem:[#allocation152_spill] sm:$0xff] }
 0x701   :  { %v15939_v45 = vpop.f32.mrb[71].mxu0  ;;  %v16651_v44 = vld [vmem:[#allocation116_spill] sm:$0xff] }
 0x702   :  { %v9738_v24 = vadd.f32 %v9674_v18, %v15784_v31  ;;  %v9675_v8 = vmul.f32 0.2, %v8701_v25  ;;  %v16647_v31 = vld [vmem:[#allocation111_spill] sm:$0xff] }
 0x703   :  { %v8416_v32 = vpop.f32.mrb[144].mxu1 }
 0x704   :  { %9802 = vst [vmem:[#allocation5 + $0x80] sm:$0xff] %v9738_v24  ;;  %v10700_v43 = vadd.f32 %v8416_v32, %v16645_v39  ;;  %v9739_v36 = vadd.f32 %v9675_v8, %v15790_v40  ;;  %v8418_v49 = vpop.f32.mrb[145].mxu1  ;;  %v16652_v24 = vld [vmem:[#allocation154_spill] sm:$0xff] }
 0x705   :  { %v8419_v52 = vpop.f32.mrb[146].mxu1  ;;  %v16653_v49 = vld [vmem:[#allocation119_spill] sm:$0xff] }
 0x706   :  { %v8706_v56 = vadd.f32 %v10700_v43, %v16646_v48  ;;  %9803 = vst [vmem:[#allocation5 + $0x88] sm:$0xff] %v9739_v36  ;;  %v10701_v3 = vadd.f32 %v8419_v52, %v16647_v31  ;;  %v8421_v41 = vpop.f32.mrb[147].mxu1 }
 0x708   :  { %v9676_v16 = vmul.f32 0.2, %v8706_v56  ;;  %v8709_v6 = vadd.f32 %v10701_v3, %v16648_v38 }
 0x70a   :  { %v9740_v17 = vadd.f32 %v15782_v60, %v9676_v16  ;;  %v9677_v28 = vmul.f32 0.2, %v8709_v6  ;;  %v16654_v16 = vld [vmem:[#allocation151_spill] sm:$0xff] }
 0x70b   :  { %v8424_v20 = vpop.f32.mrb[148].mxu1 }
 0x70c   :  { %9804 = vst [vmem:[#allocation5 + $0x90] sm:$0xff] %v9740_v17  ;;  %v9741_v40 = vadd.f32 %v15786_v33, %v9677_v28  ;;  %v10702_v9 = vadd.f32 %v8424_v20, %v16649_v4  ;;  %v8426_v58 = vpop.f32.mrb[149].mxu1  ;;  %v16656_v20 = vld [vmem:[#allocation153_spill] sm:$0xff] }
 0x70d   :  { %v8427_v10 = vpop.f32.mrb[150].mxu1 }
 0x70e   :  { %9805 = vst [vmem:[#allocation5 + $0x98] sm:$0xff] %v9741_v40  ;;  %v8714_v34 = vadd.f32 %v10702_v9, %v16650_v5  ;;  %v10703_v25 = vadd.f32 %v8427_v10, %v16651_v44  ;;  %v8429_v18 = vpop.f32.mrb[151].mxu1  ;;  %v15951_v43 = vpop.f32.mrb[72].mxu0  ;;  %v16657_v10 = vld [vmem:[#allocation43_spill] sm:$0xff] }
 0x70f   :  { %v15953_v33 = vpop.f32.mrb[73].mxu0 }
 0x710   :  { %v8717_v8 = vadd.f32 %v10703_v25, %v16652_v24  ;;  %v9678_v32 = vmul.f32 0.2, %v8714_v34  ;;  %v15957_v31 = vpop.f32.mrb[74].mxu0  ;;  %v16658_v25 = vld [vmem:[#allocation156_spill] sm:$0xff]  ;;  %v16659_v24 = vld [vmem:[#allocation123_spill] sm:$0xff] }
 0x711   :  { %v15959_v41 = vpop.f32.mrb[75].mxu0 }
 0x712   :  { %v9742_v60 = vadd.f32 %v9678_v32, %v15796_v59  ;;  %v9679_v39 = vmul.f32 0.2, %v8717_v8  ;;  %v16655_v59 = vld [vmem:[#allocation120_spill] sm:$0xff] }
 0x713   :  { %v8432_v36 = vpop.f32.mrb[152].mxu1 }
 0x714   :  { %9806 = vst [vmem:[#allocation5 + $0xa0] sm:$0xff] %v9742_v60  ;;  %v10704_v52 = vadd.f32 %v8432_v36, %v16653_v49  ;;  %v9743_v48 = vadd.f32 %v9679_v39, %v15802_v19  ;;  %v8434_v56 = vpop.f32.mrb[153].mxu1  ;;  %v16660_v60 = vld [vmem:[#allocation158_spill] sm:$0xff] }
 0x715   :  { %v8435_v3 = vpop.f32.mrb[154].mxu1 }
 0x716   :  { %v8722_v38 = vadd.f32 %v10704_v52, %v16654_v16  ;;  %9807 = vst [vmem:[#allocation5 + $0xa8] sm:$0xff] %v9743_v48  ;;  %v10705_v6 = vadd.f32 %v8435_v3, %v16655_v59  ;;  %v8437_v17 = vpop.f32.mrb[155].mxu1  ;;  %v16661_v48 = vld [vmem:[#allocation124_spill] sm:$0xff] }
 0x718   :  { %v9680_v28 = vmul.f32 0.2, %v8722_v38  ;;  %v8725_v40 = vadd.f32 %v10705_v6, %v16656_v20  ;;  %v16662_v38 = vld [vmem:[#allocation155_spill] sm:$0xff]  ;;  %v16663_v6 = vld [vmem:[#allocation126_spill] sm:$0xff] }
 0x71a   :  { %v9744_v4 = vadd.f32 %v15794_v54, %v9680_v28  ;;  %v9681_v9 = vmul.f32 0.2, %v8725_v40 }
 0x71b   :  { %v8440_v58 = vpop.f32.mrb[156].mxu1 }
 0x71c   :  { %9808 = vst [vmem:[#allocation5 + $0xb0] sm:$0xff] %v9744_v4  ;;  %v9745_v19 = vadd.f32 %v15798_v23, %v9681_v9  ;;  %v10706_v5 = vadd.f32 %v8440_v58, %v16657_v10  ;;  %v8442_v34 = vpop.f32.mrb[157].mxu1  ;;  %v16664_v4 = vld [vmem:[#allocation157_spill] sm:$0xff] }
 0x71d   :  { %v8443_v44 = vpop.f32.mrb[158].mxu1 }
 0x71e   :  { %9809 = vst [vmem:[#allocation5 + $0xb8] sm:$0xff] %v9745_v19  ;;  %v8730_v18 = vadd.f32 %v10706_v5, %v16658_v25  ;;  %v10707_v8 = vadd.f32 %v8443_v44, %v16659_v24  ;;  %v8445_v32 = vpop.f32.mrb[159].mxu1  ;;  %v16665_v44 = vld [vmem:[#allocation47_spill] sm:$0xff] }
 0x720   :  { %v8733_v39 = vadd.f32 %v10707_v8, %v16660_v60  ;;  %v9682_v36 = vmul.f32 0.2, %v8730_v18  ;;  %v16666_v8 = vld [vmem:[#allocation160_spill] sm:$0xff]  ;;  %v16667_v60 = vld [vmem:[#allocation127_spill] sm:$0xff] }
 0x722   :  { %v9746_v54 = vadd.f32 %v9682_v36, %v15808_v22  ;;  %v9683_v49 = vmul.f32 0.2, %v8733_v39 }
 0x723   :  { %v8448_v52 = vpop.f32.mrb[160].mxu1  ;;  %v15975_v20 = vpop.f32.mrb[76].mxu0 }
 0x724   :  { %9810 = vst [vmem:[#allocation5 + $0xc0] sm:$0xff] %v9746_v54  ;;  %v10708_v23 = vadd.f32 %v8448_v52, %v16661_v48  ;;  %v9747_v56 = vadd.f32 %v9683_v49, %v15814_v11  ;;  %v8450_v3 = vpop.f32.mrb[161].mxu1  ;;  %v15978_v9 = vpop.f32.mrb[77].mxu0  ;;  %v16668_v54 = vld [vmem:[#allocation162_spill] sm:$0xff] }
 0x725   :  { %v8451_v16 = vpop.f32.mrb[162].mxu1  ;;  %v15980_v58 = vpop.f32.mrb[78].mxu0 }
 0x726   :  { %v8738_v59 = vadd.f32 %v10708_v23, %v16662_v38  ;;  %9811 = vst [vmem:[#allocation5 + $0xc8] sm:$0xff] %v9747_v56  ;;  %v10709_v17 = vadd.f32 %v8451_v16, %v16663_v6  ;;  %v8453_v28 = vpop.f32.mrb[163].mxu1  ;;  %v15983_v10 = vpop.f32.mrb[79].mxu0  ;;  %v16669_v56 = vld [vmem:[#allocation49_spill] sm:$0xff] }
 0x728   :  { %v9684_v40 = vmul.f32 0.2, %v8738_v59  ;;  %v8741_v22 = vadd.f32 %v10709_v17, %v16664_v4  ;;  %v16670_v59 = vld [vmem:[#allocation159_spill] sm:$0xff] }
 0x729   :  { %v16671_v17 = vld [vmem:[#allocation51_spill] sm:$0xff] }
 0x72a   :  { %v9748_v19 = vadd.f32 %v15806_v57, %v9684_v40  ;;  %v9685_v11 = vmul.f32 0.2, %v8741_v22 }
 0x72b   :  { %v8456_v5 = vpop.f32.mrb[164].mxu1  ;;  %v15995_v4 = vpop.f32.mrb[80].mxu0 }
 0x72c   :  { %9812 = vst [vmem:[#allocation5 + $0xd0] sm:$0xff] %v9748_v19  ;;  %v9749_v34 = vadd.f32 %v15810_v47, %v9685_v11  ;;  %v10710_v25 = vadd.f32 %v8456_v5, %v16665_v44  ;;  %v8458_v18 = vpop.f32.mrb[165].mxu1  ;;  %v16672_v19 = vld [vmem:[#allocation161_spill] sm:$0xff]  ;;  %v15998_v11 = vpop.f32.mrb[81].mxu0 }
 0x72d   :  { %v8459_v24 = vpop.f32.mrb[166].mxu1  ;;  %v16000_v5 = vpop.f32.mrb[82].mxu0 }
 0x72e   :  { %9813 = vst [vmem:[#allocation5 + $0xd8] sm:$0xff] %v9749_v34  ;;  %v8746_v32 = vadd.f32 %v10710_v25, %v16666_v8  ;;  %v10711_v39 = vadd.f32 %v8459_v24, %v16667_v60  ;;  %v8461_v36 = vpop.f32.mrb[167].mxu1  ;;  %v16003_v44 = vpop.f32.mrb[83].mxu0  ;;  %v16673_v24 = vld [vmem:[#allocation53_spill] sm:$0xff] }
 0x730   :  { %v8749_v49 = vadd.f32 %v10711_v39, %v16668_v54  ;;  %v9686_v57 = vmul.f32 0.2, %v8746_v32  ;;  %v16674_v39 = vld [vmem:[#allocation164_spill] sm:$0xff]  ;;  %v16675_v54 = vld [vmem:[#allocation55_spill] sm:$0xff] }
 0x732   :  { %v9750_v52 = vadd.f32 %v9686_v57, %v15820_v42  ;;  %v9687_v48 = vmul.f32 0.2, %v8749_v49 }
 0x733   :  { %v8464_v23 = vpop.f32.mrb[168].mxu1 }
 0x734   :  { %9814 = vst [vmem:[#allocation5 + $0xe0] sm:$0xff] %v9750_v52  ;;  %v10712_v47 = vadd.f32 %v8464_v23, %v16669_v56  ;;  %v9751_v3 = vadd.f32 %v9687_v48, %v15827_v62  ;;  %v8466_v16 = vpop.f32.mrb[169].mxu1  ;;  %v16676_v52 = vld [vmem:[#allocation166_spill] sm:$0xff] }
 0x735   :  { %v8467_v38 = vpop.f32.mrb[170].mxu1 }
 0x736   :  { %v8754_v6 = vadd.f32 %v10712_v47, %v16670_v59  ;;  %9815 = vst [vmem:[#allocation5 + $0xe8] sm:$0xff] %v9751_v3  ;;  %v10713_v28 = vadd.f32 %v8467_v38, %v16671_v17  ;;  %v8469_v40 = vpop.f32.mrb[171].mxu1  ;;  %v16677_v3 = vld [vmem:[#allocation57_spill] sm:$0xff] }
 0x738   :  { %v9688_v22 = vmul.f32 0.2, %v8754_v6  ;;  %v8757_v42 = vadd.f32 %v10713_v28, %v16672_v19  ;;  %v16678_v6 = vld [vmem:[#allocation163_spill] sm:$0xff]  ;;  %v16679_v28 = vld [vmem:[#allocation128_spill] sm:$0xff] }
 0x73a   :  { %v9752_v34 = vadd.f32 %v15818_v37, %v9688_v22  ;;  %v9689_v62 = vmul.f32 0.2, %v8757_v42  ;;  %v16680_v42 = vld [vmem:[#allocation165_spill] sm:$0xff] }
 0x73b   :  { %v8472_v25 = vpop.f32.mrb[172].mxu1 }
 0x73c   :  { %9816 = vst [vmem:[#allocation5 + $0xf0] sm:$0xff] %v9752_v34  ;;  %v9753_v18 = vadd.f32 %v15822_v0, %v9689_v62  ;;  %v10714_v8 = vadd.f32 %v8472_v25, %v16673_v24  ;;  %v8474_v32 = vpop.f32.mrb[173].mxu1  ;;  %v16681_v24 = vld [vmem:[#allocation59_spill] sm:$0xff] }
 0x73d   :  { %v8475_v60 = vpop.f32.mrb[174].mxu1 }
 0x73e   :  { %9817 = vst [vmem:[#allocation5 + $0xf8] sm:$0xff] %v9753_v18  ;;  %v8762_v36 = vadd.f32 %v10714_v8, %v16674_v39  ;;  %v10715_v49 = vadd.f32 %v8475_v60, %v16675_v54  ;;  %v8477_v57 = vpop.f32.mrb[175].mxu1  ;;  %v16682_v60 = vld [vmem:[#allocation168_spill] sm:$0xff] }
 0x73f   :  { %v16684_v57 = vld [vmem:[#allocation170_spill] sm:$0xff] }
 0x740   :  { %v8765_v48 = vadd.f32 %v10715_v49, %v16676_v52  ;;  %v9690_v37 = vmul.f32 0.2, %v8762_v36  ;;  %v16683_v36 = vld [vmem:[#allocation129_spill] sm:$0xff] }
 0x742   :  { %v9754_v23 = vadd.f32 %v9690_v37, %v15841_v12  ;;  %v9691_v56 = vmul.f32 0.2, %v8765_v48 }
 0x743   :  { %v8480_v47 = vpop.f32.mrb[176].mxu1 }
 0x744   :  { %9818 = vst [vmem:[#allocation5 + $0x100] sm:$0xff] %v9754_v23  ;;  %v10716_v0 = vadd.f32 %v8480_v47, %v16677_v3  ;;  %v9755_v16 = vadd.f32 %v9691_v56, %v15856_v13  ;;  %v8482_v38 = vpop.f32.mrb[177].mxu1  ;;  %v16685_v56 = vld [vmem:[#allocation61_spill] sm:$0xff] }
 0x745   :  { %v8483_v59 = vpop.f32.mrb[178].mxu1 }
 0x746   :  { %v8770_v17 = vadd.f32 %v10716_v0, %v16678_v6  ;;  %9819 = vst [vmem:[#allocation5 + $0x108] sm:$0xff] %v9755_v16  ;;  %v10717_v40 = vadd.f32 %v8483_v59, %v16679_v28  ;;  %v8485_v22 = vpop.f32.mrb[179].mxu1  ;;  %v16686_v16 = vld [vmem:[#allocation167_spill] sm:$0xff]  ;;  %v16687_v59 = vld [vmem:[#allocation130_spill] sm:$0xff] }
 0x748   :  { %v9692_v19 = vmul.f32 0.2, %v8770_v17  ;;  %v8773_v34 = vadd.f32 %v10717_v40, %v16680_v42  ;;  %v16688_v40 = vld [vmem:[#allocation169_spill] sm:$0xff] }
 0x74a   :  { %v9756_v12 = vadd.f32 %v15839_v14, %v9692_v19  ;;  %v9693_v62 = vmul.f32 0.2, %v8773_v34 }
 0x74b   :  { %v8488_v25 = vpop.f32.mrb[180].mxu1 }
 0x74c   :  { %9820 = vst [vmem:[#allocation5 + $0x110] sm:$0xff] %v9756_v12  ;;  %v9757_v18 = vadd.f32 %v15845_v27, %v9693_v62  ;;  %v10718_v13 = vadd.f32 %v8488_v25, %v16681_v24  ;;  %v8490_v8 = vpop.f32.mrb[181].mxu1  ;;  %v16689_v12 = vld [vmem:[#allocation131_spill] sm:$0xff] }
 0x74d   :  { %v8491_v32 = vpop.f32.mrb[182].mxu1 }
 0x74e   :  { %9821 = vst [vmem:[#allocation5 + $0x118] sm:$0xff] %v9757_v18  ;;  %v8778_v39 = vadd.f32 %v10718_v13, %v16682_v60  ;;  %v10719_v54 = vadd.f32 %v8491_v32, %v16683_v36  ;;  %v8493_v49 = vpop.f32.mrb[183].mxu1  ;;  %v16690_v18 = vld [vmem:[#allocation172_spill] sm:$0xff]  ;;  %v16692_v60 = vld [vmem:[#allocation174_spill] sm:$0xff] }
 0x74f   :  { %v16691_v13 = vld [vmem:[#allocation132_spill] sm:$0xff] }
 0x750   :  { %v8781_v52 = vadd.f32 %v10719_v54, %v16684_v57  ;;  %v9694_v48 = vmul.f32 0.2, %v8778_v39  ;;  %v16693_v57 = vld [vmem:[#allocation171_spill] sm:$0xff] }
 0x752   :  { %v9758_v14 = vadd.f32 %v9694_v48, %v15870_v35  ;;  %v9695_v37 = vmul.f32 0.2, %v8781_v52 }
 0x753   :  { %v8496_v23 = vpop.f32.mrb[184].mxu1 }
 0x754   :  { %9822 = vst [vmem:[#allocation5 + $0x120] sm:$0xff] %v9758_v14  ;;  %v10720_v27 = vadd.f32 %v8496_v23, %v16685_v56  ;;  %v9759_v47 = vadd.f32 %v9695_v37, %v15885_v2  ;;  %v8498_v3 = vpop.f32.mrb[185].mxu1  ;;  %v16694_v23 = vld [vmem:[#allocation173_spill] sm:$0xff] }
 0x755   :  { %v8499_v0 = vpop.f32.mrb[186].mxu1 }
 0x756   :  { %v8786_v38 = vadd.f32 %v10720_v27, %v16686_v16  ;;  %9823 = vst [vmem:[#allocation5 + $0x128] sm:$0xff] %v9759_v47  ;;  %v10721_v6 = vadd.f32 %v8499_v0, %v16687_v59  ;;  %v8501_v17 = vpop.f32.mrb[187].mxu1  ;;  %v16695_v16 = vld [vmem:[#allocation176_spill] sm:$0xff] }
 0x757   :  { %v16696_v17 = vld [vmem:[#allocation178_spill] sm:$0xff] }
 0x758   :  { %v9696_v28 = vmul.f32 0.2, %v8786_v38  ;;  %v8789_v22 = vadd.f32 %v10721_v6, %v16688_v40 }
 0x75a   :  { %v9760_v35 = vadd.f32 %v15868_v30, %v9696_v28  ;;  %v9697_v19 = vmul.f32 0.2, %v8789_v22 }
 0x75b   :  { %v8504_v42 = vpop.f32.mrb[188].mxu1 }
 0x75c   :  { %9824 = vst [vmem:[#allocation5 + $0x130] sm:$0xff] %v9760_v35  ;;  %v9761_v34 = vadd.f32 %v15874_v26, %v9697_v19  ;;  %v10722_v2 = vadd.f32 %v8504_v42, %v16689_v12  ;;  %v8506_v62 = vpop.f32.mrb[189].mxu1  ;;  %v16697_v42 = vld [vmem:[#allocation175_spill] sm:$0xff] }
 0x75d   :  { %v8507_v25 = vpop.f32.mrb[190].mxu1  ;;  %v16698_v62 = vld [vmem:[#allocation177_spill] sm:$0xff] }
 0x75e   :  { %9825 = vst [vmem:[#allocation5 + $0x138] sm:$0xff] %v9761_v34  ;;  %v8794_v24 = vadd.f32 %v10722_v2, %v16690_v18  ;;  %v10723_v8 = vadd.f32 %v8507_v25, %v16691_v13  ;;  %v8509_v32 = vpop.f32.mrb[191].mxu1 }
 0x75f   :  { %v16699_v32 = vld [vmem:[#allocation181_spill] sm:$0xff] }
 0x760   :  { %v8797_v39 = vadd.f32 %v10723_v8, %v16692_v60  ;;  %v9698_v36 = vmul.f32 0.2, %v8794_v24 }
 0x762   :  { %v9762_v30 = vadd.f32 %v9698_v36, %v15893_v50  ;;  %v9699_v54 = vmul.f32 0.2, %v8797_v39 }
 0x763   :  { %v8512_v49 = vpop.f32.mrb[64].mxu1 }
 0x764   :  { %9826 = vst [vmem:[#allocation5 + $0x140] sm:$0xff] %v9762_v30  ;;  %v8802_v26 = vadd.f32 %v16693_v57, %v8512_v49  ;;  %v9763_v52 = vadd.f32 %v9699_v54, %v15903_v1  ;;  %v8514_v48 = vpop.f32.mrb[65].mxu1  ;;  %v16700_v30 = vld [vmem:[#allocation183_spill] sm:$0xff] }
 0x765   :  { %v8515_v14 = vpop.f32.mrb[66].mxu1  ;;  %v16701_v48 = vld [vmem:[#allocation179_spill] sm:$0xff] }
 0x766   :  { %v9700_v37 = vmul.f32 0.2, %v8802_v26  ;;  %9827 = vst [vmem:[#allocation5 + $0x148] sm:$0xff] %v9763_v52  ;;  %v8805_v56 = vadd.f32 %v16694_v23, %v8515_v14  ;;  %v8517_v27 = vpop.f32.mrb[67].mxu1 }
 0x768   :  { %v9764_v47 = vadd.f32 %v15891_v46, %v9700_v37  ;;  %v9701_v3 = vmul.f32 0.2, %v8805_v56  ;;  %v16702_v56 = vld [vmem:[#allocation182_spill] sm:$0xff] }
 0x76a   :  { %9828 = vst [vmem:[#allocation5 + $0x150] sm:$0xff] %v9764_v47  ;;  %v9765_v50 = vadd.f32 %v15897_v21, %v9701_v3 }
 0x76b   :  { %v8520_v0 = vpop.f32.mrb[68].mxu1 }
 0x76c   :  { %9829 = vst [vmem:[#allocation5 + $0x158] sm:$0xff] %v9765_v50  ;;  %v8810_v38 = vadd.f32 %v16695_v16, %v8520_v0  ;;  %v8522_v59 = vpop.f32.mrb[69].mxu1  ;;  %v16703_v16 = vld [vmem:[#allocation185_spill] sm:$0xff] }
 0x76d   :  { %v8523_v6 = vpop.f32.mrb[70].mxu1 }
 0x76e   :  { %v9702_v1 = vmul.f32 0.2, %v8810_v38  ;;  %v8813_v28 = vadd.f32 %v16696_v17, %v8523_v6  ;;  %v8525_v40 = vpop.f32.mrb[71].mxu1 }
 0x770   :  { %v9703_v22 = vmul.f32 0.2, %v8813_v28  ;;  %v9766_v35 = vadd.f32 %v9702_v1, %v15913_v15  ;;  %v16704_v1 = vld [vmem:[#allocation187_spill] sm:$0xff] }
 0x772   :  { %9830 = vst [vmem:[#allocation5 + $0x160] sm:$0xff] %v9766_v35  ;;  %v9767_v46 = vadd.f32 %v9703_v22, %v15919_v63 }
 0x773   :  { %v8528_v19 = vpop.f32.mrb[72].mxu1 }
 0x774   :  { %9831 = vst [vmem:[#allocation5 + $0x168] sm:$0xff] %v9767_v46  ;;  %v8818_v21 = vadd.f32 %v16697_v42, %v8528_v19  ;;  %v8530_v34 = vpop.f32.mrb[73].mxu1  ;;  %v16705_v46 = vld [vmem:[#allocation184_spill] sm:$0xff] }
 0x775   :  { %v8531_v12 = vpop.f32.mrb[74].mxu1  ;;  %v16706_v34 = vld [vmem:[#allocation186_spill] sm:$0xff] }
 0x776   :  { %v9704_v2 = vmul.f32 0.2, %v8818_v21  ;;  %v8821_v25 = vadd.f32 %v16698_v62, %v8531_v12  ;;  %v8533_v18 = vpop.f32.mrb[75].mxu1 }
 0x778   :  { %v9768_v24 = vadd.f32 %v15911_v55, %v9704_v2  ;;  %v9705_v13 = vmul.f32 0.2, %v8821_v25 }
 0x77a   :  { %9832 = vst [vmem:[#allocation5 + $0x170] sm:$0xff] %v9768_v24  ;;  %v9769_v8 = vadd.f32 %v15917_v53, %v9705_v13  ;;  %v16707_v24 = vld [vmem:[#allocation189_spill] sm:$0xff] }
 0x77b   :  { %v8536_v15 = vpop.f32.mrb[76].mxu1 }
 0x77c   :  { %9833 = vst [vmem:[#allocation5 + $0x178] sm:$0xff] %v9769_v8  ;;  %v8826_v63 = vadd.f32 %v16699_v32, %v8536_v15  ;;  %v8538_v60 = vpop.f32.mrb[77].mxu1  ;;  %v16708_v32 = vld [vmem:[#allocation190_spill] sm:$0xff] }
 0x77d   :  { %v8539_v39 = vpop.f32.mrb[78].mxu1 }
 0x77e   :  { %v9706_v36 = vmul.f32 0.2, %v8826_v63  ;;  %v8829_v54 = vadd.f32 %v16700_v30, %v8539_v39  ;;  %v8541_v49 = vpop.f32.mrb[79].mxu1 }
 0x780   :  { %v9707_v57 = vmul.f32 0.2, %v8829_v54  ;;  %v9770_v26 = vadd.f32 %v9706_v36, %v15933_v29  ;;  %v16709_v54 = vld [vmem:[#allocation188_spill] sm:$0xff] }
 0x782   :  { %9834 = vst [vmem:[#allocation5 + $0x180] sm:$0xff] %v9770_v26  ;;  %v9771_v55 = vadd.f32 %v9707_v57, %v15939_v45 }
 0x783   :  { %v8544_v52 = vpop.f32.mrb[80].mxu1 }
 0x784   :  { %9835 = vst [vmem:[#allocation5 + $0x188] sm:$0xff] %v9771_v55  ;;  %v8834_v53 = vadd.f32 %v16701_v48, %v8544_v52  ;;  %v8546_v14 = vpop.f32.mrb[81].mxu1  ;;  %v16710_v55 = vld [vmem:[#allocation44_spill] sm:$0xff] }
 0x785   :  { %v8547_v37 = vpop.f32.mrb[82].mxu1 }
 0x786   :  { %v9708_v23 = vmul.f32 0.2, %v8834_v53  ;;  %v8837_v27 = vadd.f32 %v16702_v56, %v8547_v37  ;;  %v8549_v47 = vpop.f32.mrb[83].mxu1 }
 0x787   :  { %v16711_v47 = vld [vmem:[#allocation52_spill] sm:$0xff] }
 0x788   :  { %v9772_v3 = vadd.f32 %v15931_v51, %v9708_v23  ;;  %v9709_v50 = vmul.f32 0.2, %v8837_v27 }
 0x78a   :  { %9836 = vst [vmem:[#allocation5 + $0x190] sm:$0xff] %v9772_v3  ;;  %v9773_v0 = vadd.f32 %v15937_v7, %v9709_v50 }
 0x78b   :  { %v8552_v29 = vpop.f32.mrb[84].mxu1 }
 0x78c   :  { %9837 = vst [vmem:[#allocation5 + $0x198] sm:$0xff] %v9773_v0  ;;  %v8842_v45 = vadd.f32 %v16703_v16, %v8552_v29  ;;  %v8554_v38 = vpop.f32.mrb[85].mxu1 }
 0x78d   :  { %v8555_v59 = vpop.f32.mrb[86].mxu1 }
 0x78e   :  { %v9710_v6 = vmul.f32 0.2, %v8842_v45  ;;  %v8845_v17 = vadd.f32 %v16704_v1, %v8555_v59  ;;  %v8557_v28 = vpop.f32.mrb[87].mxu1  ;;  %v16712_v45 = vld [vmem:[#allocation48_spill] sm:$0xff] }
 0x790   :  { %v9711_v40 = vmul.f32 0.2, %v8845_v17  ;;  %v9774_v22 = vadd.f32 %v9710_v6, %v15953_v33 }
 0x792   :  { %9838 = vst [vmem:[#allocation5 + $0x1a0] sm:$0xff] %v9774_v22  ;;  %v9775_v51 = vadd.f32 %v9711_v40, %v15959_v41 }
 0x793   :  { %v8560_v35 = vpop.f32.mrb[88].mxu1 }
 0x794   :  { %9839 = vst [vmem:[#allocation5 + $0x1a8] sm:$0xff] %v9775_v51  ;;  %v8850_v7 = vadd.f32 %v16705_v46, %v8560_v35  ;;  %v8562_v19 = vpop.f32.mrb[89].mxu1 }
 0x795   :  { %v8563_v42 = vpop.f32.mrb[90].mxu1 }
 0x796   :  { %v9712_v21 = vmul.f32 0.2, %v8850_v7  ;;  %v8853_v12 = vadd.f32 %v16706_v34, %v8563_v42  ;;  %v8565_v2 = vpop.f32.mrb[91].mxu1 }
 0x798   :  { %v9776_v62 = vadd.f32 %v15951_v43, %v9712_v21  ;;  %v9713_v25 = vmul.f32 0.2, %v8853_v12 }
 0x79a   :  { %9840 = vst [vmem:[#allocation5 + $0x1b0] sm:$0xff] %v9776_v62  ;;  %v9777_v18 = vadd.f32 %v15957_v31, %v9713_v25 }
 0x79b   :  { %v8568_v33 = vpop.f32.mrb[92].mxu1 }
 0x79c   :  { %9841 = vst [vmem:[#allocation5 + $0x1b8] sm:$0xff] %v9777_v18  ;;  %v8858_v41 = vadd.f32 %v16707_v24, %v8568_v33  ;;  %v8570_v13 = vpop.f32.mrb[93].mxu1 }
 0x79d   :  { %v8571_v8 = vpop.f32.mrb[94].mxu1 }
 0x79e   :  { %v9714_v15 = vmul.f32 0.2, %v8858_v41  ;;  %v8861_v63 = vadd.f32 %v16708_v32, %v8571_v8  ;;  %v8573_v60 = vpop.f32.mrb[95].mxu1 }
 0x7a0   :  { %v9715_v39 = vmul.f32 0.2, %v8861_v63  ;;  %v9778_v36 = vadd.f32 %v9714_v15, %v15978_v9 }
 0x7a2   :  { %9842 = vst [vmem:[#allocation5 + $0x1c0] sm:$0xff] %v9778_v36  ;;  %v9779_v43 = vadd.f32 %v9715_v39, %v15983_v10 }
 0x7a3   :  { %v8576_v30 = vpop.f32.mrb[96].mxu1 }
 0x7a4   :  { %9843 = vst [vmem:[#allocation5 + $0x1c8] sm:$0xff] %v9779_v43  ;;  %v8866_v31 = vadd.f32 %v16709_v54, %v8576_v30  ;;  %v8578_v49 = vpop.f32.mrb[97].mxu1 }
 0x7a5   :  { %v8579_v57 = vpop.f32.mrb[98].mxu1 }
 0x7a6   :  { %v9716_v26 = vmul.f32 0.2, %v8866_v31  ;;  %v8869_v52 = vadd.f32 %v16710_v55, %v8579_v57  ;;  %v8581_v48 = vpop.f32.mrb[99].mxu1 }
 0x7a8   :  { %v9780_v53 = vadd.f32 %v15975_v20, %v9716_v26  ;;  %v9717_v14 = vmul.f32 0.2, %v8869_v52 }
 0x7aa   :  { %9844 = vst [vmem:[#allocation5 + $0x1d0] sm:$0xff] %v9780_v53  ;;  %v9781_v37 = vadd.f32 %v15980_v58, %v9717_v14 }
 0x7ab   :  { %v8584_v9 = vpop.f32.mrb[100].mxu1 }
 0x7ac   :  { %9845 = vst [vmem:[#allocation5 + $0x1d8] sm:$0xff] %v9781_v37  ;;  %v8874_v10 = vadd.f32 %v15694_v61, %v8584_v9  ;;  %v8586_v23 = vpop.f32.mrb[101].mxu1  ;;  %v16713_v61 = vld [vmem:[#allocation50_spill] sm:$0xff] }
 0x7ad   :  { %v8587_v56 = vpop.f32.mrb[102].mxu1 }
 0x7ae   :  { %v9718_v27 = vmul.f32 0.2, %v8874_v10  ;;  %v8877_v3 = vadd.f32 %v16711_v47, %v8587_v56  ;;  %v8589_v50 = vpop.f32.mrb[103].mxu1 }
 0x7b0   :  { %v9719_v0 = vmul.f32 0.2, %v8877_v3  ;;  %v9782_v29 = vadd.f32 %v9718_v27, %v15998_v11 }
 0x7b2   :  { %9846 = vst [vmem:[#allocation5 + $0x1e0] sm:$0xff] %v9782_v29  ;;  %v9783_v20 = vadd.f32 %v9719_v0, %v16003_v44 }
 0x7b3   :  { %v8592_v16 = vpop.f32.mrb[104].mxu1 }
 0x7b4   :  { %9847 = vst [vmem:[#allocation5 + $0x1e8] sm:$0xff] %v9783_v20  ;;  %v8882_v58 = vadd.f32 %v16712_v45, %v8592_v16  ;;  %v8594_v38 = vpop.f32.mrb[105].mxu1 }
 0x7b5   :  { %v8595_v59 = vpop.f32.mrb[106].mxu1 }
 0x7b6   :  { %v9720_v6 = vmul.f32 0.2, %v8882_v58  ;;  %v8885_v1 = vadd.f32 %v16713_v61, %v8595_v59  ;;  %v8597_v17 = vpop.f32.mrb[107].mxu1 }
 0x7b8   :  { %v9784_v28 = vadd.f32 %v15995_v4, %v9720_v6  ;;  %v9721_v40 = vmul.f32 0.2, %v8885_v1 }
 0x7ba   :  { %9848 = vst [vmem:[#allocation5 + $0x1f0] sm:$0xff] %v9784_v28  ;;  %v9785_v11 = vadd.f32 %v16000_v5, %v9721_v40 }
 0x7bc   :  { %9849 = vst [vmem:[#allocation5 + $0x1f8] sm:$0xff] %v9785_v11 }
 0x7bd   :  { %11445 = shalt.err (!%p11442_p4)
}
 0x7be   :  { %s11446_s10 = scalar_lea.hbm %s16096_s4, 8192 }
 0x7bf   :  { %p11447_p5 = scmp.ne.s32.totalorder %s16096_s4, %s11446_s10  ;;  %p11450_p6 = scmp.lt.u32.totalorder %s11446_s10, %s16096_s4 }
 0x7c1   :  { %p11452_p7 = pnand %p11450_p6, %p11447_p5 }
 0x7c3   :  { %11455 = shalt.err (!%p11452_p7)
}
 0x7c4   :  { %s11461_s15 = smov 128   ;;  %s11462_s16 = smov 8  }
 0x7c5   :  { %9861 = dma.vmem_to_hbm [thread:$0]  %s9856_s6, 8192, %s16096_s4, [#allocation6], %s11461_s15, %s11461_s15, %s11462_s16  }
 0x7c6   :  { %11456 = dma.done.wait [#allocation6], 8192  }
 0x7c7   :  { %11457 = vsyncadd [#allocation6], 4294959104 }
 0x7c8   :  { %9865 = vsyncpa [#allocation6], 1 }

</bundles_post_ra>
